<compile_context>
chip_gen: v6e
topology: v6e:2x2x1
jax: 0.10.0
libtpu: 0.0.40
codegen_flags: <defaults>
</compile_context>

<pallas_src>
import math

import jax
import jax.numpy as jnp
from jax.experimental import pallas as pl
from jax.experimental.pallas import tpu as pltpu

D_MODEL = 512
N_HEADS = 8
D_K = 64
D_V = 64
D_FF = 2048
LN_EPS = 1e-5


def _vmem_limit_bytes():
    """Generation-aware scoped-VMEM budget (v5e/v6e: 128 MiB physical, v7x: 64 MiB)."""
    cap = 64 << 20
    try:
        info = pltpu.get_tpu_info()
        cap = int(getattr(info, "vmem_capacity_bytes", cap))
    except Exception:
        pass
    return max(32 << 20, min(3 * cap // 4, 96 << 20))


def _divisor_tiles(n, cap=512):
    """Candidate tile sizes for an axis of size n, largest first: the full extent (if it
    fits the cap) or a multiple-of-8 divisor of n."""
    cands = []
    if n <= cap:
        cands.append(n)
    t = min(cap, n)
    t -= t % 8
    while t >= 8:
        if n % t == 0 and t not in cands:
            cands.append(t)
        t -= 8
    # TODO(synk): pad / use masked tails instead of this full-extent fallback when n has a
    # large prime factor (a single giant block could exceed the VMEM budget for huge inputs).
    return cands or [n]


# ----------------------------------------------------------------------------
# Kernel 1: fused QKV projection.
#   x2d [R, 512] @ w_qkv [512, 1536] -> qkv planes [3, R, 512]
#   (plane j = x @ w_qkv[:, j*512:(j+1)*512]; lane-dense 512-wide stores).
# ----------------------------------------------------------------------------
def _qkv_proj_kernel(x_ref, w_ref, o_ref):
    o_ref[...] = jnp.dot(
        x_ref[...], w_ref[...], preferred_element_type=jnp.float32
    ).astype(o_ref.dtype)


def _qkv_projection(x2d, w_qkv):
    R, _ = x2d.shape
    tr = _divisor_tiles(R, cap=512)[0]
    return pl.pallas_call(
        _qkv_proj_kernel,
        out_shape=jax.ShapeDtypeStruct((3, R, D_MODEL), x2d.dtype),
        grid=(R // tr, 3),
        in_specs=[
            pl.BlockSpec((tr, D_MODEL), lambda i, j: (i, 0)),
            pl.BlockSpec((D_MODEL, D_MODEL), lambda i, j: (0, j)),
        ],
        out_specs=pl.BlockSpec((None, tr, D_MODEL), lambda i, j: (j, i, 0)),
        compiler_params=pltpu.CompilerParams(
            dimension_semantics=("parallel", "parallel"),
            vmem_limit_bytes=_vmem_limit_bytes(),
        ),
    )(x2d, w_qkv)


# ----------------------------------------------------------------------------
# Kernel 2: fused multi-head attention + FFN + residual + LayerNorm.
# ----------------------------------------------------------------------------
def _attn_ffn_kernel(q_ref, k_ref, v_ref, w1_ref, w2_ref, out_ref, attn_ref, ctx_sc):
    """One (batch, q-tile) block.

    q_ref:   [q_t, 512]   this q-tile (heads interleaved along lanes)
    k_ref:   [Lk, 512]    full keys for this batch
    v_ref:   [Lk, 512]    full values for this batch
    w1_ref:  [512, 2048]  FFN weight 1 (VMEM-resident)
    w2_ref:  [2048, 512]  FFN weight 2 (VMEM-resident)
    out_ref: [q_t, 512]   LayerNorm(FFN(ctx) + ctx)
    attn_ref:[H, q_t, Lk] softmax attention (returned to the caller)
    ctx_sc:  [q_t, 512]   f32 VMEM scratch for the concatenated head contexts
    """
    scale = jnp.asarray(1.0 / math.sqrt(D_K), q_ref.dtype)  # 0.125 — exact in any float dtype

    # Per-head scaled-dot-product attention.  Each head's context goes straight into its
    # lane slice of the ctx scratch (no concat, no simultaneously-live head outputs).
    for h in range(N_HEADS):
        qh = q_ref[:, h * D_K:(h + 1) * D_K] * scale          # fold 1/sqrt(d_k) into Q
        kh = k_ref[:, h * D_K:(h + 1) * D_K]
        vh = v_ref[:, h * D_V:(h + 1) * D_V]
        # Q_h @ K_h^T: contract last dims (no explicit transpose), f32 accumulation.
        s = jax.lax.dot_general(
            qh, kh, (((1,), (1,)), ((), ())), preferred_element_type=jnp.float32
        )                                                     # [q_t, Lk] f32
        s = s - jnp.max(s, axis=-1, keepdims=True)
        e = jnp.exp(s)
        p = e / jnp.sum(e, axis=-1, keepdims=True)            # exact softmax: rows sum to 1
        attn_ref[h] = p.astype(attn_ref.dtype)
        ctx_sc[:, h * D_V:(h + 1) * D_V] = jnp.dot(
            p.astype(vh.dtype), vh, preferred_element_type=jnp.float32
        )

    # Fused epilogue: FFN (full 2048-wide contraction) + residual + fresh LayerNorm.
    ctx_f32 = ctx_sc[...]
    ctx = ctx_f32.astype(out_ref.dtype)
    h1 = jnp.dot(ctx, w1_ref[...], preferred_element_type=jnp.float32)
    h1 = jnp.maximum(h1, 0.0).astype(ctx.dtype)               # ReLU, native dtype into the MXU
    y = jnp.dot(h1, w2_ref[...], preferred_element_type=jnp.float32)
    y = y + ctx_f32                                           # residual (MHA.fc is never applied)
    mu = jnp.mean(y, axis=-1, keepdims=True)
    yc = y - mu
    var = jnp.mean(yc * yc, axis=-1, keepdims=True)
    out_ref[...] = (yc * jax.lax.rsqrt(var + LN_EPS)).astype(out_ref.dtype)


def _fused_attention_ffn(qkv, w1, w2):
    """qkv: [3, B, L, 512]. Returns (out [B, L, 512], attn [B, H, L, L])."""
    _, B, L, _ = qkv.shape
    dtype = qkv.dtype
    nbytes = jnp.dtype(dtype).itemsize
    vmem = _vmem_limit_bytes()

    def est(q_t):  # rough per-invocation VMEM footprint for a candidate q-tile
        b = 2 * q_t * D_MODEL * nbytes                 # Q tile (double-buffered)
        b += 2 * 2 * L * D_MODEL * nbytes              # K + V blocks
        b += 2 * 2 * D_MODEL * D_FF * nbytes           # w_ff1 + w_ff2 (resident)
        b += 2 * q_t * D_MODEL * nbytes                # out tile
        b += 2 * N_HEADS * q_t * L * nbytes            # attn tile
        b += q_t * D_MODEL * 4                         # ctx scratch (f32)
        b += q_t * D_FF * 4 + 2 * q_t * D_MODEL * 4    # FFN f32 temps
        b += 2 * q_t * L * 4                           # per-head softmax temps
        return b

    budget = int(vmem * 0.8)
    cands = _divisor_tiles(L, cap=512)
    q_t = cands[-1]
    for c in cands:                                     # largest tile that fits the budget
        if est(c) <= budget:
            q_t = c
            break
    # Keep >= 2 grid programs on the parallel axes when possible (v7x has 2 TensorCores).
    if B * (L // q_t) < 2:
        for c in cands:
            if c < q_t and B * (L // c) >= 2 and est(c) <= budget:
                q_t = c
                break

    out, attn = pl.pallas_call(
        _attn_ffn_kernel,
        out_shape=(
            jax.ShapeDtypeStruct((B, L, D_MODEL), dtype),
            jax.ShapeDtypeStruct((B, N_HEADS, L, L), dtype),
        ),
        grid=(B, L // q_t),
        in_specs=[
            pl.BlockSpec((None, None, q_t, D_MODEL), lambda b, qi: (0, b, qi, 0)),  # Q plane
            pl.BlockSpec((None, None, L, D_MODEL), lambda b, qi: (1, b, 0, 0)),     # K plane
            pl.BlockSpec((None, None, L, D_MODEL), lambda b, qi: (2, b, 0, 0)),     # V plane
            pl.BlockSpec((D_MODEL, D_FF), lambda b, qi: (0, 0)),                    # w_ff1
            pl.BlockSpec((D_FF, D_MODEL), lambda b, qi: (0, 0)),                    # w_ff2
        ],
        out_specs=(
            pl.BlockSpec((None, q_t, D_MODEL), lambda b, qi: (b, qi, 0)),
            pl.BlockSpec((None, N_HEADS, q_t, L), lambda b, qi: (b, 0, qi, 0)),
        ),
        scratch_shapes=[pltpu.VMEM((q_t, D_MODEL), jnp.float32)],
        compiler_params=pltpu.CompilerParams(
            dimension_semantics=("parallel", "parallel"),
            vmem_limit_bytes=vmem,
        ),
    )(qkv, qkv, qkv, w1, w2)
    return out, attn


# ----------------------------------------------------------------------------
# Full EncoderLayer forward.
# ----------------------------------------------------------------------------
def fuse_qkv_weight(w_q, w_k, w_v):
    """Call ONCE at init: fuse W_Q|W_K|W_V into a single [512, 1536] weight."""
    return jnp.concatenate([w_q, w_k, w_v], axis=1)


@jax.jit
def encoder_layer(x, w_qkv, w_ff1, w_ff2):
    """x: [B, L, 512]; w_qkv: [512, 1536] (pre-fused at init); w_ff1: [512, 2048];
    w_ff2: [2048, 512].  Returns (enc_outputs [B, L, 512], attn [B, H, L, L])."""
    B, L, D = x.shape
    qkv = _qkv_projection(x.reshape(B * L, D), w_qkv)   # [3, B*L, 512]
    qkv = qkv.reshape(3, B, L, D_MODEL)                 # metadata-only reshape (contiguous)
    return _fused_attention_ffn(qkv, w_ff1, w_ff2)


# ----------------------------------------------------------------------------
# Plain-JAX reference (mirrors the PyTorch forward exactly).
# ----------------------------------------------------------------------------
def _reference(x, w_q, w_k, w_v, w_ff1, w_ff2):
    B, L, _ = x.shape

    def proj(w):
        y = x @ w
        return y.reshape(B, L, N_HEADS, D_K).transpose(0, 2, 1, 3)

    Q, K, V = proj(w_q), proj(w_k), proj(w_v)
    scores = jnp.einsum("bhqd,bhkd->bhqk", Q, K) / math.sqrt(D_K)
    attn = jax.nn.softmax(scores, axis=-1)
    ctx = jnp.einsum("bhqk,bhkd->bhqd", attn, V)
    ctx = ctx.transpose(0, 2, 1, 3).reshape(B, L, N_HEADS * D_V)
    h = jax.nn.relu(ctx @ w_ff1)
    y = h @ w_ff2 + ctx
    mean = y.mean(-1, keepdims=True)
    var = ((y - mean) ** 2).mean(-1, keepdims=True)
    out = (y - mean) * jax.lax.rsqrt(var + LN_EPS)
    return out, attn


if __name__ == "__main__":
    B, L = 2, 8
    dtype = jnp.float32
    key = jax.random.PRNGKey(0)
    ks = jax.random.split(key, 6)
    s_model = 1.0 / math.sqrt(D_MODEL)
    s_ff = 1.0 / math.sqrt(D_FF)

    x = jax.random.normal(ks[0], (B, L, D_MODEL), dtype=dtype)
    w_q = jax.random.normal(ks[1], (D_MODEL, N_HEADS * D_K), dtype=dtype) * s_model
    w_k = jax.random.normal(ks[2], (D_MODEL, N_HEADS * D_K), dtype=dtype) * s_model
    w_v = jax.random.normal(ks[3], (D_MODEL, N_HEADS * D_V), dtype=dtype) * s_model
    w_ff1 = jax.random.normal(ks[4], (D_MODEL, D_FF), dtype=dtype) * s_model
    w_ff2 = jax.random.normal(ks[5], (D_FF, D_MODEL), dtype=dtype) * s_ff

    # Fuse the QKV weight once at init (kept out of the per-call / jit path).
    w_qkv = fuse_qkv_weight(w_q, w_k, w_v)

    out, attn = encoder_layer(x, w_qkv, w_ff1, w_ff2)
    jax.block_until_ready((out, attn))

    ref_out, ref_attn = _reference(x, w_q, w_k, w_v, w_ff1, w_ff2)
    assert out.shape == (B, L, D_MODEL) and attn.shape == (B, N_HEADS, L, L)
    # Exact softmax division in the kernel: attention rows sum to 1.
    assert jnp.allclose(jnp.sum(attn, axis=-1), 1.0, atol=1e-3)
    # Tolerance covers MXU default-precision matmul differences (softmax itself is exact).
    assert jnp.allclose(attn, ref_attn, atol=2e-2, rtol=2e-2), float(
        jnp.max(jnp.abs(attn - ref_attn))
    )
    assert jnp.allclose(out, ref_out, atol=2e-2, rtol=2e-2), float(
        jnp.max(jnp.abs(out - ref_out))
    )

    print("KERNEL_OK")
</pallas_src>

<mosaic_0001>
module attributes {stable_mosaic.version = 11 : i64} {
  func.func @_qkv_proj_kernel(%arg0: i32, %arg1: i32, %arg2: memref<16x512xf32, #tpu.memory_space<vmem>>, %arg3: memref<512x512xf32, #tpu.memory_space<vmem>>, %arg4: memref<1x16x512xf32, #tpu.memory_space<vmem>>) attributes {dimension_semantics = [#tpu.dimension_semantics<parallel>, #tpu.dimension_semantics<parallel>], iteration_bounds = array<i64: 1, 3>, scalar_prefetch = 0 : i64, scratch_operands = 0 : i64, tpu.core_type = #tpu.core_type<tc>, window_params = [{transform_indices = @transform_0, window_bounds = array<i64: 16, 512>}, {transform_indices = @transform_1, window_bounds = array<i64: 512, 512>}, {transform_indices = @transform_2, window_bounds = array<i64: 1, 16, 512>}]} {
    %c0 = arith.constant 0 : index
    %c0_0 = arith.constant 0 : index
    %0 = vector.load %arg2[%c0, %c0_0] : memref<16x512xf32, #tpu.memory_space<vmem>>, vector<16x512xf32>
    %c0_1 = arith.constant 0 : index
    %c0_2 = arith.constant 0 : index
    %1 = vector.load %arg3[%c0_1, %c0_2] : memref<512x512xf32, #tpu.memory_space<vmem>>, vector<512x512xf32>
    %cst = arith.constant dense<0.000000e+00> : vector<16x512xf32>
    %2 = tpu.matmul %0, %1, %cst {dimension_numbers = #tpu.dot_dimension_numbers<[1], [0], [0], [1], [0, 0, 1, 1], [], []>} : vector<16x512xf32>, vector<512x512xf32>, vector<16x512xf32> -> vector<16x512xf32>
    %c0_3 = arith.constant 0 : index
    %c0_4 = arith.constant 0 : index
    %c0_5 = arith.constant 0 : index
    %3 = vector.load %arg4[%c0_3, %c0_4, %c0_5] : memref<1x16x512xf32, #tpu.memory_space<vmem>>, vector<1x16x512xf32>
    %4 = vector.shape_cast %3 : vector<1x16x512xf32> to vector<16x512xf32>
    %5 = vector.shape_cast %2 : vector<16x512xf32> to vector<1x16x512xf32>
    tpu.vector_store %arg4[%c0_3, %c0_4, %c0_5], %5 {strides = array<i32>} : memref<1x16x512xf32, #tpu.memory_space<vmem>>, vector<1x16x512xf32>,
    return
  }
  func.func @transform_0(%arg0: i32, %arg1: i32) -> (i32, i32) {
    %c0_i32 = arith.constant 0 : i32
    %c0_i32_0 = arith.constant 0 : i32
    return %arg0, %c0_i32 : i32, i32
  }
  func.func @transform_1(%arg0: i32, %arg1: i32) -> (i32, i32) {
    %c0_i32 = arith.constant 0 : i32
    %c0_i32_0 = arith.constant 0 : i32
    return %c0_i32, %arg1 : i32, i32
  }
  func.func @transform_2(%arg0: i32, %arg1: i32) -> (i32, i32, i32) {
    %c0_i32 = arith.constant 0 : i32
    %c0_i32_0 = arith.constant 0 : i32
    return %arg1, %arg0, %c0_i32 : i32, i32, i32
  }
}

module attributes {stable_mosaic.version = 11 : i64} {
  func.func @_attn_ffn_kernel(%arg0: i32, %arg1: i32, %arg2: memref<1x1x8x512xf32, #tpu.memory_space<vmem>>, %arg3: memref<1x1x8x512xf32, #tpu.memory_space<vmem>>, %arg4: memref<1x1x8x512xf32, #tpu.memory_space<vmem>>, %arg5: memref<512x2048xf32, #tpu.memory_space<vmem>>, %arg6: memref<2048x512xf32, #tpu.memory_space<vmem>>, %arg7: memref<1x8x512xf32, #tpu.memory_space<vmem>>, %arg8: memref<1x8x8x8xf32, #tpu.memory_space<vmem>>, %arg9: memref<8x512xf32, #tpu.memory_space<vmem>>) attributes {dimension_semantics = [#tpu.dimension_semantics<parallel>, #tpu.dimension_semantics<parallel>], iteration_bounds = array<i64: 2, 1>, scalar_prefetch = 0 : i64, scratch_operands = 1 : i64, tpu.core_type = #tpu.core_type<tc>, window_params = [{transform_indices = @transform_0, window_bounds = array<i64: 1, 1, 8, 512>}, {transform_indices = @transform_1, window_bounds = array<i64: 1, 1, 8, 512>}, {transform_indices = @transform_2, window_bounds = array<i64: 1, 1, 8, 512>}, {pipeline_mode = #tpu.pipeline_mode<synchronous>, transform_indices = @transform_3, window_bounds = array<i64: 512, 2048>}, {pipeline_mode = #tpu.pipeline_mode<synchronous>, transform_indices = @transform_4, window_bounds = array<i64: 2048, 512>}, {transform_indices = @transform_5, window_bounds = array<i64: 1, 8, 512>}, {transform_indices = @transform_6, window_bounds = array<i64: 1, 8, 8, 8>}]} {
    %c0 = arith.constant 0 : index
    %c0_0 = arith.constant 0 : index
    %c0_1 = arith.constant 0 : index
    %c0_2 = arith.constant 0 : index
    %0 = vector.load %arg2[%c0, %c0_0, %c0_1, %c0_2] : memref<1x1x8x512xf32, #tpu.memory_space<vmem>>, vector<1x1x8x64xf32>
    %1 = vector.shape_cast %0 : vector<1x1x8x64xf32> to vector<8x64xf32>
    %cst = arith.constant 1.250000e-01 : f32
    %2 = vector.broadcast %cst : f32 to vector<8x64xf32>
    %3 = arith.mulf %1, %2 : vector<8x64xf32>
    %c0_3 = arith.constant 0 : index
    %c0_4 = arith.constant 0 : index
    %c0_5 = arith.constant 0 : index
    %c0_6 = arith.constant 0 : index
    %4 = vector.load %arg3[%c0_3, %c0_4, %c0_5, %c0_6] : memref<1x1x8x512xf32, #tpu.memory_space<vmem>>, vector<1x1x8x64xf32>
    %5 = vector.shape_cast %4 : vector<1x1x8x64xf32> to vector<8x64xf32>
    %c0_7 = arith.constant 0 : index
    %c0_8 = arith.constant 0 : index
    %c0_9 = arith.constant 0 : index
    %c0_10 = arith.constant 0 : index
    %6 = vector.load %arg4[%c0_7, %c0_8, %c0_9, %c0_10] : memref<1x1x8x512xf32, #tpu.memory_space<vmem>>, vector<1x1x8x64xf32>
    %7 = vector.shape_cast %6 : vector<1x1x8x64xf32> to vector<8x64xf32>
    %cst_11 = arith.constant dense<0.000000e+00> : vector<8x8xf32>
    %8 = tpu.matmul %3, %5, %cst_11 {dimension_numbers = #tpu.dot_dimension_numbers<[1], [1], [0], [0], [0, 0, 1, 0], [], []>} : vector<8x64xf32>, vector<8x64xf32>, vector<8x8xf32> -> vector<8x8xf32>
    %cst_12 = arith.constant dense<0xFF800000> : vector<8xf32>
    %9 = vector.multi_reduction <maximumf>, %8, %cst_12 [1] : vector<8x8xf32> to vector<8xf32>
    %10 = vector.shape_cast %9 : vector<8xf32> to vector<8x1xf32>
    %11 = vector.broadcast %10 : vector<8x1xf32> to vector<8x8xf32>
    %12 = arith.subf %8, %11 : vector<8x8xf32>
    %13 = math.exp %12 : vector<8x8xf32>
    %cst_13 = arith.constant dense<0.000000e+00> : vector<8xf32>
    %14 = vector.multi_reduction <add>, %13, %cst_13 [1] : vector<8x8xf32> to vector<8xf32>
    %15 = vector.shape_cast %14 : vector<8xf32> to vector<8x1xf32>
    %16 = vector.broadcast %15 : vector<8x1xf32> to vector<8x8xf32>
    %17 = arith.divf %13, %16 : vector<8x8xf32>
    %c0_14 = arith.constant 0 : index
    %c0_15 = arith.constant 0 : index
    %c0_16 = arith.constant 0 : index
    %c0_17 = arith.constant 0 : index
    %18 = vector.load %arg8[%c0_14, %c0_15, %c0_16, %c0_17] : memref<1x8x8x8xf32, #tpu.memory_space<vmem>>, vector<1x1x8x8xf32>
    %19 = vector.shape_cast %18 : vector<1x1x8x8xf32> to vector<8x8xf32>
    %20 = vector.shape_cast %17 : vector<8x8xf32> to vector<1x1x8x8xf32>
    tpu.vector_store %arg8[%c0_14, %c0_15, %c0_16, %c0_17], %20 {strides = array<i32>} : memref<1x8x8x8xf32, #tpu.memory_space<vmem>>, vector<1x1x8x8xf32>,
    %cst_18 = arith.constant dense<0.000000e+00> : vector<8x64xf32>
    %21 = tpu.matmul %17, %7, %cst_18 {dimension_numbers = #tpu.dot_dimension_numbers<[1], [0], [0], [1], [0, 0, 1, 1], [], []>} : vector<8x8xf32>, vector<8x64xf32>, vector<8x64xf32> -> vector<8x64xf32>
    %c0_19 = arith.constant 0 : index
    %c0_20 = arith.constant 0 : index
    %22 = vector.load %arg9[%c0_19, %c0_20] : memref<8x512xf32, #tpu.memory_space<vmem>>, vector<8x64xf32>
    tpu.vector_store %arg9[%c0_19, %c0_20], %21 {strides = array<i32>} : memref<8x512xf32, #tpu.memory_space<vmem>>, vector<8x64xf32>,
    %c0_21 = arith.constant 0 : index
    %c0_22 = arith.constant 0 : index
    %c0_23 = arith.constant 0 : index
    %c64 = arith.constant 64 : index
    %23 = vector.load %arg2[%c0_21, %c0_22, %c0_23, %c64] : memref<1x1x8x512xf32, #tpu.memory_space<vmem>>, vector<1x1x8x64xf32>
    %24 = vector.shape_cast %23 : vector<1x1x8x64xf32> to vector<8x64xf32>
    %cst_24 = arith.constant 1.250000e-01 : f32
    %25 = vector.broadcast %cst_24 : f32 to vector<8x64xf32>
    %26 = arith.mulf %24, %25 : vector<8x64xf32>
    %c0_25 = arith.constant 0 : index
    %c0_26 = arith.constant 0 : index
    %c0_27 = arith.constant 0 : index
    %c64_28 = arith.constant 64 : index
    %27 = vector.load %arg3[%c0_25, %c0_26, %c0_27, %c64_28] : memref<1x1x8x512xf32, #tpu.memory_space<vmem>>, vector<1x1x8x64xf32>
    %28 = vector.shape_cast %27 : vector<1x1x8x64xf32> to vector<8x64xf32>
    %c0_29 = arith.constant 0 : index
    %c0_30 = arith.constant 0 : index
    %c0_31 = arith.constant 0 : index
    %c64_32 = arith.constant 64 : index
    %29 = vector.load %arg4[%c0_29, %c0_30, %c0_31, %c64_32] : memref<1x1x8x512xf32, #tpu.memory_space<vmem>>, vector<1x1x8x64xf32>
    %30 = vector.shape_cast %29 : vector<1x1x8x64xf32> to vector<8x64xf32>
    %cst_33 = arith.constant dense<0.000000e+00> : vector<8x8xf32>
    %31 = tpu.matmul %26, %28, %cst_33 {dimension_numbers = #tpu.dot_dimension_numbers<[1], [1], [0], [0], [0, 0, 1, 0], [], []>} : vector<8x64xf32>, vector<8x64xf32>, vector<8x8xf32> -> vector<8x8xf32>
    %cst_34 = arith.constant dense<0xFF800000> : vector<8xf32>
    %32 = vector.multi_reduction <maximumf>, %31, %cst_34 [1] : vector<8x8xf32> to vector<8xf32>
    %33 = vector.shape_cast %32 : vector<8xf32> to vector<8x1xf32>
    %34 = vector.broadcast %33 : vector<8x1xf32> to vector<8x8xf32>
    %35 = arith.subf %31, %34 : vector<8x8xf32>
    %36 = math.exp %35 : vector<8x8xf32>
    %cst_35 = arith.constant dense<0.000000e+00> : vector<8xf32>
    %37 = vector.multi_reduction <add>, %36, %cst_35 [1] : vector<8x8xf32> to vector<8xf32>
    %38 = vector.shape_cast %37 : vector<8xf32> to vector<8x1xf32>
    %39 = vector.broadcast %38 : vector<8x1xf32> to vector<8x8xf32>
    %40 = arith.divf %36, %39 : vector<8x8xf32>
    %c0_36 = arith.constant 0 : index
    %c1 = arith.constant 1 : index
    %c0_37 = arith.constant 0 : index
    %c0_38 = arith.constant 0 : index
    %41 = vector.load %arg8[%c0_36, %c1, %c0_37, %c0_38] : memref<1x8x8x8xf32, #tpu.memory_space<vmem>>, vector<1x1x8x8xf32>
    %42 = vector.shape_cast %41 : vector<1x1x8x8xf32> to vector<8x8xf32>
    %43 = vector.shape_cast %40 : vector<8x8xf32> to vector<1x1x8x8xf32>
    tpu.vector_store %arg8[%c0_36, %c1, %c0_37, %c0_38], %43 {strides = array<i32>} : memref<1x8x8x8xf32, #tpu.memory_space<vmem>>, vector<1x1x8x8xf32>,
    %cst_39 = arith.constant dense<0.000000e+00> : vector<8x64xf32>
    %44 = tpu.matmul %40, %30, %cst_39 {dimension_numbers = #tpu.dot_dimension_numbers<[1], [0], [0], [1], [0, 0, 1, 1], [], []>} : vector<8x8xf32>, vector<8x64xf32>, vector<8x64xf32> -> vector<8x64xf32>
    %c0_40 = arith.constant 0 : index
    %c64_41 = arith.constant 64 : index
    %45 = vector.load %arg9[%c0_40, %c64_41] : memref<8x512xf32, #tpu.memory_space<vmem>>, vector<8x64xf32>
    tpu.vector_store %arg9[%c0_40, %c64_41], %44 {strides = array<i32>} : memref<8x512xf32, #tpu.memory_space<vmem>>, vector<8x64xf32>,
    %c0_42 = arith.constant 0 : index
    %c0_43 = arith.constant 0 : index
    %c0_44 = arith.constant 0 : index
    %c128 = arith.constant 128 : index
    %46 = vector.load %arg2[%c0_42, %c0_43, %c0_44, %c128] : memref<1x1x8x512xf32, #tpu.memory_space<vmem>>, vector<1x1x8x64xf32>
    %47 = vector.shape_cast %46 : vector<1x1x8x64xf32> to vector<8x64xf32>
    %cst_45 = arith.constant 1.250000e-01 : f32
    %48 = vector.broadcast %cst_45 : f32 to vector<8x64xf32>
    %49 = arith.mulf %47, %48 : vector<8x64xf32>
    %c0_46 = arith.constant 0 : index
    %c0_47 = arith.constant 0 : index
    %c0_48 = arith.constant 0 : index
    %c128_49 = arith.constant 128 : index
    %50 = vector.load %arg3[%c0_46, %c0_47, %c0_48, %c128_49] : memref<1x1x8x512xf32, #tpu.memory_space<vmem>>, vector<1x1x8x64xf32>
    %51 = vector.shape_cast %50 : vector<1x1x8x64xf32> to vector<8x64xf32>
    %c0_50 = arith.constant 0 : index
    %c0_51 = arith.constant 0 : index
    %c0_52 = arith.constant 0 : index
    %c128_53 = arith.constant 128 : index
    %52 = vector.load %arg4[%c0_50, %c0_51, %c0_52, %c128_53] : memref<1x1x8x512xf32, #tpu.memory_space<vmem>>, vector<1x1x8x64xf32>
    %53 = vector.shape_cast %52 : vector<1x1x8x64xf32> to vector<8x64xf32>
    %cst_54 = arith.constant dense<0.000000e+00> : vector<8x8xf32>
    %54 = tpu.matmul %49, %51, %cst_54 {dimension_numbers = #tpu.dot_dimension_numbers<[1], [1], [0], [0], [0, 0, 1, 0], [], []>} : vector<8x64xf32>, vector<8x64xf32>, vector<8x8xf32> -> vector<8x8xf32>
    %cst_55 = arith.constant dense<0xFF800000> : vector<8xf32>
    %55 = vector.multi_reduction <maximumf>, %54, %cst_55 [1] : vector<8x8xf32> to vector<8xf32>
    %56 = vector.shape_cast %55 : vector<8xf32> to vector<8x1xf32>
    %57 = vector.broadcast %56 : vector<8x1xf32> to vector<8x8xf32>
    %58 = arith.subf %54, %57 : vector<8x8xf32>
    %59 = math.exp %58 : vector<8x8xf32>
    %cst_56 = arith.constant dense<0.000000e+00> : vector<8xf32>
    %60 = vector.multi_reduction <add>, %59, %cst_56 [1] : vector<8x8xf32> to vector<8xf32>
    %61 = vector.shape_cast %60 : vector<8xf32> to vector<8x1xf32>
    %62 = vector.broadcast %61 : vector<8x1xf32> to vector<8x8xf32>
    %63 = arith.divf %59, %62 : vector<8x8xf32>
    %c0_57 = arith.constant 0 : index
    %c2 = arith.constant 2 : index
    %c0_58 = arith.constant 0 : index
    %c0_59 = arith.constant 0 : index
    %64 = vector.load %arg8[%c0_57, %c2, %c0_58, %c0_59] : memref<1x8x8x8xf32, #tpu.memory_space<vmem>>, vector<1x1x8x8xf32>
    %65 = vector.shape_cast %64 : vector<1x1x8x8xf32> to vector<8x8xf32>
    %66 = vector.shape_cast %63 : vector<8x8xf32> to vector<1x1x8x8xf32>
    tpu.vector_store %arg8[%c0_57, %c2, %c0_58, %c0_59], %66 {strides = array<i32>} : memref<1x8x8x8xf32, #tpu.memory_space<vmem>>, vector<1x1x8x8xf32>,
    %cst_60 = arith.constant dense<0.000000e+00> : vector<8x64xf32>
    %67 = tpu.matmul %63, %53, %cst_60 {dimension_numbers = #tpu.dot_dimension_numbers<[1], [0], [0], [1], [0, 0, 1, 1], [], []>} : vector<8x8xf32>, vector<8x64xf32>, vector<8x64xf32> -> vector<8x64xf32>
    %c0_61 = arith.constant 0 : index
    %c128_62 = arith.constant 128 : index
    %68 = vector.load %arg9[%c0_61, %c128_62] : memref<8x512xf32, #tpu.memory_space<vmem>>, vector<8x64xf32>
    tpu.vector_store %arg9[%c0_61, %c128_62], %67 {strides = array<i32>} : memref<8x512xf32, #tpu.memory_space<vmem>>, vector<8x64xf32>,
    %c0_63 = arith.constant 0 : index
    %c0_64 = arith.constant 0 : index
    %c0_65 = arith.constant 0 : index
    %c192 = arith.constant 192 : index
    %69 = vector.load %arg2[%c0_63, %c0_64, %c0_65, %c192] : memref<1x1x8x512xf32, #tpu.memory_space<vmem>>, vector<1x1x8x64xf32>
    %70 = vector.shape_cast %69 : vector<1x1x8x64xf32> to vector<8x64xf32>
    %cst_66 = arith.constant 1.250000e-01 : f32
    %71 = vector.broadcast %cst_66 : f32 to vector<8x64xf32>
    %72 = arith.mulf %70, %71 : vector<8x64xf32>
    %c0_67 = arith.constant 0 : index
    %c0_68 = arith.constant 0 : index
    %c0_69 = arith.constant 0 : index
    %c192_70 = arith.constant 192 : index
    %73 = vector.load %arg3[%c0_67, %c0_68, %c0_69, %c192_70] : memref<1x1x8x512xf32, #tpu.memory_space<vmem>>, vector<1x1x8x64xf32>
    %74 = vector.shape_cast %73 : vector<1x1x8x64xf32> to vector<8x64xf32>
    %c0_71 = arith.constant 0 : index
    %c0_72 = arith.constant 0 : index
    %c0_73 = arith.constant 0 : index
    %c192_74 = arith.constant 192 : index
    %75 = vector.load %arg4[%c0_71, %c0_72, %c0_73, %c192_74] : memref<1x1x8x512xf32, #tpu.memory_space<vmem>>, vector<1x1x8x64xf32>
    %76 = vector.shape_cast %75 : vector<1x1x8x64xf32> to vector<8x64xf32>
    %cst_75 = arith.constant dense<0.000000e+00> : vector<8x8xf32>
    %77 = tpu.matmul %72, %74, %cst_75 {dimension_numbers = #tpu.dot_dimension_numbers<[1], [1], [0], [0], [0, 0, 1, 0], [], []>} : vector<8x64xf32>, vector<8x64xf32>, vector<8x8xf32> -> vector<8x8xf32>
    %cst_76 = arith.constant dense<0xFF800000> : vector<8xf32>
    %78 = vector.multi_reduction <maximumf>, %77, %cst_76 [1] : vector<8x8xf32> to vector<8xf32>
    %79 = vector.shape_cast %78 : vector<8xf32> to vector<8x1xf32>
    %80 = vector.broadcast %79 : vector<8x1xf32> to vector<8x8xf32>
    %81 = arith.subf %77, %80 : vector<8x8xf32>
    %82 = math.exp %81 : vector<8x8xf32>
    %cst_77 = arith.constant dense<0.000000e+00> : vector<8xf32>
    %83 = vector.multi_reduction <add>, %82, %cst_77 [1] : vector<8x8xf32> to vector<8xf32>
    %84 = vector.shape_cast %83 : vector<8xf32> to vector<8x1xf32>
    %85 = vector.broadcast %84 : vector<8x1xf32> to vector<8x8xf32>
    %86 = arith.divf %82, %85 : vector<8x8xf32>
    %c0_78 = arith.constant 0 : index
    %c3 = arith.constant 3 : index
    %c0_79 = arith.constant 0 : index
    %c0_80 = arith.constant 0 : index
    %87 = vector.load %arg8[%c0_78, %c3, %c0_79, %c0_80] : memref<1x8x8x8xf32, #tpu.memory_space<vmem>>, vector<1x1x8x8xf32>
    %88 = vector.shape_cast %87 : vector<1x1x8x8xf32> to vector<8x8xf32>
    %89 = vector.shape_cast %86 : vector<8x8xf32> to vector<1x1x8x8xf32>
    tpu.vector_store %arg8[%c0_78, %c3, %c0_79, %c0_80], %89 {strides = array<i32>} : memref<1x8x8x8xf32, #tpu.memory_space<vmem>>, vector<1x1x8x8xf32>,
    %cst_81 = arith.constant dense<0.000000e+00> : vector<8x64xf32>
    %90 = tpu.matmul %86, %76, %cst_81 {dimension_numbers = #tpu.dot_dimension_numbers<[1], [0], [0], [1], [0, 0, 1, 1], [], []>} : vector<8x8xf32>, vector<8x64xf32>, vector<8x64xf32> -> vector<8x64xf32>
    %c0_82 = arith.constant 0 : index
    %c192_83 = arith.constant 192 : index
    %91 = vector.load %arg9[%c0_82, %c192_83] : memref<8x512xf32, #tpu.memory_space<vmem>>, vector<8x64xf32>
    tpu.vector_store %arg9[%c0_82, %c192_83], %90 {strides = array<i32>} : memref<8x512xf32, #tpu.memory_space<vmem>>, vector<8x64xf32>,
    %c0_84 = arith.constant 0 : index
    %c0_85 = arith.constant 0 : index
    %c0_86 = arith.constant 0 : index
    %c256 = arith.constant 256 : index
    %92 = vector.load %arg2[%c0_84, %c0_85, %c0_86, %c256] : memref<1x1x8x512xf32, #tpu.memory_space<vmem>>, vector<1x1x8x64xf32>
    %93 = vector.shape_cast %92 : vector<1x1x8x64xf32> to vector<8x64xf32>
    %cst_87 = arith.constant 1.250000e-01 : f32
    %94 = vector.broadcast %cst_87 : f32 to vector<8x64xf32>
    %95 = arith.mulf %93, %94 : vector<8x64xf32>
    %c0_88 = arith.constant 0 : index
    %c0_89 = arith.constant 0 : index
    %c0_90 = arith.constant 0 : index
    %c256_91 = arith.constant 256 : index
    %96 = vector.load %arg3[%c0_88, %c0_89, %c0_90, %c256_91] : memref<1x1x8x512xf32, #tpu.memory_space<vmem>>, vector<1x1x8x64xf32>
    %97 = vector.shape_cast %96 : vector<1x1x8x64xf32> to vector<8x64xf32>
    %c0_92 = arith.constant 0 : index
    %c0_93 = arith.constant 0 : index
    %c0_94 = arith.constant 0 : index
    %c256_95 = arith.constant 256 : index
    %98 = vector.load %arg4[%c0_92, %c0_93, %c0_94, %c256_95] : memref<1x1x8x512xf32, #tpu.memory_space<vmem>>, vector<1x1x8x64xf32>
    %99 = vector.shape_cast %98 : vector<1x1x8x64xf32> to vector<8x64xf32>
    %cst_96 = arith.constant dense<0.000000e+00> : vector<8x8xf32>
    %100 = tpu.matmul %95, %97, %cst_96 {dimension_numbers = #tpu.dot_dimension_numbers<[1], [1], [0], [0], [0, 0, 1, 0], [], []>} : vector<8x64xf32>, vector<8x64xf32>, vector<8x8xf32> -> vector<8x8xf32>
    %cst_97 = arith.constant dense<0xFF800000> : vector<8xf32>
    %101 = vector.multi_reduction <maximumf>, %100, %cst_97 [1] : vector<8x8xf32> to vector<8xf32>
    %102 = vector.shape_cast %101 : vector<8xf32> to vector<8x1xf32>
    %103 = vector.broadcast %102 : vector<8x1xf32> to vector<8x8xf32>
    %104 = arith.subf %100, %103 : vector<8x8xf32>
    %105 = math.exp %104 : vector<8x8xf32>
    %cst_98 = arith.constant dense<0.000000e+00> : vector<8xf32>
    %106 = vector.multi_reduction <add>, %105, %cst_98 [1] : vector<8x8xf32> to vector<8xf32>
    %107 = vector.shape_cast %106 : vector<8xf32> to vector<8x1xf32>
    %108 = vector.broadcast %107 : vector<8x1xf32> to vector<8x8xf32>
    %109 = arith.divf %105, %108 : vector<8x8xf32>
    %c0_99 = arith.constant 0 : index
    %c4 = arith.constant 4 : index
    %c0_100 = arith.constant 0 : index
    %c0_101 = arith.constant 0 : index
    %110 = vector.load %arg8[%c0_99, %c4, %c0_100, %c0_101] : memref<1x8x8x8xf32, #tpu.memory_space<vmem>>, vector<1x1x8x8xf32>
    %111 = vector.shape_cast %110 : vector<1x1x8x8xf32> to vector<8x8xf32>
    %112 = vector.shape_cast %109 : vector<8x8xf32> to vector<1x1x8x8xf32>
    tpu.vector_store %arg8[%c0_99, %c4, %c0_100, %c0_101], %112 {strides = array<i32>} : memref<1x8x8x8xf32, #tpu.memory_space<vmem>>, vector<1x1x8x8xf32>,
    %cst_102 = arith.constant dense<0.000000e+00> : vector<8x64xf32>
    %113 = tpu.matmul %109, %99, %cst_102 {dimension_numbers = #tpu.dot_dimension_numbers<[1], [0], [0], [1], [0, 0, 1, 1], [], []>} : vector<8x8xf32>, vector<8x64xf32>, vector<8x64xf32> -> vector<8x64xf32>
    %c0_103 = arith.constant 0 : index
    %c256_104 = arith.constant 256 : index
    %114 = vector.load %arg9[%c0_103, %c256_104] : memref<8x512xf32, #tpu.memory_space<vmem>>, vector<8x64xf32>
    tpu.vector_store %arg9[%c0_103, %c256_104], %113 {strides = array<i32>} : memref<8x512xf32, #tpu.memory_space<vmem>>, vector<8x64xf32>,
    %c0_105 = arith.constant 0 : index
    %c0_106 = arith.constant 0 : index
    %c0_107 = arith.constant 0 : index
    %c320 = arith.constant 320 : index
    %115 = vector.load %arg2[%c0_105, %c0_106, %c0_107, %c320] : memref<1x1x8x512xf32, #tpu.memory_space<vmem>>, vector<1x1x8x64xf32>
    %116 = vector.shape_cast %115 : vector<1x1x8x64xf32> to vector<8x64xf32>
    %cst_108 = arith.constant 1.250000e-01 : f32
    %117 = vector.broadcast %cst_108 : f32 to vector<8x64xf32>
    %118 = arith.mulf %116, %117 : vector<8x64xf32>
    %c0_109 = arith.constant 0 : index
    %c0_110 = arith.constant 0 : index
    %c0_111 = arith.constant 0 : index
    %c320_112 = arith.constant 320 : index
    %119 = vector.load %arg3[%c0_109, %c0_110, %c0_111, %c320_112] : memref<1x1x8x512xf32, #tpu.memory_space<vmem>>, vector<1x1x8x64xf32>
    %120 = vector.shape_cast %119 : vector<1x1x8x64xf32> to vector<8x64xf32>
    %c0_113 = arith.constant 0 : index
    %c0_114 = arith.constant 0 : index
    %c0_115 = arith.constant 0 : index
    %c320_116 = arith.constant 320 : index
    %121 = vector.load %arg4[%c0_113, %c0_114, %c0_115, %c320_116] : memref<1x1x8x512xf32, #tpu.memory_space<vmem>>, vector<1x1x8x64xf32>
    %122 = vector.shape_cast %121 : vector<1x1x8x64xf32> to vector<8x64xf32>
    %cst_117 = arith.constant dense<0.000000e+00> : vector<8x8xf32>
    %123 = tpu.matmul %118, %120, %cst_117 {dimension_numbers = #tpu.dot_dimension_numbers<[1], [1], [0], [0], [0, 0, 1, 0], [], []>} : vector<8x64xf32>, vector<8x64xf32>, vector<8x8xf32> -> vector<8x8xf32>
    %cst_118 = arith.constant dense<0xFF800000> : vector<8xf32>
    %124 = vector.multi_reduction <maximumf>, %123, %cst_118 [1] : vector<8x8xf32> to vector<8xf32>
    %125 = vector.shape_cast %124 : vector<8xf32> to vector<8x1xf32>
    %126 = vector.broadcast %125 : vector<8x1xf32> to vector<8x8xf32>
    %127 = arith.subf %123, %126 : vector<8x8xf32>
    %128 = math.exp %127 : vector<8x8xf32>
    %cst_119 = arith.constant dense<0.000000e+00> : vector<8xf32>
    %129 = vector.multi_reduction <add>, %128, %cst_119 [1] : vector<8x8xf32> to vector<8xf32>
    %130 = vector.shape_cast %129 : vector<8xf32> to vector<8x1xf32>
    %131 = vector.broadcast %130 : vector<8x1xf32> to vector<8x8xf32>
    %132 = arith.divf %128, %131 : vector<8x8xf32>
    %c0_120 = arith.constant 0 : index
    %c5 = arith.constant 5 : index
    %c0_121 = arith.constant 0 : index
    %c0_122 = arith.constant 0 : index
    %133 = vector.load %arg8[%c0_120, %c5, %c0_121, %c0_122] : memref<1x8x8x8xf32, #tpu.memory_space<vmem>>, vector<1x1x8x8xf32>
    %134 = vector.shape_cast %133 : vector<1x1x8x8xf32> to vector<8x8xf32>
    %135 = vector.shape_cast %132 : vector<8x8xf32> to vector<1x1x8x8xf32>
    tpu.vector_store %arg8[%c0_120, %c5, %c0_121, %c0_122], %135 {strides = array<i32>} : memref<1x8x8x8xf32, #tpu.memory_space<vmem>>, vector<1x1x8x8xf32>,
    %cst_123 = arith.constant dense<0.000000e+00> : vector<8x64xf32>
    %136 = tpu.matmul %132, %122, %cst_123 {dimension_numbers = #tpu.dot_dimension_numbers<[1], [0], [0], [1], [0, 0, 1, 1], [], []>} : vector<8x8xf32>, vector<8x64xf32>, vector<8x64xf32> -> vector<8x64xf32>
    %c0_124 = arith.constant 0 : index
    %c320_125 = arith.constant 320 : index
    %137 = vector.load %arg9[%c0_124, %c320_125] : memref<8x512xf32, #tpu.memory_space<vmem>>, vector<8x64xf32>
    tpu.vector_store %arg9[%c0_124, %c320_125], %136 {strides = array<i32>} : memref<8x512xf32, #tpu.memory_space<vmem>>, vector<8x64xf32>,
    %c0_126 = arith.constant 0 : index
    %c0_127 = arith.constant 0 : index
    %c0_128 = arith.constant 0 : index
    %c384 = arith.constant 384 : index
    %138 = vector.load %arg2[%c0_126, %c0_127, %c0_128, %c384] : memref<1x1x8x512xf32, #tpu.memory_space<vmem>>, vector<1x1x8x64xf32>
    %139 = vector.shape_cast %138 : vector<1x1x8x64xf32> to vector<8x64xf32>
    %cst_129 = arith.constant 1.250000e-01 : f32
    %140 = vector.broadcast %cst_129 : f32 to vector<8x64xf32>
    %141 = arith.mulf %139, %140 : vector<8x64xf32>
    %c0_130 = arith.constant 0 : index
    %c0_131 = arith.constant 0 : index
    %c0_132 = arith.constant 0 : index
    %c384_133 = arith.constant 384 : index
    %142 = vector.load %arg3[%c0_130, %c0_131, %c0_132, %c384_133] : memref<1x1x8x512xf32, #tpu.memory_space<vmem>>, vector<1x1x8x64xf32>
    %143 = vector.shape_cast %142 : vector<1x1x8x64xf32> to vector<8x64xf32>
    %c0_134 = arith.constant 0 : index
    %c0_135 = arith.constant 0 : index
    %c0_136 = arith.constant 0 : index
    %c384_137 = arith.constant 384 : index
    %144 = vector.load %arg4[%c0_134, %c0_135, %c0_136, %c384_137] : memref<1x1x8x512xf32, #tpu.memory_space<vmem>>, vector<1x1x8x64xf32>
    %145 = vector.shape_cast %144 : vector<1x1x8x64xf32> to vector<8x64xf32>
    %cst_138 = arith.constant dense<0.000000e+00> : vector<8x8xf32>
    %146 = tpu.matmul %141, %143, %cst_138 {dimension_numbers = #tpu.dot_dimension_numbers<[1], [1], [0], [0], [0, 0, 1, 0], [], []>} : vector<8x64xf32>, vector<8x64xf32>, vector<8x8xf32> -> vector<8x8xf32>
    %cst_139 = arith.constant dense<0xFF800000> : vector<8xf32>
    %147 = vector.multi_reduction <maximumf>, %146, %cst_139 [1] : vector<8x8xf32> to vector<8xf32>
    %148 = vector.shape_cast %147 : vector<8xf32> to vector<8x1xf32>
    %149 = vector.broadcast %148 : vector<8x1xf32> to vector<8x8xf32>
    %150 = arith.subf %146, %149 : vector<8x8xf32>
    %151 = math.exp %150 : vector<8x8xf32>
    %cst_140 = arith.constant dense<0.000000e+00> : vector<8xf32>
    %152 = vector.multi_reduction <add>, %151, %cst_140 [1] : vector<8x8xf32> to vector<8xf32>
    %153 = vector.shape_cast %152 : vector<8xf32> to vector<8x1xf32>
    %154 = vector.broadcast %153 : vector<8x1xf32> to vector<8x8xf32>
    %155 = arith.divf %151, %154 : vector<8x8xf32>
    %c0_141 = arith.constant 0 : index
    %c6 = arith.constant 6 : index
    %c0_142 = arith.constant 0 : index
    %c0_143 = arith.constant 0 : index
    %156 = vector.load %arg8[%c0_141, %c6, %c0_142, %c0_143] : memref<1x8x8x8xf32, #tpu.memory_space<vmem>>, vector<1x1x8x8xf32>
    %157 = vector.shape_cast %156 : vector<1x1x8x8xf32> to vector<8x8xf32>
    %158 = vector.shape_cast %155 : vector<8x8xf32> to vector<1x1x8x8xf32>
    tpu.vector_store %arg8[%c0_141, %c6, %c0_142, %c0_143], %158 {strides = array<i32>} : memref<1x8x8x8xf32, #tpu.memory_space<vmem>>, vector<1x1x8x8xf32>,
    %cst_144 = arith.constant dense<0.000000e+00> : vector<8x64xf32>
    %159 = tpu.matmul %155, %145, %cst_144 {dimension_numbers = #tpu.dot_dimension_numbers<[1], [0], [0], [1], [0, 0, 1, 1], [], []>} : vector<8x8xf32>, vector<8x64xf32>, vector<8x64xf32> -> vector<8x64xf32>
    %c0_145 = arith.constant 0 : index
    %c384_146 = arith.constant 384 : index
    %160 = vector.load %arg9[%c0_145, %c384_146] : memref<8x512xf32, #tpu.memory_space<vmem>>, vector<8x64xf32>
    tpu.vector_store %arg9[%c0_145, %c384_146], %159 {strides = array<i32>} : memref<8x512xf32, #tpu.memory_space<vmem>>, vector<8x64xf32>,
    %c0_147 = arith.constant 0 : index
    %c0_148 = arith.constant 0 : index
    %c0_149 = arith.constant 0 : index
    %c448 = arith.constant 448 : index
    %161 = vector.load %arg2[%c0_147, %c0_148, %c0_149, %c448] : memref<1x1x8x512xf32, #tpu.memory_space<vmem>>, vector<1x1x8x64xf32>
    %162 = vector.shape_cast %161 : vector<1x1x8x64xf32> to vector<8x64xf32>
    %cst_150 = arith.constant 1.250000e-01 : f32
    %163 = vector.broadcast %cst_150 : f32 to vector<8x64xf32>
    %164 = arith.mulf %162, %163 : vector<8x64xf32>
    %c0_151 = arith.constant 0 : index
    %c0_152 = arith.constant 0 : index
    %c0_153 = arith.constant 0 : index
    %c448_154 = arith.constant 448 : index
    %165 = vector.load %arg3[%c0_151, %c0_152, %c0_153, %c448_154] : memref<1x1x8x512xf32, #tpu.memory_space<vmem>>, vector<1x1x8x64xf32>
    %166 = vector.shape_cast %165 : vector<1x1x8x64xf32> to vector<8x64xf32>
    %c0_155 = arith.constant 0 : index
    %c0_156 = arith.constant 0 : index
    %c0_157 = arith.constant 0 : index
    %c448_158 = arith.constant 448 : index
    %167 = vector.load %arg4[%c0_155, %c0_156, %c0_157, %c448_158] : memref<1x1x8x512xf32, #tpu.memory_space<vmem>>, vector<1x1x8x64xf32>
    %168 = vector.shape_cast %167 : vector<1x1x8x64xf32> to vector<8x64xf32>
    %cst_159 = arith.constant dense<0.000000e+00> : vector<8x8xf32>
    %169 = tpu.matmul %164, %166, %cst_159 {dimension_numbers = #tpu.dot_dimension_numbers<[1], [1], [0], [0], [0, 0, 1, 0], [], []>} : vector<8x64xf32>, vector<8x64xf32>, vector<8x8xf32> -> vector<8x8xf32>
    %cst_160 = arith.constant dense<0xFF800000> : vector<8xf32>
    %170 = vector.multi_reduction <maximumf>, %169, %cst_160 [1] : vector<8x8xf32> to vector<8xf32>
    %171 = vector.shape_cast %170 : vector<8xf32> to vector<8x1xf32>
    %172 = vector.broadcast %171 : vector<8x1xf32> to vector<8x8xf32>
    %173 = arith.subf %169, %172 : vector<8x8xf32>
    %174 = math.exp %173 : vector<8x8xf32>
    %cst_161 = arith.constant dense<0.000000e+00> : vector<8xf32>
    %175 = vector.multi_reduction <add>, %174, %cst_161 [1] : vector<8x8xf32> to vector<8xf32>
    %176 = vector.shape_cast %175 : vector<8xf32> to vector<8x1xf32>
    %177 = vector.broadcast %176 : vector<8x1xf32> to vector<8x8xf32>
    %178 = arith.divf %174, %177 : vector<8x8xf32>
    %c0_162 = arith.constant 0 : index
    %c7 = arith.constant 7 : index
    %c0_163 = arith.constant 0 : index
    %c0_164 = arith.constant 0 : index
    %179 = vector.load %arg8[%c0_162, %c7, %c0_163, %c0_164] : memref<1x8x8x8xf32, #tpu.memory_space<vmem>>, vector<1x1x8x8xf32>
    %180 = vector.shape_cast %179 : vector<1x1x8x8xf32> to vector<8x8xf32>
    %181 = vector.shape_cast %178 : vector<8x8xf32> to vector<1x1x8x8xf32>
    tpu.vector_store %arg8[%c0_162, %c7, %c0_163, %c0_164], %181 {strides = array<i32>} : memref<1x8x8x8xf32, #tpu.memory_space<vmem>>, vector<1x1x8x8xf32>,
    %cst_165 = arith.constant dense<0.000000e+00> : vector<8x64xf32>
    %182 = tpu.matmul %178, %168, %cst_165 {dimension_numbers = #tpu.dot_dimension_numbers<[1], [0], [0], [1], [0, 0, 1, 1], [], []>} : vector<8x8xf32>, vector<8x64xf32>, vector<8x64xf32> -> vector<8x64xf32>
    %c0_166 = arith.constant 0 : index
    %c448_167 = arith.constant 448 : index
    %183 = vector.load %arg9[%c0_166, %c448_167] : memref<8x512xf32, #tpu.memory_space<vmem>>, vector<8x64xf32>
    tpu.vector_store %arg9[%c0_166, %c448_167], %182 {strides = array<i32>} : memref<8x512xf32, #tpu.memory_space<vmem>>, vector<8x64xf32>,
    %c0_168 = arith.constant 0 : index
    %c0_169 = arith.constant 0 : index
    %184 = vector.load %arg9[%c0_168, %c0_169] : memref<8x512xf32, #tpu.memory_space<vmem>>, vector<8x512xf32>
    %c0_170 = arith.constant 0 : index
    %c0_171 = arith.constant 0 : index
    %185 = vector.load %arg5[%c0_170, %c0_171] : memref<512x2048xf32, #tpu.memory_space<vmem>>, vector<512x2048xf32>
    %cst_172 = arith.constant dense<0.000000e+00> : vector<8x2048xf32>
    %186 = tpu.matmul %184, %185, %cst_172 {dimension_numbers = #tpu.dot_dimension_numbers<[1], [0], [0], [1], [0, 0, 1, 1], [], []>} : vector<8x512xf32>, vector<512x2048xf32>, vector<8x2048xf32> -> vector<8x2048xf32>
    %cst_173 = arith.constant 0.000000e+00 : f32
    %187 = vector.broadcast %cst_173 : f32 to vector<8x2048xf32>
    %188 = arith.maximumf %186, %187 : vector<8x2048xf32>
    %c0_174 = arith.constant 0 : index
    %c0_175 = arith.constant 0 : index
    %189 = vector.load %arg6[%c0_174, %c0_175] : memref<2048x512xf32, #tpu.memory_space<vmem>>, vector<2048x512xf32>
    %cst_176 = arith.constant dense<0.000000e+00> : vector<8x512xf32>
    %190 = tpu.matmul %188, %189, %cst_176 {dimension_numbers = #tpu.dot_dimension_numbers<[1], [0], [0], [1], [0, 0, 1, 1], [], []>} : vector<8x2048xf32>, vector<2048x512xf32>, vector<8x512xf32> -> vector<8x512xf32>
    %191 = arith.addf %190, %184 : vector<8x512xf32>
    %cst_177 = arith.constant dense<0.000000e+00> : vector<8xf32>
    %192 = vector.multi_reduction <add>, %191, %cst_177 [1] : vector<8x512xf32> to vector<8xf32>
    %193 = vector.shape_cast %192 : vector<8xf32> to vector<8x1xf32>
    %cst_178 = arith.constant 5.120000e+02 : f32
    %194 = vector.broadcast %cst_178 : f32 to vector<8x1xf32>
    %195 = arith.divf %193, %194 : vector<8x1xf32>
    %196 = vector.broadcast %195 : vector<8x1xf32> to vector<8x512xf32>
    %197 = arith.subf %191, %196 : vector<8x512xf32>
    %198 = arith.mulf %197, %197 : vector<8x512xf32>
    %cst_179 = arith.constant dense<0.000000e+00> : vector<8xf32>
    %199 = vector.multi_reduction <add>, %198, %cst_179 [1] : vector<8x512xf32> to vector<8xf32>
    %200 = vector.shape_cast %199 : vector<8xf32> to vector<8x1xf32>
    %cst_180 = arith.constant 5.120000e+02 : f32
    %201 = vector.broadcast %cst_180 : f32 to vector<8x1xf32>
    %202 = arith.divf %200, %201 : vector<8x1xf32>
    %cst_181 = arith.constant 9.99999974E-6 : f32
    %203 = vector.broadcast %cst_181 : f32 to vector<8x1xf32>
    %204 = arith.addf %202, %203 : vector<8x1xf32>
    %205 = math.rsqrt %204 : vector<8x1xf32>
    %206 = vector.broadcast %205 : vector<8x1xf32> to vector<8x512xf32>
    %207 = arith.mulf %197, %206 : vector<8x512xf32>
    %c0_182 = arith.constant 0 : index
    %c0_183 = arith.constant 0 : index
    %c0_184 = arith.constant 0 : index
    %208 = vector.load %arg7[%c0_182, %c0_183, %c0_184] : memref<1x8x512xf32, #tpu.memory_space<vmem>>, vector<1x8x512xf32>
    %209 = vector.shape_cast %208 : vector<1x8x512xf32> to vector<8x512xf32>
    %210 = vector.shape_cast %207 : vector<8x512xf32> to vector<1x8x512xf32>
    tpu.vector_store %arg7[%c0_182, %c0_183, %c0_184], %210 {strides = array<i32>} : memref<1x8x512xf32, #tpu.memory_space<vmem>>, vector<1x8x512xf32>,
    return
  }
  func.func @transform_0(%arg0: i32, %arg1: i32) -> (i32, i32, i32, i32) {
    %c0_i32 = arith.constant 0 : i32
    %c0_i32_0 = arith.constant 0 : i32
    %c0_i32_1 = arith.constant 0 : i32
    return %c0_i32, %arg0, %arg1, %c0_i32_0 : i32, i32, i32, i32
  }
  func.func @transform_1(%arg0: i32, %arg1: i32) -> (i32, i32, i32, i32) {
    %c1_i32 = arith.constant 1 : i32
    %c0_i32 = arith.constant 0 : i32
    %c0_i32_0 = arith.constant 0 : i32
    %c0_i32_1 = arith.constant 0 : i32
    return %c1_i32, %arg0, %c0_i32, %c0_i32_0 : i32, i32, i32, i32
  }
  func.func @transform_2(%arg0: i32, %arg1: i32) -> (i32, i32, i32, i32) {
    %c2_i32 = arith.constant 2 : i32
    %c0_i32 = arith.constant 0 : i32
    %c0_i32_0 = arith.constant 0 : i32
    %c0_i32_1 = arith.constant 0 : i32
    return %c2_i32, %arg0, %c0_i32, %c0_i32_0 : i32, i32, i32, i32
  }
  func.func @transform_3(%arg0: i32, %arg1: i32) -> (i32, i32) {
    %c0_i32 = arith.constant 0 : i32
    %c0_i32_0 = arith.constant 0 : i32
    %c0_i32_1 = arith.constant 0 : i32
    return %c0_i32, %c0_i32_0 : i32, i32
  }
  func.func @transform_4(%arg0: i32, %arg1: i32) -> (i32, i32) {
    %c0_i32 = arith.constant 0 : i32
    %c0_i32_0 = arith.constant 0 : i32
    %c0_i32_1 = arith.constant 0 : i32
    return %c0_i32, %c0_i32_0 : i32, i32
  }
  func.func @transform_5(%arg0: i32, %arg1: i32) -> (i32, i32, i32) {
    %c0_i32 = arith.constant 0 : i32
    %c0_i32_0 = arith.constant 0 : i32
    return %arg0, %arg1, %c0_i32 : i32, i32, i32
  }
  func.func @transform_6(%arg0: i32, %arg1: i32) -> (i32, i32, i32, i32) {
    %c0_i32 = arith.constant 0 : i32
    %c0_i32_0 = arith.constant 0 : i32
    %c0_i32_1 = arith.constant 0 : i32
    return %arg0, %c0_i32, %arg1, %c0_i32_0 : i32, i32, i32, i32
  }
}

</mosaic_0001>

<bundles_post_ra>
// kernel: encoder_layer.2
= control target key start
LH: loop header
LB: loop body
LE: loop exit
PB: predicated region body
PF: predicated region fallthrough
CT: control target
= control target key end

     0   :  { %7 = vsyncpa [#allocation3], 0  ;;  %s1533_s0 = inlined_call_operand.hbm [shape: f32[16,512], index: 0, kind: input, shape index: {}]   ;;  %s1534_s1 = inlined_call_operand.hbm [shape: f32[512,1536], index: 1, kind: input, shape index: {}]   ;;  %s1535_s2 = inlined_call_operand.vmem [shape: f32[3,16,512], index: 2, kind: output, shape index: {}]  }
   0x1   :  { %8 = vsyncpa [#allocation5], 0 }
   0x2   :  { %10 = vsyncpa [#allocation5 + $0x1], 0  ;;  %s1123_s9 = smov 0   ;;  %s1125_s10 = smov 0  }
   0x3   :  { %s1127_s11 = smov 0   ;;  %s1129_s12 = smov 0  }
   0x4   :  { %s1131_s13 = smov 0   ;;  %s1133_s14 = smov 0  }
   0x5 LB: > { %s907_s15 = sadd.s32 4294967295, %s1101_s14   ;;  %p68_p0 = scmp.ne.s32.totalorder %s1089_s11, %s1085_s10  ;;  %s1101_s14 = sphi %s1133_s14, %s16_s14   ;;  %s1097_s13 = sphi %s1131_s13, %s1547_s13   ;;  %s1093_s12 = sphi %s1129_s12, %s1546_s12   ;;  %s1089_s11 = sphi %s1127_s11, %s1545_s11   ;;  %s1085_s10 = sphi %s1125_s10, %s1544_s10   ;;  %s1081_s9 = sphi %s1123_s9, %s1543_s9  }
   0x6   : > { %p69_p1 = scmp.eq.s32.totalorder %s1101_s14, 0  ;;  %p74_p2 = scmp.ne.s32.totalorder %s1085_s10, %s1081_s9 }
   0x7   : > { %p1156_p3 = scmp.eq.s32.totalorder %s907_s15, 0  ;;  %p909_p4 = scmp.ge.s32.totalorder %s1101_s14, 1 }
   0x8   : > { %p70_p5 = por %p69_p1, %p68_p0  ;;  %p113_p6 = scmp.lt.s32.totalorder %s1101_s14, 4 }
   0x9   : > { %p1164_p7 = por %p1156_p3, %p74_p2  ;;  %s1103_s19 = smov [#allocation2]  }
   0xa   : > { %p1168_p8 = pnand %p909_p4, %p113_p6  ;;  %s129_s20 = sshll.u32 %s1103_s19, 4  ;;  %s130_s20 = int_to_ptr.vmem [resolvable:$true] %s129_s20 }
   0xb   : > { %s1538_s17 = scalar_select %p1164_p7, 1, 0 }
   0xc   : > { %p930_p9 = pneg %p1168_p8  ;;  %p939_p11 = scmp.lt.s32.totalorder %s1101_s14, 3 }
   0xd   : > { %s61_s22 = sadd.s32 1, %s1089_s11  ;;  %s1004_s24 = scalar_lea.vmem %s130_s20, 1024 }
   0xe   : > { %p1176_p10 = pnand %p930_p9, %p1156_p3  ;;  %p1182_p12 = pnand %p939_p11, %p70_p5 }
   0xf   : > { %p1005_p0 = scmp.ne.s32.totalorder %s130_s20, %s1004_s24  ;;  %p1012_p4 = scmp.lt.s32.totalorder %s130_s20, %s130_s20 }
  0x10   : > { %p995_p13 = pneg %p1176_p10  ;;  %p1013_p6 = scmp.lt.s32.totalorder %s1004_s24, %s1004_s24 }
  0x12   : > { %p1007_p1 = pnand %p1005_p0, %p995_p13  ;;  %p1014_p7 = por %p1013_p6, %p1012_p4 }
  0x14   : > { %p1008_p2 = pneg %p1007_p1 }
  0x16   : > { %p1015_p9 = pnand %p1014_p7, %p1008_p2 }
  0x18   : > { %1018 = shalt.err (!%p1015_p9)
}
  0x19   : > { %s1104_s25 = smov 512   ;;  %s1105_s26 = smov 32  }
  0x1a   : > { %933 = dma.hbm_to_vmem [thread:$0]  (!%p1176_p10), %s1533_s0, 1024, %s130_s20, [#allocation3], %s1104_s25, %s1104_s25, %s1105_s26  }
  0x1b   : > { %s25_s29 = sadd.s32 1, %s1097_s13  ;;  %s143_s30 = sand.u32 1, %s1089_s11  }
  0x1c   : > { %p26_p5 = scmp.ge.s32.totalorder %s25_s29, 3  ;;  %s912_s3 = sshll.u32 %s143_s30, 11 }
  0x1d   : > { %s922_s4 = sshll.u32 %s1097_s13, 9  ;;  %s147_s9 = scalar_lea.vmem [#allocation4], %s912_s3 }
  0x1e   : > { %s1549_s29 = smov (%p26_p5, %s25_s29), 0  ;;  %s153_s7 = scalar_lea.hbm %s1534_s1, %s922_s4 }
  0x1f   : > { %s58_s8 = ssub.s32 %s1097_s13, %s1549_s29  ;;  %s154_s15 = sshll.u32 %s147_s9, 4  ;;  %s155_s15 = int_to_ptr.vmem [resolvable:$true] %s154_s15 }
  0x20   : > { %p59_p7 = scmp.eq.s32.totalorder %s58_s8, 0  ;;  %s144_s20 = scalar_lea.sflag [#allocation5], %s143_s30 }
  0x21   : > { %p1021_p10 = pneg %p1182_p12  ;;  %s1032_s21 = scalar_lea.vmem %s155_s15, 32768 }
  0x22   : > { %s1207_s19 = scalar_select %p59_p7, %s1089_s11, %s61_s22  }
  0x23   : > { %p1033_p11 = scmp.ne.s32.totalorder %s155_s15, %s1032_s21  ;;  %s1106_s24 = smov [#allocation4]  }
  0x24   : > { %s1037_s27 = sshll.u32 %s1106_s24, 4  ;;  %s1038_s27 = int_to_ptr.vmem [resolvable:$false] %s1037_s27 }
  0x25   : > { %p1035_p13 = pnand %p1033_p11, %p1021_p10  ;;  %s1039_s28 = scalar_lea.vmem %s1038_s27, 65536 }
  0x26   : > { %p1040_p1 = scmp.lt.s32.totalorder %s155_s15, %s1038_s27  ;;  %p1041_p2 = scmp.lt.s32.totalorder %s1039_s28, %s1032_s21 }
  0x27   : > { %p1036_p0 = pneg %p1035_p13 }
  0x28   : > { %p1042_p4 = por %p1041_p2, %p1040_p1 }
  0x2a   : > { %p1043_p6 = pnand %p1042_p4, %p1036_p0 }
  0x2c   : > { %1046 = shalt.err (!%p1043_p6)
}
  0x2d   : > { %s1107_s3 = smov 1536   ;;  %166 = sbr.rel (%p1168_p8) target bundleno = 392 (0x188), region = 28 }
  0x2e   : > { %937 = dma.hbm_to_vmem [thread:$0]  (!%p1182_p12), %s153_s7, 32768, %s155_s15, %s144_s20, %s1107_s3, %s1104_s25, %s1105_s26  }
  0x32   : > { %1072 = dma.done.wait (%p1156_p3), [#allocation3], 1024  }
  0x33   : > { %1074 = vsyncadd (%p1156_p3), [#allocation3], 4294966272  ;;  %s172_s22 = sand.u32 1, %s1085_s10   ;;  %p1542_p9 = scmp.ne.s32.totalorder %s1538_s17, 0 }
  0x34   : > { %s917_s30 = sshll.u32 %s172_s22, 11  ;;  %s173_s4 = scalar_lea.sflag [#allocation5], %s172_s22 }
  0x35   : > { %s1222_s5 = scalar_lea.vmem [#allocation4], %s917_s30 }
  0x36   : > { %1076 = dma.done.wait (%p1542_p9), %s173_s4, 32768  }
  0x37   : > { %1078 = vsyncadd (%p1542_p9), %s173_s4, 4294934528  ;;  %v284_v0 = vld [vmem:[%s1222_s5 + $0x1e8] sm:$0xff]  ;;  %v283_v2 = vld [vmem:[%s1222_s5 + $0x1e0] sm:$0xff]  ;;  %p205_p3 = scmp.lt.s32.totalorder %s1093_s12, 2 }
  0x38   : > { %v412_v1 = vld [vmem:[%s1222_s5 + $0x5e8] sm:$0xff]  ;;  %479 = vmatprep.subr.mxu0 %v284_v0  ;;  %v411_v3 = vld [vmem:[%s1222_s5 + $0x5e0] sm:$0xff] }
  0x39   : > { %556 = vmatprep.subr.mxu1 %v412_v1  ;;  %v280_v4 = vld [vmem:[%s1222_s5 + $0x1c8] sm:$0xff]  ;;  %480 = vmatpush1.msra.mxu0 %v283_v2  ;;  %v279_v6 = vld [vmem:[%s1222_s5 + $0x1c0] sm:$0xff]  ;;  %s1551_s12 = smov (!%p205_p3, %s1093_s12), 2 }
  0x3a   : > { %v408_v5 = vld [vmem:[%s1222_s5 + $0x5c8] sm:$0xff]  ;;  %557 = vmatpush1.msra.mxu1 %v411_v3  ;;  %v407_v7 = vld [vmem:[%s1222_s5 + $0x5c0] sm:$0xff]  ;;  %481 = vmatprep.subr.mxu0 %v280_v4  ;;  %s923_s16 = sshll.u32 %s1551_s12, 6 }
  0x3b   : > { %v276_v8 = vld [vmem:[%s1222_s5 + $0x1a8] sm:$0xff]  ;;  %558 = vmatprep.subr.mxu1 %v408_v5  ;;  %v275_v10 = vld [vmem:[%s1222_s5 + $0x1a0] sm:$0xff]  ;;  %482 = vmatpush1.msra.mxu0 %v279_v6  ;;  %s1505_s23 = scalar_lea.vmem %s1535_s2, %s923_s16 }
  0x3c   : > { %v404_v9 = vld [vmem:[%s1222_s5 + $0x5a8] sm:$0xff]  ;;  %v403_v11 = vld [vmem:[%s1222_s5 + $0x5a0] sm:$0xff]  ;;  %559 = vmatpush1.msra.mxu1 %v407_v7  ;;  %483 = vmatprep.subr.mxu0 %v276_v8 }
  0x3d   : > { %v272_v12 = vld [vmem:[%s1222_s5 + $0x188] sm:$0xff]  ;;  %560 = vmatprep.subr.mxu1 %v404_v9  ;;  %v271_v14 = vld [vmem:[%s1222_s5 + $0x180] sm:$0xff]  ;;  %484 = vmatpush1.msra.mxu0 %v275_v10 }
  0x3e   : > { %v400_v13 = vld [vmem:[%s1222_s5 + $0x588] sm:$0xff]  ;;  %v399_v15 = vld [vmem:[%s1222_s5 + $0x580] sm:$0xff]  ;;  %561 = vmatpush1.msra.mxu1 %v403_v11  ;;  %485 = vmatprep.subr.mxu0 %v272_v12 }
  0x3f   : > { %v268_v16 = vld [vmem:[%s1222_s5 + $0x168] sm:$0xff]  ;;  %562 = vmatprep.subr.mxu1 %v400_v13  ;;  %v267_v18 = vld [vmem:[%s1222_s5 + $0x160] sm:$0xff]  ;;  %486 = vmatpush1.msra.mxu0 %v271_v14 }
  0x40   : > { %v396_v17 = vld [vmem:[%s1222_s5 + $0x568] sm:$0xff]  ;;  %v395_v19 = vld [vmem:[%s1222_s5 + $0x560] sm:$0xff]  ;;  %563 = vmatpush1.msra.mxu1 %v399_v15  ;;  %487 = vmatprep.subr.mxu0 %v268_v16 }
  0x41   : > { %v264_v20 = vld [vmem:[%s1222_s5 + $0x148] sm:$0xff]  ;;  %564 = vmatprep.subr.mxu1 %v396_v17  ;;  %v263_v22 = vld [vmem:[%s1222_s5 + $0x140] sm:$0xff]  ;;  %488 = vmatpush1.msra.mxu0 %v267_v18 }
  0x42   : > { %v392_v21 = vld [vmem:[%s1222_s5 + $0x548] sm:$0xff]  ;;  %v391_v23 = vld [vmem:[%s1222_s5 + $0x540] sm:$0xff]  ;;  %565 = vmatpush1.msra.mxu1 %v395_v19  ;;  %489 = vmatprep.subr.mxu0 %v264_v20 }
  0x43   : > { %v260_v24 = vld [vmem:[%s1222_s5 + $0x128] sm:$0xff]  ;;  %566 = vmatprep.subr.mxu1 %v392_v21  ;;  %v259_v26 = vld [vmem:[%s1222_s5 + $0x120] sm:$0xff]  ;;  %490 = vmatpush1.msra.mxu0 %v263_v22 }
  0x44   : > { %v388_v25 = vld [vmem:[%s1222_s5 + $0x528] sm:$0xff]  ;;  %v387_v27 = vld [vmem:[%s1222_s5 + $0x520] sm:$0xff]  ;;  %567 = vmatpush1.msra.mxu1 %v391_v23  ;;  %491 = vmatprep.subr.mxu0 %v260_v24 }
  0x45   : > { %v256_v28 = vld [vmem:[%s1222_s5 + $0x108] sm:$0xff]  ;;  %568 = vmatprep.subr.mxu1 %v388_v25  ;;  %v255_v30 = vld [vmem:[%s1222_s5 + $0x100] sm:$0xff]  ;;  %492 = vmatpush1.msra.mxu0 %v259_v26 }
  0x46   : > { %v384_v29 = vld [vmem:[%s1222_s5 + $0x508] sm:$0xff]  ;;  %v383_v31 = vld [vmem:[%s1222_s5 + $0x500] sm:$0xff]  ;;  %569 = vmatpush1.msra.mxu1 %v387_v27  ;;  %493 = vmatprep.subr.mxu0 %v256_v28 }
  0x47   : > { %v252_v32 = vld [vmem:[%s1222_s5 + $0xe8] sm:$0xff]  ;;  %570 = vmatprep.subr.mxu1 %v384_v29  ;;  %v251_v34 = vld [vmem:[%s1222_s5 + $0xe0] sm:$0xff]  ;;  %494 = vmatpush1.msra.mxu0 %v255_v30 }
  0x48   : > { %v380_v33 = vld [vmem:[%s1222_s5 + $0x4e8] sm:$0xff]  ;;  %v379_v35 = vld [vmem:[%s1222_s5 + $0x4e0] sm:$0xff]  ;;  %571 = vmatpush1.msra.mxu1 %v383_v31  ;;  %495 = vmatprep.subr.mxu0 %v252_v32 }
  0x49   : > { %v248_v36 = vld [vmem:[%s1222_s5 + $0xc8] sm:$0xff]  ;;  %572 = vmatprep.subr.mxu1 %v380_v33  ;;  %v247_v38 = vld [vmem:[%s1222_s5 + $0xc0] sm:$0xff]  ;;  %496 = vmatpush1.msra.mxu0 %v251_v34 }
  0x4a   : > { %v376_v37 = vld [vmem:[%s1222_s5 + $0x4c8] sm:$0xff]  ;;  %v375_v39 = vld [vmem:[%s1222_s5 + $0x4c0] sm:$0xff]  ;;  %573 = vmatpush1.msra.mxu1 %v379_v35  ;;  %497 = vmatprep.subr.mxu0 %v248_v36 }
  0x4b   : > { %v244_v40 = vld [vmem:[%s1222_s5 + $0xa8] sm:$0xff]  ;;  %574 = vmatprep.subr.mxu1 %v376_v37  ;;  %v243_v42 = vld [vmem:[%s1222_s5 + $0xa0] sm:$0xff]  ;;  %498 = vmatpush1.msra.mxu0 %v247_v38 }
  0x4c   : > { %v372_v41 = vld [vmem:[%s1222_s5 + $0x4a8] sm:$0xff]  ;;  %v371_v43 = vld [vmem:[%s1222_s5 + $0x4a0] sm:$0xff]  ;;  %575 = vmatpush1.msra.mxu1 %v375_v39  ;;  %499 = vmatprep.subr.mxu0 %v244_v40 }
  0x4d   : > { %v240_v44 = vld [vmem:[%s1222_s5 + $0x88] sm:$0xff]  ;;  %576 = vmatprep.subr.mxu1 %v372_v41  ;;  %v239_v46 = vld [vmem:[%s1222_s5 + $0x80] sm:$0xff]  ;;  %500 = vmatpush1.msra.mxu0 %v243_v42 }
  0x4e   : > { %v368_v45 = vld [vmem:[%s1222_s5 + $0x488] sm:$0xff]  ;;  %v367_v47 = vld [vmem:[%s1222_s5 + $0x480] sm:$0xff]  ;;  %577 = vmatpush1.msra.mxu1 %v371_v43  ;;  %501 = vmatprep.subr.mxu0 %v240_v44 }
  0x4f   : > { %v236_v48 = vld [vmem:[%s1222_s5 + $0x68] sm:$0xff]  ;;  %578 = vmatprep.subr.mxu1 %v368_v45  ;;  %v235_v50 = vld [vmem:[%s1222_s5 + $0x60] sm:$0xff]  ;;  %502 = vmatpush1.msra.mxu0 %v239_v46 }
  0x50   : > { %v364_v49 = vld [vmem:[%s1222_s5 + $0x468] sm:$0xff]  ;;  %v363_v51 = vld [vmem:[%s1222_s5 + $0x460] sm:$0xff]  ;;  %579 = vmatpush1.msra.mxu1 %v367_v47  ;;  %503 = vmatprep.subr.mxu0 %v236_v48 }
  0x51   : > { %v232_v52 = vld [vmem:[%s1222_s5 + $0x48] sm:$0xff]  ;;  %580 = vmatprep.subr.mxu1 %v364_v49  ;;  %v231_v54 = vld [vmem:[%s1222_s5 + $0x40] sm:$0xff]  ;;  %504 = vmatpush1.msra.mxu0 %v235_v50 }
  0x52   : > { %v360_v53 = vld [vmem:[%s1222_s5 + $0x448] sm:$0xff]  ;;  %v359_v55 = vld [vmem:[%s1222_s5 + $0x440] sm:$0xff]  ;;  %581 = vmatpush1.msra.mxu1 %v363_v51  ;;  %505 = vmatprep.subr.mxu0 %v232_v52 }
  0x53   : > { %v228_v56 = vld [vmem:[%s1222_s5 + $0x28] sm:$0xff]  ;;  %582 = vmatprep.subr.mxu1 %v360_v53  ;;  %v227_v58 = vld [vmem:[%s1222_s5 + $0x20] sm:$0xff]  ;;  %506 = vmatpush1.msra.mxu0 %v231_v54 }
  0x54   : > { %v356_v57 = vld [vmem:[%s1222_s5 + $0x428] sm:$0xff]  ;;  %v355_v59 = vld [vmem:[%s1222_s5 + $0x420] sm:$0xff]  ;;  %583 = vmatpush1.msra.mxu1 %v359_v55  ;;  %507 = vmatprep.subr.mxu0 %v228_v56 }
  0x55   : > { %v224_v60 = vld [vmem:[%s1222_s5 + $0x8] sm:$0xff]  ;;  %584 = vmatprep.subr.mxu1 %v356_v57  ;;  %v223_v62 = vld [vmem:[%s1222_s5] sm:$0xff]  ;;  %508 = vmatpush1.msra.mxu0 %v227_v58 }
  0x56   : > { %v352_v61 = vld [vmem:[%s1222_s5 + $0x408] sm:$0xff]  ;;  %v351_v63 = vld [vmem:[%s1222_s5 + $0x400] sm:$0xff]  ;;  %585 = vmatpush1.msra.mxu1 %v355_v59  ;;  %509 = vmatprep.subr.mxu0 %v224_v60 }
  0x57   : > { %v348_v0 = vld [vmem:[%s1222_s5 + $0x3e8] sm:$0xff]  ;;  %586 = vmatprep.subr.mxu1 %v352_v61  ;;  %v347_v2 = vld [vmem:[%s1222_s5 + $0x3e0] sm:$0xff]  ;;  %510 = vmatpush1.msra.mxu0 %v223_v62 }
  0x58   : > { %v476_v1 = vld [vmem:[%s1222_s5 + $0x7e8] sm:$0xff]  ;;  %v475_v3 = vld [vmem:[%s1222_s5 + $0x7e0] sm:$0xff]  ;;  %587 = vmatpush1.msra.mxu1 %v351_v63  ;;  %511 = vmatprep.subr.mxu0 %v348_v0 }
  0x59   : > { %v344_v4 = vld [vmem:[%s1222_s5 + $0x3c8] sm:$0xff]  ;;  %588 = vmatprep.subr.mxu1 %v476_v1  ;;  %v343_v6 = vld [vmem:[%s1222_s5 + $0x3c0] sm:$0xff]  ;;  %512 = vmatpush2.msra.mxu0 %v347_v2  ;;  %v1358_v1 = vld [vmem:[#allocation2 + $0x18] sm:$0xff] }
  0x5a   : > { %v472_v5 = vld [vmem:[%s1222_s5 + $0x7c8] sm:$0xff]  ;;  %v471_v7 = vld [vmem:[%s1222_s5 + $0x7c0] sm:$0xff]  ;;  %589 = vmatpush2.msra.mxu1 %v475_v3  ;;  %513 = vmatprep.subr.mxu0 %v344_v4  ;;  %v1362_v3 = vld [vmem:[#allocation2 + $0x10] sm:$0xff] }
  0x5b   : > { %v340_v8 = vld [vmem:[%s1222_s5 + $0x3a8] sm:$0xff]  ;;  %590 = vmatprep.subr.mxu1 %v472_v5  ;;  %v339_v10 = vld [vmem:[%s1222_s5 + $0x3a0] sm:$0xff]  ;;  %514 = vmatpush2.msra.mxu0 %v343_v6  ;;  %v286_v4 = vld [vmem:[%s1222_s5 + $0x1f8] sm:$0xff] }
  0x5c   : > { %v468_v9 = vld [vmem:[%s1222_s5 + $0x7a8] sm:$0xff]  ;;  %v467_v11 = vld [vmem:[%s1222_s5 + $0x7a0] sm:$0xff]  ;;  %591 = vmatpush2.msra.mxu1 %v471_v7  ;;  %515 = vmatprep.subr.mxu0 %v340_v8  ;;  %v414_v5 = vld [vmem:[%s1222_s5 + $0x5f8] sm:$0xff] }
  0x5d   : > { %v336_v12 = vld [vmem:[%s1222_s5 + $0x388] sm:$0xff]  ;;  %592 = vmatprep.subr.mxu1 %v468_v9  ;;  %v335_v14 = vld [vmem:[%s1222_s5 + $0x380] sm:$0xff]  ;;  %516 = vmatpush2.msra.mxu0 %v339_v10  ;;  %v285_v6 = vld [vmem:[%s1222_s5 + $0x1f0] sm:$0xff] }
  0x5e   : > { %v464_v13 = vld [vmem:[%s1222_s5 + $0x788] sm:$0xff]  ;;  %v463_v15 = vld [vmem:[%s1222_s5 + $0x780] sm:$0xff]  ;;  %593 = vmatpush2.msra.mxu1 %v467_v11  ;;  %517 = vmatprep.subr.mxu0 %v336_v12  ;;  %v413_v7 = vld [vmem:[%s1222_s5 + $0x5f0] sm:$0xff] }
  0x5f   : > { %v332_v16 = vld [vmem:[%s1222_s5 + $0x368] sm:$0xff]  ;;  %594 = vmatprep.subr.mxu1 %v464_v13  ;;  %v331_v18 = vld [vmem:[%s1222_s5 + $0x360] sm:$0xff]  ;;  %518 = vmatpush2.msra.mxu0 %v335_v14  ;;  %v282_v8 = vld [vmem:[%s1222_s5 + $0x1d8] sm:$0xff] }
  0x60   : > { %v460_v17 = vld [vmem:[%s1222_s5 + $0x768] sm:$0xff]  ;;  %v459_v19 = vld [vmem:[%s1222_s5 + $0x760] sm:$0xff]  ;;  %595 = vmatpush2.msra.mxu1 %v463_v15  ;;  %519 = vmatprep.subr.mxu0 %v332_v16  ;;  %v410_v9 = vld [vmem:[%s1222_s5 + $0x5d8] sm:$0xff] }
  0x61   : > { %v328_v20 = vld [vmem:[%s1222_s5 + $0x348] sm:$0xff]  ;;  %596 = vmatprep.subr.mxu1 %v460_v17  ;;  %v327_v22 = vld [vmem:[%s1222_s5 + $0x340] sm:$0xff]  ;;  %520 = vmatpush2.msra.mxu0 %v331_v18  ;;  %v281_v10 = vld [vmem:[%s1222_s5 + $0x1d0] sm:$0xff] }
  0x62   : > { %v456_v21 = vld [vmem:[%s1222_s5 + $0x748] sm:$0xff]  ;;  %v455_v23 = vld [vmem:[%s1222_s5 + $0x740] sm:$0xff]  ;;  %597 = vmatpush2.msra.mxu1 %v459_v19  ;;  %521 = vmatprep.subr.mxu0 %v328_v20  ;;  %v409_v11 = vld [vmem:[%s1222_s5 + $0x5d0] sm:$0xff] }
  0x63   : > { %v324_v24 = vld [vmem:[%s1222_s5 + $0x328] sm:$0xff]  ;;  %598 = vmatprep.subr.mxu1 %v456_v21  ;;  %v323_v26 = vld [vmem:[%s1222_s5 + $0x320] sm:$0xff]  ;;  %522 = vmatpush2.msra.mxu0 %v327_v22  ;;  %v278_v12 = vld [vmem:[%s1222_s5 + $0x1b8] sm:$0xff] }
  0x64   : > { %v452_v25 = vld [vmem:[%s1222_s5 + $0x728] sm:$0xff]  ;;  %v451_v27 = vld [vmem:[%s1222_s5 + $0x720] sm:$0xff]  ;;  %599 = vmatpush2.msra.mxu1 %v455_v23  ;;  %523 = vmatprep.subr.mxu0 %v324_v24  ;;  %v406_v13 = vld [vmem:[%s1222_s5 + $0x5b8] sm:$0xff] }
  0x65   : > { %v320_v28 = vld [vmem:[%s1222_s5 + $0x308] sm:$0xff]  ;;  %600 = vmatprep.subr.mxu1 %v452_v25  ;;  %v319_v30 = vld [vmem:[%s1222_s5 + $0x300] sm:$0xff]  ;;  %524 = vmatpush2.msra.mxu0 %v323_v26  ;;  %v277_v14 = vld [vmem:[%s1222_s5 + $0x1b0] sm:$0xff] }
  0x66   : > { %v448_v29 = vld [vmem:[%s1222_s5 + $0x708] sm:$0xff]  ;;  %v447_v31 = vld [vmem:[%s1222_s5 + $0x700] sm:$0xff]  ;;  %601 = vmatpush2.msra.mxu1 %v451_v27  ;;  %525 = vmatprep.subr.mxu0 %v320_v28  ;;  %v405_v15 = vld [vmem:[%s1222_s5 + $0x5b0] sm:$0xff] }
  0x67   : > { %v316_v32 = vld [vmem:[%s1222_s5 + $0x2e8] sm:$0xff]  ;;  %602 = vmatprep.subr.mxu1 %v448_v29  ;;  %v315_v34 = vld [vmem:[%s1222_s5 + $0x2e0] sm:$0xff]  ;;  %526 = vmatpush2.msra.mxu0 %v319_v30  ;;  %v274_v16 = vld [vmem:[%s1222_s5 + $0x198] sm:$0xff] }
  0x68   : > { %v444_v33 = vld [vmem:[%s1222_s5 + $0x6e8] sm:$0xff]  ;;  %v443_v35 = vld [vmem:[%s1222_s5 + $0x6e0] sm:$0xff]  ;;  %603 = vmatpush2.msra.mxu1 %v447_v31  ;;  %527 = vmatprep.subr.mxu0 %v316_v32  ;;  %v402_v17 = vld [vmem:[%s1222_s5 + $0x598] sm:$0xff] }
  0x69   : > { %v312_v36 = vld [vmem:[%s1222_s5 + $0x2c8] sm:$0xff]  ;;  %604 = vmatprep.subr.mxu1 %v444_v33  ;;  %v311_v38 = vld [vmem:[%s1222_s5 + $0x2c0] sm:$0xff]  ;;  %528 = vmatpush2.msra.mxu0 %v315_v34  ;;  %v273_v18 = vld [vmem:[%s1222_s5 + $0x190] sm:$0xff] }
  0x6a   : > { %v440_v37 = vld [vmem:[%s1222_s5 + $0x6c8] sm:$0xff]  ;;  %v439_v39 = vld [vmem:[%s1222_s5 + $0x6c0] sm:$0xff]  ;;  %605 = vmatpush2.msra.mxu1 %v443_v35  ;;  %529 = vmatprep.subr.mxu0 %v312_v36  ;;  %v401_v19 = vld [vmem:[%s1222_s5 + $0x590] sm:$0xff] }
  0x6b   : > { %v308_v40 = vld [vmem:[%s1222_s5 + $0x2a8] sm:$0xff]  ;;  %606 = vmatprep.subr.mxu1 %v440_v37  ;;  %v307_v42 = vld [vmem:[%s1222_s5 + $0x2a0] sm:$0xff]  ;;  %530 = vmatpush2.msra.mxu0 %v311_v38  ;;  %v270_v20 = vld [vmem:[%s1222_s5 + $0x178] sm:$0xff] }
  0x6c   : > { %v436_v41 = vld [vmem:[%s1222_s5 + $0x6a8] sm:$0xff]  ;;  %v435_v43 = vld [vmem:[%s1222_s5 + $0x6a0] sm:$0xff]  ;;  %607 = vmatpush2.msra.mxu1 %v439_v39  ;;  %531 = vmatprep.subr.mxu0 %v308_v40  ;;  %v398_v21 = vld [vmem:[%s1222_s5 + $0x578] sm:$0xff] }
  0x6d   : > { %v304_v44 = vld [vmem:[%s1222_s5 + $0x288] sm:$0xff]  ;;  %608 = vmatprep.subr.mxu1 %v436_v41  ;;  %v303_v46 = vld [vmem:[%s1222_s5 + $0x280] sm:$0xff]  ;;  %532 = vmatpush2.msra.mxu0 %v307_v42  ;;  %v269_v22 = vld [vmem:[%s1222_s5 + $0x170] sm:$0xff] }
  0x6e   : > { %v432_v45 = vld [vmem:[%s1222_s5 + $0x688] sm:$0xff]  ;;  %v431_v47 = vld [vmem:[%s1222_s5 + $0x680] sm:$0xff]  ;;  %609 = vmatpush2.msra.mxu1 %v435_v43  ;;  %533 = vmatprep.subr.mxu0 %v304_v44  ;;  %v397_v23 = vld [vmem:[%s1222_s5 + $0x570] sm:$0xff] }
  0x6f   : > { %v300_v48 = vld [vmem:[%s1222_s5 + $0x268] sm:$0xff]  ;;  %610 = vmatprep.subr.mxu1 %v432_v45  ;;  %v299_v50 = vld [vmem:[%s1222_s5 + $0x260] sm:$0xff]  ;;  %534 = vmatpush2.msra.mxu0 %v303_v46  ;;  %v266_v24 = vld [vmem:[%s1222_s5 + $0x158] sm:$0xff] }
  0x70   : > { %v428_v49 = vld [vmem:[%s1222_s5 + $0x668] sm:$0xff]  ;;  %v427_v51 = vld [vmem:[%s1222_s5 + $0x660] sm:$0xff]  ;;  %611 = vmatpush2.msra.mxu1 %v431_v47  ;;  %535 = vmatprep.subr.mxu0 %v300_v48  ;;  %v394_v25 = vld [vmem:[%s1222_s5 + $0x558] sm:$0xff] }
  0x71   : > { %v296_v52 = vld [vmem:[%s1222_s5 + $0x248] sm:$0xff]  ;;  %612 = vmatprep.subr.mxu1 %v428_v49  ;;  %v295_v54 = vld [vmem:[%s1222_s5 + $0x240] sm:$0xff]  ;;  %536 = vmatpush2.msra.mxu0 %v299_v50  ;;  %v265_v26 = vld [vmem:[%s1222_s5 + $0x150] sm:$0xff] }
  0x72   : > { %v424_v53 = vld [vmem:[%s1222_s5 + $0x648] sm:$0xff]  ;;  %v423_v55 = vld [vmem:[%s1222_s5 + $0x640] sm:$0xff]  ;;  %613 = vmatpush2.msra.mxu1 %v427_v51  ;;  %537 = vmatprep.subr.mxu0 %v296_v52  ;;  %v393_v27 = vld [vmem:[%s1222_s5 + $0x550] sm:$0xff] }
  0x73   : > { %v292_v56 = vld [vmem:[%s1222_s5 + $0x228] sm:$0xff]  ;;  %614 = vmatprep.subr.mxu1 %v424_v53  ;;  %v291_v58 = vld [vmem:[%s1222_s5 + $0x220] sm:$0xff]  ;;  %538 = vmatpush2.msra.mxu0 %v295_v54  ;;  %v262_v28 = vld [vmem:[%s1222_s5 + $0x138] sm:$0xff] }
  0x74   : > { %v420_v57 = vld [vmem:[%s1222_s5 + $0x628] sm:$0xff]  ;;  %v419_v59 = vld [vmem:[%s1222_s5 + $0x620] sm:$0xff]  ;;  %615 = vmatpush2.msra.mxu1 %v423_v55  ;;  %539 = vmatprep.subr.mxu0 %v292_v56  ;;  %v390_v29 = vld [vmem:[%s1222_s5 + $0x538] sm:$0xff] }
  0x75   : > { %v288_v60 = vld [vmem:[%s1222_s5 + $0x208] sm:$0xff]  ;;  %616 = vmatprep.subr.mxu1 %v420_v57  ;;  %v287_v62 = vld [vmem:[%s1222_s5 + $0x200] sm:$0xff]  ;;  %540 = vmatpush2.msra.mxu0 %v291_v58  ;;  %v261_v30 = vld [vmem:[%s1222_s5 + $0x130] sm:$0xff] }
  0x76   : > { %v416_v61 = vld [vmem:[%s1222_s5 + $0x608] sm:$0xff]  ;;  %617 = vmatpush2.msra.mxu1 %v419_v59  ;;  %v415_v0 = vld [vmem:[%s1222_s5 + $0x600] sm:$0xff]  ;;  %541 = vmatprep.subr.mxu0 %v288_v60  ;;  %v389_v31 = vld [vmem:[%s1222_s5 + $0x530] sm:$0xff] }
  0x77   : > { %v1355_v63 = vld [vmem:[#allocation2 + $0x8] sm:$0xff]  ;;  %618 = vmatprep.subr.mxu1 %v416_v61  ;;  %v1360_v2 = vld [vmem:[#allocation2] sm:$0xff]  ;;  %542 = vmatpush2.msra.mxu0 %v287_v62  ;;  %v258_v32 = vld [vmem:[%s1222_s5 + $0x118] sm:$0xff] }
  0x78   : > { %543 = vmatprep.mubr.f32.mxu0 %v1355_v63  ;;  %619 = vmatpush2.msra.mxu1 %v415_v0  ;;  %v386_v33 = vld [vmem:[%s1222_s5 + $0x518] sm:$0xff]  ;;  %v257_v34 = vld [vmem:[%s1222_s5 + $0x110] sm:$0xff] }
  0x79   : > { %620 = vmatprep.mubr.f32.mxu1 %v1358_v1  ;;  %544 = vmatmul.mubr.f32.vlgmr.msra.gmra.mxu0 %v1360_v2  ;;  %v385_v35 = vld [vmem:[%s1222_s5 + $0x510] sm:$0xff]  ;;  %v254_v36 = vld [vmem:[%s1222_s5 + $0xf8] sm:$0xff] }
  0x7a   : > { %621 = vmatmul.mubr.f32.vlgmr.msra.gmra.mxu1 %v1362_v3  ;;  %633 = vmatprep.subr.mxu0 %v286_v4  ;;  %v382_v37 = vld [vmem:[%s1222_s5 + $0x4f8] sm:$0xff]  ;;  %v253_v38 = vld [vmem:[%s1222_s5 + $0xf0] sm:$0xff] }
  0x7b   : > { %710 = vmatprep.subr.mxu1 %v414_v5  ;;  %634 = vmatpush1.msra.mxu0 %v285_v6  ;;  %v381_v39 = vld [vmem:[%s1222_s5 + $0x4f0] sm:$0xff]  ;;  %v250_v40 = vld [vmem:[%s1222_s5 + $0xd8] sm:$0xff] }
  0x7c   : > { %711 = vmatpush1.msra.mxu1 %v413_v7  ;;  %635 = vmatprep.subr.mxu0 %v282_v8  ;;  %v378_v41 = vld [vmem:[%s1222_s5 + $0x4d8] sm:$0xff]  ;;  %v249_v42 = vld [vmem:[%s1222_s5 + $0xd0] sm:$0xff] }
  0x7d   : > { %712 = vmatprep.subr.mxu1 %v410_v9  ;;  %636 = vmatpush1.msra.mxu0 %v281_v10  ;;  %v377_v43 = vld [vmem:[%s1222_s5 + $0x4d0] sm:$0xff]  ;;  %v246_v44 = vld [vmem:[%s1222_s5 + $0xb8] sm:$0xff] }
  0x7e   : > { %713 = vmatpush1.msra.mxu1 %v409_v11  ;;  %637 = vmatprep.subr.mxu0 %v278_v12  ;;  %v374_v45 = vld [vmem:[%s1222_s5 + $0x4b8] sm:$0xff]  ;;  %v245_v46 = vld [vmem:[%s1222_s5 + $0xb0] sm:$0xff] }
  0x7f   : > { %714 = vmatprep.subr.mxu1 %v406_v13  ;;  %638 = vmatpush1.msra.mxu0 %v277_v14  ;;  %v373_v47 = vld [vmem:[%s1222_s5 + $0x4b0] sm:$0xff]  ;;  %v242_v48 = vld [vmem:[%s1222_s5 + $0x98] sm:$0xff] }
  0x80   : > { %715 = vmatpush1.msra.mxu1 %v405_v15  ;;  %639 = vmatprep.subr.mxu0 %v274_v16  ;;  %v370_v49 = vld [vmem:[%s1222_s5 + $0x498] sm:$0xff]  ;;  %v241_v50 = vld [vmem:[%s1222_s5 + $0x90] sm:$0xff] }
  0x81   : > { %716 = vmatprep.subr.mxu1 %v402_v17  ;;  %640 = vmatpush1.msra.mxu0 %v273_v18  ;;  %v369_v51 = vld [vmem:[%s1222_s5 + $0x490] sm:$0xff]  ;;  %v238_v52 = vld [vmem:[%s1222_s5 + $0x78] sm:$0xff] }
  0x82   : > { %717 = vmatpush1.msra.mxu1 %v401_v19  ;;  %641 = vmatprep.subr.mxu0 %v270_v20  ;;  %v366_v53 = vld [vmem:[%s1222_s5 + $0x478] sm:$0xff]  ;;  %v237_v54 = vld [vmem:[%s1222_s5 + $0x70] sm:$0xff] }
  0x83   : > { %718 = vmatprep.subr.mxu1 %v398_v21  ;;  %642 = vmatpush1.msra.mxu0 %v269_v22  ;;  %v365_v55 = vld [vmem:[%s1222_s5 + $0x470] sm:$0xff]  ;;  %v234_v56 = vld [vmem:[%s1222_s5 + $0x58] sm:$0xff] }
  0x84   : > { %719 = vmatpush1.msra.mxu1 %v397_v23  ;;  %643 = vmatprep.subr.mxu0 %v266_v24  ;;  %v362_v57 = vld [vmem:[%s1222_s5 + $0x458] sm:$0xff]  ;;  %v233_v58 = vld [vmem:[%s1222_s5 + $0x50] sm:$0xff] }
  0x85   : > { %720 = vmatprep.subr.mxu1 %v394_v25  ;;  %644 = vmatpush1.msra.mxu0 %v265_v26  ;;  %v361_v59 = vld [vmem:[%s1222_s5 + $0x450] sm:$0xff]  ;;  %v230_v60 = vld [vmem:[%s1222_s5 + $0x38] sm:$0xff] }
  0x86   : > { %721 = vmatpush1.msra.mxu1 %v393_v27  ;;  %645 = vmatprep.subr.mxu0 %v262_v28  ;;  %v358_v61 = vld [vmem:[%s1222_s5 + $0x438] sm:$0xff]  ;;  %v229_v62 = vld [vmem:[%s1222_s5 + $0x30] sm:$0xff] }
  0x87   : > { %722 = vmatprep.subr.mxu1 %v390_v29  ;;  %646 = vmatpush1.msra.mxu0 %v261_v30  ;;  %v357_v0 = vld [vmem:[%s1222_s5 + $0x430] sm:$0xff]  ;;  %v226_v4 = vld [vmem:[%s1222_s5 + $0x18] sm:$0xff] }
  0x88   : > { %723 = vmatpush1.msra.mxu1 %v389_v31  ;;  %647 = vmatprep.subr.mxu0 %v258_v32  ;;  %v354_v5 = vld [vmem:[%s1222_s5 + $0x418] sm:$0xff]  ;;  %v225_v6 = vld [vmem:[%s1222_s5 + $0x10] sm:$0xff] }
  0x89   : > { %724 = vmatprep.subr.mxu1 %v386_v33  ;;  %648 = vmatpush1.msra.mxu0 %v257_v34  ;;  %v353_v7 = vld [vmem:[%s1222_s5 + $0x410] sm:$0xff]  ;;  %v350_v8 = vld [vmem:[%s1222_s5 + $0x3f8] sm:$0xff] }
  0x8a   : > { %725 = vmatpush1.msra.mxu1 %v385_v35  ;;  %649 = vmatprep.subr.mxu0 %v254_v36  ;;  %v478_v9 = vld [vmem:[%s1222_s5 + $0x7f8] sm:$0xff]  ;;  %v349_v10 = vld [vmem:[%s1222_s5 + $0x3f0] sm:$0xff] }
  0x8b   : > { %726 = vmatprep.subr.mxu1 %v382_v37  ;;  %650 = vmatpush1.msra.mxu0 %v253_v38  ;;  %v477_v11 = vld [vmem:[%s1222_s5 + $0x7f0] sm:$0xff]  ;;  %v346_v12 = vld [vmem:[%s1222_s5 + $0x3d8] sm:$0xff] }
  0x8c   : > { %727 = vmatpush1.msra.mxu1 %v381_v39  ;;  %651 = vmatprep.subr.mxu0 %v250_v40  ;;  %v474_v13 = vld [vmem:[%s1222_s5 + $0x7d8] sm:$0xff]  ;;  %v345_v14 = vld [vmem:[%s1222_s5 + $0x3d0] sm:$0xff] }
  0x8d   : > { %728 = vmatprep.subr.mxu1 %v378_v41  ;;  %652 = vmatpush1.msra.mxu0 %v249_v42  ;;  %v473_v15 = vld [vmem:[%s1222_s5 + $0x7d0] sm:$0xff]  ;;  %v342_v16 = vld [vmem:[%s1222_s5 + $0x3b8] sm:$0xff] }
  0x8e   : > { %729 = vmatpush1.msra.mxu1 %v377_v43  ;;  %653 = vmatprep.subr.mxu0 %v246_v44  ;;  %v470_v17 = vld [vmem:[%s1222_s5 + $0x7b8] sm:$0xff]  ;;  %v341_v18 = vld [vmem:[%s1222_s5 + $0x3b0] sm:$0xff] }
  0x8f   : > { %730 = vmatprep.subr.mxu1 %v374_v45  ;;  %654 = vmatpush1.msra.mxu0 %v245_v46  ;;  %v469_v19 = vld [vmem:[%s1222_s5 + $0x7b0] sm:$0xff]  ;;  %v338_v20 = vld [vmem:[%s1222_s5 + $0x398] sm:$0xff] }
  0x90   : > { %731 = vmatpush1.msra.mxu1 %v373_v47  ;;  %655 = vmatprep.subr.mxu0 %v242_v48  ;;  %v466_v21 = vld [vmem:[%s1222_s5 + $0x798] sm:$0xff]  ;;  %v337_v22 = vld [vmem:[%s1222_s5 + $0x390] sm:$0xff] }
  0x91   : > { %732 = vmatprep.subr.mxu1 %v370_v49  ;;  %656 = vmatpush1.msra.mxu0 %v241_v50  ;;  %v465_v23 = vld [vmem:[%s1222_s5 + $0x790] sm:$0xff]  ;;  %v334_v24 = vld [vmem:[%s1222_s5 + $0x378] sm:$0xff] }
  0x92   : > { %733 = vmatpush1.msra.mxu1 %v369_v51  ;;  %657 = vmatprep.subr.mxu0 %v238_v52  ;;  %v462_v25 = vld [vmem:[%s1222_s5 + $0x778] sm:$0xff]  ;;  %v333_v26 = vld [vmem:[%s1222_s5 + $0x370] sm:$0xff] }
  0x93   : > { %734 = vmatprep.subr.mxu1 %v366_v53  ;;  %658 = vmatpush1.msra.mxu0 %v237_v54  ;;  %v461_v27 = vld [vmem:[%s1222_s5 + $0x770] sm:$0xff]  ;;  %v330_v28 = vld [vmem:[%s1222_s5 + $0x358] sm:$0xff] }
  0x94   : > { %735 = vmatpush1.msra.mxu1 %v365_v55  ;;  %659 = vmatprep.subr.mxu0 %v234_v56  ;;  %v458_v29 = vld [vmem:[%s1222_s5 + $0x758] sm:$0xff]  ;;  %v329_v30 = vld [vmem:[%s1222_s5 + $0x350] sm:$0xff] }
  0x95   : > { %736 = vmatprep.subr.mxu1 %v362_v57  ;;  %660 = vmatpush1.msra.mxu0 %v233_v58  ;;  %v457_v31 = vld [vmem:[%s1222_s5 + $0x750] sm:$0xff]  ;;  %v326_v32 = vld [vmem:[%s1222_s5 + $0x338] sm:$0xff]  ;;  %v220_v58 = vld [vmem:[#allocation2 + $0x28] sm:$0xff] }
  0x96   : > { %737 = vmatpush1.msra.mxu1 %v361_v59  ;;  %661 = vmatprep.subr.mxu0 %v230_v60  ;;  %v454_v33 = vld [vmem:[%s1222_s5 + $0x738] sm:$0xff]  ;;  %v325_v34 = vld [vmem:[%s1222_s5 + $0x330] sm:$0xff] }
  0x97   : > { %738 = vmatprep.subr.mxu1 %v358_v61  ;;  %662 = vmatpush1.msra.mxu0 %v229_v62  ;;  %v453_v35 = vld [vmem:[%s1222_s5 + $0x730] sm:$0xff]  ;;  %v322_v36 = vld [vmem:[%s1222_s5 + $0x318] sm:$0xff]  ;;  %v219_v62 = vld [vmem:[#allocation2 + $0x20] sm:$0xff] }
  0x98   : > { %739 = vmatpush1.msra.mxu1 %v357_v0  ;;  %663 = vmatprep.subr.mxu0 %v226_v4  ;;  %v450_v37 = vld [vmem:[%s1222_s5 + $0x718] sm:$0xff]  ;;  %v321_v38 = vld [vmem:[%s1222_s5 + $0x310] sm:$0xff] }
  0x99   : > { %740 = vmatprep.subr.mxu1 %v354_v5  ;;  %664 = vmatpush1.msra.mxu0 %v225_v6  ;;  %v449_v39 = vld [vmem:[%s1222_s5 + $0x710] sm:$0xff]  ;;  %v318_v40 = vld [vmem:[%s1222_s5 + $0x2f8] sm:$0xff] }
  0x9a   : > { %741 = vmatpush1.msra.mxu1 %v353_v7  ;;  %665 = vmatprep.subr.mxu0 %v350_v8  ;;  %v446_v41 = vld [vmem:[%s1222_s5 + $0x6f8] sm:$0xff]  ;;  %v317_v42 = vld [vmem:[%s1222_s5 + $0x2f0] sm:$0xff] }
  0x9b   : > { %742 = vmatprep.subr.mxu1 %v478_v9  ;;  %666 = vmatpush2.msra.mxu0 %v349_v10  ;;  %v445_v43 = vld [vmem:[%s1222_s5 + $0x6f0] sm:$0xff]  ;;  %v314_v44 = vld [vmem:[%s1222_s5 + $0x2d8] sm:$0xff] }
  0x9c   : > { %743 = vmatpush2.msra.mxu1 %v477_v11  ;;  %667 = vmatprep.subr.mxu0 %v346_v12  ;;  %v442_v45 = vld [vmem:[%s1222_s5 + $0x6d8] sm:$0xff]  ;;  %v313_v46 = vld [vmem:[%s1222_s5 + $0x2d0] sm:$0xff] }
  0x9d   : > { %744 = vmatprep.subr.mxu1 %v474_v13  ;;  %668 = vmatpush2.msra.mxu0 %v345_v14  ;;  %v441_v47 = vld [vmem:[%s1222_s5 + $0x6d0] sm:$0xff]  ;;  %v310_v48 = vld [vmem:[%s1222_s5 + $0x2b8] sm:$0xff] }
  0x9e   : > { %745 = vmatpush2.msra.mxu1 %v473_v15  ;;  %669 = vmatprep.subr.mxu0 %v342_v16  ;;  %v438_v49 = vld [vmem:[%s1222_s5 + $0x6b8] sm:$0xff]  ;;  %v309_v50 = vld [vmem:[%s1222_s5 + $0x2b0] sm:$0xff] }
  0x9f   : > { %746 = vmatprep.subr.mxu1 %v470_v17  ;;  %670 = vmatpush2.msra.mxu0 %v341_v18  ;;  %v437_v51 = vld [vmem:[%s1222_s5 + $0x6b0] sm:$0xff]  ;;  %v306_v52 = vld [vmem:[%s1222_s5 + $0x298] sm:$0xff] }
  0xa0   : > { %747 = vmatpush2.msra.mxu1 %v469_v19  ;;  %671 = vmatprep.subr.mxu0 %v338_v20  ;;  %v434_v53 = vld [vmem:[%s1222_s5 + $0x698] sm:$0xff]  ;;  %v305_v54 = vld [vmem:[%s1222_s5 + $0x290] sm:$0xff] }
  0xa1   : > { %748 = vmatprep.subr.mxu1 %v466_v21  ;;  %672 = vmatpush2.msra.mxu0 %v337_v22  ;;  %v433_v55 = vld [vmem:[%s1222_s5 + $0x690] sm:$0xff]  ;;  %v302_v56 = vld [vmem:[%s1222_s5 + $0x278] sm:$0xff] }
  0xa2   : > { %749 = vmatpush2.msra.mxu1 %v465_v23  ;;  %673 = vmatprep.subr.mxu0 %v334_v24  ;;  %v430_v57 = vld [vmem:[%s1222_s5 + $0x678] sm:$0xff]  ;;  %v301_v60 = vld [vmem:[%s1222_s5 + $0x270] sm:$0xff] }
  0xa3   : > { %750 = vmatprep.subr.mxu1 %v462_v25  ;;  %674 = vmatpush2.msra.mxu0 %v333_v26  ;;  %v222_v59 = vld [vmem:[#allocation2 + $0x38] sm:$0xff]  ;;  %v429_v61 = vld [vmem:[%s1222_s5 + $0x670] sm:$0xff] }
  0xa4   : > { %751 = vmatpush2.msra.mxu1 %v461_v27  ;;  %675 = vmatprep.subr.mxu0 %v330_v28  ;;  %v221_v0 = vld [vmem:[#allocation2 + $0x30] sm:$0xff]  ;;  %v298_v4 = vld [vmem:[%s1222_s5 + $0x258] sm:$0xff] }
  0xa5   : > { %752 = vmatprep.subr.mxu1 %v458_v29  ;;  %676 = vmatpush2.msra.mxu0 %v329_v30  ;;  %v426_v5 = vld [vmem:[%s1222_s5 + $0x658] sm:$0xff]  ;;  %v297_v6 = vld [vmem:[%s1222_s5 + $0x250] sm:$0xff] }
  0xa6   : > { %753 = vmatpush2.msra.mxu1 %v457_v31  ;;  %677 = vmatprep.subr.mxu0 %v326_v32  ;;  %v425_v7 = vld [vmem:[%s1222_s5 + $0x650] sm:$0xff]  ;;  %v294_v8 = vld [vmem:[%s1222_s5 + $0x238] sm:$0xff] }
  0xa7   : > { %754 = vmatprep.subr.mxu1 %v454_v33  ;;  %678 = vmatpush2.msra.mxu0 %v325_v34  ;;  %v422_v9 = vld [vmem:[%s1222_s5 + $0x638] sm:$0xff]  ;;  %v293_v10 = vld [vmem:[%s1222_s5 + $0x230] sm:$0xff] }
  0xa8   : > { %755 = vmatpush2.msra.mxu1 %v453_v35  ;;  %679 = vmatprep.subr.mxu0 %v322_v36  ;;  %v421_v11 = vld [vmem:[%s1222_s5 + $0x630] sm:$0xff]  ;;  %v290_v12 = vld [vmem:[%s1222_s5 + $0x218] sm:$0xff] }
  0xa9   : > { %756 = vmatprep.subr.mxu1 %v450_v37  ;;  %680 = vmatpush2.msra.mxu0 %v321_v38  ;;  %v418_v13 = vld [vmem:[%s1222_s5 + $0x618] sm:$0xff]  ;;  %v289_v14 = vld [vmem:[%s1222_s5 + $0x210] sm:$0xff] }
  0xaa   : > { %757 = vmatpush2.msra.mxu1 %v449_v39  ;;  %681 = vmatprep.subr.mxu0 %v318_v40  ;;  %v417_v15 = vld [vmem:[%s1222_s5 + $0x610] sm:$0xff] }
  0xab   : > { %758 = vmatprep.subr.mxu1 %v446_v41  ;;  %682 = vmatpush2.msra.mxu0 %v317_v42 }
  0xac   : > { %759 = vmatpush2.msra.mxu1 %v445_v43  ;;  %683 = vmatprep.subr.mxu0 %v314_v44 }
  0xad   : > { %760 = vmatprep.subr.mxu1 %v442_v45  ;;  %684 = vmatpush2.msra.mxu0 %v313_v46 }
  0xae   : > { %761 = vmatpush2.msra.mxu1 %v441_v47  ;;  %685 = vmatprep.subr.mxu0 %v310_v48 }
  0xaf   : > { %762 = vmatprep.subr.mxu1 %v438_v49  ;;  %686 = vmatpush2.msra.mxu0 %v309_v50 }
  0xb0   : > { %763 = vmatpush2.msra.mxu1 %v437_v51  ;;  %687 = vmatprep.subr.mxu0 %v306_v52 }
  0xb1   : > { %764 = vmatprep.subr.mxu1 %v434_v53  ;;  %688 = vmatpush2.msra.mxu0 %v305_v54 }
  0xb2   : > { %765 = vmatpush2.msra.mxu1 %v433_v55  ;;  %689 = vmatprep.subr.mxu0 %v302_v56 }
  0xb3   : > { %766 = vmatprep.subr.mxu1 %v430_v57  ;;  %549 = vmatprep.mubr.f32.mxu0 %v220_v58 }
  0xb4   : > { %626 = vmatprep.mubr.f32.mxu1 %v222_v59  ;;  %690 = vmatpush2.msra.mxu0 %v301_v60 }
  0xb5   : > { %767 = vmatpush2.msra.mxu1 %v429_v61  ;;  %550 = vmatmul.mubr.f32.gmra.mxu0 %v219_v62 }
  0xb6   : > { %627 = vmatmul.mubr.f32.gmra.mxu1 %v221_v0  ;;  %691 = vmatprep.subr.mxu0 %v298_v4 }
  0xb7   : > { %768 = vmatprep.subr.mxu1 %v426_v5  ;;  %692 = vmatpush2.msra.mxu0 %v297_v6 }
  0xb8   : > { %769 = vmatpush2.msra.mxu1 %v425_v7  ;;  %693 = vmatprep.subr.mxu0 %v294_v8 }
  0xb9   : > { %770 = vmatprep.subr.mxu1 %v422_v9  ;;  %694 = vmatpush2.msra.mxu0 %v293_v10 }
  0xba   : > { %771 = vmatpush2.msra.mxu1 %v421_v11  ;;  %695 = vmatprep.subr.mxu0 %v290_v12 }
  0xbb   : > { %772 = vmatprep.subr.mxu1 %v418_v13  ;;  %696 = vmatpush2.msra.mxu0 %v289_v14 }
  0xbc   : > { %697 = vmatprep.mubr.f32.mxu0 %v1355_v63  ;;  %773 = vmatpush2.msra.mxu1 %v417_v15 }
  0xbd   : > { %774 = vmatprep.mubr.f32.mxu1 %v1358_v1  ;;  %698 = vmatmul.mubr.f32.vlgmr.msra.gmra.mxu0 %v1360_v2 }
  0xbe   : > { %775 = vmatmul.mubr.f32.vlgmr.msra.gmra.mxu1 %v1362_v3  ;;  %703 = vmatprep.mubr.f32.mxu0 %v220_v58 }
  0xbf   : > { %780 = vmatprep.mubr.f32.mxu1 %v222_v59 }
  0xc1   : > { %704 = vmatmul.mubr.f32.gmra.mxu0 %v219_v62 }
  0xc2   : > { %781 = vmatmul.mubr.f32.gmra.mxu1 %v221_v0 }
 0x139   : > { %v545_v16 = vpop.f32.mrf.mxu0 }
 0x13a   : > { %v622_v63 = vpop.f32.mrf.mxu1 }
 0x13b   : > { %v623_v1 = vadd.f32 %v622_v63, %v545_v16  ;;  %v547_v2 = vpop.f32.mrf.mxu0 }
 0x13c   : > { %v624_v3 = vpop.f32.mrf.mxu1 }
 0x13d   : > { %787 = vst [vmem:[%s1505_s23] sm:$0xff] %v623_v1  ;;  %v625_v17 = vadd.f32 %v624_v3, %v547_v2 }
 0x13f   : > { %788 = vst [vmem:[%s1505_s23 + $0x8] sm:$0xff] %v625_v17 }
 0x175   : > { %v551_v18 = vpop.f32.mrf.mxu0 }
 0x176   : > { %v628_v19 = vpop.f32.mrf.mxu1 }
 0x177   : > { %v629_v20 = vadd.f32 %v628_v19, %v551_v18  ;;  %v553_v21 = vpop.f32.mrf.mxu0 }
 0x178   : > { %v630_v22 = vpop.f32.mrf.mxu1 }
 0x179   : > { %791 = vst [vmem:[%s1505_s23 + $0x20] sm:$0xff] %v629_v20  ;;  %v631_v23 = vadd.f32 %v630_v22, %v553_v21 }
 0x17b   : > { %792 = vst [vmem:[%s1505_s23 + $0x28] sm:$0xff] %v631_v23 }
 0x17d   : > { %v699_v24 = vpop.f32.mrf.mxu0 }
 0x17e   : > { %v776_v25 = vpop.f32.mrf.mxu1 }
 0x17f   : > { %v777_v26 = vadd.f32 %v776_v25, %v699_v24  ;;  %v701_v27 = vpop.f32.mrf.mxu0 }
 0x180   : > { %v778_v28 = vpop.f32.mrf.mxu1 }
 0x181   : > { %789 = vst [vmem:[%s1505_s23 + $0x10] sm:$0xff] %v777_v26  ;;  %v779_v29 = vadd.f32 %v778_v28, %v701_v27  ;;  %v705_v30 = vpop.f32.mrf.mxu0 }
 0x182   : > { %v782_v31 = vpop.f32.mrf.mxu1 }
 0x183   : > { %790 = vst [vmem:[%s1505_s23 + $0x18] sm:$0xff] %v779_v29  ;;  %v783_v32 = vadd.f32 %v782_v31, %v705_v30  ;;  %v707_v33 = vpop.f32.mrf.mxu0 }
 0x184   : > { %v784_v34 = vpop.f32.mrf.mxu1 }
 0x185   : > { %793 = vst [vmem:[%s1505_s23 + $0x30] sm:$0xff] %v783_v32  ;;  %v785_v35 = vadd.f32 %v784_v34, %v707_v33 }
 0x187   : > { %794 = vst [vmem:[%s1505_s23 + $0x38] sm:$0xff] %v785_v35 }
 0x188 PF: > { %s16_s14 = sadd.s32 1, %s1101_s14   ;;  %s1543_s9 = smov %s1085_s10 }
 0x189   : > { %p13_p8 = scmp.ge.s32.totalorder %s16_s14, 5   ;;  %s1544_s10 = smov %s1089_s11 }
 0x18a   : > { %s1545_s11 = smov %s1207_s19  ;;  %s1546_s12 = smov %s1097_s13 }
 0x18b   : > { %s1547_s13 = smov %s1549_s29  ;;  %15 = sbr.rel (!%p13_p8) target bundleno = 5 (0x5), region = 74 }
 0x190   :  { %827 = vsyncpa [#allocation3], 1 }
 0x191   :  { %829 = vsyncpa [#allocation3 + $0x1], 1 }
 0x192   :  { %830 = vsyncpa [#allocation5], 1 }
 0x193   :  { %832 = vsyncpa [#allocation5 + $0x1], 1 }

// kernel: encoder_layer.3
= control target key start
LH: loop header
LB: loop body
LE: loop exit
PB: predicated region body
PF: predicated region fallthrough
CT: control target
= control target key end

     0   :  { %12 = vsyncpa [#allocation4], 0  ;;  %s7443_s0 = inlined_call_operand.vmem [shape: f32[3,2,8,512], index: 0, kind: input, shape index: {}, may-alias: {0,1,2}]   ;;  %s7444_s1 = inlined_call_operand.vmem [shape: f32[3,2,8,512], index: 1, kind: input, shape index: {}, may-alias: {0,1,2}]   ;;  %s7445_s2 = inlined_call_operand.vmem [shape: f32[3,2,8,512], index: 2, kind: input, shape index: {}, may-alias: {0,1,2}]   ;;  %s7446_s3 = inlined_call_operand.hbm [shape: f32[512,2048], index: 3, kind: input, shape index: {}]   ;;  %s7447_s4 = inlined_call_operand.hbm [shape: f32[2048,512], index: 4, kind: input, shape index: {}]   ;;  %s7448_s5 = inlined_call_operand.hbm [shape: f32[2,8,512], index: 5, kind: output, shape index: {0}]   ;;  %s7449_s6 = inlined_call_operand.hbm [shape: f32[2,8,8,8], index: 6, kind: output, shape index: {1}]  }
   0x1   :  { %13 = vsyncpa [#allocation7], 0 }
   0x2   :  { %14 = vsyncpa [#allocation5], 0 }
   0x3   :  { %16 = vsyncpa [#allocation5 + $0x1], 0 }
   0x4   :  { %17 = vsyncpa [#allocation10], 0 }
   0x5   :  { %19 = vsyncpa [#allocation10 + $0x1], 0  ;;  %s6878_s21 = smov 0   ;;  %s6880_s22 = smov 0  }
   0x6   :  { %s6882_s23 = smov 0   ;;  %s6884_s24 = smov 0  }
   0x7   :  { %s6886_s25 = smov 0   ;;  %s6888_s26 = smov 0  }
   0x8 LB: > { %s6334_s27 = sadd.s32 4294967295, %s6828_s26   ;;  %s6335_s28 = sadd.s32 4294967294, %s6828_s26   ;;  %s6828_s26 = sphi %s6888_s26, %s25_s26   ;;  %s6824_s25 = sphi %s6886_s25, %s7462_s25   ;;  %s6820_s24 = sphi %s6884_s24, %s7461_s24   ;;  %s6816_s23 = sphi %s6882_s23, %s7460_s23   ;;  %s6812_s22 = sphi %s6880_s22, %s7459_s22   ;;  %s6808_s21 = sphi %s6878_s21, %s7458_s21  }
   0x9   : > { %s37_s29 = sadd.s32 1, %s6824_s25  ;;  %s168_s30 = sadd.s32 1, %s6816_s23 }
   0xa   : > { %p39_p0 = scmp.ge.s32.totalorder %s37_s29, 2  ;;  %p178_p1 = scmp.ne.s32.totalorder %s6816_s23, %s6812_s22 }
   0xb   : > { %p179_p2 = scmp.eq.s32.totalorder %s6334_s27, 1  ;;  %p184_p3 = scmp.ne.s32.totalorder %s6812_s22, %s6808_s21 }
   0xc   : > { %s7464_s29 = smov (%p39_p0, %s37_s29), 0  ;;  %p185_p5 = scmp.eq.s32.totalorder %s6335_s28, 1 }
   0xd   : > { %p6918_p4 = por %p179_p2, %p178_p1  ;;  %s163_s8 = ssub.s32 %s6824_s25, %s7464_s29 }
   0xe   : > { %p6336_p6 = scmp.ge.s32.totalorder %s6828_s26, 1  ;;  %p166_p7 = scmp.eq.s32.totalorder %s163_s8, 0 }
   0xf   : > { %s7451_s7 = scalar_select %p6918_p4, 1, 0 }
  0x10   : > { %p6925_p8 = por %p185_p5, %p184_p3  ;;  %p220_p9 = scmp.lt.s32.totalorder %s6828_s26, 3 }
  0x11   : > { %s6931_s10 = scalar_select %p166_p7, %s6816_s23, %s168_s30  }
  0x12   : > { %s7452_s9 = scalar_select %p6925_p8, 1, 0 }
  0x13   : > { %p6933_p10 = pnand %p6336_p6, %p220_p9  ;;  %p6937_p11 = scmp.eq.s32.totalorder %s6334_s27, 0 }
  0x14   : > { %s6830_s13 = smov [#allocation3]   ;;  %s6831_s16 = smov [#allocation6]  }
  0x15   : > { %p6535_p12 = pneg %p6933_p10  ;;  %s232_s14 = sshll.u32 %s6830_s13, 4  ;;  %s233_s14 = int_to_ptr.vmem [resolvable:$true] %s232_s14 }
  0x16   : > { %s245_s17 = sshll.u32 %s6831_s16, 4  ;;  %s6673_s18 = scalar_lea.vmem %s233_s14, 131072  ;;  %s246_s17 = int_to_ptr.vmem [resolvable:$true] %s245_s17 }
  0x17   : > { %p6945_p13 = pnand %p6937_p11, %p6535_p12  ;;  %p6674_p1 = scmp.ne.s32.totalorder %s233_s14, %s6673_s18 }
  0x18   : > { %p6681_p5 = scmp.lt.s32.totalorder %s233_s14, %s233_s14  ;;  %p6682_p6 = scmp.lt.s32.totalorder %s6673_s18, %s6673_s18 }
  0x19   : > { %p6664_p0 = pneg %p6945_p13 }
  0x1a   : > { %p6683_p7 = por %p6682_p6, %p6681_p5 }
  0x1b   : > { %p6676_p2 = pnand %p6674_p1, %p6664_p0 }
  0x1d   : > { %p6677_p3 = pneg %p6676_p2 }
  0x1f   : > { %p6684_p9 = pnand %p6683_p7, %p6677_p3 }
  0x21   : > { %6687 = shalt.err (!%p6684_p9)
}
  0x22   : > { %s6832_s19 = smov 2048   ;;  %s6833_s20 = smov 128  }
  0x23   : > { %6538 = dma.hbm_to_vmem [thread:$0]  (!%p6945_p13), %s7446_s3, 131072, %s233_s14, [#allocation4], %s6832_s19, %s6832_s19, %s6833_s20  }
  0x24   : > { %s6699_s30 = scalar_lea.vmem %s246_s17, 131072  ;;  %p6707_p8 = scmp.lt.s32.totalorder %s246_s17, %s246_s17 }
  0x25   : > { %p6700_p12 = scmp.ne.s32.totalorder %s246_s17, %s6699_s30  ;;  %p6708_p4 = scmp.lt.s32.totalorder %s6699_s30, %s6699_s30 }
  0x27   : > { %p6702_p1 = pnand %p6700_p12, %p6664_p0  ;;  %p6709_p5 = por %p6708_p4, %p6707_p8 }
  0x29   : > { %p6703_p2 = pneg %p6702_p1 }
  0x2b   : > { %p6710_p3 = pnand %p6709_p5, %p6703_p2 }
  0x2d   : > { %6713 = shalt.err (!%p6710_p3)
}
  0x2e   : > { %s6834_s8 = smov 512   ;;  %s6835_s13 = smov 32  }
  0x2f   : > { %6541 = dma.hbm_to_vmem [thread:$0]  (!%p6945_p13), %s7447_s4, 131072, %s246_s17, [#allocation7], %s6834_s8, %s6834_s8, %s6835_s13  }
  0x30   : > { %291 = sbr.rel (%p6933_p10) target bundleno = 2976 (0xba0), region = 40 }
  0x35   : > { %6791 = dma.done.wait (%p6937_p11), [#allocation4], 131072  }
  0x36   : > { %6793 = vsyncadd (%p6937_p11), [#allocation4], 4294836224 }
  0x37   : > { %6795 = dma.done.wait (%p6937_p11), [#allocation7], 131072  }
  0x38   : > { %6797 = vsyncadd (%p6937_p11), [#allocation7], 4294836224  ;;  %p346_p4 = scmp.lt.s32.totalorder %s6820_s24, 1  ;;  %v6836_v0 = vmov 0.0   ;;  %vm6837_vm0 = vmmov 0   ;;  %vm371_vm1 = vcmask 523264  }
  0x39   : > { %6443 = vmatprep.subr.mxu0 %v6836_v0  ;;  %6445 = vmatprep.mubr.msk.f32.mxu0 %vm6837_vm0, %v6836_v0  ;;  %vm448_vm2 = vcmask 64512   ;;  %s6838_s28 = smov 64   ;;  %s7028_s16 = sand.u32 1, %s6812_s22   ;;  %vm713_vm3 = vcmask 1048064  }
  0x3a   : > { %s347_s11 = scalar_select %p346_p4, %s6820_s24, 1  ;;  %6448 = vmatprep.subr.mxu1 %v6836_v0  ;;  %6450 = vmatprep.mubr.msk.f32.mxu1 %vm6837_vm0, %v6836_v0 }
  0x3b   : > { %s6344_s18 = sshll.u32 %s7028_s16, 6  ;;  %s6130_s20 = scalar_lea.sflag [#allocation10], %s7028_s16 }
  0x3c   : > { %s6985_s14 = sshll.u32 %s347_s11, 5  ;;  %s7031_s11 = scalar_lea.vmem [#allocation9], %s6344_s18 }
  0x3d   : > { %s354_s17 = scalar_lea.vmem %s7443_s0, %s6985_s14  ;;  %s6995_s27 = scalar_lea.vmem %s7444_s1, %s6985_s14 }
  0x3e   : > { %v6351_v1 = vld [vmem:[%s6995_s27 + $0x40] sm:$0xff]  ;;  %v882_v7 = vld [vmem:[%s354_s17 + $0x8] sm:$0xff]  ;;  %v6380_v9 = vld [vmem:[%s6995_s27 + $0x50] sm:$0xff]  ;;  %s7018_s13 = scalar_lea.vmem %s7445_s2, %s6985_s14  ;;  %s6410_s14 = sshll.u32 %s6820_s24, 10 }
  0x3f   : > { %v367_v2 = vld [vmem:[%s354_s17] sm:$0xff]  ;;  %6444 = vmatpush3.xpose.msk.msra.mxu0 %vm371_vm1, %v6351_v1  ;;  %543 = vrot.lane.b32.xlu1 %v6351_v1, %s6838_s28  ;;  %v883_v8 = vmul.f32 0.125, %v882_v7  ;;  %v1228_v10 = vld [vmem:[%s354_s17 + $0x10] sm:$0xff]  ;;  %v6392_v12 = vld [vmem:[%s6995_s27 + $0x58] sm:$0xff]  ;;  %s6160_s19 = sshll.u32 %s7031_s11, 4  ;;  %p7456_p10 = scmp.ne.s32.totalorder %s7451_s7, 0  ;;  %s7366_s19 = int_to_ptr.vmem [resolvable:$true] %s6160_s19 }
  0x40   : > { %v368_v3 = vmul.f32 0.125, %v367_v2  ;;  %6458 = vmatprep.subr.mxu0 %v6836_v0  ;;  %v1229_v11 = vmul.f32 0.125, %v1228_v10  ;;  %v1574_v13 = vld [vmem:[%s354_s17 + $0x18] sm:$0xff]  ;;  %v7021_v20 = vld [vmem:[%s7018_s13 + $0x80] sm:$0xff]  ;;  %v6368_v21 = vld [vmem:[%s6995_s27 + $0x48] sm:$0xff]  ;;  %s7363_s17 = scalar_lea.hbm %s7449_s6, %s6410_s14  ;;  %s6714_s27 = scalar_lea.vmem %s7366_s19, 1024 }
  0x41   : > { %v1575_v14 = vmul.f32 0.125, %v1574_v13  ;;  %6449 = vmatpush3.msra.mxu1 %v7021_v20  ;;  %v6369_v13 = vld [vmem:[%s7018_s13 + $0x88] sm:$0xff]  ;;  %p6715_p8 = scmp.ne.s32.totalorder %s7366_s19, %s6714_s27 }
  0x42   : > { %6446 = vmatmul.mubr.msk.f32.vlgmr.msra.gmra.mxu0 %vm371_vm1, %v368_v3  ;;  %6453 = vmatprep.subr.mxu1 %v6836_v0 }
  0x43   : > { %6460 = vmatprep.mubr.msk.f32.mxu0 %vm6837_vm0, %v6836_v0  ;;  %540 = vrot.lane.b32.xlu1 %v368_v3, %s6838_s28  ;;  %p6716_p11 = pnand %p6715_p8, %p7456_p10 }
  0x45   : > { %p6717_p13 = pneg %p6716_p11 }
  0x47   : > { %887 = vrot.lane.b32.xlu1 %v883_v8, %s6838_s28 }
  0x4b   : > { %1236 = vrot.lane.b32.xlu1 %v6380_v9, %s6838_s28 }
  0x4f   : > { %1233 = vrot.lane.b32.xlu1 %v1229_v11, %s6838_s28 }
  0x53   : > { %1582 = vrot.lane.b32.xlu1 %v6392_v12, %s6838_s28 }
  0x57   : > { %1579 = vrot.lane.b32.xlu1 %v1575_v14, %s6838_s28 }
  0xb1   : > { %v544_v23 = vpop.permute.xlu1 %543 }
  0xb5   : > { %v541_v25 = vpop.permute.xlu1 %540 }
  0xb9   : > { %v888_v27 = vpop.permute.xlu1 %887 }
  0xbd   : > { %v1237_v29 = vpop.permute.xlu1 %1236 }
  0xc1   : > { %v1234_v30 = vpop.permute.xlu1 %1233 }
  0xc5   : > { %v1583_v31 = vpop.permute.xlu1 %1582 }
  0xc9   : > { %v1580_v32 = vpop.permute.xlu1 %1579 }
 0x102   : > { %v444_v4 = vpop.f32.mrf.mxu0 }
 0x103   : > { %v449_v5 = vsel %vm448_vm2, %v444_v4, -inf }
 0x104   : > { %450 = vmax.xlane.f32.xlu0 %v449_v5  ;;  %v6447_v6 = vpop.f32.mrf.mxu0 }
 0x18d   : > { %v451_v15 = vpop.xlane.xlu0 %450 }
 0x18e   : > { %v452_v16 = vsub.f32 %v444_v4, %v451_v15 }
 0x190   : > { %v453_v17 = vmul.f32 1.442695, %v452_v16 }
 0x192   : > { %6613 = vpow2.f32 %v453_v17 }
 0x19f   : > { %v6614_v18 = vpop.eup %6613 }
 0x1a0   : > { %v455_v19 = vsel %vm448_vm2, %v6614_v18, 0.0 }
 0x1a1   : > { %456 = vadd.xlane.f32.xlu0 %v455_v19 }
 0x1b7   : > { %890 = vrot.lane.b32.xlu0 %v6368_v21, %s6838_s28 }
 0x22a   : > { %v457_v22 = vpop.xlane.xlu0 %456 }
 0x22b   : > { %6615 = vrcp.f32 %v457_v22 }
 0x22e   : > { %v891_v28 = vpop.permute.xlu0 %890 }
 0x238   : > { %v6616_v24 = vpop.eup %6615 }
 0x239   : > { %v459_v26 = vmul.f32 %v6616_v24, %v6614_v18 }
 0x23b   : > { %460 = vst.msk [vmem:[%s7031_s11] sm:$0xff] %vm448_vm2, %v459_v26  ;;  %6451 = vmatmul.mubr.msk.f32.vlgmr.msra.gmra.mxu1 %vm448_vm2, %v459_v26 }
 0x23c   : > { %6454 = vmatpush3.xpose.msk.msra.mxu1 %vm371_vm1, %v544_v23  ;;  %6455 = vmatprep.mubr.msk.f32.mxu1 %vm6837_vm0, %v6836_v0 }
 0x23d   : > { %6463 = vmatprep.subr.mxu1 %v6836_v0 }
 0x23f   : > { %6456 = vmatmul.mubr.msk.f32.vlgmr.msra.gmra.mxu1 %vm371_vm1, %v541_v25 }
 0x240   : > { %6464 = vmatpush3.xpose.msk.msra.mxu1 %vm371_vm1, %v6368_v21  ;;  %6465 = vmatprep.mubr.msk.f32.mxu1 %vm6837_vm0, %v6836_v0 }
 0x241   : > { %6473 = vmatprep.subr.mxu1 %v6836_v0 }
 0x243   : > { %6466 = vmatmul.mubr.msk.f32.vlgmr.msra.gmra.mxu1 %vm371_vm1, %v883_v8 }
 0x244   : > { %6474 = vmatpush3.xpose.msk.msra.mxu1 %vm371_vm1, %v891_v28  ;;  %6475 = vmatprep.mubr.msk.f32.mxu1 %vm6837_vm0, %v6836_v0 }
 0x245   : > { %6483 = vmatprep.subr.mxu1 %v6836_v0 }
 0x247   : > { %6476 = vmatmul.mubr.msk.f32.vlgmr.msra.gmra.mxu1 %vm371_vm1, %v888_v27 }
 0x248   : > { %6484 = vmatpush3.xpose.msk.msra.mxu1 %vm371_vm1, %v6380_v9  ;;  %6485 = vmatprep.mubr.msk.f32.mxu1 %vm6837_vm0, %v6836_v0 }
 0x249   : > { %6493 = vmatprep.subr.mxu1 %v6836_v0 }
 0x24b   : > { %6486 = vmatmul.mubr.msk.f32.vlgmr.msra.gmra.mxu1 %vm371_vm1, %v1229_v11 }
 0x24c   : > { %6494 = vmatpush3.xpose.msk.msra.mxu1 %vm371_vm1, %v1237_v29  ;;  %6495 = vmatprep.mubr.msk.f32.mxu1 %vm6837_vm0, %v6836_v0  ;;  %v6381_v29 = vld [vmem:[%s7018_s13 + $0x90] sm:$0xff] }
 0x24d   : > { %6503 = vmatprep.subr.mxu1 %v6836_v0 }
 0x24f   : > { %6496 = vmatmul.mubr.msk.f32.vlgmr.msra.gmra.mxu1 %vm371_vm1, %v1234_v30  ;;  %v6393_v30 = vld [vmem:[%s7018_s13 + $0x98] sm:$0xff] }
 0x250   : > { %6504 = vmatpush3.xpose.msk.msra.mxu1 %vm371_vm1, %v6392_v12  ;;  %6505 = vmatprep.mubr.msk.f32.mxu1 %vm6837_vm0, %v6836_v0 }
 0x251   : > { %6513 = vmatprep.subr.mxu1 %v6836_v0 }
 0x253   : > { %6506 = vmatmul.mubr.msk.f32.vlgmr.msra.gmra.mxu1 %vm371_vm1, %v1575_v14 }
 0x254   : > { %6514 = vmatpush3.xpose.msk.msra.mxu1 %vm371_vm1, %v1583_v31  ;;  %6515 = vmatprep.mubr.msk.f32.mxu1 %vm6837_vm0, %v6836_v0 }
 0x257   : > { %6516 = vmatmul.mubr.msk.f32.vlgmr.msra.gmra.mxu1 %vm371_vm1, %v1580_v32 }
 0x2fb   : > { %v530_v33 = vpop.f32.mrf.mxu1 }
 0x2fc   : > { %534 = vst.msk [vmem:[#allocation2] sm:$0xff] %vm371_vm1, %v530_v33 }
 0x2fd   : > { %v6452_v34 = vpop.f32.mrf.mxu1 }
 0x2ff   : > { %v615_v35 = vpop.f32.mrf.mxu1 }
 0x300   : > { %v619_v36 = vsel %vm448_vm2, %v615_v35, -inf }
 0x301   : > { %620 = vmax.xlane.f32.xlu1 %v619_v36  ;;  %v6457_v37 = vpop.f32.mrf.mxu1 }
 0x303   : > { %v791_v38 = vpop.f32.mrf.mxu1 }
 0x304   : > { %v795_v39 = vsel %vm448_vm2, %v791_v38, -inf }
 0x305   : > { %796 = vmax.xlane.f32.xlu0 %v795_v39  ;;  %v6467_v40 = vpop.f32.mrf.mxu1 }
 0x307   : > { %v962_v41 = vpop.f32.mrf.mxu1 }
 0x308   : > { %v966_v42 = vsel %vm448_vm2, %v962_v41, -inf }
 0x309   : > { %967 = vmax.xlane.f32.xlu0 %v966_v42  ;;  %v6477_v43 = vpop.f32.mrf.mxu1 }
 0x30b   : > { %v1137_v44 = vpop.f32.mrf.mxu1 }
 0x30c   : > { %v1141_v45 = vsel %vm448_vm2, %v1137_v44, -inf }
 0x30d   : > { %1142 = vmax.xlane.f32.xlu1 %v1141_v45  ;;  %v6487_v46 = vpop.f32.mrf.mxu1 }
 0x30f   : > { %v1308_v47 = vpop.f32.mrf.mxu1 }
 0x310   : > { %v1312_v48 = vsel %vm448_vm2, %v1308_v47, -inf }
 0x311   : > { %1313 = vmax.xlane.f32.xlu0 %v1312_v48  ;;  %v6497_v49 = vpop.f32.mrf.mxu1 }
 0x313   : > { %v1483_v50 = vpop.f32.mrf.mxu1 }
 0x314   : > { %v1487_v51 = vsel %vm448_vm2, %v1483_v50, -inf }
 0x315   : > { %1488 = vmax.xlane.f32.xlu1 %v1487_v51  ;;  %v6507_v52 = vpop.f32.mrf.mxu1 }
 0x317   : > { %v1654_v53 = vpop.f32.mrf.mxu1 }
 0x318   : > { %v1658_v54 = vsel %vm448_vm2, %v1654_v53, -inf }
 0x319   : > { %1659 = vmax.xlane.f32.xlu0 %v1658_v54  ;;  %v6517_v55 = vpop.f32.mrf.mxu1 }
 0x38a   : > { %v621_v56 = vpop.xlane.xlu1 %620 }
 0x38b   : > { %v622_v57 = vsub.f32 %v615_v35, %v621_v56  ;;  %v1998_v56 = vld [vmem:[#allocation3 + $0x788] sm:$0xff] }
 0x38c   : > { %2781 = vmatprep.subr.mxu1 %v1998_v56  ;;  %v2494_v56 = vld [vmem:[#allocation3 + $0x1708] sm:$0xff] }
 0x38d   : > { %v623_v58 = vmul.f32 1.442695, %v622_v57  ;;  %v1997_v57 = vld [vmem:[#allocation3 + $0x780] sm:$0xff] }
 0x38e   : > { %v797_v59 = vpop.xlane.xlu0 %796  ;;  %2782 = vmatpush1.msra.mxu1 %v1997_v57  ;;  %v2493_v57 = vld [vmem:[#allocation3 + $0x1700] sm:$0xff] }
 0x38f   : > { %6617 = vpow2.f32 %v623_v58  ;;  %v798_v60 = vsub.f32 %v791_v38, %v797_v59  ;;  %v1982_v58 = vld [vmem:[#allocation3 + $0x708] sm:$0xff]  ;;  %v1981_v59 = vld [vmem:[#allocation3 + $0x700] sm:$0xff] }
 0x390   : > { %2783 = vmatprep.subr.mxu1 %v1982_v58 }
 0x391   : > { %v799_v61 = vmul.f32 1.442695, %v798_v60  ;;  %v1966_v60 = vld [vmem:[#allocation3 + $0x688] sm:$0xff]  ;;  %2784 = vmatpush1.msra.mxu1 %v1981_v59 }
 0x392   : > { %v968_v62 = vpop.xlane.xlu0 %967  ;;  %2785 = vmatprep.subr.mxu1 %v1966_v60  ;;  %v2014_v59 = vld [vmem:[#allocation3 + $0x808] sm:$0xff]  ;;  %v2013_v60 = vld [vmem:[#allocation3 + $0x800] sm:$0xff] }
 0x393   : > { %6619 = vpow2.f32 %v799_v61  ;;  %v969_v63 = vsub.f32 %v962_v41, %v968_v62  ;;  %v1965_v61 = vld [vmem:[#allocation3 + $0x680] sm:$0xff]  ;;  %v1950_v62 = vld [vmem:[#allocation3 + $0x608] sm:$0xff] }
 0x394   : > { %2786 = vmatpush1.msra.mxu1 %v1965_v61 }
 0x395   : > { %v970_v1 = vmul.f32 1.442695, %v969_v63  ;;  %v1949_v63 = vld [vmem:[#allocation3 + $0x600] sm:$0xff]  ;;  %2787 = vmatprep.subr.mxu1 %v1950_v62 }
 0x396   : > { %v1143_v2 = vpop.xlane.xlu1 %1142  ;;  %2788 = vmatpush1.msra.mxu1 %v1949_v63  ;;  %v2478_v63 = vld [vmem:[#allocation3 + $0x1688] sm:$0xff] }
 0x397   : > { %6621 = vpow2.f32 %v970_v1  ;;  %v1144_v3 = vsub.f32 %v1137_v44, %v1143_v2  ;;  %v1934_v1 = vld [vmem:[#allocation3 + $0x588] sm:$0xff]  ;;  %v1933_v2 = vld [vmem:[#allocation3 + $0x580] sm:$0xff] }
 0x398   : > { %2789 = vmatprep.subr.mxu1 %v1934_v1  ;;  %v2000_v1 = vld [vmem:[#allocation3 + $0x798] sm:$0xff] }
 0x399   : > { %v1145_v4 = vmul.f32 1.442695, %v1144_v3  ;;  %v1917_v3 = vld [vmem:[#allocation3 + $0x500] sm:$0xff]  ;;  %2790 = vmatpush1.msra.mxu1 %v1933_v2 }
 0x39a   : > { %v1314_v14 = vpop.xlane.xlu0 %1313  ;;  %v2477_v2 = vld [vmem:[#allocation3 + $0x1680] sm:$0xff] }
 0x39b   : > { %6623 = vpow2.f32 %v1145_v4  ;;  %v1315_v15 = vsub.f32 %v1308_v47, %v1314_v14  ;;  %v1902_v4 = vld [vmem:[#allocation3 + $0x488] sm:$0xff] }
 0x39c   : > { %v6618_v5 = vpop.eup %6617  ;;  %v1822_v14 = vld [vmem:[#allocation3 + $0x208] sm:$0xff] }
 0x39d   : > { %v625_v6 = vsel %vm448_vm2, %v6618_v5, 0.0  ;;  %v1316_v19 = vmul.f32 1.442695, %v1315_v15  ;;  %v1821_v15 = vld [vmem:[#allocation3 + $0x200] sm:$0xff] }
 0x39e   : > { %626 = vadd.xlane.f32.xlu1 %v625_v6  ;;  %v1489_v16 = vpop.xlane.xlu1 %1488  ;;  %v1886_v6 = vld [vmem:[#allocation3 + $0x408] sm:$0xff] }
 0x39f   : > { %v1490_v18 = vsub.f32 %v1483_v50, %v1489_v16  ;;  %6625 = vpow2.f32 %v1316_v19  ;;  %v1806_v16 = vld [vmem:[#allocation3 + $0x188] sm:$0xff]  ;;  %v1789_v19 = vld [vmem:[#allocation3 + $0x100] sm:$0xff] }
 0x3a0   : > { %v6620_v7 = vpop.eup %6619 }
 0x3a1   : > { %v801_v8 = vsel %vm448_vm2, %v6620_v7, 0.0  ;;  %v1491_v22 = vmul.f32 1.442695, %v1490_v18  ;;  %v1790_v18 = vld [vmem:[#allocation3 + $0x108] sm:$0xff] }
 0x3a2   : > { %802 = vadd.xlane.f32.xlu0 %v801_v8  ;;  %v1660_v17 = vpop.xlane.xlu0 %1659  ;;  %v1870_v8 = vld [vmem:[#allocation3 + $0x388] sm:$0xff] }
 0x3a3   : > { %v1661_v21 = vsub.f32 %v1654_v53, %v1660_v17  ;;  %6627 = vpow2.f32 %v1491_v22  ;;  %v1805_v17 = vld [vmem:[#allocation3 + $0x180] sm:$0xff] }
 0x3a4   : > { %v6622_v9 = vpop.eup %6621  ;;  %v1773_v22 = vld [vmem:[#allocation3 + $0x80] sm:$0xff] }
 0x3a5   : > { %v972_v10 = vsel %vm448_vm2, %v6622_v9, 0.0  ;;  %v1662_v23 = vmul.f32 1.442695, %v1661_v21  ;;  %v1774_v21 = vld [vmem:[#allocation3 + $0x88] sm:$0xff] }
 0x3a6   : > { %973 = vadd.xlane.f32.xlu1 %v972_v10  ;;  %v1854_v10 = vld [vmem:[#allocation3 + $0x308] sm:$0xff] }
 0x3a7   : > { %6629 = vpow2.f32 %v1662_v23  ;;  %v1758_v23 = vld [vmem:[#allocation3 + $0x8] sm:$0xff] }
 0x3a8   : > { %v7081_v11 = vpop.eup %6623 }
 0x3a9   : > { %v1147_v12 = vsel %vm448_vm2, %v7081_v11, 0.0 }
 0x3aa   : > { %1148 = vadd.xlane.f32.xlu0 %v1147_v12  ;;  %v1838_v12 = vld [vmem:[#allocation3 + $0x288] sm:$0xff] }
 0x3ac   : > { %v6626_v24 = vpop.eup %6625 }
 0x3ad   : > { %v1318_v26 = vsel %vm448_vm2, %v6626_v24, 0.0 }
 0x3b0   : > { %v7089_v25 = vpop.eup %6627 }
 0x3b4   : > { %v7092_v27 = vpop.eup %6629 }
 0x3b5   : > { %v1664_v28 = vsel %vm448_vm2, %v7092_v27, 0.0 }
 0x3b7   : > { %980 = vrot.lane.b32.xlu1 %v6369_v13, %s6838_s28 }
 0x3c0   : > { %633 = vrot.lane.b32.xlu0 %v7021_v20, %s6838_s28  ;;  %v1493_v20 = vsel %vm448_vm2, %v7089_v25, 0.0 }
 0x3db   : > { %1319 = vadd.xlane.f32.xlu1 %v1318_v26  ;;  %v2253_v26 = vld [vmem:[#allocation3 + $0xf80] sm:$0xff] }
 0x3df   : > { %1494 = vadd.xlane.f32.xlu0 %v1493_v20  ;;  %1665 = vadd.xlane.f32.xlu1 %v1664_v28  ;;  %v2237_v20 = vld [vmem:[#allocation3 + $0xf00] sm:$0xff]  ;;  %v2222_v28 = vld [vmem:[#allocation3 + $0xe88] sm:$0xff] }
 0x3f0   : > { %1326 = vrot.lane.b32.xlu1 %v6381_v29, %s6838_s28 }
 0x3f5   : > { %1672 = vrot.lane.b32.xlu0 %v6393_v30, %s6838_s28 }
 0x427   : > { %v627_v31 = vpop.xlane.xlu1 %626 }
 0x428   : > { %6631 = vrcp.f32 %v627_v31  ;;  %v2205_v31 = vld [vmem:[#allocation3 + $0xe00] sm:$0xff] }
 0x42b   : > { %v803_v32 = vpop.xlane.xlu0 %802 }
 0x42c   : > { %6633 = vrcp.f32 %v803_v32  ;;  %v2190_v32 = vld [vmem:[#allocation3 + $0xd88] sm:$0xff] }
 0x42f   : > { %v974_v33 = vpop.xlane.xlu1 %973 }
 0x430   : > { %6635 = vrcp.f32 %v974_v33  ;;  %v2189_v33 = vld [vmem:[#allocation3 + $0xd80] sm:$0xff] }
 0x433   : > { %v1149_v34 = vpop.xlane.xlu0 %1148  ;;  %v981_v41 = vpop.permute.xlu1 %980 }
 0x434   : > { %6637 = vrcp.f32 %v1149_v34  ;;  %v2174_v34 = vld [vmem:[#allocation3 + $0xd08] sm:$0xff] }
 0x435   : > { %v6632_v35 = vpop.eup %6631 }
 0x436   : > { %v629_v36 = vmul.f32 %v6632_v35, %v6618_v5  ;;  %v1901_v5 = vld [vmem:[#allocation3 + $0x480] sm:$0xff] }
 0x437   : > { %v634_v37 = vpop.permute.xlu0 %633  ;;  %v2173_v35 = vld [vmem:[#allocation3 + $0xd00] sm:$0xff] }
 0x438   : > { %6459 = vmatpush3.msra.mxu0 %v634_v37  ;;  %6360 = vst.msk [vmem:[%s7031_s11 + $0x8] sm:$0xff] %vm448_vm2, %v629_v36  ;;  %v2157_v37 = vld [vmem:[#allocation3 + $0xc80] sm:$0xff] }
 0x439   : > { %v6634_v38 = vpop.eup %6633  ;;  %6461 = vmatmul.mubr.msk.f32.vlgmr.msra.gmra.mxu0 %vm448_vm2, %v629_v36  ;;  %6468 = vmatprep.subr.mxu0 %v6836_v0  ;;  %v2158_v36 = vld [vmem:[#allocation3 + $0xc88] sm:$0xff] }
 0x43a   : > { %6469 = vmatpush3.msra.mxu0 %v6369_v13  ;;  %6470 = vmatprep.mubr.msk.f32.mxu0 %vm6837_vm0, %v6836_v0  ;;  %v805_v39 = vmul.f32 %v6634_v38, %v6620_v7  ;;  %v1885_v7 = vld [vmem:[#allocation3 + $0x400] sm:$0xff]  ;;  %v2142_v38 = vld [vmem:[#allocation3 + $0xc08] sm:$0xff] }
 0x43b   : > { %6478 = vmatprep.subr.mxu0 %v6836_v0  ;;  %v1837_v13 = vld [vmem:[#allocation3 + $0x280] sm:$0xff] }
 0x43c   : > { %6366 = vst.msk [vmem:[%s7031_s11 + $0x10] sm:$0xff] %vm448_vm2, %v805_v39 }
 0x43d   : > { %v6636_v40 = vpop.eup %6635  ;;  %6471 = vmatmul.mubr.msk.f32.vlgmr.msra.gmra.mxu0 %vm448_vm2, %v805_v39  ;;  %v2141_v39 = vld [vmem:[#allocation3 + $0xc00] sm:$0xff] }
 0x43e   : > { %6479 = vmatpush3.msra.mxu0 %v981_v41  ;;  %6480 = vmatprep.mubr.msk.f32.mxu0 %vm6837_vm0, %v6836_v0  ;;  %v976_v42 = vmul.f32 %v6636_v40, %v6622_v9  ;;  %v1869_v9 = vld [vmem:[#allocation3 + $0x380] sm:$0xff]  ;;  %v2126_v40 = vld [vmem:[#allocation3 + $0xb88] sm:$0xff] }
 0x43f   : > { %6488 = vmatprep.subr.mxu0 %v6836_v0  ;;  %v2125_v41 = vld [vmem:[#allocation3 + $0xb80] sm:$0xff] }
 0x440   : > { %6372 = vst.msk [vmem:[%s7031_s11 + $0x18] sm:$0xff] %vm448_vm2, %v976_v42 }
 0x441   : > { %v6638_v43 = vpop.eup %6637  ;;  %6481 = vmatmul.mubr.msk.f32.vlgmr.msra.gmra.mxu0 %vm448_vm2, %v976_v42  ;;  %v2110_v42 = vld [vmem:[#allocation3 + $0xb08] sm:$0xff] }
 0x442   : > { %6489 = vmatpush3.msra.mxu0 %v6381_v29  ;;  %6490 = vmatprep.mubr.msk.f32.mxu0 %vm6837_vm0, %v6836_v0  ;;  %v1151_v44 = vmul.f32 %v6638_v43, %v7081_v11  ;;  %v1853_v11 = vld [vmem:[#allocation3 + $0x300] sm:$0xff] }
 0x443   : > { %6498 = vmatprep.subr.mxu0 %v6836_v0  ;;  %v2221_v29 = vld [vmem:[#allocation3 + $0xe80] sm:$0xff] }
 0x444   : > { %6378 = vst.msk [vmem:[%s7031_s11 + $0x20] sm:$0xff] %vm448_vm2, %v1151_v44  ;;  %v2109_v43 = vld [vmem:[#allocation3 + $0xb00] sm:$0xff] }
 0x445   : > { %6491 = vmatmul.mubr.msk.f32.vlgmr.msra.gmra.mxu0 %vm448_vm2, %v1151_v44  ;;  %v2094_v44 = vld [vmem:[#allocation3 + $0xa88] sm:$0xff] }
 0x446   : > { %6500 = vmatprep.mubr.msk.f32.mxu0 %vm6837_vm0, %v6836_v0 }
 0x464   : > { %v1320_v45 = vpop.xlane.xlu1 %1319 }
 0x465   : > { %6639 = vrcp.f32 %v1320_v45  ;;  %v2093_v45 = vld [vmem:[#allocation3 + $0xa80] sm:$0xff] }
 0x468   : > { %v1666_v46 = vpop.xlane.xlu1 %1665  ;;  %v1495_v47 = vpop.xlane.xlu0 %1494 }
 0x469   : > { %6641 = vrcp.f32 %v1666_v46  ;;  %v2078_v46 = vld [vmem:[#allocation3 + $0xa08] sm:$0xff] }
 0x46a   : > { %6643 = vrcp.f32 %v1495_v47  ;;  %v2077_v47 = vld [vmem:[#allocation3 + $0xa00] sm:$0xff] }
 0x46c   : > { %v1327_v48 = vpop.permute.xlu1 %1326  ;;  %v1673_v54 = vpop.permute.xlu0 %1672 }
 0x46d   : > { %6499 = vmatpush3.msra.mxu0 %v1327_v48  ;;  %v2062_v48 = vld [vmem:[#allocation3 + $0x988] sm:$0xff] }
 0x46e   : > { %6508 = vmatprep.subr.mxu0 %v6836_v0 }
 0x472   : > { %v6640_v49 = vpop.eup %6639 }
 0x473   : > { %v1322_v50 = vmul.f32 %v6640_v49, %v6626_v24  ;;  %v1757_v24 = vld [vmem:[#allocation3] sm:$0xff] }
 0x474   : > { %v2061_v49 = vld [vmem:[#allocation3 + $0x980] sm:$0xff] }
 0x475   : > { %6384 = vst.msk [vmem:[%s7031_s11 + $0x28] sm:$0xff] %vm448_vm2, %v1322_v50  ;;  %6501 = vmatmul.mubr.msk.f32.vlgmr.msra.gmra.mxu0 %vm448_vm2, %v1322_v50  ;;  %v2046_v50 = vld [vmem:[#allocation3 + $0x908] sm:$0xff] }
 0x476   : > { %v6642_v51 = vpop.eup %6641  ;;  %6509 = vmatpush3.msra.mxu0 %v6393_v30  ;;  %6510 = vmatprep.mubr.msk.f32.mxu0 %vm6837_vm0, %v6836_v0  ;;  %v2206_v30 = vld [vmem:[#allocation3 + $0xe08] sm:$0xff] }
 0x477   : > { %v6644_v52 = vpop.eup %6643  ;;  %6518 = vmatprep.subr.mxu0 %v6836_v0  ;;  %v1668_v53 = vmul.f32 %v6642_v51, %v7092_v27  ;;  %v2238_v27 = vld [vmem:[#allocation3 + $0xf08] sm:$0xff]  ;;  %v2045_v51 = vld [vmem:[#allocation3 + $0x900] sm:$0xff] }
 0x478   : > { %v1497_v55 = vmul.f32 %v6644_v52, %v7089_v25  ;;  %v2254_v25 = vld [vmem:[#allocation3 + $0xf88] sm:$0xff] }
 0x479   : > { %6396 = vst.msk [vmem:[%s7031_s11 + $0x38] sm:$0xff] %vm448_vm2, %v1668_v53  ;;  %v2510_v52 = vld [vmem:[#allocation3 + $0x1788] sm:$0xff] }
 0x47a   : > { %6390 = vst.msk [vmem:[%s7031_s11 + $0x30] sm:$0xff] %vm448_vm2, %v1497_v55  ;;  %6511 = vmatmul.mubr.msk.f32.vlgmr.msra.gmra.mxu0 %vm448_vm2, %v1497_v55  ;;  %v2029_v55 = vld [vmem:[#allocation3 + $0x880] sm:$0xff] }
 0x47b   : > { %6519 = vmatpush3.msra.mxu0 %v1673_v54  ;;  %6520 = vmatprep.mubr.msk.f32.mxu0 %vm6837_vm0, %v6836_v0  ;;  %v1918_v0 = vld [vmem:[#allocation3 + $0x508] sm:$0xff]  ;;  %v2509_v54 = vld [vmem:[#allocation3 + $0x1780] sm:$0xff] }
 0x47c   : > { %2791 = vmatprep.subr.mxu1 %v1918_v0  ;;  %2852 = vmatprep.subr.mxu0 %v2510_v52  ;;  %v2621_v52 = vld [vmem:[#allocation3 + $0x1b00] sm:$0xff] }
 0x47d   : > { %2792 = vmatpush1.msra.mxu1 %v1917_v3  ;;  %v2462_v3 = vld [vmem:[#allocation3 + $0x1608] sm:$0xff] }
 0x47e   : > { %6521 = vmatmul.mubr.msk.f32.vlgmr.msra.gmra.mxu0 %vm448_vm2, %v1668_v53  ;;  %2793 = vmatprep.subr.mxu1 %v1902_v4  ;;  %v2030_v53 = vld [vmem:[#allocation3 + $0x888] sm:$0xff]  ;;  %v2461_v4 = vld [vmem:[#allocation3 + $0x1600] sm:$0xff] }
 0x47f   : > { %2794 = vmatpush1.msra.mxu1 %v1901_v5  ;;  %2853 = vmatpush1.msra.mxu0 %v2509_v54  ;;  %v2605_v54 = vld [vmem:[#allocation3 + $0x1a80] sm:$0xff] }
 0x480   : > { %2795 = vmatprep.subr.mxu1 %v1886_v6  ;;  %2854 = vmatprep.subr.mxu0 %v2494_v56  ;;  %v2446_v6 = vld [vmem:[#allocation3 + $0x1588] sm:$0xff]  ;;  %v2589_v56 = vld [vmem:[#allocation3 + $0x1a00] sm:$0xff] }
 0x481   : > { %2796 = vmatpush1.msra.mxu1 %v1885_v7  ;;  %2855 = vmatpush1.msra.mxu0 %v2493_v57  ;;  %v2445_v7 = vld [vmem:[#allocation3 + $0x1580] sm:$0xff]  ;;  %v2574_v57 = vld [vmem:[#allocation3 + $0x1988] sm:$0xff] }
 0x482   : > { %2797 = vmatprep.subr.mxu1 %v1870_v8  ;;  %2856 = vmatprep.subr.mxu0 %v2478_v63  ;;  %v2541_v63 = vld [vmem:[#allocation3 + $0x1880] sm:$0xff] }
 0x483   : > { %2798 = vmatpush1.msra.mxu1 %v1869_v9  ;;  %2857 = vmatpush1.msra.mxu0 %v2477_v2  ;;  %v2430_v9 = vld [vmem:[#allocation3 + $0x1508] sm:$0xff] }
 0x484   : > { %2799 = vmatprep.subr.mxu1 %v1854_v10  ;;  %2858 = vmatprep.subr.mxu0 %v2462_v3  ;;  %v2429_v10 = vld [vmem:[#allocation3 + $0x1500] sm:$0xff]  ;;  %v2526_v2 = vld [vmem:[#allocation3 + $0x1808] sm:$0xff]  ;;  %v2512_v3 = vld [vmem:[#allocation3 + $0x1798] sm:$0xff] }
 0x485   : > { %2800 = vmatpush1.msra.mxu1 %v1853_v11  ;;  %2859 = vmatpush1.msra.mxu0 %v2461_v4 }
 0x486   : > { %2801 = vmatprep.subr.mxu1 %v1838_v12  ;;  %2860 = vmatprep.subr.mxu0 %v2446_v6  ;;  %v2414_v12 = vld [vmem:[#allocation3 + $0x1488] sm:$0xff] }
 0x487   : > { %2802 = vmatpush1.msra.mxu1 %v1837_v13  ;;  %2861 = vmatpush1.msra.mxu0 %v2445_v7  ;;  %v2413_v13 = vld [vmem:[#allocation3 + $0x1480] sm:$0xff] }
 0x488   : > { %2803 = vmatprep.subr.mxu1 %v1822_v14  ;;  %2862 = vmatprep.subr.mxu0 %v2430_v9 }
 0x489   : > { %2804 = vmatpush1.msra.mxu1 %v1821_v15  ;;  %2863 = vmatpush1.msra.mxu0 %v2429_v10  ;;  %v2398_v15 = vld [vmem:[#allocation3 + $0x1408] sm:$0xff] }
 0x48a   : > { %2805 = vmatprep.subr.mxu1 %v1806_v16  ;;  %2864 = vmatprep.subr.mxu0 %v2414_v12  ;;  %v2397_v16 = vld [vmem:[#allocation3 + $0x1400] sm:$0xff] }
 0x48b   : > { %2806 = vmatpush1.msra.mxu1 %v1805_v17  ;;  %2865 = vmatpush1.msra.mxu0 %v2413_v13  ;;  %v2382_v17 = vld [vmem:[#allocation3 + $0x1388] sm:$0xff]  ;;  %v1984_v13 = vld [vmem:[#allocation3 + $0x718] sm:$0xff] }
 0x48c   : > { %2807 = vmatprep.subr.mxu1 %v1790_v18  ;;  %2866 = vmatprep.subr.mxu0 %v2398_v15  ;;  %v2381_v18 = vld [vmem:[#allocation3 + $0x1380] sm:$0xff]  ;;  %v1968_v15 = vld [vmem:[#allocation3 + $0x698] sm:$0xff] }
 0x48d   : > { %2808 = vmatpush1.msra.mxu1 %v1789_v19  ;;  %2867 = vmatpush1.msra.mxu0 %v2397_v16  ;;  %v2366_v19 = vld [vmem:[#allocation3 + $0x1308] sm:$0xff]  ;;  %v1967_v16 = vld [vmem:[#allocation3 + $0x690] sm:$0xff] }
 0x48e   : > { %2809 = vmatprep.subr.mxu1 %v1774_v21  ;;  %2868 = vmatprep.subr.mxu0 %v2382_v17  ;;  %v2365_v21 = vld [vmem:[#allocation3 + $0x1300] sm:$0xff]  ;;  %v1952_v17 = vld [vmem:[#allocation3 + $0x618] sm:$0xff] }
 0x48f   : > { %2810 = vmatpush1.msra.mxu1 %v1773_v22  ;;  %2869 = vmatpush1.msra.mxu0 %v2381_v18  ;;  %v2350_v22 = vld [vmem:[#allocation3 + $0x1288] sm:$0xff]  ;;  %v1951_v18 = vld [vmem:[#allocation3 + $0x610] sm:$0xff] }
 0x490   : > { %2811 = vmatprep.subr.mxu1 %v1758_v23  ;;  %2870 = vmatprep.subr.mxu0 %v2366_v19  ;;  %v2349_v23 = vld [vmem:[#allocation3 + $0x1280] sm:$0xff]  ;;  %v1936_v19 = vld [vmem:[#allocation3 + $0x598] sm:$0xff] }
 0x491   : > { %2812 = vmatpush1.msra.mxu1 %v1757_v24  ;;  %2871 = vmatpush1.msra.mxu0 %v2365_v21  ;;  %v2334_v24 = vld [vmem:[#allocation3 + $0x1208] sm:$0xff]  ;;  %v1935_v21 = vld [vmem:[#allocation3 + $0x590] sm:$0xff] }
 0x492   : > { %2813 = vmatprep.subr.mxu1 %v2254_v25  ;;  %2872 = vmatprep.subr.mxu0 %v2350_v22  ;;  %v2333_v25 = vld [vmem:[#allocation3 + $0x1200] sm:$0xff]  ;;  %v1920_v22 = vld [vmem:[#allocation3 + $0x518] sm:$0xff] }
 0x493   : > { %2814 = vmatpush2.msra.mxu1 %v2253_v26  ;;  %2873 = vmatpush1.msra.mxu0 %v2349_v23  ;;  %v2318_v26 = vld [vmem:[#allocation3 + $0x1188] sm:$0xff]  ;;  %v1919_v23 = vld [vmem:[#allocation3 + $0x510] sm:$0xff] }
 0x494   : > { %2815 = vmatprep.subr.mxu1 %v2238_v27  ;;  %2874 = vmatprep.subr.mxu0 %v2334_v24  ;;  %v2317_v27 = vld [vmem:[#allocation3 + $0x1180] sm:$0xff]  ;;  %v1904_v24 = vld [vmem:[#allocation3 + $0x498] sm:$0xff] }
 0x495   : > { %2816 = vmatpush2.msra.mxu1 %v2237_v20  ;;  %2875 = vmatpush1.msra.mxu0 %v2333_v25  ;;  %v2302_v20 = vld [vmem:[#allocation3 + $0x1108] sm:$0xff]  ;;  %v1903_v25 = vld [vmem:[#allocation3 + $0x490] sm:$0xff] }
 0x496   : > { %2817 = vmatprep.subr.mxu1 %v2222_v28  ;;  %2876 = vmatprep.subr.mxu0 %v2318_v26  ;;  %v2301_v28 = vld [vmem:[#allocation3 + $0x1100] sm:$0xff]  ;;  %v1888_v26 = vld [vmem:[#allocation3 + $0x418] sm:$0xff] }
 0x497   : > { %2818 = vmatpush2.msra.mxu1 %v2221_v29  ;;  %2877 = vmatpush1.msra.mxu0 %v2317_v27  ;;  %v2286_v29 = vld [vmem:[#allocation3 + $0x1088] sm:$0xff]  ;;  %v1887_v27 = vld [vmem:[#allocation3 + $0x410] sm:$0xff] }
 0x498   : > { %2819 = vmatprep.subr.mxu1 %v2206_v30  ;;  %2878 = vmatprep.subr.mxu0 %v2302_v20  ;;  %v2285_v30 = vld [vmem:[#allocation3 + $0x1080] sm:$0xff]  ;;  %v1872_v20 = vld [vmem:[#allocation3 + $0x398] sm:$0xff] }
 0x499   : > { %2820 = vmatpush2.msra.mxu1 %v2205_v31  ;;  %2879 = vmatpush1.msra.mxu0 %v2301_v28  ;;  %v2270_v31 = vld [vmem:[#allocation3 + $0x1008] sm:$0xff]  ;;  %v1871_v28 = vld [vmem:[#allocation3 + $0x390] sm:$0xff] }
 0x49a   : > { %2821 = vmatprep.subr.mxu1 %v2190_v32  ;;  %2880 = vmatprep.subr.mxu0 %v2286_v29  ;;  %v2269_v32 = vld [vmem:[#allocation3 + $0x1000] sm:$0xff]  ;;  %v1856_v29 = vld [vmem:[#allocation3 + $0x318] sm:$0xff] }
 0x49b   : > { %2822 = vmatpush2.msra.mxu1 %v2189_v33  ;;  %2881 = vmatpush1.msra.mxu0 %v2285_v30  ;;  %v2766_v33 = vld [vmem:[#allocation3 + $0x1f88] sm:$0xff]  ;;  %v1855_v30 = vld [vmem:[#allocation3 + $0x310] sm:$0xff] }
 0x49c   : > { %2823 = vmatprep.subr.mxu1 %v2174_v34  ;;  %2882 = vmatprep.subr.mxu0 %v2270_v31  ;;  %v2765_v34 = vld [vmem:[#allocation3 + $0x1f80] sm:$0xff]  ;;  %v1840_v31 = vld [vmem:[#allocation3 + $0x298] sm:$0xff] }
 0x49d   : > { %2824 = vmatpush2.msra.mxu1 %v2173_v35  ;;  %2883 = vmatpush1.msra.mxu0 %v2269_v32  ;;  %v2750_v35 = vld [vmem:[#allocation3 + $0x1f08] sm:$0xff]  ;;  %v1839_v32 = vld [vmem:[#allocation3 + $0x290] sm:$0xff] }
 0x49e   : > { %2825 = vmatprep.subr.mxu1 %v2158_v36  ;;  %2884 = vmatprep.subr.mxu0 %v2766_v33  ;;  %v2749_v36 = vld [vmem:[#allocation3 + $0x1f00] sm:$0xff]  ;;  %v1824_v33 = vld [vmem:[#allocation3 + $0x218] sm:$0xff] }
 0x49f   : > { %2826 = vmatpush2.msra.mxu1 %v2157_v37  ;;  %2885 = vmatpush2.msra.mxu0 %v2765_v34  ;;  %v2734_v37 = vld [vmem:[#allocation3 + $0x1e88] sm:$0xff]  ;;  %v1823_v34 = vld [vmem:[#allocation3 + $0x210] sm:$0xff] }
 0x4a0   : > { %2827 = vmatprep.subr.mxu1 %v2142_v38  ;;  %2886 = vmatprep.subr.mxu0 %v2750_v35  ;;  %v2733_v38 = vld [vmem:[#allocation3 + $0x1e80] sm:$0xff]  ;;  %v1808_v35 = vld [vmem:[#allocation3 + $0x198] sm:$0xff] }
 0x4a1   : > { %2828 = vmatpush2.msra.mxu1 %v2141_v39  ;;  %2887 = vmatpush2.msra.mxu0 %v2749_v36  ;;  %v2718_v39 = vld [vmem:[#allocation3 + $0x1e08] sm:$0xff]  ;;  %v1807_v36 = vld [vmem:[#allocation3 + $0x190] sm:$0xff] }
 0x4a2   : > { %2829 = vmatprep.subr.mxu1 %v2126_v40  ;;  %2888 = vmatprep.subr.mxu0 %v2734_v37  ;;  %v2717_v40 = vld [vmem:[#allocation3 + $0x1e00] sm:$0xff]  ;;  %v1792_v37 = vld [vmem:[#allocation3 + $0x118] sm:$0xff] }
 0x4a3   : > { %2830 = vmatpush2.msra.mxu1 %v2125_v41  ;;  %2889 = vmatpush2.msra.mxu0 %v2733_v38  ;;  %v2702_v41 = vld [vmem:[#allocation3 + $0x1d88] sm:$0xff]  ;;  %v1791_v38 = vld [vmem:[#allocation3 + $0x110] sm:$0xff] }
 0x4a4   : > { %2831 = vmatprep.subr.mxu1 %v2110_v42  ;;  %2890 = vmatprep.subr.mxu0 %v2718_v39  ;;  %v2701_v42 = vld [vmem:[#allocation3 + $0x1d80] sm:$0xff]  ;;  %v1776_v39 = vld [vmem:[#allocation3 + $0x98] sm:$0xff] }
 0x4a5   : > { %2832 = vmatpush2.msra.mxu1 %v2109_v43  ;;  %2891 = vmatpush2.msra.mxu0 %v2717_v40  ;;  %v2686_v43 = vld [vmem:[#allocation3 + $0x1d08] sm:$0xff]  ;;  %v1775_v40 = vld [vmem:[#allocation3 + $0x90] sm:$0xff] }
 0x4a6   : > { %2833 = vmatprep.subr.mxu1 %v2094_v44  ;;  %2892 = vmatprep.subr.mxu0 %v2702_v41  ;;  %v2685_v44 = vld [vmem:[#allocation3 + $0x1d00] sm:$0xff]  ;;  %v1760_v41 = vld [vmem:[#allocation3 + $0x18] sm:$0xff] }
 0x4a7   : > { %2834 = vmatpush2.msra.mxu1 %v2093_v45  ;;  %2893 = vmatpush2.msra.mxu0 %v2701_v42  ;;  %v2670_v45 = vld [vmem:[#allocation3 + $0x1c88] sm:$0xff]  ;;  %v1759_v42 = vld [vmem:[#allocation3 + $0x10] sm:$0xff] }
 0x4a8   : > { %2835 = vmatprep.subr.mxu1 %v2078_v46  ;;  %2894 = vmatprep.subr.mxu0 %v2686_v43  ;;  %v2669_v46 = vld [vmem:[#allocation3 + $0x1c80] sm:$0xff]  ;;  %v2256_v43 = vld [vmem:[#allocation3 + $0xf98] sm:$0xff] }
 0x4a9   : > { %2836 = vmatpush2.msra.mxu1 %v2077_v47  ;;  %2895 = vmatpush2.msra.mxu0 %v2685_v44  ;;  %v2654_v47 = vld [vmem:[#allocation3 + $0x1c08] sm:$0xff]  ;;  %v2255_v44 = vld [vmem:[#allocation3 + $0xf90] sm:$0xff] }
 0x4aa   : > { %2837 = vmatprep.subr.mxu1 %v2062_v48  ;;  %2896 = vmatprep.subr.mxu0 %v2670_v45  ;;  %v2653_v48 = vld [vmem:[#allocation3 + $0x1c00] sm:$0xff]  ;;  %v2240_v45 = vld [vmem:[#allocation3 + $0xf18] sm:$0xff] }
 0x4ab   : > { %2838 = vmatpush2.msra.mxu1 %v2061_v49  ;;  %2897 = vmatpush2.msra.mxu0 %v2669_v46  ;;  %v2638_v49 = vld [vmem:[#allocation3 + $0x1b88] sm:$0xff]  ;;  %v2239_v46 = vld [vmem:[#allocation3 + $0xf10] sm:$0xff] }
 0x4ac   : > { %2839 = vmatprep.subr.mxu1 %v2046_v50  ;;  %2898 = vmatprep.subr.mxu0 %v2654_v47  ;;  %v2637_v50 = vld [vmem:[#allocation3 + $0x1b80] sm:$0xff]  ;;  %v2224_v47 = vld [vmem:[#allocation3 + $0xe98] sm:$0xff] }
 0x4ad   : > { %2840 = vmatpush2.msra.mxu1 %v2045_v51  ;;  %2899 = vmatpush2.msra.mxu0 %v2653_v48  ;;  %v2622_v51 = vld [vmem:[#allocation3 + $0x1b08] sm:$0xff]  ;;  %v2223_v48 = vld [vmem:[#allocation3 + $0xe90] sm:$0xff] }
 0x4ae   : > { %2841 = vmatprep.subr.mxu1 %v2030_v53  ;;  %2900 = vmatprep.subr.mxu0 %v2638_v49  ;;  %v2606_v53 = vld [vmem:[#allocation3 + $0x1a88] sm:$0xff]  ;;  %v2208_v49 = vld [vmem:[#allocation3 + $0xe18] sm:$0xff] }
 0x4af   : > { %2842 = vmatpush2.msra.mxu1 %v2029_v55  ;;  %2901 = vmatpush2.msra.mxu0 %v2637_v50  ;;  %v2590_v55 = vld [vmem:[#allocation3 + $0x1a08] sm:$0xff]  ;;  %v2207_v50 = vld [vmem:[#allocation3 + $0xe10] sm:$0xff] }
 0x4b0   : > { %2843 = vmatprep.subr.mxu1 %v2014_v59  ;;  %2902 = vmatprep.subr.mxu0 %v2622_v51  ;;  %v2558_v59 = vld [vmem:[#allocation3 + $0x1908] sm:$0xff]  ;;  %v2192_v51 = vld [vmem:[#allocation3 + $0xd98] sm:$0xff] }
 0x4b1   : > { %2844 = vmatpush2.msra.mxu1 %v2013_v60  ;;  %2903 = vmatpush2.msra.mxu0 %v2621_v52  ;;  %v2557_v60 = vld [vmem:[#allocation3 + $0x1900] sm:$0xff]  ;;  %v2191_v52 = vld [vmem:[#allocation3 + $0xd90] sm:$0xff] }
 0x4b2   : > { %2923 = vmatprep.subr.mxu1 %v2000_v1  ;;  %2904 = vmatprep.subr.mxu0 %v2606_v53  ;;  %v2176_v53 = vld [vmem:[#allocation3 + $0xd18] sm:$0xff] }
 0x4b3   : > { %2905 = vmatpush2.msra.mxu0 %v2605_v54  ;;  %v2175_v54 = vld [vmem:[#allocation3 + $0xd10] sm:$0xff] }
 0x4b4   : > { %2906 = vmatprep.subr.mxu0 %v2590_v55  ;;  %v2160_v55 = vld [vmem:[#allocation3 + $0xc98] sm:$0xff] }
 0x4b5   : > { %2907 = vmatpush2.msra.mxu0 %v2589_v56 }
 0x4b6   : > { %2908 = vmatprep.subr.mxu0 %v2574_v57  ;;  %v2159_v57 = vld [vmem:[#allocation3 + $0xc90] sm:$0xff] }
 0x4f9   : > { %v705_v58 = vpop.f32.mrf.mxu0 }
 0x4fa   : > { %710 = vrot.lane.b32.xlu0 %v705_v58, %s6838_s28  ;;  %v2573_v58 = vld [vmem:[#allocation3 + $0x1980] sm:$0xff] }
 0x4fb   : > { %v6462_v61 = vpop.f32.mrf.mxu0  ;;  %2909 = vmatpush2.msra.mxu0 %v2573_v58  ;;  %v2144_v58 = vld [vmem:[#allocation3 + $0xc18] sm:$0xff] }
 0x4fc   : > { %2910 = vmatprep.subr.mxu0 %v2558_v59  ;;  %v2143_v59 = vld [vmem:[#allocation3 + $0xc10] sm:$0xff] }
 0x4fd   : > { %v877_v62 = vpop.f32.mrf.mxu0  ;;  %2911 = vmatpush2.msra.mxu0 %v2557_v60  ;;  %v2128_v60 = vld [vmem:[#allocation3 + $0xb98] sm:$0xff] }
 0x4fe   : > { %881 = vst.msk [vmem:[#allocation2 + $0x8] sm:$0xff] %vm371_vm1, %v877_v62  ;;  %v2542_v62 = vld [vmem:[#allocation3 + $0x1888] sm:$0xff] }
 0x4ff   : > { %v6472_v0 = vpop.f32.mrf.mxu0  ;;  %2912 = vmatprep.subr.mxu0 %v2542_v62  ;;  %v2112_v62 = vld [vmem:[#allocation3 + $0xb18] sm:$0xff] }
 0x500   : > { %2913 = vmatpush2.msra.mxu0 %v2541_v63  ;;  %v2525_v0 = vld [vmem:[#allocation3 + $0x1800] sm:$0xff]  ;;  %v2111_v63 = vld [vmem:[#allocation3 + $0xb10] sm:$0xff] }
 0x501   : > { %v1052_v5 = vpop.f32.mrf.mxu0  ;;  %2914 = vmatprep.subr.mxu0 %v2526_v2  ;;  %v2095_v2 = vld [vmem:[#allocation3 + $0xa90] sm:$0xff] }
 0x502   : > { %1057 = vrot.lane.b32.xlu1 %v1052_v5, %s6838_s28  ;;  %2915 = vmatpush2.msra.mxu0 %v2525_v0 }
 0x503   : > { %v6482_v8 = vpop.f32.mrf.mxu0  ;;  %2994 = vmatprep.subr.mxu0 %v2512_v3  ;;  %v2080_v3 = vld [vmem:[#allocation3 + $0xa18] sm:$0xff] }
 0x505   : > { %v1223_v11 = vpop.f32.mrf.mxu0 }
 0x506   : > { %1227 = vst.msk [vmem:[#allocation2 + $0x10] sm:$0xff] %vm371_vm1, %v1223_v11  ;;  %v1999_v11 = vld [vmem:[#allocation3 + $0x790] sm:$0xff] }
 0x507   : > { %v6492_v14 = vpop.f32.mrf.mxu0 }
 0x508   : > { %v1983_v14 = vld [vmem:[#allocation3 + $0x710] sm:$0xff] }
 0x535   : > { %v1398_v61 = vpop.f32.mrf.mxu0 }
 0x536   : > { %1403 = vrot.lane.b32.xlu0 %v1398_v61, %s6838_s28  ;;  %v2127_v61 = vld [vmem:[#allocation3 + $0xb90] sm:$0xff] }
 0x537   : > { %v6502_v1 = vpop.f32.mrf.mxu0 }
 0x538   : > { %v2096_v1 = vld [vmem:[#allocation3 + $0xa98] sm:$0xff] }
 0x53a   : > { %v1569_v4 = vpop.f32.mrf.mxu0 }
 0x53b   : > { %1573 = vst.msk [vmem:[#allocation2 + $0x18] sm:$0xff] %vm371_vm1, %v1569_v4  ;;  %v2079_v4 = vld [vmem:[#allocation3 + $0xa10] sm:$0xff] }
 0x53c   : > { %v6512_v5 = vpop.f32.mrf.mxu0 }
 0x53d   : > { %v2064_v5 = vld [vmem:[#allocation3 + $0x998] sm:$0xff] }
 0x53e   : > { %v1744_v6 = vpop.f32.mrf.mxu0 }
 0x53f   : > { %1749 = vrot.lane.b32.xlu1 %v1744_v6, %s6838_s28  ;;  %v2063_v6 = vld [vmem:[#allocation3 + $0x990] sm:$0xff]  ;;  %s6839_s28 = smov [#allocation9]  }
 0x540   : > { %v6522_v7 = vpop.f32.mrf.mxu0  ;;  %s6718_s30 = sshll.u32 %s6839_s28, 4  ;;  %s6719_s30 = int_to_ptr.vmem [resolvable:$false] %s6718_s30 }
 0x541   : > { %v2048_v7 = vld [vmem:[#allocation3 + $0x918] sm:$0xff]  ;;  %s6720_s8 = scalar_lea.vmem %s6719_s30, 2048  ;;  %p6721_p0 = scmp.lt.s32.totalorder %s7366_s19, %s6719_s30 }
 0x542   : > { %p6722_p6 = scmp.lt.s32.totalorder %s6720_s8, %s6714_s27 }
 0x544   : > { %p6723_p7 = por %p6722_p6, %p6721_p0 }
 0x546   : > { %p6724_p9 = pnand %p6723_p7, %p6717_p13 }
 0x56c   : > { %v711_v8 = vpop.permute.xlu0 %710 }
 0x56d   : > { %714 = vst.msk [vmem:[#allocation2] sm:$0xff] %vm713_vm3, %v711_v8  ;;  %v2047_v8 = vld [vmem:[#allocation3 + $0x910] sm:$0xff] }
 0x574   : > { %v1058_v9 = vpop.permute.xlu1 %1057  ;;  %v7156_v12 = vld [vmem:[#allocation2] sm:$0xff] }
 0x575   : > { %1060 = vst.msk [vmem:[#allocation2 + $0x8] sm:$0xff] %vm713_vm3, %v1058_v9  ;;  %v2032_v9 = vld [vmem:[#allocation3 + $0x898] sm:$0xff] }
 0x57c   : > { %v7153_v10 = vld [vmem:[#allocation2 + $0x8] sm:$0xff] }
 0x57d   : > { %2845 = vmatprep.mubr.f32.mxu1 %v7153_v10 }
 0x57e   : > { %2846 = vmatmul.mubr.f32.vlgmr.msra.gmra.mxu1 %v7156_v12 }
 0x57f   : > { %2924 = vmatpush1.msra.mxu1 %v1999_v11  ;;  %2987 = vmatprep.mubr.f32.mxu1 %v7153_v10  ;;  %v2031_v11 = vld [vmem:[#allocation3 + $0x890] sm:$0xff] }
 0x580   : > { %2925 = vmatprep.subr.mxu1 %v1984_v13 }
 0x581   : > { %2926 = vmatpush1.msra.mxu1 %v1983_v14  ;;  %v2511_v14 = vld [vmem:[#allocation3 + $0x1790] sm:$0xff] }
 0x582   : > { %2927 = vmatprep.subr.mxu1 %v1968_v15  ;;  %v2016_v15 = vld [vmem:[#allocation3 + $0x818] sm:$0xff] }
 0x583   : > { %2928 = vmatpush1.msra.mxu1 %v1967_v16 }
 0x584   : > { %2929 = vmatprep.subr.mxu1 %v1952_v17  ;;  %v2496_v17 = vld [vmem:[#allocation3 + $0x1718] sm:$0xff] }
 0x585   : > { %2930 = vmatpush1.msra.mxu1 %v1951_v18  ;;  %v2015_v18 = vld [vmem:[#allocation3 + $0x810] sm:$0xff] }
 0x586   : > { %2931 = vmatprep.subr.mxu1 %v1936_v19  ;;  %v2495_v19 = vld [vmem:[#allocation3 + $0x1710] sm:$0xff] }
 0x587   : > { %2932 = vmatpush1.msra.mxu1 %v1935_v21  ;;  %v2480_v21 = vld [vmem:[#allocation3 + $0x1698] sm:$0xff] }
 0x588   : > { %2933 = vmatprep.subr.mxu1 %v1920_v22  ;;  %v2002_v22 = vld [vmem:[#allocation3 + $0x7a8] sm:$0xff] }
 0x589   : > { %2934 = vmatpush1.msra.mxu1 %v1919_v23  ;;  %v2479_v23 = vld [vmem:[#allocation3 + $0x1690] sm:$0xff] }
 0x58a   : > { %2935 = vmatprep.subr.mxu1 %v1904_v24  ;;  %v2001_v24 = vld [vmem:[#allocation3 + $0x7a0] sm:$0xff] }
 0x58b   : > { %2936 = vmatpush1.msra.mxu1 %v1903_v25  ;;  %v2464_v25 = vld [vmem:[#allocation3 + $0x1618] sm:$0xff] }
 0x58c   : > { %2937 = vmatprep.subr.mxu1 %v1888_v26  ;;  %v1986_v26 = vld [vmem:[#allocation3 + $0x728] sm:$0xff] }
 0x58d   : > { %2938 = vmatpush1.msra.mxu1 %v1887_v27  ;;  %v2463_v27 = vld [vmem:[#allocation3 + $0x1610] sm:$0xff] }
 0x58e   : > { %2939 = vmatprep.subr.mxu1 %v1872_v20  ;;  %v1985_v20 = vld [vmem:[#allocation3 + $0x720] sm:$0xff] }
 0x58f   : > { %2940 = vmatpush1.msra.mxu1 %v1871_v28  ;;  %v2448_v28 = vld [vmem:[#allocation3 + $0x1598] sm:$0xff] }
 0x590   : > { %2941 = vmatprep.subr.mxu1 %v1856_v29  ;;  %v1970_v29 = vld [vmem:[#allocation3 + $0x6a8] sm:$0xff] }
 0x591   : > { %2942 = vmatpush1.msra.mxu1 %v1855_v30  ;;  %v2447_v30 = vld [vmem:[#allocation3 + $0x1590] sm:$0xff] }
 0x592   : > { %2943 = vmatprep.subr.mxu1 %v1840_v31  ;;  %v1969_v31 = vld [vmem:[#allocation3 + $0x6a0] sm:$0xff] }
 0x593   : > { %2944 = vmatpush1.msra.mxu1 %v1839_v32  ;;  %v2432_v32 = vld [vmem:[#allocation3 + $0x1518] sm:$0xff] }
 0x594   : > { %2945 = vmatprep.subr.mxu1 %v1824_v33  ;;  %v1954_v33 = vld [vmem:[#allocation3 + $0x628] sm:$0xff] }
 0x595   : > { %2946 = vmatpush1.msra.mxu1 %v1823_v34  ;;  %v2431_v34 = vld [vmem:[#allocation3 + $0x1510] sm:$0xff] }
 0x596   : > { %2947 = vmatprep.subr.mxu1 %v1808_v35  ;;  %v1953_v35 = vld [vmem:[#allocation3 + $0x620] sm:$0xff] }
 0x597   : > { %2948 = vmatpush1.msra.mxu1 %v1807_v36  ;;  %v2416_v36 = vld [vmem:[#allocation3 + $0x1498] sm:$0xff] }
 0x598   : > { %2949 = vmatprep.subr.mxu1 %v1792_v37  ;;  %v1938_v37 = vld [vmem:[#allocation3 + $0x5a8] sm:$0xff] }
 0x599   : > { %2950 = vmatpush1.msra.mxu1 %v1791_v38  ;;  %v2415_v38 = vld [vmem:[#allocation3 + $0x1490] sm:$0xff] }
 0x59a   : > { %2951 = vmatprep.subr.mxu1 %v1776_v39  ;;  %v1937_v39 = vld [vmem:[#allocation3 + $0x5a0] sm:$0xff] }
 0x59b   : > { %2952 = vmatpush1.msra.mxu1 %v1775_v40  ;;  %v2400_v40 = vld [vmem:[#allocation3 + $0x1418] sm:$0xff] }
 0x59c   : > { %2953 = vmatprep.subr.mxu1 %v1760_v41  ;;  %v1922_v41 = vld [vmem:[#allocation3 + $0x528] sm:$0xff] }
 0x59d   : > { %2954 = vmatpush1.msra.mxu1 %v1759_v42  ;;  %v2399_v42 = vld [vmem:[#allocation3 + $0x1410] sm:$0xff] }
 0x59e   : > { %2955 = vmatprep.subr.mxu1 %v2256_v43  ;;  %v1921_v43 = vld [vmem:[#allocation3 + $0x520] sm:$0xff] }
 0x59f   : > { %2956 = vmatpush2.msra.mxu1 %v2255_v44  ;;  %v2384_v44 = vld [vmem:[#allocation3 + $0x1398] sm:$0xff] }
 0x5a0   : > { %2957 = vmatprep.subr.mxu1 %v2240_v45  ;;  %v1906_v45 = vld [vmem:[#allocation3 + $0x4a8] sm:$0xff] }
 0x5a1   : > { %2958 = vmatpush2.msra.mxu1 %v2239_v46  ;;  %v2383_v46 = vld [vmem:[#allocation3 + $0x1390] sm:$0xff] }
 0x5a2   : > { %2959 = vmatprep.subr.mxu1 %v2224_v47  ;;  %v1905_v47 = vld [vmem:[#allocation3 + $0x4a0] sm:$0xff] }
 0x5a3   : > { %2960 = vmatpush2.msra.mxu1 %v2223_v48  ;;  %v2368_v48 = vld [vmem:[#allocation3 + $0x1318] sm:$0xff] }
 0x5a4   : > { %2961 = vmatprep.subr.mxu1 %v2208_v49  ;;  %v1890_v49 = vld [vmem:[#allocation3 + $0x428] sm:$0xff] }
 0x5a5   : > { %2962 = vmatpush2.msra.mxu1 %v2207_v50  ;;  %v2367_v50 = vld [vmem:[#allocation3 + $0x1310] sm:$0xff] }
 0x5a6   : > { %2963 = vmatprep.subr.mxu1 %v2192_v51  ;;  %v1889_v51 = vld [vmem:[#allocation3 + $0x420] sm:$0xff] }
 0x5a7   : > { %2964 = vmatpush2.msra.mxu1 %v2191_v52  ;;  %v2352_v52 = vld [vmem:[#allocation3 + $0x1298] sm:$0xff] }
 0x5a8   : > { %2965 = vmatprep.subr.mxu1 %v2176_v53  ;;  %v1404_v56 = vpop.permute.xlu0 %1403  ;;  %v1874_v53 = vld [vmem:[#allocation3 + $0x3a8] sm:$0xff] }
 0x5a9   : > { %2966 = vmatpush2.msra.mxu1 %v2175_v54  ;;  %1406 = vst.msk [vmem:[#allocation2 + $0x10] sm:$0xff] %vm713_vm3, %v1404_v56  ;;  %v2351_v54 = vld [vmem:[#allocation3 + $0x1290] sm:$0xff]  ;;  %v2336_v56 = vld [vmem:[#allocation3 + $0x1218] sm:$0xff] }
 0x5aa   : > { %2967 = vmatprep.subr.mxu1 %v2160_v55  ;;  %v1873_v55 = vld [vmem:[#allocation3 + $0x3a0] sm:$0xff] }
 0x5ab   : > { %2968 = vmatpush2.msra.mxu1 %v2159_v57  ;;  %v1858_v57 = vld [vmem:[#allocation3 + $0x328] sm:$0xff] }
 0x5ac   : > { %2969 = vmatprep.subr.mxu1 %v2144_v58  ;;  %v2335_v58 = vld [vmem:[#allocation3 + $0x1210] sm:$0xff] }
 0x5ad   : > { %2970 = vmatpush2.msra.mxu1 %v2143_v59  ;;  %v1857_v59 = vld [vmem:[#allocation3 + $0x320] sm:$0xff] }
 0x5ae   : > { %2971 = vmatprep.subr.mxu1 %v2128_v60  ;;  %v2320_v60 = vld [vmem:[#allocation3 + $0x1198] sm:$0xff] }
 0x5af   : > { %2972 = vmatpush2.msra.mxu1 %v2127_v61  ;;  %v1842_v61 = vld [vmem:[#allocation3 + $0x2a8] sm:$0xff] }
 0x5b0   : > { %2973 = vmatprep.subr.mxu1 %v2112_v62  ;;  %v7165_v16 = vld [vmem:[#allocation2 + $0x10] sm:$0xff] }
 0x5b1   : > { %2974 = vmatpush2.msra.mxu1 %v2111_v63  ;;  %v1750_v0 = vpop.permute.xlu1 %1749  ;;  %v2319_v62 = vld [vmem:[#allocation3 + $0x1190] sm:$0xff]  ;;  %v1841_v63 = vld [vmem:[#allocation3 + $0x2a0] sm:$0xff] }
 0x5b2   : > { %1752 = vst.msk [vmem:[#allocation2 + $0x18] sm:$0xff] %vm713_vm3, %v1750_v0  ;;  %2975 = vmatprep.subr.mxu1 %v2096_v1  ;;  %v2304_v1 = vld [vmem:[#allocation3 + $0x1118] sm:$0xff]  ;;  %v2303_v0 = vld [vmem:[#allocation3 + $0x1110] sm:$0xff] }
 0x5b3   : > { %2976 = vmatpush2.msra.mxu1 %v2095_v2  ;;  %v1826_v2 = vld [vmem:[#allocation3 + $0x228] sm:$0xff] }
 0x5b4   : > { %2977 = vmatprep.subr.mxu1 %v2080_v3  ;;  %v1825_v3 = vld [vmem:[#allocation3 + $0x220] sm:$0xff] }
 0x5b5   : > { %2978 = vmatpush2.msra.mxu1 %v2079_v4  ;;  %v2288_v4 = vld [vmem:[#allocation3 + $0x1098] sm:$0xff] }
 0x5b6   : > { %2979 = vmatprep.subr.mxu1 %v2064_v5  ;;  %v1810_v5 = vld [vmem:[#allocation3 + $0x1a8] sm:$0xff] }
 0x5b7   : > { %2980 = vmatpush2.msra.mxu1 %v2063_v6  ;;  %v2287_v6 = vld [vmem:[#allocation3 + $0x1090] sm:$0xff] }
 0x5b8   : > { %2981 = vmatprep.subr.mxu1 %v2048_v7  ;;  %v1809_v7 = vld [vmem:[#allocation3 + $0x1a0] sm:$0xff] }
 0x5b9   : > { %2982 = vmatpush2.msra.mxu1 %v2047_v8  ;;  %v7162_v13 = vld [vmem:[#allocation2 + $0x18] sm:$0xff] }
 0x5ba   : > { %2916 = vmatprep.mubr.f32.mxu0 %v7162_v13  ;;  %2983 = vmatprep.subr.mxu1 %v2032_v9  ;;  %v2272_v8 = vld [vmem:[#allocation3 + $0x1018] sm:$0xff]  ;;  %v1794_v9 = vld [vmem:[#allocation3 + $0x128] sm:$0xff] }
 0x5bb   : > { %2917 = vmatmul.mubr.f32.vlgmr.msra.gmra.mxu0 %v7165_v16  ;;  %2984 = vmatpush2.msra.mxu1 %v2031_v11  ;;  %v2271_v11 = vld [vmem:[#allocation3 + $0x1010] sm:$0xff] }
 0x5bc   : > { %2995 = vmatpush1.msra.mxu0 %v2511_v14  ;;  %2985 = vmatprep.subr.mxu1 %v2016_v15  ;;  %v1793_v14 = vld [vmem:[#allocation3 + $0x120] sm:$0xff]  ;;  %v2768_v15 = vld [vmem:[#allocation3 + $0x1f98] sm:$0xff] }
 0x5bd   : > { %2996 = vmatprep.subr.mxu0 %v2496_v17  ;;  %3058 = vmatprep.mubr.f32.mxu0 %v7162_v13  ;;  %v1778_v17 = vld [vmem:[#allocation3 + $0xa8] sm:$0xff] }
 0x5be   : > { %2986 = vmatpush2.msra.mxu1 %v2015_v18  ;;  %2997 = vmatpush1.msra.mxu0 %v2495_v19  ;;  %v2767_v18 = vld [vmem:[#allocation3 + $0x1f90] sm:$0xff]  ;;  %v1777_v19 = vld [vmem:[#allocation3 + $0xa0] sm:$0xff] }
 0x5bf   : > { %2988 = vmatmul.mubr.f32.vlgmr.msra.gmra.mxu1 %v7156_v12  ;;  %2998 = vmatprep.subr.mxu0 %v2480_v21  ;;  %v2752_v21 = vld [vmem:[#allocation3 + $0x1f18] sm:$0xff] }
 0x5c0   : > { %3065 = vmatprep.subr.mxu1 %v2002_v22  ;;  %2999 = vmatpush1.msra.mxu0 %v2479_v23  ;;  %v1762_v22 = vld [vmem:[#allocation3 + $0x28] sm:$0xff]  ;;  %v2751_v23 = vld [vmem:[#allocation3 + $0x1f10] sm:$0xff] }
 0x5c1   : > { %3066 = vmatpush1.msra.mxu1 %v2001_v24  ;;  %3129 = vmatprep.mubr.f32.mxu1 %v7153_v10  ;;  %v1761_v24 = vld [vmem:[#allocation3 + $0x20] sm:$0xff] }
 0x5c2   : > { %3000 = vmatprep.subr.mxu0 %v2464_v25  ;;  %3067 = vmatprep.subr.mxu1 %v1986_v26  ;;  %v2736_v25 = vld [vmem:[#allocation3 + $0x1e98] sm:$0xff]  ;;  %v2258_v26 = vld [vmem:[#allocation3 + $0xfa8] sm:$0xff] }
 0x5c3   : > { %3001 = vmatpush1.msra.mxu0 %v2463_v27  ;;  %3068 = vmatpush1.msra.mxu1 %v1985_v20  ;;  %v2735_v27 = vld [vmem:[#allocation3 + $0x1e90] sm:$0xff]  ;;  %v2257_v20 = vld [vmem:[#allocation3 + $0xfa0] sm:$0xff] }
 0x5c4   : > { %3002 = vmatprep.subr.mxu0 %v2448_v28  ;;  %3069 = vmatprep.subr.mxu1 %v1970_v29  ;;  %v2720_v28 = vld [vmem:[#allocation3 + $0x1e18] sm:$0xff]  ;;  %v2242_v29 = vld [vmem:[#allocation3 + $0xf28] sm:$0xff] }
 0x5c5   : > { %3003 = vmatpush1.msra.mxu0 %v2447_v30  ;;  %3070 = vmatpush1.msra.mxu1 %v1969_v31  ;;  %v2719_v30 = vld [vmem:[#allocation3 + $0x1e10] sm:$0xff]  ;;  %v2241_v31 = vld [vmem:[#allocation3 + $0xf20] sm:$0xff] }
 0x5c6   : > { %3004 = vmatprep.subr.mxu0 %v2432_v32  ;;  %3071 = vmatprep.subr.mxu1 %v1954_v33  ;;  %v2704_v32 = vld [vmem:[#allocation3 + $0x1d98] sm:$0xff]  ;;  %v2226_v33 = vld [vmem:[#allocation3 + $0xea8] sm:$0xff] }
 0x5c7   : > { %3005 = vmatpush1.msra.mxu0 %v2431_v34  ;;  %3072 = vmatpush1.msra.mxu1 %v1953_v35  ;;  %v2703_v34 = vld [vmem:[#allocation3 + $0x1d90] sm:$0xff]  ;;  %v2225_v35 = vld [vmem:[#allocation3 + $0xea0] sm:$0xff] }
 0x5c8   : > { %3006 = vmatprep.subr.mxu0 %v2416_v36  ;;  %3073 = vmatprep.subr.mxu1 %v1938_v37  ;;  %v2688_v36 = vld [vmem:[#allocation3 + $0x1d18] sm:$0xff]  ;;  %v2210_v37 = vld [vmem:[#allocation3 + $0xe28] sm:$0xff] }
 0x5c9   : > { %3007 = vmatpush1.msra.mxu0 %v2415_v38  ;;  %3074 = vmatpush1.msra.mxu1 %v1937_v39  ;;  %v2687_v38 = vld [vmem:[#allocation3 + $0x1d10] sm:$0xff]  ;;  %v2209_v39 = vld [vmem:[#allocation3 + $0xe20] sm:$0xff] }
 0x5ca   : > { %3008 = vmatprep.subr.mxu0 %v2400_v40  ;;  %3075 = vmatprep.subr.mxu1 %v1922_v41  ;;  %v2672_v40 = vld [vmem:[#allocation3 + $0x1c98] sm:$0xff]  ;;  %v2194_v41 = vld [vmem:[#allocation3 + $0xda8] sm:$0xff] }
 0x5cb   : > { %3009 = vmatpush1.msra.mxu0 %v2399_v42  ;;  %3076 = vmatpush1.msra.mxu1 %v1921_v43  ;;  %v2671_v42 = vld [vmem:[#allocation3 + $0x1c90] sm:$0xff]  ;;  %v2193_v43 = vld [vmem:[#allocation3 + $0xda0] sm:$0xff] }
 0x5cc   : > { %3010 = vmatprep.subr.mxu0 %v2384_v44  ;;  %3077 = vmatprep.subr.mxu1 %v1906_v45  ;;  %v2656_v44 = vld [vmem:[#allocation3 + $0x1c18] sm:$0xff]  ;;  %v2178_v45 = vld [vmem:[#allocation3 + $0xd28] sm:$0xff] }
 0x5cd   : > { %3011 = vmatpush1.msra.mxu0 %v2383_v46  ;;  %3078 = vmatpush1.msra.mxu1 %v1905_v47  ;;  %v2655_v46 = vld [vmem:[#allocation3 + $0x1c10] sm:$0xff]  ;;  %v2177_v47 = vld [vmem:[#allocation3 + $0xd20] sm:$0xff] }
 0x5ce   : > { %3012 = vmatprep.subr.mxu0 %v2368_v48  ;;  %3079 = vmatprep.subr.mxu1 %v1890_v49  ;;  %v2640_v48 = vld [vmem:[#allocation3 + $0x1b98] sm:$0xff]  ;;  %v2162_v49 = vld [vmem:[#allocation3 + $0xca8] sm:$0xff] }
 0x5cf   : > { %3013 = vmatpush1.msra.mxu0 %v2367_v50  ;;  %3080 = vmatpush1.msra.mxu1 %v1889_v51  ;;  %v2639_v50 = vld [vmem:[#allocation3 + $0x1b90] sm:$0xff]  ;;  %v2161_v51 = vld [vmem:[#allocation3 + $0xca0] sm:$0xff] }
 0x5d0   : > { %3014 = vmatprep.subr.mxu0 %v2352_v52  ;;  %3081 = vmatprep.subr.mxu1 %v1874_v53  ;;  %v2624_v52 = vld [vmem:[#allocation3 + $0x1b18] sm:$0xff]  ;;  %v2146_v53 = vld [vmem:[#allocation3 + $0xc28] sm:$0xff] }
 0x5d1   : > { %3015 = vmatpush1.msra.mxu0 %v2351_v54  ;;  %3082 = vmatpush1.msra.mxu1 %v1873_v55  ;;  %v2623_v54 = vld [vmem:[#allocation3 + $0x1b10] sm:$0xff]  ;;  %v2145_v55 = vld [vmem:[#allocation3 + $0xc20] sm:$0xff] }
 0x5d2   : > { %3016 = vmatprep.subr.mxu0 %v2336_v56  ;;  %3083 = vmatprep.subr.mxu1 %v1858_v57  ;;  %v2608_v56 = vld [vmem:[#allocation3 + $0x1a98] sm:$0xff]  ;;  %v2130_v57 = vld [vmem:[#allocation3 + $0xba8] sm:$0xff] }
 0x5d3   : > { %3017 = vmatpush1.msra.mxu0 %v2335_v58  ;;  %3084 = vmatpush1.msra.mxu1 %v1857_v59  ;;  %v2607_v58 = vld [vmem:[#allocation3 + $0x1a90] sm:$0xff]  ;;  %v2129_v59 = vld [vmem:[#allocation3 + $0xba0] sm:$0xff] }
 0x5d4   : > { %3018 = vmatprep.subr.mxu0 %v2320_v60  ;;  %3085 = vmatprep.subr.mxu1 %v1842_v61  ;;  %v2592_v60 = vld [vmem:[#allocation3 + $0x1a18] sm:$0xff]  ;;  %v2114_v61 = vld [vmem:[#allocation3 + $0xb28] sm:$0xff] }
 0x5d5   : > { %3019 = vmatpush1.msra.mxu0 %v2319_v62  ;;  %3086 = vmatpush1.msra.mxu1 %v1841_v63  ;;  %v2591_v62 = vld [vmem:[#allocation3 + $0x1a10] sm:$0xff]  ;;  %v2113_v63 = vld [vmem:[#allocation3 + $0xb20] sm:$0xff] }
 0x5d6   : > { %3020 = vmatprep.subr.mxu0 %v2304_v1  ;;  %3087 = vmatprep.subr.mxu1 %v1826_v2  ;;  %v2576_v1 = vld [vmem:[#allocation3 + $0x1998] sm:$0xff]  ;;  %v2098_v2 = vld [vmem:[#allocation3 + $0xaa8] sm:$0xff] }
 0x5d7   : > { %3021 = vmatpush1.msra.mxu0 %v2303_v0  ;;  %3088 = vmatpush1.msra.mxu1 %v1825_v3  ;;  %v2575_v0 = vld [vmem:[#allocation3 + $0x1990] sm:$0xff]  ;;  %v2097_v3 = vld [vmem:[#allocation3 + $0xaa0] sm:$0xff] }
 0x5d8   : > { %3022 = vmatprep.subr.mxu0 %v2288_v4  ;;  %3089 = vmatprep.subr.mxu1 %v1810_v5  ;;  %v2560_v4 = vld [vmem:[#allocation3 + $0x1918] sm:$0xff]  ;;  %v2082_v5 = vld [vmem:[#allocation3 + $0xa28] sm:$0xff] }
 0x5d9   : > { %3023 = vmatpush1.msra.mxu0 %v2287_v6  ;;  %3090 = vmatpush1.msra.mxu1 %v1809_v7  ;;  %v2559_v6 = vld [vmem:[#allocation3 + $0x1910] sm:$0xff]  ;;  %v2081_v7 = vld [vmem:[#allocation3 + $0xa20] sm:$0xff] }
 0x5da   : > { %3024 = vmatprep.subr.mxu0 %v2272_v8  ;;  %3091 = vmatprep.subr.mxu1 %v1794_v9  ;;  %v2544_v8 = vld [vmem:[#allocation3 + $0x1898] sm:$0xff]  ;;  %v2066_v9 = vld [vmem:[#allocation3 + $0x9a8] sm:$0xff] }
 0x5db   : > { %3025 = vmatpush1.msra.mxu0 %v2271_v11  ;;  %3092 = vmatpush1.msra.mxu1 %v1793_v14  ;;  %v2543_v11 = vld [vmem:[#allocation3 + $0x1890] sm:$0xff]  ;;  %v2065_v14 = vld [vmem:[#allocation3 + $0x9a0] sm:$0xff] }
 0x5dc   : > { %3026 = vmatprep.subr.mxu0 %v2768_v15  ;;  %3093 = vmatprep.subr.mxu1 %v1778_v17  ;;  %v2528_v15 = vld [vmem:[#allocation3 + $0x1818] sm:$0xff]  ;;  %v2050_v17 = vld [vmem:[#allocation3 + $0x928] sm:$0xff] }
 0x5dd   : > { %3027 = vmatpush2.msra.mxu0 %v2767_v18  ;;  %3094 = vmatpush1.msra.mxu1 %v1777_v19  ;;  %v2527_v18 = vld [vmem:[#allocation3 + $0x1810] sm:$0xff]  ;;  %v2049_v19 = vld [vmem:[#allocation3 + $0x920] sm:$0xff] }
 0x5de   : > { %3028 = vmatprep.subr.mxu0 %v2752_v21  ;;  %3095 = vmatprep.subr.mxu1 %v1762_v22  ;;  %v2034_v21 = vld [vmem:[#allocation3 + $0x8a8] sm:$0xff] }
 0x5df   : > { %3029 = vmatpush2.msra.mxu0 %v2751_v23  ;;  %3096 = vmatpush1.msra.mxu1 %v1761_v24  ;;  %v2514_v22 = vld [vmem:[#allocation3 + $0x17a8] sm:$0xff]  ;;  %v2033_v23 = vld [vmem:[#allocation3 + $0x8a0] sm:$0xff] }
 0x5e0   : > { %3030 = vmatprep.subr.mxu0 %v2736_v25  ;;  %3097 = vmatprep.subr.mxu1 %v2258_v26  ;;  %v2513_v24 = vld [vmem:[#allocation3 + $0x17a0] sm:$0xff]  ;;  %v2018_v25 = vld [vmem:[#allocation3 + $0x828] sm:$0xff] }
 0x5e1   : > { %3031 = vmatpush2.msra.mxu0 %v2735_v27  ;;  %3098 = vmatpush2.msra.mxu1 %v2257_v20  ;;  %v2498_v26 = vld [vmem:[#allocation3 + $0x1728] sm:$0xff]  ;;  %v2017_v27 = vld [vmem:[#allocation3 + $0x820] sm:$0xff] }
 0x5e2   : > { %3032 = vmatprep.subr.mxu0 %v2720_v28  ;;  %3099 = vmatprep.subr.mxu1 %v2242_v29  ;;  %v2497_v20 = vld [vmem:[#allocation3 + $0x1720] sm:$0xff]  ;;  %v2482_v28 = vld [vmem:[#allocation3 + $0x16a8] sm:$0xff]  ;;  %v2004_v29 = vld [vmem:[#allocation3 + $0x7b8] sm:$0xff] }
 0x5e3   : > { %3033 = vmatpush2.msra.mxu0 %v2719_v30  ;;  %3100 = vmatpush2.msra.mxu1 %v2241_v31  ;;  %v2481_v30 = vld [vmem:[#allocation3 + $0x16a0] sm:$0xff]  ;;  %v2003_v31 = vld [vmem:[#allocation3 + $0x7b0] sm:$0xff] }
 0x5e4   : > { %3034 = vmatprep.subr.mxu0 %v2704_v32  ;;  %3101 = vmatprep.subr.mxu1 %v2226_v33  ;;  %v1988_v32 = vld [vmem:[#allocation3 + $0x738] sm:$0xff]  ;;  %v2465_v33 = vld [vmem:[#allocation3 + $0x1620] sm:$0xff] }
 0x5e5   : > { %3035 = vmatpush2.msra.mxu0 %v2703_v34  ;;  %3102 = vmatpush2.msra.mxu1 %v2225_v35  ;;  %v1987_v34 = vld [vmem:[#allocation3 + $0x730] sm:$0xff]  ;;  %v1972_v35 = vld [vmem:[#allocation3 + $0x6b8] sm:$0xff] }
 0x5e6   : > { %3036 = vmatprep.subr.mxu0 %v2688_v36  ;;  %3103 = vmatprep.subr.mxu1 %v2210_v37  ;;  %v2449_v36 = vld [vmem:[#allocation3 + $0x15a0] sm:$0xff]  ;;  %v1971_v37 = vld [vmem:[#allocation3 + $0x6b0] sm:$0xff] }
 0x5e7   : > { %3037 = vmatpush2.msra.mxu0 %v2687_v38  ;;  %3104 = vmatpush2.msra.mxu1 %v2209_v39  ;;  %v2434_v38 = vld [vmem:[#allocation3 + $0x1528] sm:$0xff]  ;;  %v2433_v39 = vld [vmem:[#allocation3 + $0x1520] sm:$0xff] }
 0x5e8   : > { %3038 = vmatprep.subr.mxu0 %v2672_v40  ;;  %3105 = vmatprep.subr.mxu1 %v2194_v41  ;;  %v1955_v40 = vld [vmem:[#allocation3 + $0x630] sm:$0xff]  ;;  %v2418_v41 = vld [vmem:[#allocation3 + $0x14a8] sm:$0xff] }
 0x5e9   : > { %3039 = vmatpush2.msra.mxu0 %v2671_v42  ;;  %3106 = vmatpush2.msra.mxu1 %v2193_v43  ;;  %v1940_v42 = vld [vmem:[#allocation3 + $0x5b8] sm:$0xff]  ;;  %v1939_v43 = vld [vmem:[#allocation3 + $0x5b0] sm:$0xff] }
 0x5ea   : > { %3040 = vmatprep.subr.mxu0 %v2656_v44  ;;  %3107 = vmatprep.subr.mxu1 %v2178_v45  ;;  %v2402_v44 = vld [vmem:[#allocation3 + $0x1428] sm:$0xff]  ;;  %v1924_v45 = vld [vmem:[#allocation3 + $0x538] sm:$0xff] }
 0x5eb   : > { %3041 = vmatpush2.msra.mxu0 %v2655_v46  ;;  %3108 = vmatpush2.msra.mxu1 %v2177_v47  ;;  %v2401_v46 = vld [vmem:[#allocation3 + $0x1420] sm:$0xff]  ;;  %v1923_v47 = vld [vmem:[#allocation3 + $0x530] sm:$0xff] }
 0x5ec   : > { %3042 = vmatprep.subr.mxu0 %v2640_v48  ;;  %3109 = vmatprep.subr.mxu1 %v2162_v49  ;;  %v2386_v48 = vld [vmem:[#allocation3 + $0x13a8] sm:$0xff]  ;;  %v1908_v49 = vld [vmem:[#allocation3 + $0x4b8] sm:$0xff] }
 0x5ed   : > { %3043 = vmatpush2.msra.mxu0 %v2639_v50  ;;  %3110 = vmatpush2.msra.mxu1 %v2161_v51  ;;  %v2385_v50 = vld [vmem:[#allocation3 + $0x13a0] sm:$0xff]  ;;  %v1907_v51 = vld [vmem:[#allocation3 + $0x4b0] sm:$0xff] }
 0x5ee   : > { %3044 = vmatprep.subr.mxu0 %v2624_v52  ;;  %3111 = vmatprep.subr.mxu1 %v2146_v53  ;;  %v2370_v52 = vld [vmem:[#allocation3 + $0x1328] sm:$0xff]  ;;  %v1892_v53 = vld [vmem:[#allocation3 + $0x438] sm:$0xff] }
 0x5ef   : > { %3045 = vmatpush2.msra.mxu0 %v2623_v54  ;;  %3112 = vmatpush2.msra.mxu1 %v2145_v55  ;;  %v2369_v54 = vld [vmem:[#allocation3 + $0x1320] sm:$0xff]  ;;  %v1891_v55 = vld [vmem:[#allocation3 + $0x430] sm:$0xff] }
 0x5f0   : > { %3046 = vmatprep.subr.mxu0 %v2608_v56  ;;  %3113 = vmatprep.subr.mxu1 %v2130_v57  ;;  %v2354_v56 = vld [vmem:[#allocation3 + $0x12a8] sm:$0xff]  ;;  %v1876_v57 = vld [vmem:[#allocation3 + $0x3b8] sm:$0xff] }
 0x5f1   : > { %3047 = vmatpush2.msra.mxu0 %v2607_v58  ;;  %3114 = vmatpush2.msra.mxu1 %v2129_v59  ;;  %v2353_v58 = vld [vmem:[#allocation3 + $0x12a0] sm:$0xff]  ;;  %v1875_v59 = vld [vmem:[#allocation3 + $0x3b0] sm:$0xff] }
 0x5f2   : > { %3048 = vmatprep.subr.mxu0 %v2592_v60  ;;  %3115 = vmatprep.subr.mxu1 %v2114_v61  ;;  %v2338_v60 = vld [vmem:[#allocation3 + $0x1228] sm:$0xff]  ;;  %v1860_v61 = vld [vmem:[#allocation3 + $0x338] sm:$0xff] }
 0x5f3   : > { %3049 = vmatpush2.msra.mxu0 %v2591_v62  ;;  %3116 = vmatpush2.msra.mxu1 %v2113_v63  ;;  %v2337_v62 = vld [vmem:[#allocation3 + $0x1220] sm:$0xff]  ;;  %v1859_v63 = vld [vmem:[#allocation3 + $0x330] sm:$0xff] }
 0x5f4   : > { %3050 = vmatprep.subr.mxu0 %v2576_v1  ;;  %3117 = vmatprep.subr.mxu1 %v2098_v2  ;;  %v2322_v1 = vld [vmem:[#allocation3 + $0x11a8] sm:$0xff]  ;;  %v1844_v2 = vld [vmem:[#allocation3 + $0x2b8] sm:$0xff] }
 0x5f5   : > { %3051 = vmatpush2.msra.mxu0 %v2575_v0  ;;  %3118 = vmatpush2.msra.mxu1 %v2097_v3  ;;  %v2321_v0 = vld [vmem:[#allocation3 + $0x11a0] sm:$0xff]  ;;  %v1843_v3 = vld [vmem:[#allocation3 + $0x2b0] sm:$0xff] }
 0x5f6   : > { %3052 = vmatprep.subr.mxu0 %v2560_v4  ;;  %3119 = vmatprep.subr.mxu1 %v2082_v5  ;;  %v2306_v4 = vld [vmem:[#allocation3 + $0x1128] sm:$0xff]  ;;  %v1828_v5 = vld [vmem:[#allocation3 + $0x238] sm:$0xff] }
 0x5f7   : > { %3053 = vmatpush2.msra.mxu0 %v2559_v6  ;;  %3120 = vmatpush2.msra.mxu1 %v2081_v7  ;;  %v2305_v6 = vld [vmem:[#allocation3 + $0x1120] sm:$0xff]  ;;  %v1827_v7 = vld [vmem:[#allocation3 + $0x230] sm:$0xff] }
 0x5f8   : > { %3054 = vmatprep.subr.mxu0 %v2544_v8  ;;  %3121 = vmatprep.subr.mxu1 %v2066_v9  ;;  %v2290_v8 = vld [vmem:[#allocation3 + $0x10a8] sm:$0xff]  ;;  %v1812_v9 = vld [vmem:[#allocation3 + $0x1b8] sm:$0xff] }
 0x5f9   : > { %3055 = vmatpush2.msra.mxu0 %v2543_v11  ;;  %3122 = vmatpush2.msra.mxu1 %v2065_v14  ;;  %v2289_v11 = vld [vmem:[#allocation3 + $0x10a0] sm:$0xff]  ;;  %v1811_v14 = vld [vmem:[#allocation3 + $0x1b0] sm:$0xff] }
 0x5fa   : > { %3056 = vmatprep.subr.mxu0 %v2528_v15  ;;  %3123 = vmatprep.subr.mxu1 %v2050_v17  ;;  %v2274_v15 = vld [vmem:[#allocation3 + $0x1028] sm:$0xff]  ;;  %v1796_v17 = vld [vmem:[#allocation3 + $0x138] sm:$0xff] }
 0x5fb   : > { %3057 = vmatpush2.msra.mxu0 %v2527_v18  ;;  %3124 = vmatpush2.msra.mxu1 %v2049_v19  ;;  %v2273_v18 = vld [vmem:[#allocation3 + $0x1020] sm:$0xff]  ;;  %v1795_v19 = vld [vmem:[#allocation3 + $0x130] sm:$0xff] }
 0x5fc   : > { %3059 = vmatmul.mubr.f32.vlgmr.msra.gmra.mxu0 %v7165_v16  ;;  %3125 = vmatprep.subr.mxu1 %v2034_v21  ;;  %v2466_v16 = vld [vmem:[#allocation3 + $0x1628] sm:$0xff] }
 0x5fd   : > { %3136 = vmatprep.subr.mxu0 %v2514_v22  ;;  %3126 = vmatpush2.msra.mxu1 %v2033_v23  ;;  %v2770_v21 = vld [vmem:[#allocation3 + $0x1fa8] sm:$0xff]  ;;  %v1780_v22 = vld [vmem:[#allocation3 + $0xb8] sm:$0xff]  ;;  %v2769_v23 = vld [vmem:[#allocation3 + $0x1fa0] sm:$0xff] }
 0x5fe   : > { %3137 = vmatpush1.msra.mxu0 %v2513_v24  ;;  %3200 = vmatprep.mubr.f32.mxu0 %v7162_v13  ;;  %v2450_v13 = vld [vmem:[#allocation3 + $0x15a8] sm:$0xff]  ;;  %v1779_v24 = vld [vmem:[#allocation3 + $0xb0] sm:$0xff] }
 0x5ff   : > { %3127 = vmatprep.subr.mxu1 %v2018_v25  ;;  %3138 = vmatprep.subr.mxu0 %v2498_v26  ;;  %v2754_v25 = vld [vmem:[#allocation3 + $0x1f28] sm:$0xff]  ;;  %v1764_v26 = vld [vmem:[#allocation3 + $0x38] sm:$0xff] }
 0x600   : > { %3128 = vmatpush2.msra.mxu1 %v2017_v27  ;;  %3139 = vmatpush1.msra.mxu0 %v2497_v20  ;;  %v2753_v27 = vld [vmem:[#allocation3 + $0x1f20] sm:$0xff]  ;;  %v1763_v20 = vld [vmem:[#allocation3 + $0x30] sm:$0xff] }
 0x601   : > { %3130 = vmatmul.mubr.f32.vlgmr.msra.gmra.mxu1 %v7156_v12  ;;  %3140 = vmatprep.subr.mxu0 %v2482_v28  ;;  %v1956_v12 = vld [vmem:[#allocation3 + $0x638] sm:$0xff]  ;;  %v2738_v28 = vld [vmem:[#allocation3 + $0x1ea8] sm:$0xff] }
 0x602   : > { %3207 = vmatprep.subr.mxu1 %v2004_v29  ;;  %3141 = vmatpush1.msra.mxu0 %v2481_v30  ;;  %v2260_v29 = vld [vmem:[#allocation3 + $0xfb8] sm:$0xff]  ;;  %v2737_v30 = vld [vmem:[#allocation3 + $0x1ea0] sm:$0xff] }
 0x603   : > { %3208 = vmatpush1.msra.mxu1 %v2003_v31  ;;  %3271 = vmatprep.mubr.f32.mxu1 %v7153_v10  ;;  %v2417_v10 = vld [vmem:[#allocation3 + $0x14a0] sm:$0xff]  ;;  %v2259_v31 = vld [vmem:[#allocation3 + $0xfb0] sm:$0xff] }
 0x604   : > { %3142 = vmatprep.subr.mxu0 %v2466_v16  ;;  %3209 = vmatprep.subr.mxu1 %v1988_v32  ;;  %v2722_v16 = vld [vmem:[#allocation3 + $0x1e28] sm:$0xff]  ;;  %v2244_v32 = vld [vmem:[#allocation3 + $0xf38] sm:$0xff] }
 0x605   : > { %3143 = vmatpush1.msra.mxu0 %v2465_v33  ;;  %3210 = vmatpush1.msra.mxu1 %v1987_v34  ;;  %v2721_v33 = vld [vmem:[#allocation3 + $0x1e20] sm:$0xff]  ;;  %v2243_v34 = vld [vmem:[#allocation3 + $0xf30] sm:$0xff] }
 0x606   : > { %3144 = vmatprep.subr.mxu0 %v2450_v13  ;;  %3211 = vmatprep.subr.mxu1 %v1972_v35  ;;  %v2706_v13 = vld [vmem:[#allocation3 + $0x1da8] sm:$0xff]  ;;  %v2228_v35 = vld [vmem:[#allocation3 + $0xeb8] sm:$0xff] }
 0x607   : > { %3145 = vmatpush1.msra.mxu0 %v2449_v36  ;;  %3212 = vmatpush1.msra.mxu1 %v1971_v37  ;;  %v2705_v36 = vld [vmem:[#allocation3 + $0x1da0] sm:$0xff]  ;;  %v2227_v37 = vld [vmem:[#allocation3 + $0xeb0] sm:$0xff] }
 0x608   : > { %3146 = vmatprep.subr.mxu0 %v2434_v38  ;;  %3213 = vmatprep.subr.mxu1 %v1956_v12  ;;  %v2690_v38 = vld [vmem:[#allocation3 + $0x1d28] sm:$0xff]  ;;  %v2212_v12 = vld [vmem:[#allocation3 + $0xe38] sm:$0xff] }
 0x609   : > { %3147 = vmatpush1.msra.mxu0 %v2433_v39  ;;  %3214 = vmatpush1.msra.mxu1 %v1955_v40  ;;  %v2689_v39 = vld [vmem:[#allocation3 + $0x1d20] sm:$0xff]  ;;  %v2211_v40 = vld [vmem:[#allocation3 + $0xe30] sm:$0xff] }
 0x60a   : > { %3148 = vmatprep.subr.mxu0 %v2418_v41  ;;  %3215 = vmatprep.subr.mxu1 %v1940_v42  ;;  %v2674_v41 = vld [vmem:[#allocation3 + $0x1ca8] sm:$0xff]  ;;  %v2196_v42 = vld [vmem:[#allocation3 + $0xdb8] sm:$0xff] }
 0x60b   : > { %3149 = vmatpush1.msra.mxu0 %v2417_v10  ;;  %3216 = vmatpush1.msra.mxu1 %v1939_v43  ;;  %v2673_v10 = vld [vmem:[#allocation3 + $0x1ca0] sm:$0xff]  ;;  %v2195_v43 = vld [vmem:[#allocation3 + $0xdb0] sm:$0xff] }
 0x60c   : > { %3150 = vmatprep.subr.mxu0 %v2402_v44  ;;  %3217 = vmatprep.subr.mxu1 %v1924_v45  ;;  %v2658_v44 = vld [vmem:[#allocation3 + $0x1c28] sm:$0xff]  ;;  %v2180_v45 = vld [vmem:[#allocation3 + $0xd38] sm:$0xff] }
 0x60d   : > { %3151 = vmatpush1.msra.mxu0 %v2401_v46  ;;  %3218 = vmatpush1.msra.mxu1 %v1923_v47  ;;  %v2657_v46 = vld [vmem:[#allocation3 + $0x1c20] sm:$0xff]  ;;  %v2179_v47 = vld [vmem:[#allocation3 + $0xd30] sm:$0xff] }
 0x60e   : > { %3152 = vmatprep.subr.mxu0 %v2386_v48  ;;  %3219 = vmatprep.subr.mxu1 %v1908_v49  ;;  %v2642_v48 = vld [vmem:[#allocation3 + $0x1ba8] sm:$0xff]  ;;  %v2164_v49 = vld [vmem:[#allocation3 + $0xcb8] sm:$0xff] }
 0x60f   : > { %3153 = vmatpush1.msra.mxu0 %v2385_v50  ;;  %3220 = vmatpush1.msra.mxu1 %v1907_v51  ;;  %v2641_v50 = vld [vmem:[#allocation3 + $0x1ba0] sm:$0xff]  ;;  %v2163_v51 = vld [vmem:[#allocation3 + $0xcb0] sm:$0xff] }
 0x610   : > { %3154 = vmatprep.subr.mxu0 %v2370_v52  ;;  %3221 = vmatprep.subr.mxu1 %v1892_v53  ;;  %v2626_v52 = vld [vmem:[#allocation3 + $0x1b28] sm:$0xff]  ;;  %v2148_v53 = vld [vmem:[#allocation3 + $0xc38] sm:$0xff] }
 0x611   : > { %3155 = vmatpush1.msra.mxu0 %v2369_v54  ;;  %3222 = vmatpush1.msra.mxu1 %v1891_v55  ;;  %v2625_v54 = vld [vmem:[#allocation3 + $0x1b20] sm:$0xff]  ;;  %v2147_v55 = vld [vmem:[#allocation3 + $0xc30] sm:$0xff] }
 0x612   : > { %3156 = vmatprep.subr.mxu0 %v2354_v56  ;;  %3223 = vmatprep.subr.mxu1 %v1876_v57  ;;  %v2610_v56 = vld [vmem:[#allocation3 + $0x1aa8] sm:$0xff]  ;;  %v2132_v57 = vld [vmem:[#allocation3 + $0xbb8] sm:$0xff] }
 0x613   : > { %3157 = vmatpush1.msra.mxu0 %v2353_v58  ;;  %3224 = vmatpush1.msra.mxu1 %v1875_v59  ;;  %v2609_v58 = vld [vmem:[#allocation3 + $0x1aa0] sm:$0xff]  ;;  %v2131_v59 = vld [vmem:[#allocation3 + $0xbb0] sm:$0xff] }
 0x614   : > { %3158 = vmatprep.subr.mxu0 %v2338_v60  ;;  %3225 = vmatprep.subr.mxu1 %v1860_v61  ;;  %v2594_v60 = vld [vmem:[#allocation3 + $0x1a28] sm:$0xff]  ;;  %v2116_v61 = vld [vmem:[#allocation3 + $0xb38] sm:$0xff] }
 0x615   : > { %3159 = vmatpush1.msra.mxu0 %v2337_v62  ;;  %3226 = vmatpush1.msra.mxu1 %v1859_v63  ;;  %v2593_v62 = vld [vmem:[#allocation3 + $0x1a20] sm:$0xff]  ;;  %v2115_v63 = vld [vmem:[#allocation3 + $0xb30] sm:$0xff] }
 0x616   : > { %3160 = vmatprep.subr.mxu0 %v2322_v1  ;;  %3227 = vmatprep.subr.mxu1 %v1844_v2  ;;  %v2578_v1 = vld [vmem:[#allocation3 + $0x19a8] sm:$0xff]  ;;  %v2100_v2 = vld [vmem:[#allocation3 + $0xab8] sm:$0xff] }
 0x617   : > { %3161 = vmatpush1.msra.mxu0 %v2321_v0  ;;  %3228 = vmatpush1.msra.mxu1 %v1843_v3  ;;  %v2577_v0 = vld [vmem:[#allocation3 + $0x19a0] sm:$0xff]  ;;  %v2099_v3 = vld [vmem:[#allocation3 + $0xab0] sm:$0xff] }
 0x618   : > { %3162 = vmatprep.subr.mxu0 %v2306_v4  ;;  %3229 = vmatprep.subr.mxu1 %v1828_v5  ;;  %v2562_v4 = vld [vmem:[#allocation3 + $0x1928] sm:$0xff]  ;;  %v2084_v5 = vld [vmem:[#allocation3 + $0xa38] sm:$0xff] }
 0x619   : > { %3163 = vmatpush1.msra.mxu0 %v2305_v6  ;;  %3230 = vmatpush1.msra.mxu1 %v1827_v7  ;;  %v2561_v6 = vld [vmem:[#allocation3 + $0x1920] sm:$0xff]  ;;  %v2083_v7 = vld [vmem:[#allocation3 + $0xa30] sm:$0xff] }
 0x61a   : > { %3164 = vmatprep.subr.mxu0 %v2290_v8  ;;  %3231 = vmatprep.subr.mxu1 %v1812_v9  ;;  %v2546_v8 = vld [vmem:[#allocation3 + $0x18a8] sm:$0xff]  ;;  %v2068_v9 = vld [vmem:[#allocation3 + $0x9b8] sm:$0xff] }
 0x61b   : > { %3165 = vmatpush1.msra.mxu0 %v2289_v11  ;;  %3232 = vmatpush1.msra.mxu1 %v1811_v14  ;;  %v2545_v11 = vld [vmem:[#allocation3 + $0x18a0] sm:$0xff]  ;;  %v2067_v14 = vld [vmem:[#allocation3 + $0x9b0] sm:$0xff] }
 0x61c   : > { %3166 = vmatprep.subr.mxu0 %v2274_v15  ;;  %3233 = vmatprep.subr.mxu1 %v1796_v17  ;;  %v2530_v15 = vld [vmem:[#allocation3 + $0x1828] sm:$0xff]  ;;  %v2052_v17 = vld [vmem:[#allocation3 + $0x938] sm:$0xff] }
 0x61d   : > { %3167 = vmatpush1.msra.mxu0 %v2273_v18  ;;  %3234 = vmatpush1.msra.mxu1 %v1795_v19  ;;  %v2529_v18 = vld [vmem:[#allocation3 + $0x1820] sm:$0xff]  ;;  %v2051_v19 = vld [vmem:[#allocation3 + $0x930] sm:$0xff] }
 0x61e   : > { %3168 = vmatprep.subr.mxu0 %v2770_v21  ;;  %3235 = vmatprep.subr.mxu1 %v1780_v22  ;;  %v2036_v21 = vld [vmem:[#allocation3 + $0x8b8] sm:$0xff] }
 0x61f   : > { %3169 = vmatpush2.msra.mxu0 %v2769_v23  ;;  %3236 = vmatpush1.msra.mxu1 %v1779_v24  ;;  %v2516_v22 = vld [vmem:[#allocation3 + $0x17b8] sm:$0xff]  ;;  %v2035_v23 = vld [vmem:[#allocation3 + $0x8b0] sm:$0xff] }
 0x620   : > { %3170 = vmatprep.subr.mxu0 %v2754_v25  ;;  %3237 = vmatprep.subr.mxu1 %v1764_v26  ;;  %v2515_v24 = vld [vmem:[#allocation3 + $0x17b0] sm:$0xff]  ;;  %v2020_v26 = vld [vmem:[#allocation3 + $0x838] sm:$0xff] }
 0x621   : > { %3171 = vmatpush2.msra.mxu0 %v2753_v27  ;;  %3238 = vmatpush1.msra.mxu1 %v1763_v20  ;;  %v7175_v25 = vld [vmem:[#allocation2 + $0x10] sm:$0xff]  ;;  %v2500_v27 = vld [vmem:[#allocation3 + $0x1738] sm:$0xff] }
 0x622   : > { %3172 = vmatprep.subr.mxu0 %v2738_v28  ;;  %3239 = vmatprep.subr.mxu1 %v2260_v29  ;;  %v2019_v20 = vld [vmem:[#allocation3 + $0x830] sm:$0xff]  ;;  %v7178_v29 = vld [vmem:[#allocation2 + $0x18] sm:$0xff] }
 0x623   : > { %3173 = vmatpush2.msra.mxu0 %v2737_v30  ;;  %3240 = vmatpush2.msra.mxu1 %v2259_v31  ;;  %v2499_v28 = vld [vmem:[#allocation3 + $0x1730] sm:$0xff]  ;;  %v2484_v30 = vld [vmem:[#allocation3 + $0x16b8] sm:$0xff]  ;;  %v2006_v31 = vld [vmem:[#allocation3 + $0x7c8] sm:$0xff] }
 0x624   : > { %3174 = vmatprep.subr.mxu0 %v2722_v16  ;;  %3241 = vmatprep.subr.mxu1 %v2244_v32  ;;  %v2483_v16 = vld [vmem:[#allocation3 + $0x16b0] sm:$0xff]  ;;  %v2005_v32 = vld [vmem:[#allocation3 + $0x7c0] sm:$0xff] }
 0x625   : > { %3175 = vmatpush2.msra.mxu0 %v2721_v33  ;;  %3242 = vmatpush2.msra.mxu1 %v2243_v34  ;;  %v7181_v33 = vld [vmem:[#allocation2] sm:$0xff]  ;;  %v2468_v34 = vld [vmem:[#allocation3 + $0x1638] sm:$0xff] }
 0x626   : > { %3176 = vmatprep.subr.mxu0 %v2706_v13  ;;  %3243 = vmatprep.subr.mxu1 %v2228_v35  ;;  %v1990_v13 = vld [vmem:[#allocation3 + $0x748] sm:$0xff]  ;;  %v2467_v35 = vld [vmem:[#allocation3 + $0x1630] sm:$0xff] }
 0x627   : > { %3177 = vmatpush2.msra.mxu0 %v2705_v36  ;;  %3244 = vmatpush2.msra.mxu1 %v2227_v37  ;;  %v1989_v36 = vld [vmem:[#allocation3 + $0x740] sm:$0xff]  ;;  %v7184_v37 = vld [vmem:[#allocation2 + $0x8] sm:$0xff] }
 0x628   : > { %3178 = vmatprep.subr.mxu0 %v2690_v38  ;;  %3245 = vmatprep.subr.mxu1 %v2212_v12  ;;  %v2452_v38 = vld [vmem:[#allocation3 + $0x15b8] sm:$0xff]  ;;  %v1974_v12 = vld [vmem:[#allocation3 + $0x6c8] sm:$0xff] }
 0x629   : > { %3179 = vmatpush2.msra.mxu0 %v2689_v39  ;;  %3246 = vmatpush2.msra.mxu1 %v2211_v40  ;;  %v2451_v39 = vld [vmem:[#allocation3 + $0x15b0] sm:$0xff]  ;;  %v1973_v40 = vld [vmem:[#allocation3 + $0x6c0] sm:$0xff] }
 0x62a   : > { %3180 = vmatprep.subr.mxu0 %v2674_v41  ;;  %3247 = vmatprep.subr.mxu1 %v2196_v42  ;;  %v2436_v41 = vld [vmem:[#allocation3 + $0x1538] sm:$0xff]  ;;  %v1958_v42 = vld [vmem:[#allocation3 + $0x648] sm:$0xff] }
 0x62b   : > { %3181 = vmatpush2.msra.mxu0 %v2673_v10  ;;  %3248 = vmatpush2.msra.mxu1 %v2195_v43  ;;  %v2435_v10 = vld [vmem:[#allocation3 + $0x1530] sm:$0xff]  ;;  %v1957_v43 = vld [vmem:[#allocation3 + $0x640] sm:$0xff] }
 0x62c   : > { %3182 = vmatprep.subr.mxu0 %v2658_v44  ;;  %3249 = vmatprep.subr.mxu1 %v2180_v45  ;;  %v2420_v44 = vld [vmem:[#allocation3 + $0x14b8] sm:$0xff]  ;;  %v1942_v45 = vld [vmem:[#allocation3 + $0x5c8] sm:$0xff] }
 0x62d   : > { %3183 = vmatpush2.msra.mxu0 %v2657_v46  ;;  %3250 = vmatpush2.msra.mxu1 %v2179_v47  ;;  %v2419_v46 = vld [vmem:[#allocation3 + $0x14b0] sm:$0xff]  ;;  %v1941_v47 = vld [vmem:[#allocation3 + $0x5c0] sm:$0xff] }
 0x62e   : > { %3184 = vmatprep.subr.mxu0 %v2642_v48  ;;  %3251 = vmatprep.subr.mxu1 %v2164_v49  ;;  %v2404_v48 = vld [vmem:[#allocation3 + $0x1438] sm:$0xff]  ;;  %v1926_v49 = vld [vmem:[#allocation3 + $0x548] sm:$0xff] }
 0x62f   : > { %3185 = vmatpush2.msra.mxu0 %v2641_v50  ;;  %3252 = vmatpush2.msra.mxu1 %v2163_v51  ;;  %v2403_v50 = vld [vmem:[#allocation3 + $0x1430] sm:$0xff]  ;;  %v1925_v51 = vld [vmem:[#allocation3 + $0x540] sm:$0xff] }
 0x630   : > { %3186 = vmatprep.subr.mxu0 %v2626_v52  ;;  %3253 = vmatprep.subr.mxu1 %v2148_v53  ;;  %v2388_v52 = vld [vmem:[#allocation3 + $0x13b8] sm:$0xff]  ;;  %v1910_v53 = vld [vmem:[#allocation3 + $0x4c8] sm:$0xff] }
 0x631   : > { %3187 = vmatpush2.msra.mxu0 %v2625_v54  ;;  %3254 = vmatpush2.msra.mxu1 %v2147_v55  ;;  %v2387_v54 = vld [vmem:[#allocation3 + $0x13b0] sm:$0xff]  ;;  %v1909_v55 = vld [vmem:[#allocation3 + $0x4c0] sm:$0xff] }
 0x632   : > { %3188 = vmatprep.subr.mxu0 %v2610_v56  ;;  %3255 = vmatprep.subr.mxu1 %v2132_v57  ;;  %v2372_v56 = vld [vmem:[#allocation3 + $0x1338] sm:$0xff]  ;;  %v1894_v57 = vld [vmem:[#allocation3 + $0x448] sm:$0xff] }
 0x633   : > { %3189 = vmatpush2.msra.mxu0 %v2609_v58  ;;  %3256 = vmatpush2.msra.mxu1 %v2131_v59  ;;  %v2371_v58 = vld [vmem:[#allocation3 + $0x1330] sm:$0xff]  ;;  %v1893_v59 = vld [vmem:[#allocation3 + $0x440] sm:$0xff] }
 0x634   : > { %3190 = vmatprep.subr.mxu0 %v2594_v60  ;;  %3257 = vmatprep.subr.mxu1 %v2116_v61  ;;  %v2356_v60 = vld [vmem:[#allocation3 + $0x12b8] sm:$0xff]  ;;  %v1878_v61 = vld [vmem:[#allocation3 + $0x3c8] sm:$0xff] }
 0x635   : > { %3191 = vmatpush2.msra.mxu0 %v2593_v62  ;;  %3258 = vmatpush2.msra.mxu1 %v2115_v63  ;;  %v2355_v62 = vld [vmem:[#allocation3 + $0x12b0] sm:$0xff]  ;;  %v1877_v63 = vld [vmem:[#allocation3 + $0x3c0] sm:$0xff] }
 0x636   : > { %3192 = vmatprep.subr.mxu0 %v2578_v1  ;;  %3259 = vmatprep.subr.mxu1 %v2100_v2  ;;  %v2340_v1 = vld [vmem:[#allocation3 + $0x1238] sm:$0xff]  ;;  %v1862_v2 = vld [vmem:[#allocation3 + $0x348] sm:$0xff] }
 0x637   : > { %3193 = vmatpush2.msra.mxu0 %v2577_v0  ;;  %3260 = vmatpush2.msra.mxu1 %v2099_v3  ;;  %v2339_v0 = vld [vmem:[#allocation3 + $0x1230] sm:$0xff]  ;;  %v1861_v3 = vld [vmem:[#allocation3 + $0x340] sm:$0xff] }
 0x638   : > { %3194 = vmatprep.subr.mxu0 %v2562_v4  ;;  %3261 = vmatprep.subr.mxu1 %v2084_v5  ;;  %v2324_v4 = vld [vmem:[#allocation3 + $0x11b8] sm:$0xff]  ;;  %v1846_v5 = vld [vmem:[#allocation3 + $0x2c8] sm:$0xff] }
 0x639   : > { %3195 = vmatpush2.msra.mxu0 %v2561_v6  ;;  %3262 = vmatpush2.msra.mxu1 %v2083_v7  ;;  %v2323_v6 = vld [vmem:[#allocation3 + $0x11b0] sm:$0xff]  ;;  %v1845_v7 = vld [vmem:[#allocation3 + $0x2c0] sm:$0xff] }
 0x63a   : > { %3196 = vmatprep.subr.mxu0 %v2546_v8  ;;  %3263 = vmatprep.subr.mxu1 %v2068_v9  ;;  %v2308_v8 = vld [vmem:[#allocation3 + $0x1138] sm:$0xff]  ;;  %v1830_v9 = vld [vmem:[#allocation3 + $0x248] sm:$0xff] }
 0x63b   : > { %3197 = vmatpush2.msra.mxu0 %v2545_v11  ;;  %3264 = vmatpush2.msra.mxu1 %v2067_v14  ;;  %v2307_v11 = vld [vmem:[#allocation3 + $0x1130] sm:$0xff]  ;;  %v1829_v14 = vld [vmem:[#allocation3 + $0x240] sm:$0xff] }
 0x63c   : > { %3198 = vmatprep.subr.mxu0 %v2530_v15  ;;  %3265 = vmatprep.subr.mxu1 %v2052_v17  ;;  %v2292_v15 = vld [vmem:[#allocation3 + $0x10b8] sm:$0xff]  ;;  %v1814_v17 = vld [vmem:[#allocation3 + $0x1c8] sm:$0xff] }
 0x63d   : > { %3199 = vmatpush2.msra.mxu0 %v2529_v18  ;;  %3266 = vmatpush2.msra.mxu1 %v2051_v19  ;;  %v2291_v18 = vld [vmem:[#allocation3 + $0x10b0] sm:$0xff]  ;;  %v1813_v19 = vld [vmem:[#allocation3 + $0x1c0] sm:$0xff] }
 0x63e   : > { %3201 = vmatmul.mubr.f32.vlgmr.msra.gmra.mxu0 %v7175_v25  ;;  %3267 = vmatprep.subr.mxu1 %v2036_v21  ;;  %v2276_v21 = vld [vmem:[#allocation3 + $0x1038] sm:$0xff] }
 0x63f   : > { %3278 = vmatprep.subr.mxu0 %v2516_v22  ;;  %3268 = vmatpush2.msra.mxu1 %v2035_v23  ;;  %v1798_v22 = vld [vmem:[#allocation3 + $0x148] sm:$0xff]  ;;  %v2275_v23 = vld [vmem:[#allocation3 + $0x1030] sm:$0xff] }
 0x640   : > { %3279 = vmatpush1.msra.mxu0 %v2515_v24  ;;  %3342 = vmatprep.mubr.f32.mxu0 %v7178_v29  ;;  %v1797_v24 = vld [vmem:[#allocation3 + $0x140] sm:$0xff] }
 0x641   : > { %3269 = vmatprep.subr.mxu1 %v2020_v26  ;;  %3280 = vmatprep.subr.mxu0 %v2500_v27  ;;  %v2772_v26 = vld [vmem:[#allocation3 + $0x1fb8] sm:$0xff]  ;;  %v1782_v27 = vld [vmem:[#allocation3 + $0xc8] sm:$0xff] }
 0x642   : > { %3270 = vmatpush2.msra.mxu1 %v2019_v20  ;;  %3281 = vmatpush1.msra.mxu0 %v2499_v28  ;;  %v2771_v20 = vld [vmem:[#allocation3 + $0x1fb0] sm:$0xff]  ;;  %v1781_v28 = vld [vmem:[#allocation3 + $0xc0] sm:$0xff] }
 0x643   : > { %3272 = vmatmul.mubr.f32.vlgmr.msra.gmra.mxu1 %v7181_v33  ;;  %3282 = vmatprep.subr.mxu0 %v2484_v30  ;;  %v2756_v30 = vld [vmem:[#allocation3 + $0x1f38] sm:$0xff] }
 0x644   : > { %3349 = vmatprep.subr.mxu1 %v2006_v31  ;;  %3283 = vmatpush1.msra.mxu0 %v2483_v16  ;;  %v1766_v31 = vld [vmem:[#allocation3 + $0x48] sm:$0xff]  ;;  %v2755_v16 = vld [vmem:[#allocation3 + $0x1f30] sm:$0xff] }
 0x645   : > { %3350 = vmatpush1.msra.mxu1 %v2005_v32  ;;  %3413 = vmatprep.mubr.f32.mxu1 %v7184_v37  ;;  %v1765_v32 = vld [vmem:[#allocation3 + $0x40] sm:$0xff] }
 0x646   : > { %3284 = vmatprep.subr.mxu0 %v2468_v34  ;;  %3351 = vmatprep.subr.mxu1 %v1990_v13  ;;  %v2740_v34 = vld [vmem:[#allocation3 + $0x1eb8] sm:$0xff]  ;;  %v2262_v13 = vld [vmem:[#allocation3 + $0xfc8] sm:$0xff] }
 0x647   : > { %3285 = vmatpush1.msra.mxu0 %v2467_v35  ;;  %3352 = vmatpush1.msra.mxu1 %v1989_v36  ;;  %v2739_v35 = vld [vmem:[#allocation3 + $0x1eb0] sm:$0xff]  ;;  %v2261_v36 = vld [vmem:[#allocation3 + $0xfc0] sm:$0xff] }
 0x648   : > { %3286 = vmatprep.subr.mxu0 %v2452_v38  ;;  %3353 = vmatprep.subr.mxu1 %v1974_v12  ;;  %v2724_v38 = vld [vmem:[#allocation3 + $0x1e38] sm:$0xff]  ;;  %v2246_v12 = vld [vmem:[#allocation3 + $0xf48] sm:$0xff] }
 0x649   : > { %3287 = vmatpush1.msra.mxu0 %v2451_v39  ;;  %3354 = vmatpush1.msra.mxu1 %v1973_v40  ;;  %v2723_v39 = vld [vmem:[#allocation3 + $0x1e30] sm:$0xff]  ;;  %v2245_v40 = vld [vmem:[#allocation3 + $0xf40] sm:$0xff] }
 0x64a   : > { %3288 = vmatprep.subr.mxu0 %v2436_v41  ;;  %3355 = vmatprep.subr.mxu1 %v1958_v42  ;;  %v2708_v41 = vld [vmem:[#allocation3 + $0x1db8] sm:$0xff]  ;;  %v2230_v42 = vld [vmem:[#allocation3 + $0xec8] sm:$0xff] }
 0x64b   : > { %3289 = vmatpush1.msra.mxu0 %v2435_v10  ;;  %3356 = vmatpush1.msra.mxu1 %v1957_v43  ;;  %v2707_v10 = vld [vmem:[#allocation3 + $0x1db0] sm:$0xff]  ;;  %v2229_v43 = vld [vmem:[#allocation3 + $0xec0] sm:$0xff] }
 0x64c   : > { %3290 = vmatprep.subr.mxu0 %v2420_v44  ;;  %3357 = vmatprep.subr.mxu1 %v1942_v45  ;;  %v2692_v44 = vld [vmem:[#allocation3 + $0x1d38] sm:$0xff]  ;;  %v2214_v45 = vld [vmem:[#allocation3 + $0xe48] sm:$0xff] }
 0x64d   : > { %3291 = vmatpush1.msra.mxu0 %v2419_v46  ;;  %3358 = vmatpush1.msra.mxu1 %v1941_v47  ;;  %v2691_v46 = vld [vmem:[#allocation3 + $0x1d30] sm:$0xff]  ;;  %v2213_v47 = vld [vmem:[#allocation3 + $0xe40] sm:$0xff] }
 0x64e   : > { %3292 = vmatprep.subr.mxu0 %v2404_v48  ;;  %3359 = vmatprep.subr.mxu1 %v1926_v49  ;;  %v2676_v48 = vld [vmem:[#allocation3 + $0x1cb8] sm:$0xff]  ;;  %v2198_v49 = vld [vmem:[#allocation3 + $0xdc8] sm:$0xff] }
 0x64f   : > { %3293 = vmatpush1.msra.mxu0 %v2403_v50  ;;  %3360 = vmatpush1.msra.mxu1 %v1925_v51  ;;  %v2675_v50 = vld [vmem:[#allocation3 + $0x1cb0] sm:$0xff]  ;;  %v2197_v51 = vld [vmem:[#allocation3 + $0xdc0] sm:$0xff] }
 0x650   : > { %3294 = vmatprep.subr.mxu0 %v2388_v52  ;;  %3361 = vmatprep.subr.mxu1 %v1910_v53  ;;  %v2660_v52 = vld [vmem:[#allocation3 + $0x1c38] sm:$0xff]  ;;  %v2182_v53 = vld [vmem:[#allocation3 + $0xd48] sm:$0xff] }
 0x651   : > { %3295 = vmatpush1.msra.mxu0 %v2387_v54  ;;  %3362 = vmatpush1.msra.mxu1 %v1909_v55  ;;  %v2659_v54 = vld [vmem:[#allocation3 + $0x1c30] sm:$0xff]  ;;  %v2181_v55 = vld [vmem:[#allocation3 + $0xd40] sm:$0xff] }
 0x652   : > { %3296 = vmatprep.subr.mxu0 %v2372_v56  ;;  %3363 = vmatprep.subr.mxu1 %v1894_v57  ;;  %v2644_v56 = vld [vmem:[#allocation3 + $0x1bb8] sm:$0xff]  ;;  %v2166_v57 = vld [vmem:[#allocation3 + $0xcc8] sm:$0xff] }
 0x653   : > { %3297 = vmatpush1.msra.mxu0 %v2371_v58  ;;  %3364 = vmatpush1.msra.mxu1 %v1893_v59  ;;  %v2643_v58 = vld [vmem:[#allocation3 + $0x1bb0] sm:$0xff]  ;;  %v2165_v59 = vld [vmem:[#allocation3 + $0xcc0] sm:$0xff] }
 0x654   : > { %3298 = vmatprep.subr.mxu0 %v2356_v60  ;;  %3365 = vmatprep.subr.mxu1 %v1878_v61  ;;  %v2628_v60 = vld [vmem:[#allocation3 + $0x1b38] sm:$0xff]  ;;  %v2150_v61 = vld [vmem:[#allocation3 + $0xc48] sm:$0xff] }
 0x655   : > { %3299 = vmatpush1.msra.mxu0 %v2355_v62  ;;  %3366 = vmatpush1.msra.mxu1 %v1877_v63  ;;  %v2627_v62 = vld [vmem:[#allocation3 + $0x1b30] sm:$0xff]  ;;  %v2149_v63 = vld [vmem:[#allocation3 + $0xc40] sm:$0xff] }
 0x656   : > { %3300 = vmatprep.subr.mxu0 %v2340_v1  ;;  %3367 = vmatprep.subr.mxu1 %v1862_v2  ;;  %v2612_v1 = vld [vmem:[#allocation3 + $0x1ab8] sm:$0xff]  ;;  %v2134_v2 = vld [vmem:[#allocation3 + $0xbc8] sm:$0xff] }
 0x657   : > { %3301 = vmatpush1.msra.mxu0 %v2339_v0  ;;  %3368 = vmatpush1.msra.mxu1 %v1861_v3  ;;  %v2611_v0 = vld [vmem:[#allocation3 + $0x1ab0] sm:$0xff]  ;;  %v2133_v3 = vld [vmem:[#allocation3 + $0xbc0] sm:$0xff] }
 0x658   : > { %3302 = vmatprep.subr.mxu0 %v2324_v4  ;;  %3369 = vmatprep.subr.mxu1 %v1846_v5  ;;  %v2596_v4 = vld [vmem:[#allocation3 + $0x1a38] sm:$0xff]  ;;  %v2118_v5 = vld [vmem:[#allocation3 + $0xb48] sm:$0xff] }
 0x659   : > { %3303 = vmatpush1.msra.mxu0 %v2323_v6  ;;  %3370 = vmatpush1.msra.mxu1 %v1845_v7  ;;  %v2595_v6 = vld [vmem:[#allocation3 + $0x1a30] sm:$0xff]  ;;  %v2117_v7 = vld [vmem:[#allocation3 + $0xb40] sm:$0xff] }
 0x65a   : > { %3304 = vmatprep.subr.mxu0 %v2308_v8  ;;  %3371 = vmatprep.subr.mxu1 %v1830_v9  ;;  %v2580_v8 = vld [vmem:[#allocation3 + $0x19b8] sm:$0xff]  ;;  %v2102_v9 = vld [vmem:[#allocation3 + $0xac8] sm:$0xff] }
 0x65b   : > { %3305 = vmatpush1.msra.mxu0 %v2307_v11  ;;  %3372 = vmatpush1.msra.mxu1 %v1829_v14  ;;  %v2579_v11 = vld [vmem:[#allocation3 + $0x19b0] sm:$0xff]  ;;  %v2101_v14 = vld [vmem:[#allocation3 + $0xac0] sm:$0xff] }
 0x65c   : > { %3306 = vmatprep.subr.mxu0 %v2292_v15  ;;  %3373 = vmatprep.subr.mxu1 %v1814_v17  ;;  %v2564_v15 = vld [vmem:[#allocation3 + $0x1938] sm:$0xff]  ;;  %v2086_v17 = vld [vmem:[#allocation3 + $0xa48] sm:$0xff] }
 0x65d   : > { %3307 = vmatpush1.msra.mxu0 %v2291_v18  ;;  %3374 = vmatpush1.msra.mxu1 %v1813_v19  ;;  %v2563_v18 = vld [vmem:[#allocation3 + $0x1930] sm:$0xff]  ;;  %v2085_v19 = vld [vmem:[#allocation3 + $0xa40] sm:$0xff] }
 0x65e   : > { %3308 = vmatprep.subr.mxu0 %v2276_v21  ;;  %3375 = vmatprep.subr.mxu1 %v1798_v22  ;;  %v2548_v21 = vld [vmem:[#allocation3 + $0x18b8] sm:$0xff]  ;;  %v2070_v22 = vld [vmem:[#allocation3 + $0x9c8] sm:$0xff] }
 0x65f   : > { %3309 = vmatpush1.msra.mxu0 %v2275_v23  ;;  %3376 = vmatpush1.msra.mxu1 %v1797_v24  ;;  %v2547_v23 = vld [vmem:[#allocation3 + $0x18b0] sm:$0xff]  ;;  %v2069_v24 = vld [vmem:[#allocation3 + $0x9c0] sm:$0xff] }
 0x660   : > { %3310 = vmatprep.subr.mxu0 %v2772_v26  ;;  %3377 = vmatprep.subr.mxu1 %v1782_v27  ;;  %v2847_v26 = vpop.f32.mrf.mxu1  ;;  %v2532_v27 = vld [vmem:[#allocation3 + $0x1838] sm:$0xff] }
 0x661   : > { %3311 = vmatpush2.msra.mxu0 %v2771_v20  ;;  %3378 = vmatpush1.msra.mxu1 %v1781_v28  ;;  %v2054_v20 = vld [vmem:[#allocation3 + $0x948] sm:$0xff] }
 0x662   : > { %3312 = vmatprep.subr.mxu0 %v2756_v30  ;;  %3379 = vmatprep.subr.mxu1 %v1766_v31  ;;  %v2531_v30 = vld [vmem:[#allocation3 + $0x1830] sm:$0xff]  ;;  %v2053_v31 = vld [vmem:[#allocation3 + $0x940] sm:$0xff] }
 0x663   : > { %3313 = vmatpush2.msra.mxu0 %v2755_v16  ;;  %3380 = vmatpush1.msra.mxu1 %v1765_v32  ;;  %v2038_v32 = vld [vmem:[#allocation3 + $0x8c8] sm:$0xff] }
 0x664   : > { %3314 = vmatprep.subr.mxu0 %v2740_v34  ;;  %3381 = vmatprep.subr.mxu1 %v2262_v13  ;;  %v2518_v34 = vld [vmem:[#allocation3 + $0x17c8] sm:$0xff]  ;;  %v2037_v13 = vld [vmem:[#allocation3 + $0x8c0] sm:$0xff] }
 0x665   : > { %3315 = vmatpush2.msra.mxu0 %v2739_v35  ;;  %3382 = vmatpush2.msra.mxu1 %v2261_v36  ;;  %v2517_v35 = vld [vmem:[#allocation3 + $0x17c0] sm:$0xff]  ;;  %v2022_v36 = vld [vmem:[#allocation3 + $0x848] sm:$0xff] }
 0x666   : > { %3316 = vmatprep.subr.mxu0 %v2724_v38  ;;  %3383 = vmatprep.subr.mxu1 %v2246_v12  ;;  %v2502_v38 = vld [vmem:[#allocation3 + $0x1748] sm:$0xff]  ;;  %v2021_v12 = vld [vmem:[#allocation3 + $0x840] sm:$0xff] }
 0x667   : > { %3317 = vmatpush2.msra.mxu0 %v2723_v39  ;;  %3384 = vmatpush2.msra.mxu1 %v2245_v40  ;;  %v2501_v39 = vld [vmem:[#allocation3 + $0x1740] sm:$0xff]  ;;  %v2486_v40 = vld [vmem:[#allocation3 + $0x16c8] sm:$0xff] }
 0x668   : > { %3318 = vmatprep.subr.mxu0 %v2708_v41  ;;  %3385 = vmatprep.subr.mxu1 %v2230_v42  ;;  %v2008_v41 = vld [vmem:[#allocation3 + $0x7d8] sm:$0xff]  ;;  %v2485_v42 = vld [vmem:[#allocation3 + $0x16c0] sm:$0xff] }
 0x669   : > { %3319 = vmatpush2.msra.mxu0 %v2707_v10  ;;  %3386 = vmatpush2.msra.mxu1 %v2229_v43  ;;  %v2007_v10 = vld [vmem:[#allocation3 + $0x7d0] sm:$0xff]  ;;  %v1992_v43 = vld [vmem:[#allocation3 + $0x758] sm:$0xff] }
 0x66a   : > { %3320 = vmatprep.subr.mxu0 %v2692_v44  ;;  %3387 = vmatprep.subr.mxu1 %v2214_v45  ;;  %v2469_v44 = vld [vmem:[#allocation3 + $0x1640] sm:$0xff]  ;;  %v1991_v45 = vld [vmem:[#allocation3 + $0x750] sm:$0xff] }
 0x66b   : > { %3321 = vmatpush2.msra.mxu0 %v2691_v46  ;;  %3388 = vmatpush2.msra.mxu1 %v2213_v47  ;;  %v1976_v46 = vld [vmem:[#allocation3 + $0x6d8] sm:$0xff]  ;;  %v2453_v47 = vld [vmem:[#allocation3 + $0x15c0] sm:$0xff] }
 0x66c   : > { %3322 = vmatprep.subr.mxu0 %v2676_v48  ;;  %3389 = vmatprep.subr.mxu1 %v2198_v49  ;;  %v1975_v48 = vld [vmem:[#allocation3 + $0x6d0] sm:$0xff]  ;;  %v2438_v49 = vld [vmem:[#allocation3 + $0x1548] sm:$0xff] }
 0x66d   : > { %3323 = vmatpush2.msra.mxu0 %v2675_v50  ;;  %3390 = vmatpush2.msra.mxu1 %v2197_v51  ;;  %v2437_v50 = vld [vmem:[#allocation3 + $0x1540] sm:$0xff]  ;;  %v1959_v51 = vld [vmem:[#allocation3 + $0x650] sm:$0xff] }
 0x66e   : > { %3324 = vmatprep.subr.mxu0 %v2660_v52  ;;  %3391 = vmatprep.subr.mxu1 %v2182_v53  ;;  %v2422_v52 = vld [vmem:[#allocation3 + $0x14c8] sm:$0xff]  ;;  %v1944_v53 = vld [vmem:[#allocation3 + $0x5d8] sm:$0xff] }
 0x66f   : > { %3325 = vmatpush2.msra.mxu0 %v2659_v54  ;;  %3392 = vmatpush2.msra.mxu1 %v2181_v55  ;;  %v1943_v54 = vld [vmem:[#allocation3 + $0x5d0] sm:$0xff]  ;;  %v2406_v55 = vld [vmem:[#allocation3 + $0x1448] sm:$0xff] }
 0x670   : > { %3326 = vmatprep.subr.mxu0 %v2644_v56  ;;  %3393 = vmatprep.subr.mxu1 %v2166_v57  ;;  %v1928_v56 = vld [vmem:[#allocation3 + $0x558] sm:$0xff]  ;;  %v2405_v57 = vld [vmem:[#allocation3 + $0x1440] sm:$0xff] }
 0x671   : > { %3327 = vmatpush2.msra.mxu0 %v2643_v58  ;;  %3394 = vmatpush2.msra.mxu1 %v2165_v59  ;;  %v1927_v58 = vld [vmem:[#allocation3 + $0x550] sm:$0xff]  ;;  %v2390_v59 = vld [vmem:[#allocation3 + $0x13c8] sm:$0xff] }
 0x672   : > { %3328 = vmatprep.subr.mxu0 %v2628_v60  ;;  %3395 = vmatprep.subr.mxu1 %v2150_v61  ;;  %v1912_v60 = vld [vmem:[#allocation3 + $0x4d8] sm:$0xff]  ;;  %v2389_v61 = vld [vmem:[#allocation3 + $0x13c0] sm:$0xff] }
 0x673   : > { %3329 = vmatpush2.msra.mxu0 %v2627_v62  ;;  %3396 = vmatpush2.msra.mxu1 %v2149_v63  ;;  %v1911_v62 = vld [vmem:[#allocation3 + $0x4d0] sm:$0xff]  ;;  %v2374_v63 = vld [vmem:[#allocation3 + $0x1348] sm:$0xff] }
 0x674   : > { %3330 = vmatprep.subr.mxu0 %v2612_v1  ;;  %3397 = vmatprep.subr.mxu1 %v2134_v2  ;;  %v1896_v1 = vld [vmem:[#allocation3 + $0x458] sm:$0xff]  ;;  %v2373_v2 = vld [vmem:[#allocation3 + $0x1340] sm:$0xff] }
 0x675   : > { %3331 = vmatpush2.msra.mxu0 %v2611_v0  ;;  %3398 = vmatpush2.msra.mxu1 %v2133_v3  ;;  %v1895_v0 = vld [vmem:[#allocation3 + $0x450] sm:$0xff]  ;;  %v2358_v3 = vld [vmem:[#allocation3 + $0x12c8] sm:$0xff] }
 0x676   : > { %3332 = vmatprep.subr.mxu0 %v2596_v4  ;;  %3399 = vmatprep.subr.mxu1 %v2118_v5  ;;  %v1880_v4 = vld [vmem:[#allocation3 + $0x3d8] sm:$0xff]  ;;  %v2357_v5 = vld [vmem:[#allocation3 + $0x12c0] sm:$0xff] }
 0x677   : > { %3333 = vmatpush2.msra.mxu0 %v2595_v6  ;;  %3400 = vmatpush2.msra.mxu1 %v2117_v7  ;;  %v1879_v6 = vld [vmem:[#allocation3 + $0x3d0] sm:$0xff]  ;;  %v2342_v7 = vld [vmem:[#allocation3 + $0x1248] sm:$0xff] }
 0x678   : > { %3334 = vmatprep.subr.mxu0 %v2580_v8  ;;  %3401 = vmatprep.subr.mxu1 %v2102_v9  ;;  %v1864_v8 = vld [vmem:[#allocation3 + $0x358] sm:$0xff]  ;;  %v2341_v9 = vld [vmem:[#allocation3 + $0x1240] sm:$0xff] }
 0x679   : > { %3335 = vmatpush2.msra.mxu0 %v2579_v11  ;;  %3402 = vmatpush2.msra.mxu1 %v2101_v14  ;;  %v1863_v11 = vld [vmem:[#allocation3 + $0x350] sm:$0xff]  ;;  %v2326_v14 = vld [vmem:[#allocation3 + $0x11c8] sm:$0xff] }
 0x67a   : > { %3336 = vmatprep.subr.mxu0 %v2564_v15  ;;  %3403 = vmatprep.subr.mxu1 %v2086_v17  ;;  %v1848_v15 = vld [vmem:[#allocation3 + $0x2d8] sm:$0xff]  ;;  %v2325_v17 = vld [vmem:[#allocation3 + $0x11c0] sm:$0xff] }
 0x67b   : > { %3337 = vmatpush2.msra.mxu0 %v2563_v18  ;;  %3404 = vmatpush2.msra.mxu1 %v2085_v19  ;;  %v2918_v28 = vpop.f32.mrf.mxu0  ;;  %v1847_v18 = vld [vmem:[#allocation3 + $0x2d0] sm:$0xff]  ;;  %v2310_v19 = vld [vmem:[#allocation3 + $0x1148] sm:$0xff] }
 0x67c   : > { %3338 = vmatprep.subr.mxu0 %v2548_v21  ;;  %3405 = vmatprep.subr.mxu1 %v2070_v22  ;;  %v7187_v16 = vadd.f32 %v2918_v28, %v2847_v26  ;;  %v1832_v21 = vld [vmem:[#allocation3 + $0x258] sm:$0xff]  ;;  %v2309_v22 = vld [vmem:[#allocation3 + $0x1140] sm:$0xff]  ;;  %v2278_v28 = vld [vmem:[#allocation3 + $0x1048] sm:$0xff] }
 0x67d   : > { %3339 = vmatpush2.msra.mxu0 %v2547_v23  ;;  %3406 = vmatpush2.msra.mxu1 %v2069_v24  ;;  %v1831_v23 = vld [vmem:[#allocation3 + $0x250] sm:$0xff]  ;;  %v2294_v24 = vld [vmem:[#allocation3 + $0x10c8] sm:$0xff]  ;;  %v1816_v26 = vld [vmem:[#allocation3 + $0x1d8] sm:$0xff] }
 0x67e   : > { %3340 = vmatprep.subr.mxu0 %v2532_v27  ;;  %3407 = vmatprep.subr.mxu1 %v2054_v20  ;;  %v2293_v27 = vld [vmem:[#allocation3 + $0x10c0] sm:$0xff]  ;;  %v1815_v20 = vld [vmem:[#allocation3 + $0x1d0] sm:$0xff] }
 0x67f   : > { %3341 = vmatpush2.msra.mxu0 %v2531_v30  ;;  %3408 = vmatpush2.msra.mxu1 %v2053_v31  ;;  %v1800_v30 = vld [vmem:[#allocation3 + $0x158] sm:$0xff]  ;;  %v2277_v31 = vld [vmem:[#allocation3 + $0x1040] sm:$0xff] }
 0x680   : > { %3343 = vmatmul.mubr.f32.vlgmr.msra.gmra.mxu0 %v7175_v25  ;;  %3409 = vmatprep.subr.mxu1 %v2038_v32  ;;  %v2470_v25 = vld [vmem:[#allocation3 + $0x1648] sm:$0xff]  ;;  %v1799_v32 = vld [vmem:[#allocation3 + $0x150] sm:$0xff] }
 0x681   : > { %3420 = vmatprep.subr.mxu0 %v2518_v34  ;;  %3410 = vmatpush2.msra.mxu1 %v2037_v13  ;;  %v2774_v34 = vld [vmem:[#allocation3 + $0x1fc8] sm:$0xff]  ;;  %v1784_v13 = vld [vmem:[#allocation3 + $0xd8] sm:$0xff] }
 0x682   : > { %3421 = vmatpush1.msra.mxu0 %v2517_v35  ;;  %3484 = vmatprep.mubr.f32.mxu0 %v7178_v29  ;;  %v2454_v29 = vld [vmem:[#allocation3 + $0x15c8] sm:$0xff]  ;;  %v2773_v35 = vld [vmem:[#allocation3 + $0x1fc0] sm:$0xff] }
 0x683   : > { %3411 = vmatprep.subr.mxu1 %v2022_v36  ;;  %3422 = vmatprep.subr.mxu0 %v2502_v38  ;;  %v1783_v36 = vld [vmem:[#allocation3 + $0xd0] sm:$0xff]  ;;  %v2758_v38 = vld [vmem:[#allocation3 + $0x1f48] sm:$0xff] }
 0x684   : > { %3412 = vmatpush2.msra.mxu1 %v2021_v12  ;;  %3423 = vmatpush1.msra.mxu0 %v2501_v39  ;;  %v1768_v12 = vld [vmem:[#allocation3 + $0x58] sm:$0xff]  ;;  %v2757_v39 = vld [vmem:[#allocation3 + $0x1f40] sm:$0xff] }
 0x685   : > { %3414 = vmatmul.mubr.f32.vlgmr.msra.gmra.mxu1 %v7181_v33  ;;  %3424 = vmatprep.subr.mxu0 %v2486_v40  ;;  %v1960_v33 = vld [vmem:[#allocation3 + $0x658] sm:$0xff]  ;;  %v1767_v40 = vld [vmem:[#allocation3 + $0x50] sm:$0xff] }
 0x686   : > { %3491 = vmatprep.subr.mxu1 %v2008_v41  ;;  %3425 = vmatpush1.msra.mxu0 %v2485_v42  ;;  %v2742_v41 = vld [vmem:[#allocation3 + $0x1ec8] sm:$0xff]  ;;  %v2264_v42 = vld [vmem:[#allocation3 + $0xfd8] sm:$0xff] }
 0x687   : > { %3492 = vmatpush1.msra.mxu1 %v2007_v10  ;;  %3555 = vmatprep.mubr.f32.mxu1 %v7184_v37  ;;  %v2421_v37 = vld [vmem:[#allocation3 + $0x14c0] sm:$0xff] }
 0x688   : > { %3426 = vmatprep.subr.mxu0 %v2470_v25  ;;  %3493 = vmatprep.subr.mxu1 %v1992_v43  ;;  %v2741_v10 = vld [vmem:[#allocation3 + $0x1ec0] sm:$0xff]  ;;  %v2263_v25 = vld [vmem:[#allocation3 + $0xfd0] sm:$0xff]  ;;  %v2726_v43 = vld [vmem:[#allocation3 + $0x1e48] sm:$0xff] }
 0x689   : > { %3427 = vmatpush1.msra.mxu0 %v2469_v44  ;;  %3494 = vmatpush1.msra.mxu1 %v1991_v45  ;;  %v2248_v44 = vld [vmem:[#allocation3 + $0xf58] sm:$0xff]  ;;  %v2725_v45 = vld [vmem:[#allocation3 + $0x1e40] sm:$0xff] }
 0x68a   : > { %3428 = vmatprep.subr.mxu0 %v2454_v29  ;;  %3495 = vmatprep.subr.mxu1 %v1976_v46  ;;  %v2247_v29 = vld [vmem:[#allocation3 + $0xf50] sm:$0xff]  ;;  %v2710_v46 = vld [vmem:[#allocation3 + $0x1dc8] sm:$0xff] }
 0x68b   : > { %3429 = vmatpush1.msra.mxu0 %v2453_v47  ;;  %3496 = vmatpush1.msra.mxu1 %v1975_v48  ;;  %v2232_v47 = vld [vmem:[#allocation3 + $0xed8] sm:$0xff]  ;;  %v2709_v48 = vld [vmem:[#allocation3 + $0x1dc0] sm:$0xff] }
 0x68c   : > { %3430 = vmatprep.subr.mxu0 %v2438_v49  ;;  %3497 = vmatprep.subr.mxu1 %v1960_v33  ;;  %v2231_v49 = vld [vmem:[#allocation3 + $0xed0] sm:$0xff]  ;;  %v2694_v33 = vld [vmem:[#allocation3 + $0x1d48] sm:$0xff] }
 0x68d   : > { %3431 = vmatpush1.msra.mxu0 %v2437_v50  ;;  %3498 = vmatpush1.msra.mxu1 %v1959_v51  ;;  %v2216_v50 = vld [vmem:[#allocation3 + $0xe58] sm:$0xff]  ;;  %v2693_v51 = vld [vmem:[#allocation3 + $0x1d40] sm:$0xff] }
 0x68e   : > { %3432 = vmatprep.subr.mxu0 %v2422_v52  ;;  %3499 = vmatprep.subr.mxu1 %v1944_v53  ;;  %v2215_v52 = vld [vmem:[#allocation3 + $0xe50] sm:$0xff]  ;;  %v2678_v53 = vld [vmem:[#allocation3 + $0x1cc8] sm:$0xff] }
 0x68f   : > { %3433 = vmatpush1.msra.mxu0 %v2421_v37  ;;  %3500 = vmatpush1.msra.mxu1 %v1943_v54  ;;  %v2200_v37 = vld [vmem:[#allocation3 + $0xdd8] sm:$0xff]  ;;  %v2677_v54 = vld [vmem:[#allocation3 + $0x1cc0] sm:$0xff] }
 0x690   : > { %3434 = vmatprep.subr.mxu0 %v2406_v55  ;;  %3501 = vmatprep.subr.mxu1 %v1928_v56  ;;  %v2199_v55 = vld [vmem:[#allocation3 + $0xdd0] sm:$0xff]  ;;  %v2662_v56 = vld [vmem:[#allocation3 + $0x1c48] sm:$0xff] }
 0x691   : > { %3435 = vmatpush1.msra.mxu0 %v2405_v57  ;;  %3502 = vmatpush1.msra.mxu1 %v1927_v58  ;;  %v2184_v57 = vld [vmem:[#allocation3 + $0xd58] sm:$0xff]  ;;  %v2661_v58 = vld [vmem:[#allocation3 + $0x1c40] sm:$0xff] }
 0x692   : > { %3436 = vmatprep.subr.mxu0 %v2390_v59  ;;  %3503 = vmatprep.subr.mxu1 %v1912_v60  ;;  %v2183_v59 = vld [vmem:[#allocation3 + $0xd50] sm:$0xff]  ;;  %v2646_v60 = vld [vmem:[#allocation3 + $0x1bc8] sm:$0xff] }
 0x693   : > { %3437 = vmatpush1.msra.mxu0 %v2389_v61  ;;  %3504 = vmatpush1.msra.mxu1 %v1911_v62  ;;  %v2168_v61 = vld [vmem:[#allocation3 + $0xcd8] sm:$0xff]  ;;  %v2645_v62 = vld [vmem:[#allocation3 + $0x1bc0] sm:$0xff] }
 0x694   : > { %3438 = vmatprep.subr.mxu0 %v2374_v63  ;;  %3505 = vmatprep.subr.mxu1 %v1896_v1  ;;  %v2167_v63 = vld [vmem:[#allocation3 + $0xcd0] sm:$0xff]  ;;  %v2630_v1 = vld [vmem:[#allocation3 + $0x1b48] sm:$0xff] }
 0x695   : > { %3439 = vmatpush1.msra.mxu0 %v2373_v2  ;;  %3506 = vmatpush1.msra.mxu1 %v1895_v0  ;;  %v2152_v2 = vld [vmem:[#allocation3 + $0xc58] sm:$0xff]  ;;  %v2629_v0 = vld [vmem:[#allocation3 + $0x1b40] sm:$0xff] }
 0x696   : > { %3440 = vmatprep.subr.mxu0 %v2358_v3  ;;  %3507 = vmatprep.subr.mxu1 %v1880_v4  ;;  %v2151_v3 = vld [vmem:[#allocation3 + $0xc50] sm:$0xff]  ;;  %v2614_v4 = vld [vmem:[#allocation3 + $0x1ac8] sm:$0xff] }
 0x697   : > { %3441 = vmatpush1.msra.mxu0 %v2357_v5  ;;  %3508 = vmatpush1.msra.mxu1 %v1879_v6  ;;  %v2136_v5 = vld [vmem:[#allocation3 + $0xbd8] sm:$0xff]  ;;  %v2613_v6 = vld [vmem:[#allocation3 + $0x1ac0] sm:$0xff] }
 0x698   : > { %3442 = vmatprep.subr.mxu0 %v2342_v7  ;;  %3509 = vmatprep.subr.mxu1 %v1864_v8  ;;  %v2135_v7 = vld [vmem:[#allocation3 + $0xbd0] sm:$0xff]  ;;  %v2598_v8 = vld [vmem:[#allocation3 + $0x1a48] sm:$0xff] }
 0x699   : > { %3443 = vmatpush1.msra.mxu0 %v2341_v9  ;;  %3510 = vmatpush1.msra.mxu1 %v1863_v11  ;;  %v2120_v9 = vld [vmem:[#allocation3 + $0xb58] sm:$0xff]  ;;  %v2597_v11 = vld [vmem:[#allocation3 + $0x1a40] sm:$0xff] }
 0x69a   : > { %3444 = vmatprep.subr.mxu0 %v2326_v14  ;;  %3511 = vmatprep.subr.mxu1 %v1848_v15  ;;  %v2119_v14 = vld [vmem:[#allocation3 + $0xb50] sm:$0xff]  ;;  %v2582_v15 = vld [vmem:[#allocation3 + $0x19c8] sm:$0xff] }
 0x69b   : > { %3445 = vmatpush1.msra.mxu0 %v2325_v17  ;;  %3512 = vmatpush1.msra.mxu1 %v1847_v18  ;;  %v2104_v17 = vld [vmem:[#allocation3 + $0xad8] sm:$0xff]  ;;  %v2581_v18 = vld [vmem:[#allocation3 + $0x19c0] sm:$0xff] }
 0x69c   : > { %3446 = vmatprep.subr.mxu0 %v2310_v19  ;;  %3513 = vmatprep.subr.mxu1 %v1832_v21  ;;  %v2103_v19 = vld [vmem:[#allocation3 + $0xad0] sm:$0xff]  ;;  %v2566_v21 = vld [vmem:[#allocation3 + $0x1948] sm:$0xff] }
 0x69d   : > { %3447 = vmatpush1.msra.mxu0 %v2309_v22  ;;  %3514 = vmatpush1.msra.mxu1 %v1831_v23  ;;  %v2088_v22 = vld [vmem:[#allocation3 + $0xa58] sm:$0xff]  ;;  %v7193_v23 = vpop.f32.mrf.mxu1 }
 0x69e   : > { %3448 = vmatprep.subr.mxu0 %v2294_v24  ;;  %3515 = vmatprep.subr.mxu1 %v1816_v26  ;;  %v7195_v24 = vpop.f32.mrf.mxu0  ;;  %v2565_v26 = vld [vmem:[#allocation3 + $0x1940] sm:$0xff] }
 0x69f   : > { %3449 = vmatpush1.msra.mxu0 %v2293_v27  ;;  %3516 = vmatpush1.msra.mxu1 %v1815_v20  ;;  %v2087_v27 = vld [vmem:[#allocation3 + $0xa50] sm:$0xff]  ;;  %v2550_v20 = vld [vmem:[#allocation3 + $0x18c8] sm:$0xff] }
 0x6a0   : > { %3450 = vmatprep.subr.mxu0 %v2278_v28  ;;  %3517 = vmatprep.subr.mxu1 %v1800_v30  ;;  %v2072_v28 = vld [vmem:[#allocation3 + $0x9d8] sm:$0xff]  ;;  %v2989_v30 = vpop.f32.mrf.mxu1 }
 0x6a1   : > { %3451 = vmatpush1.msra.mxu0 %v2277_v31  ;;  %3518 = vmatpush1.msra.mxu1 %v1799_v32  ;;  %v2549_v31 = vld [vmem:[#allocation3 + $0x18c0] sm:$0xff]  ;;  %v2071_v32 = vld [vmem:[#allocation3 + $0x9d0] sm:$0xff] }
 0x6a2   : > { %3452 = vmatprep.subr.mxu0 %v2774_v34  ;;  %3519 = vmatprep.subr.mxu1 %v1784_v13  ;;  %v2534_v13 = vld [vmem:[#allocation3 + $0x1848] sm:$0xff] }
 0x6a3   : > { %3453 = vmatpush2.msra.mxu0 %v2773_v35  ;;  %3520 = vmatpush1.msra.mxu1 %v1783_v36  ;;  %v2056_v35 = vld [vmem:[#allocation3 + $0x958] sm:$0xff] }
 0x6a4   : > { %3454 = vmatprep.subr.mxu0 %v2758_v38  ;;  %3521 = vmatprep.subr.mxu1 %v1768_v12  ;;  %v2533_v38 = vld [vmem:[#allocation3 + $0x1840] sm:$0xff]  ;;  %v2055_v12 = vld [vmem:[#allocation3 + $0x950] sm:$0xff] }
 0x6a5   : > { %3455 = vmatpush2.msra.mxu0 %v2757_v39  ;;  %3522 = vmatpush1.msra.mxu1 %v1767_v40  ;;  %v2040_v39 = vld [vmem:[#allocation3 + $0x8d8] sm:$0xff] }
 0x6a6   : > { %3456 = vmatprep.subr.mxu0 %v2742_v41  ;;  %3523 = vmatprep.subr.mxu1 %v2264_v42  ;;  %v2520_v40 = vld [vmem:[#allocation3 + $0x17d8] sm:$0xff]  ;;  %v2039_v41 = vld [vmem:[#allocation3 + $0x8d0] sm:$0xff] }
 0x6a7   : > { %3457 = vmatpush2.msra.mxu0 %v2741_v10  ;;  %3524 = vmatpush2.msra.mxu1 %v2263_v25  ;;  %v2519_v42 = vld [vmem:[#allocation3 + $0x17d0] sm:$0xff]  ;;  %v2024_v25 = vld [vmem:[#allocation3 + $0x858] sm:$0xff] }
 0x6a8   : > { %3458 = vmatprep.subr.mxu0 %v2726_v43  ;;  %3525 = vmatprep.subr.mxu1 %v2248_v44  ;;  %v7199_v10 = vld [vmem:[#allocation2 + $0x10] sm:$0xff]  ;;  %v2504_v43 = vld [vmem:[#allocation3 + $0x1758] sm:$0xff] }
 0x6a9   : > { %3459 = vmatpush2.msra.mxu0 %v2725_v45  ;;  %3526 = vmatpush2.msra.mxu1 %v2247_v29  ;;  %v2023_v44 = vld [vmem:[#allocation3 + $0x850] sm:$0xff]  ;;  %v7202_v29 = vld [vmem:[#allocation2 + $0x18] sm:$0xff] }
 0x6aa   : > { %3460 = vmatprep.subr.mxu0 %v2710_v46  ;;  %3527 = vmatprep.subr.mxu1 %v2232_v47  ;;  %v2503_v45 = vld [vmem:[#allocation3 + $0x1750] sm:$0xff]  ;;  %v2488_v46 = vld [vmem:[#allocation3 + $0x16d8] sm:$0xff]  ;;  %v2010_v47 = vld [vmem:[#allocation3 + $0x7e8] sm:$0xff] }
 0x6ab   : > { %3461 = vmatpush2.msra.mxu0 %v2709_v48  ;;  %3528 = vmatpush2.msra.mxu1 %v2231_v49  ;;  %v2487_v48 = vld [vmem:[#allocation3 + $0x16d0] sm:$0xff]  ;;  %v2009_v49 = vld [vmem:[#allocation3 + $0x7e0] sm:$0xff] }
 0x6ac   : > { %3462 = vmatprep.subr.mxu0 %v2694_v33  ;;  %3529 = vmatprep.subr.mxu1 %v2216_v50  ;;  %v7205_v33 = vld [vmem:[#allocation2] sm:$0xff]  ;;  %v2472_v50 = vld [vmem:[#allocation3 + $0x1658] sm:$0xff] }
 0x6ad   : > { %3463 = vmatpush2.msra.mxu0 %v2693_v51  ;;  %3530 = vmatpush2.msra.mxu1 %v2215_v52  ;;  %v1994_v51 = vld [vmem:[#allocation3 + $0x768] sm:$0xff]  ;;  %v2471_v52 = vld [vmem:[#allocation3 + $0x1650] sm:$0xff] }
 0x6ae   : > { %3464 = vmatprep.subr.mxu0 %v2678_v53  ;;  %3531 = vmatprep.subr.mxu1 %v2200_v37  ;;  %v1993_v53 = vld [vmem:[#allocation3 + $0x760] sm:$0xff]  ;;  %v7208_v37 = vld [vmem:[#allocation2 + $0x8] sm:$0xff] }
 0x6af   : > { %3465 = vmatpush2.msra.mxu0 %v2677_v54  ;;  %3532 = vmatpush2.msra.mxu1 %v2199_v55  ;;  %v2456_v54 = vld [vmem:[#allocation3 + $0x15d8] sm:$0xff]  ;;  %v1978_v55 = vld [vmem:[#allocation3 + $0x6e8] sm:$0xff] }
 0x6b0   : > { %3466 = vmatprep.subr.mxu0 %v2662_v56  ;;  %3533 = vmatprep.subr.mxu1 %v2184_v57  ;;  %v2455_v56 = vld [vmem:[#allocation3 + $0x15d0] sm:$0xff]  ;;  %v1977_v57 = vld [vmem:[#allocation3 + $0x6e0] sm:$0xff] }
 0x6b1   : > { %3467 = vmatpush2.msra.mxu0 %v2661_v58  ;;  %3534 = vmatpush2.msra.mxu1 %v2183_v59  ;;  %v2440_v58 = vld [vmem:[#allocation3 + $0x1558] sm:$0xff]  ;;  %v1962_v59 = vld [vmem:[#allocation3 + $0x668] sm:$0xff] }
 0x6b2   : > { %3468 = vmatprep.subr.mxu0 %v2646_v60  ;;  %3535 = vmatprep.subr.mxu1 %v2168_v61  ;;  %v2439_v60 = vld [vmem:[#allocation3 + $0x1550] sm:$0xff]  ;;  %v1961_v61 = vld [vmem:[#allocation3 + $0x660] sm:$0xff] }
 0x6b3   : > { %3469 = vmatpush2.msra.mxu0 %v2645_v62  ;;  %3536 = vmatpush2.msra.mxu1 %v2167_v63  ;;  %v2424_v62 = vld [vmem:[#allocation3 + $0x14d8] sm:$0xff]  ;;  %v1946_v63 = vld [vmem:[#allocation3 + $0x5e8] sm:$0xff] }
 0x6b4   : > { %3470 = vmatprep.subr.mxu0 %v2630_v1  ;;  %3537 = vmatprep.subr.mxu1 %v2152_v2  ;;  %v2423_v1 = vld [vmem:[#allocation3 + $0x14d0] sm:$0xff]  ;;  %v1945_v2 = vld [vmem:[#allocation3 + $0x5e0] sm:$0xff] }
 0x6b5   : > { %3471 = vmatpush2.msra.mxu0 %v2629_v0  ;;  %3538 = vmatpush2.msra.mxu1 %v2151_v3  ;;  %v2408_v0 = vld [vmem:[#allocation3 + $0x1458] sm:$0xff]  ;;  %v1930_v3 = vld [vmem:[#allocation3 + $0x568] sm:$0xff] }
 0x6b6   : > { %3472 = vmatprep.subr.mxu0 %v2614_v4  ;;  %3539 = vmatprep.subr.mxu1 %v2136_v5  ;;  %v2407_v4 = vld [vmem:[#allocation3 + $0x1450] sm:$0xff]  ;;  %v1929_v5 = vld [vmem:[#allocation3 + $0x560] sm:$0xff] }
 0x6b7   : > { %3473 = vmatpush2.msra.mxu0 %v2613_v6  ;;  %3540 = vmatpush2.msra.mxu1 %v2135_v7  ;;  %v2392_v6 = vld [vmem:[#allocation3 + $0x13d8] sm:$0xff]  ;;  %v1914_v7 = vld [vmem:[#allocation3 + $0x4e8] sm:$0xff] }
 0x6b8   : > { %3474 = vmatprep.subr.mxu0 %v2598_v8  ;;  %3541 = vmatprep.subr.mxu1 %v2120_v9  ;;  %v2391_v8 = vld [vmem:[#allocation3 + $0x13d0] sm:$0xff]  ;;  %v1913_v9 = vld [vmem:[#allocation3 + $0x4e0] sm:$0xff] }
 0x6b9   : > { %3475 = vmatpush2.msra.mxu0 %v2597_v11  ;;  %3542 = vmatpush2.msra.mxu1 %v2119_v14  ;;  %v2376_v11 = vld [vmem:[#allocation3 + $0x1358] sm:$0xff]  ;;  %v1898_v14 = vld [vmem:[#allocation3 + $0x468] sm:$0xff] }
 0x6ba   : > { %3476 = vmatprep.subr.mxu0 %v2582_v15  ;;  %3543 = vmatprep.subr.mxu1 %v2104_v17  ;;  %v2375_v15 = vld [vmem:[#allocation3 + $0x1350] sm:$0xff]  ;;  %v1897_v17 = vld [vmem:[#allocation3 + $0x460] sm:$0xff] }
 0x6bb   : > { %3477 = vmatpush2.msra.mxu0 %v2581_v18  ;;  %3544 = vmatpush2.msra.mxu1 %v2103_v19  ;;  %v2360_v18 = vld [vmem:[#allocation3 + $0x12d8] sm:$0xff]  ;;  %v1882_v19 = vld [vmem:[#allocation3 + $0x3e8] sm:$0xff] }
 0x6bc   : > { %3478 = vmatprep.subr.mxu0 %v2566_v21  ;;  %3545 = vmatprep.subr.mxu1 %v2088_v22  ;;  %v3060_v34 = vpop.f32.mrf.mxu0  ;;  %v2359_v21 = vld [vmem:[#allocation3 + $0x12d0] sm:$0xff]  ;;  %v1881_v22 = vld [vmem:[#allocation3 + $0x3e0] sm:$0xff] }
 0x6bd   : > { %3479 = vmatpush2.msra.mxu0 %v2565_v26  ;;  %3546 = vmatpush2.msra.mxu1 %v2087_v27  ;;  %v7197_v36 = vadd.f32 %v3060_v34, %v2989_v30  ;;  %v2344_v26 = vld [vmem:[#allocation3 + $0x1258] sm:$0xff]  ;;  %v1866_v27 = vld [vmem:[#allocation3 + $0x368] sm:$0xff]  ;;  %v1849_v34 = vld [vmem:[#allocation3 + $0x2e0] sm:$0xff] }
 0x6be   : > { %3480 = vmatprep.subr.mxu0 %v2550_v20  ;;  %3547 = vmatprep.subr.mxu1 %v2072_v28  ;;  %v2343_v20 = vld [vmem:[#allocation3 + $0x1250] sm:$0xff]  ;;  %v1865_v28 = vld [vmem:[#allocation3 + $0x360] sm:$0xff]  ;;  %v2328_v30 = vld [vmem:[#allocation3 + $0x11d8] sm:$0xff] }
 0x6bf   : > { %3481 = vmatpush2.msra.mxu0 %v2549_v31  ;;  %3548 = vmatpush2.msra.mxu1 %v2071_v32  ;;  %v1850_v31 = vld [vmem:[#allocation3 + $0x2e8] sm:$0xff]  ;;  %v2327_v32 = vld [vmem:[#allocation3 + $0x11d0] sm:$0xff] }
 0x6c0   : > { %3482 = vmatprep.subr.mxu0 %v2534_v13  ;;  %3549 = vmatprep.subr.mxu1 %v2056_v35  ;;  %v2312_v13 = vld [vmem:[#allocation3 + $0x1158] sm:$0xff]  ;;  %v1834_v35 = vld [vmem:[#allocation3 + $0x268] sm:$0xff] }
 0x6c1   : > { %3483 = vmatpush2.msra.mxu0 %v2533_v38  ;;  %3550 = vmatpush2.msra.mxu1 %v2055_v12  ;;  %v2311_v38 = vld [vmem:[#allocation3 + $0x1150] sm:$0xff]  ;;  %v1833_v12 = vld [vmem:[#allocation3 + $0x260] sm:$0xff] }
 0x6c2   : > { %3485 = vmatmul.mubr.f32.vlgmr.msra.gmra.mxu0 %v7199_v10  ;;  %3551 = vmatprep.subr.mxu1 %v2040_v39  ;;  %v2296_v39 = vld [vmem:[#allocation3 + $0x10d8] sm:$0xff] }
 0x6c3   : > { %3562 = vmatprep.subr.mxu0 %v2520_v40  ;;  %3552 = vmatpush2.msra.mxu1 %v2039_v41  ;;  %v1818_v40 = vld [vmem:[#allocation3 + $0x1e8] sm:$0xff]  ;;  %v2295_v41 = vld [vmem:[#allocation3 + $0x10d0] sm:$0xff] }
 0x6c4   : > { %3563 = vmatpush1.msra.mxu0 %v2519_v42  ;;  %3626 = vmatprep.mubr.f32.mxu0 %v7202_v29  ;;  %v1817_v42 = vld [vmem:[#allocation3 + $0x1e0] sm:$0xff] }
 0x6c5   : > { %3553 = vmatprep.subr.mxu1 %v2024_v25  ;;  %3564 = vmatprep.subr.mxu0 %v2504_v43  ;;  %v2280_v25 = vld [vmem:[#allocation3 + $0x1058] sm:$0xff]  ;;  %v1802_v43 = vld [vmem:[#allocation3 + $0x168] sm:$0xff] }
 0x6c6   : > { %3554 = vmatpush2.msra.mxu1 %v2023_v44  ;;  %3565 = vmatpush1.msra.mxu0 %v2503_v45  ;;  %v2279_v44 = vld [vmem:[#allocation3 + $0x1050] sm:$0xff]  ;;  %v1801_v45 = vld [vmem:[#allocation3 + $0x160] sm:$0xff] }
 0x6c7   : > { %3556 = vmatmul.mubr.f32.vlgmr.msra.gmra.mxu1 %v7205_v33  ;;  %3566 = vmatprep.subr.mxu0 %v2488_v46  ;;  %v2776_v46 = vld [vmem:[#allocation3 + $0x1fd8] sm:$0xff] }
 0x6c8   : > { %3633 = vmatprep.subr.mxu1 %v2010_v47  ;;  %3567 = vmatpush1.msra.mxu0 %v2487_v48  ;;  %v1786_v47 = vld [vmem:[#allocation3 + $0xe8] sm:$0xff]  ;;  %v2775_v48 = vld [vmem:[#allocation3 + $0x1fd0] sm:$0xff] }
 0x6c9   : > { %3634 = vmatpush1.msra.mxu1 %v2009_v49  ;;  %3697 = vmatprep.mubr.f32.mxu1 %v7208_v37  ;;  %v1785_v49 = vld [vmem:[#allocation3 + $0xe0] sm:$0xff] }
 0x6ca   : > { %3568 = vmatprep.subr.mxu0 %v2472_v50  ;;  %3635 = vmatprep.subr.mxu1 %v1994_v51  ;;  %v2760_v50 = vld [vmem:[#allocation3 + $0x1f58] sm:$0xff]  ;;  %v1770_v51 = vld [vmem:[#allocation3 + $0x68] sm:$0xff] }
 0x6cb   : > { %3569 = vmatpush1.msra.mxu0 %v2471_v52  ;;  %3636 = vmatpush1.msra.mxu1 %v1993_v53  ;;  %v2759_v52 = vld [vmem:[#allocation3 + $0x1f50] sm:$0xff]  ;;  %v1769_v53 = vld [vmem:[#allocation3 + $0x60] sm:$0xff] }
 0x6cc   : > { %3570 = vmatprep.subr.mxu0 %v2456_v54  ;;  %3637 = vmatprep.subr.mxu1 %v1978_v55  ;;  %v2744_v54 = vld [vmem:[#allocation3 + $0x1ed8] sm:$0xff]  ;;  %v2266_v55 = vld [vmem:[#allocation3 + $0xfe8] sm:$0xff] }
 0x6cd   : > { %3571 = vmatpush1.msra.mxu0 %v2455_v56  ;;  %3638 = vmatpush1.msra.mxu1 %v1977_v57  ;;  %v2743_v56 = vld [vmem:[#allocation3 + $0x1ed0] sm:$0xff]  ;;  %v2265_v57 = vld [vmem:[#allocation3 + $0xfe0] sm:$0xff] }
 0x6ce   : > { %3572 = vmatprep.subr.mxu0 %v2440_v58  ;;  %3639 = vmatprep.subr.mxu1 %v1962_v59  ;;  %v2728_v58 = vld [vmem:[#allocation3 + $0x1e58] sm:$0xff]  ;;  %v2250_v59 = vld [vmem:[#allocation3 + $0xf68] sm:$0xff] }
 0x6cf   : > { %3573 = vmatpush1.msra.mxu0 %v2439_v60  ;;  %3640 = vmatpush1.msra.mxu1 %v1961_v61  ;;  %v2727_v60 = vld [vmem:[#allocation3 + $0x1e50] sm:$0xff]  ;;  %v2249_v61 = vld [vmem:[#allocation3 + $0xf60] sm:$0xff] }
 0x6d0   : > { %3574 = vmatprep.subr.mxu0 %v2424_v62  ;;  %3641 = vmatprep.subr.mxu1 %v1946_v63  ;;  %v2712_v62 = vld [vmem:[#allocation3 + $0x1dd8] sm:$0xff]  ;;  %v2234_v63 = vld [vmem:[#allocation3 + $0xee8] sm:$0xff] }
 0x6d1   : > { %3575 = vmatpush1.msra.mxu0 %v2423_v1  ;;  %3642 = vmatpush1.msra.mxu1 %v1945_v2  ;;  %v2711_v1 = vld [vmem:[#allocation3 + $0x1dd0] sm:$0xff]  ;;  %v2233_v2 = vld [vmem:[#allocation3 + $0xee0] sm:$0xff] }
 0x6d2   : > { %3576 = vmatprep.subr.mxu0 %v2408_v0  ;;  %3643 = vmatprep.subr.mxu1 %v1930_v3  ;;  %v2696_v0 = vld [vmem:[#allocation3 + $0x1d58] sm:$0xff]  ;;  %v2218_v3 = vld [vmem:[#allocation3 + $0xe68] sm:$0xff] }
 0x6d3   : > { %3577 = vmatpush1.msra.mxu0 %v2407_v4  ;;  %3644 = vmatpush1.msra.mxu1 %v1929_v5  ;;  %v2695_v4 = vld [vmem:[#allocation3 + $0x1d50] sm:$0xff]  ;;  %v2217_v5 = vld [vmem:[#allocation3 + $0xe60] sm:$0xff] }
 0x6d4   : > { %3578 = vmatprep.subr.mxu0 %v2392_v6  ;;  %3645 = vmatprep.subr.mxu1 %v1914_v7  ;;  %v2680_v6 = vld [vmem:[#allocation3 + $0x1cd8] sm:$0xff]  ;;  %v2202_v7 = vld [vmem:[#allocation3 + $0xde8] sm:$0xff] }
 0x6d5   : > { %3579 = vmatpush1.msra.mxu0 %v2391_v8  ;;  %3646 = vmatpush1.msra.mxu1 %v1913_v9  ;;  %v2679_v8 = vld [vmem:[#allocation3 + $0x1cd0] sm:$0xff]  ;;  %v2201_v9 = vld [vmem:[#allocation3 + $0xde0] sm:$0xff] }
 0x6d6   : > { %3580 = vmatprep.subr.mxu0 %v2376_v11  ;;  %3647 = vmatprep.subr.mxu1 %v1898_v14  ;;  %v2664_v11 = vld [vmem:[#allocation3 + $0x1c58] sm:$0xff]  ;;  %v2186_v14 = vld [vmem:[#allocation3 + $0xd68] sm:$0xff] }
 0x6d7   : > { %3581 = vmatpush1.msra.mxu0 %v2375_v15  ;;  %3648 = vmatpush1.msra.mxu1 %v1897_v17  ;;  %v2663_v15 = vld [vmem:[#allocation3 + $0x1c50] sm:$0xff]  ;;  %v2185_v17 = vld [vmem:[#allocation3 + $0xd60] sm:$0xff] }
 0x6d8   : > { %3582 = vmatprep.subr.mxu0 %v2360_v18  ;;  %3649 = vmatprep.subr.mxu1 %v1882_v19  ;;  %v2648_v18 = vld [vmem:[#allocation3 + $0x1bd8] sm:$0xff]  ;;  %v2170_v19 = vld [vmem:[#allocation3 + $0xce8] sm:$0xff] }
 0x6d9   : > { %3583 = vmatpush1.msra.mxu0 %v2359_v21  ;;  %3650 = vmatpush1.msra.mxu1 %v1881_v22  ;;  %v2647_v21 = vld [vmem:[#allocation3 + $0x1bd0] sm:$0xff]  ;;  %v2169_v22 = vld [vmem:[#allocation3 + $0xce0] sm:$0xff] }
 0x6da   : > { %3584 = vmatprep.subr.mxu0 %v2344_v26  ;;  %3651 = vmatprep.subr.mxu1 %v1866_v27  ;;  %v2632_v26 = vld [vmem:[#allocation3 + $0x1b58] sm:$0xff]  ;;  %v2154_v27 = vld [vmem:[#allocation3 + $0xc68] sm:$0xff] }
 0x6db   : > { %3585 = vmatpush1.msra.mxu0 %v2343_v20  ;;  %3652 = vmatpush1.msra.mxu1 %v1865_v28  ;;  %v2631_v20 = vld [vmem:[#allocation3 + $0x1b50] sm:$0xff]  ;;  %v2153_v28 = vld [vmem:[#allocation3 + $0xc60] sm:$0xff] }
 0x6dc   : > { %3586 = vmatprep.subr.mxu0 %v2328_v30  ;;  %3653 = vmatprep.subr.mxu1 %v1850_v31  ;;  %v2616_v30 = vld [vmem:[#allocation3 + $0x1ad8] sm:$0xff]  ;;  %v2138_v31 = vld [vmem:[#allocation3 + $0xbe8] sm:$0xff] }
 0x6dd   : > { %3587 = vmatpush1.msra.mxu0 %v2327_v32  ;;  %3654 = vmatpush1.msra.mxu1 %v1849_v34  ;;  %v2615_v32 = vld [vmem:[#allocation3 + $0x1ad0] sm:$0xff]  ;;  %v2137_v34 = vld [vmem:[#allocation3 + $0xbe0] sm:$0xff] }
 0x6de   : > { %3588 = vmatprep.subr.mxu0 %v2312_v13  ;;  %3655 = vmatprep.subr.mxu1 %v1834_v35  ;;  %v2600_v13 = vld [vmem:[#allocation3 + $0x1a58] sm:$0xff]  ;;  %v2122_v35 = vld [vmem:[#allocation3 + $0xb68] sm:$0xff] }
 0x6df   : > { %3589 = vmatpush1.msra.mxu0 %v2311_v38  ;;  %3656 = vmatpush1.msra.mxu1 %v1833_v12  ;;  %v2599_v38 = vld [vmem:[#allocation3 + $0x1a50] sm:$0xff]  ;;  %v2121_v12 = vld [vmem:[#allocation3 + $0xb60] sm:$0xff] }
 0x6e0   : > { %3590 = vmatprep.subr.mxu0 %v2296_v39  ;;  %3657 = vmatprep.subr.mxu1 %v1818_v40  ;;  %v2584_v39 = vld [vmem:[#allocation3 + $0x19d8] sm:$0xff]  ;;  %v2106_v40 = vld [vmem:[#allocation3 + $0xae8] sm:$0xff] }
 0x6e1   : > { %3591 = vmatpush1.msra.mxu0 %v2295_v41  ;;  %3658 = vmatpush1.msra.mxu1 %v1817_v42  ;;  %v2583_v41 = vld [vmem:[#allocation3 + $0x19d0] sm:$0xff]  ;;  %v2105_v42 = vld [vmem:[#allocation3 + $0xae0] sm:$0xff] }
 0x6e2   : > { %3592 = vmatprep.subr.mxu0 %v2280_v25  ;;  %3659 = vmatprep.subr.mxu1 %v1802_v43  ;;  %v2568_v25 = vld [vmem:[#allocation3 + $0x1958] sm:$0xff]  ;;  %v2090_v43 = vld [vmem:[#allocation3 + $0xa68] sm:$0xff] }
 0x6e3   : > { %3593 = vmatpush1.msra.mxu0 %v2279_v44  ;;  %3660 = vmatpush1.msra.mxu1 %v1801_v45  ;;  %v7211_v44 = vpop.f32.mrf.mxu1  ;;  %v7213_v45 = vpop.f32.mrf.mxu0 }
 0x6e4   : > { %3594 = vmatprep.subr.mxu0 %v2776_v46  ;;  %3661 = vmatprep.subr.mxu1 %v1786_v47  ;;  %v2567_v46 = vld [vmem:[#allocation3 + $0x1950] sm:$0xff]  ;;  %v2089_v47 = vld [vmem:[#allocation3 + $0xa60] sm:$0xff] }
 0x6e5   : > { %3595 = vmatpush2.msra.mxu0 %v2775_v48  ;;  %3662 = vmatpush1.msra.mxu1 %v1785_v49  ;;  %v2552_v48 = vld [vmem:[#allocation3 + $0x18d8] sm:$0xff]  ;;  %v2074_v49 = vld [vmem:[#allocation3 + $0x9e8] sm:$0xff] }
 0x6e6   : > { %3596 = vmatprep.subr.mxu0 %v2760_v50  ;;  %3663 = vmatprep.subr.mxu1 %v1770_v51  ;;  %v3131_v50 = vpop.f32.mrf.mxu1  ;;  %v2551_v51 = vld [vmem:[#allocation3 + $0x18d0] sm:$0xff] }
 0x6e7   : > { %3597 = vmatpush2.msra.mxu0 %v2759_v52  ;;  %3664 = vmatpush1.msra.mxu1 %v1769_v53  ;;  %v2073_v52 = vld [vmem:[#allocation3 + $0x9e0] sm:$0xff] }
 0x6e8   : > { %3598 = vmatprep.subr.mxu0 %v2744_v54  ;;  %3665 = vmatprep.subr.mxu1 %v2266_v55  ;;  %v2536_v54 = vld [vmem:[#allocation3 + $0x1858] sm:$0xff]  ;;  %v2058_v55 = vld [vmem:[#allocation3 + $0x968] sm:$0xff] }
 0x6e9   : > { %3599 = vmatpush2.msra.mxu0 %v2743_v56  ;;  %3666 = vmatpush2.msra.mxu1 %v2265_v57  ;;  %v2535_v57 = vld [vmem:[#allocation3 + $0x1850] sm:$0xff] }
 0x6ea   : > { %3600 = vmatprep.subr.mxu0 %v2728_v58  ;;  %3667 = vmatprep.subr.mxu1 %v2250_v59  ;;  %v2057_v58 = vld [vmem:[#allocation3 + $0x960] sm:$0xff]  ;;  %v2042_v59 = vld [vmem:[#allocation3 + $0x8e8] sm:$0xff] }
 0x6eb   : > { %3601 = vmatpush2.msra.mxu0 %v2727_v60  ;;  %3668 = vmatpush2.msra.mxu1 %v2249_v61  ;;  %v2522_v60 = vld [vmem:[#allocation3 + $0x17e8] sm:$0xff]  ;;  %v2041_v61 = vld [vmem:[#allocation3 + $0x8e0] sm:$0xff] }
 0x6ec   : > { %3602 = vmatprep.subr.mxu0 %v2712_v62  ;;  %3669 = vmatprep.subr.mxu1 %v2234_v63  ;;  %v2521_v62 = vld [vmem:[#allocation3 + $0x17e0] sm:$0xff]  ;;  %v2026_v63 = vld [vmem:[#allocation3 + $0x868] sm:$0xff] }
 0x6ed   : > { %3603 = vmatpush2.msra.mxu0 %v2711_v1  ;;  %3670 = vmatpush2.msra.mxu1 %v2233_v2  ;;  %v2506_v1 = vld [vmem:[#allocation3 + $0x1768] sm:$0xff]  ;;  %v2025_v2 = vld [vmem:[#allocation3 + $0x860] sm:$0xff] }
 0x6ee   : > { %3604 = vmatprep.subr.mxu0 %v2696_v0  ;;  %3671 = vmatprep.subr.mxu1 %v2218_v3  ;;  %v2505_v0 = vld [vmem:[#allocation3 + $0x1760] sm:$0xff]  ;;  %v2490_v3 = vld [vmem:[#allocation3 + $0x16e8] sm:$0xff] }
 0x6ef   : > { %3605 = vmatpush2.msra.mxu0 %v2695_v4  ;;  %3672 = vmatpush2.msra.mxu1 %v2217_v5  ;;  %v2012_v4 = vld [vmem:[#allocation3 + $0x7f8] sm:$0xff]  ;;  %v2489_v5 = vld [vmem:[#allocation3 + $0x16e0] sm:$0xff] }
 0x6f0   : > { %3606 = vmatprep.subr.mxu0 %v2680_v6  ;;  %3673 = vmatprep.subr.mxu1 %v2202_v7  ;;  %v2011_v6 = vld [vmem:[#allocation3 + $0x7f0] sm:$0xff]  ;;  %v1996_v7 = vld [vmem:[#allocation3 + $0x778] sm:$0xff] }
 0x6f1   : > { %3607 = vmatpush2.msra.mxu0 %v2679_v8  ;;  %3674 = vmatpush2.msra.mxu1 %v2201_v9  ;;  %v2473_v8 = vld [vmem:[#allocation3 + $0x1660] sm:$0xff]  ;;  %v1995_v9 = vld [vmem:[#allocation3 + $0x770] sm:$0xff] }
 0x6f2   : > { %3608 = vmatprep.subr.mxu0 %v2664_v11  ;;  %3675 = vmatprep.subr.mxu1 %v2186_v14  ;;  %v1980_v11 = vld [vmem:[#allocation3 + $0x6f8] sm:$0xff]  ;;  %v2457_v14 = vld [vmem:[#allocation3 + $0x15e0] sm:$0xff] }
 0x6f3   : > { %3609 = vmatpush2.msra.mxu0 %v2663_v15  ;;  %3676 = vmatpush2.msra.mxu1 %v2185_v17  ;;  %v1979_v15 = vld [vmem:[#allocation3 + $0x6f0] sm:$0xff]  ;;  %v2442_v17 = vld [vmem:[#allocation3 + $0x1568] sm:$0xff] }
 0x6f4   : > { %3610 = vmatprep.subr.mxu0 %v2648_v18  ;;  %3677 = vmatprep.subr.mxu1 %v2170_v19  ;;  %v2441_v18 = vld [vmem:[#allocation3 + $0x1560] sm:$0xff]  ;;  %v1963_v19 = vld [vmem:[#allocation3 + $0x670] sm:$0xff] }
 0x6f5   : > { %3611 = vmatpush2.msra.mxu0 %v2647_v21  ;;  %3678 = vmatpush2.msra.mxu1 %v2169_v22  ;;  %v2426_v21 = vld [vmem:[#allocation3 + $0x14e8] sm:$0xff]  ;;  %v1948_v22 = vld [vmem:[#allocation3 + $0x5f8] sm:$0xff] }
 0x6f6   : > { %3612 = vmatprep.subr.mxu0 %v2632_v26  ;;  %3679 = vmatprep.subr.mxu1 %v2154_v27  ;;  %v1947_v26 = vld [vmem:[#allocation3 + $0x5f0] sm:$0xff]  ;;  %v2410_v27 = vld [vmem:[#allocation3 + $0x1468] sm:$0xff] }
 0x6f7   : > { %3613 = vmatpush2.msra.mxu0 %v2631_v20  ;;  %3680 = vmatpush2.msra.mxu1 %v2153_v28  ;;  %v1932_v20 = vld [vmem:[#allocation3 + $0x578] sm:$0xff]  ;;  %v2409_v28 = vld [vmem:[#allocation3 + $0x1460] sm:$0xff] }
 0x6f8   : > { %3614 = vmatprep.subr.mxu0 %v2616_v30  ;;  %3681 = vmatprep.subr.mxu1 %v2138_v31  ;;  %v1931_v30 = vld [vmem:[#allocation3 + $0x570] sm:$0xff]  ;;  %v2394_v31 = vld [vmem:[#allocation3 + $0x13e8] sm:$0xff] }
 0x6f9   : > { %3615 = vmatpush2.msra.mxu0 %v2615_v32  ;;  %3682 = vmatpush2.msra.mxu1 %v2137_v34  ;;  %v1916_v32 = vld [vmem:[#allocation3 + $0x4f8] sm:$0xff]  ;;  %v2393_v34 = vld [vmem:[#allocation3 + $0x13e0] sm:$0xff] }
 0x6fa   : > { %3616 = vmatprep.subr.mxu0 %v2600_v13  ;;  %3683 = vmatprep.subr.mxu1 %v2122_v35  ;;  %v1915_v13 = vld [vmem:[#allocation3 + $0x4f0] sm:$0xff]  ;;  %v2378_v35 = vld [vmem:[#allocation3 + $0x1368] sm:$0xff] }
 0x6fb   : > { %3617 = vmatpush2.msra.mxu0 %v2599_v38  ;;  %3684 = vmatpush2.msra.mxu1 %v2121_v12  ;;  %v1900_v38 = vld [vmem:[#allocation3 + $0x478] sm:$0xff]  ;;  %v2377_v12 = vld [vmem:[#allocation3 + $0x1360] sm:$0xff] }
 0x6fc   : > { %3618 = vmatprep.subr.mxu0 %v2584_v39  ;;  %3685 = vmatprep.subr.mxu1 %v2106_v40  ;;  %v1899_v39 = vld [vmem:[#allocation3 + $0x470] sm:$0xff]  ;;  %v2362_v40 = vld [vmem:[#allocation3 + $0x12e8] sm:$0xff] }
 0x6fd   : > { %3619 = vmatpush2.msra.mxu0 %v2583_v41  ;;  %3686 = vmatpush2.msra.mxu1 %v2105_v42  ;;  %v1884_v41 = vld [vmem:[#allocation3 + $0x3f8] sm:$0xff]  ;;  %v2361_v42 = vld [vmem:[#allocation3 + $0x12e0] sm:$0xff] }
 0x6fe   : > { %3620 = vmatprep.subr.mxu0 %v2568_v25  ;;  %3687 = vmatprep.subr.mxu1 %v2090_v43  ;;  %v3202_v53 = vpop.f32.mrf.mxu0  ;;  %v1883_v25 = vld [vmem:[#allocation3 + $0x3f0] sm:$0xff]  ;;  %v2346_v43 = vld [vmem:[#allocation3 + $0x1268] sm:$0xff] }
 0x6ff   : > { %3621 = vmatpush2.msra.mxu0 %v2567_v46  ;;  %3688 = vmatpush2.msra.mxu1 %v2089_v47  ;;  %v7215_v56 = vadd.f32 %v3202_v53, %v3131_v50  ;;  %v1868_v46 = vld [vmem:[#allocation3 + $0x378] sm:$0xff]  ;;  %v2345_v47 = vld [vmem:[#allocation3 + $0x1260] sm:$0xff]  ;;  %v2314_v53 = vld [vmem:[#allocation3 + $0x1168] sm:$0xff] }
 0x700   : > { %3622 = vmatprep.subr.mxu0 %v2552_v48  ;;  %3689 = vmatprep.subr.mxu1 %v2074_v49  ;;  %v1867_v48 = vld [vmem:[#allocation3 + $0x370] sm:$0xff]  ;;  %v2330_v49 = vld [vmem:[#allocation3 + $0x11e8] sm:$0xff]  ;;  %v1852_v50 = vld [vmem:[#allocation3 + $0x2f8] sm:$0xff] }
 0x701   : > { %3623 = vmatpush2.msra.mxu0 %v2551_v51  ;;  %3690 = vmatpush2.msra.mxu1 %v2073_v52  ;;  %v2329_v51 = vld [vmem:[#allocation3 + $0x11e0] sm:$0xff]  ;;  %v1851_v52 = vld [vmem:[#allocation3 + $0x2f0] sm:$0xff] }
 0x702   : > { %3624 = vmatprep.subr.mxu0 %v2536_v54  ;;  %3691 = vmatprep.subr.mxu1 %v2058_v55  ;;  %v1836_v54 = vld [vmem:[#allocation3 + $0x278] sm:$0xff]  ;;  %v2313_v55 = vld [vmem:[#allocation3 + $0x1160] sm:$0xff] }
 0x703   : > { %3625 = vmatpush2.msra.mxu0 %v2535_v57  ;;  %3692 = vmatpush2.msra.mxu1 %v2057_v58  ;;  %v1835_v57 = vld [vmem:[#allocation3 + $0x270] sm:$0xff]  ;;  %v2298_v58 = vld [vmem:[#allocation3 + $0x10e8] sm:$0xff] }
 0x704   : > { %3627 = vmatmul.mubr.f32.vlgmr.msra.gmra.mxu0 %v7199_v10  ;;  %3693 = vmatprep.subr.mxu1 %v2042_v59  ;;  %v2474_v10 = vld [vmem:[#allocation3 + $0x1668] sm:$0xff]  ;;  %v1820_v59 = vld [vmem:[#allocation3 + $0x1f8] sm:$0xff] }
 0x705   : > { %3704 = vmatprep.subr.mxu0 %v2522_v60  ;;  %3694 = vmatpush2.msra.mxu1 %v2041_v61  ;;  %v2297_v60 = vld [vmem:[#allocation3 + $0x10e0] sm:$0xff]  ;;  %v1819_v61 = vld [vmem:[#allocation3 + $0x1f0] sm:$0xff] }
 0x706   : > { %3705 = vmatpush1.msra.mxu0 %v2521_v62  ;;  %3768 = vmatprep.mubr.f32.mxu0 %v7202_v29  ;;  %v2458_v29 = vld [vmem:[#allocation3 + $0x15e8] sm:$0xff] }
 0x707   : > { %3695 = vmatprep.subr.mxu1 %v2026_v63  ;;  %3706 = vmatprep.subr.mxu0 %v2506_v1  ;;  %v2282_v62 = vld [vmem:[#allocation3 + $0x1068] sm:$0xff]  ;;  %v1804_v63 = vld [vmem:[#allocation3 + $0x178] sm:$0xff]  ;;  %v2281_v1 = vld [vmem:[#allocation3 + $0x1060] sm:$0xff] }
 0x708   : > { %3696 = vmatpush2.msra.mxu1 %v2025_v2  ;;  %3707 = vmatpush1.msra.mxu0 %v2505_v0  ;;  %v1803_v2 = vld [vmem:[#allocation3 + $0x170] sm:$0xff]  ;;  %v2778_v0 = vld [vmem:[#allocation3 + $0x1fe8] sm:$0xff] }
 0x709   : > { %3698 = vmatmul.mubr.f32.vlgmr.msra.gmra.mxu1 %v7205_v33  ;;  %3708 = vmatprep.subr.mxu0 %v2490_v3  ;;  %v1964_v33 = vld [vmem:[#allocation3 + $0x678] sm:$0xff] }
 0x70a   : > { %3775 = vmatprep.subr.mxu1 %v2012_v4  ;;  %3709 = vmatpush1.msra.mxu0 %v2489_v5  ;;  %v1788_v3 = vld [vmem:[#allocation3 + $0xf8] sm:$0xff]  ;;  %v2777_v4 = vld [vmem:[#allocation3 + $0x1fe0] sm:$0xff]  ;;  %v1787_v5 = vld [vmem:[#allocation3 + $0xf0] sm:$0xff] }
 0x70b   : > { %3776 = vmatpush1.msra.mxu1 %v2011_v6  ;;  %3839 = vmatprep.mubr.f32.mxu1 %v7208_v37  ;;  %v2425_v37 = vld [vmem:[#allocation3 + $0x14e0] sm:$0xff]  ;;  %v2762_v6 = vld [vmem:[#allocation3 + $0x1f68] sm:$0xff] }
 0x70c   : > { %3710 = vmatprep.subr.mxu0 %v2474_v10  ;;  %3777 = vmatprep.subr.mxu1 %v1996_v7  ;;  %v1772_v10 = vld [vmem:[#allocation3 + $0x78] sm:$0xff]  ;;  %v2761_v7 = vld [vmem:[#allocation3 + $0x1f60] sm:$0xff] }
 0x70d   : > { %3711 = vmatpush1.msra.mxu0 %v2473_v8  ;;  %3778 = vmatpush1.msra.mxu1 %v1995_v9  ;;  %v1771_v8 = vld [vmem:[#allocation3 + $0x70] sm:$0xff]  ;;  %v2746_v9 = vld [vmem:[#allocation3 + $0x1ee8] sm:$0xff] }
 0x70e   : > { %3712 = vmatprep.subr.mxu0 %v2458_v29  ;;  %3779 = vmatprep.subr.mxu1 %v1980_v11  ;;  %v2268_v29 = vld [vmem:[#allocation3 + $0xff8] sm:$0xff]  ;;  %v2745_v11 = vld [vmem:[#allocation3 + $0x1ee0] sm:$0xff] }
 0x70f   : > { %3713 = vmatpush1.msra.mxu0 %v2457_v14  ;;  %3780 = vmatpush1.msra.mxu1 %v1979_v15  ;;  %v2267_v14 = vld [vmem:[#allocation3 + $0xff0] sm:$0xff]  ;;  %v2730_v15 = vld [vmem:[#allocation3 + $0x1e68] sm:$0xff] }
 0x710   : > { %3714 = vmatprep.subr.mxu0 %v2442_v17  ;;  %3781 = vmatprep.subr.mxu1 %v1964_v33  ;;  %v2252_v17 = vld [vmem:[#allocation3 + $0xf78] sm:$0xff]  ;;  %v2729_v33 = vld [vmem:[#allocation3 + $0x1e60] sm:$0xff] }
 0x711   : > { %3715 = vmatpush1.msra.mxu0 %v2441_v18  ;;  %3782 = vmatpush1.msra.mxu1 %v1963_v19  ;;  %v2251_v18 = vld [vmem:[#allocation3 + $0xf70] sm:$0xff]  ;;  %v2714_v19 = vld [vmem:[#allocation3 + $0x1de8] sm:$0xff] }
 0x712   : > { %3716 = vmatprep.subr.mxu0 %v2426_v21  ;;  %3783 = vmatprep.subr.mxu1 %v1948_v22  ;;  %v2236_v21 = vld [vmem:[#allocation3 + $0xef8] sm:$0xff]  ;;  %v2713_v22 = vld [vmem:[#allocation3 + $0x1de0] sm:$0xff] }
 0x713   : > { %3717 = vmatpush1.msra.mxu0 %v2425_v37  ;;  %3784 = vmatpush1.msra.mxu1 %v1947_v26  ;;  %v2235_v37 = vld [vmem:[#allocation3 + $0xef0] sm:$0xff]  ;;  %v2698_v26 = vld [vmem:[#allocation3 + $0x1d68] sm:$0xff] }
 0x714   : > { %3718 = vmatprep.subr.mxu0 %v2410_v27  ;;  %3785 = vmatprep.subr.mxu1 %v1932_v20  ;;  %v2220_v27 = vld [vmem:[#allocation3 + $0xe78] sm:$0xff]  ;;  %v2697_v20 = vld [vmem:[#allocation3 + $0x1d60] sm:$0xff] }
 0x715   : > { %3719 = vmatpush1.msra.mxu0 %v2409_v28  ;;  %3786 = vmatpush1.msra.mxu1 %v1931_v30  ;;  %v2219_v28 = vld [vmem:[#allocation3 + $0xe70] sm:$0xff]  ;;  %v2682_v30 = vld [vmem:[#allocation3 + $0x1ce8] sm:$0xff] }
 0x716   : > { %3720 = vmatprep.subr.mxu0 %v2394_v31  ;;  %3787 = vmatprep.subr.mxu1 %v1916_v32  ;;  %v2204_v31 = vld [vmem:[#allocation3 + $0xdf8] sm:$0xff]  ;;  %v2681_v32 = vld [vmem:[#allocation3 + $0x1ce0] sm:$0xff] }
 0x717   : > { %3721 = vmatpush1.msra.mxu0 %v2393_v34  ;;  %3788 = vmatpush1.msra.mxu1 %v1915_v13  ;;  %v2203_v34 = vld [vmem:[#allocation3 + $0xdf0] sm:$0xff]  ;;  %v2666_v13 = vld [vmem:[#allocation3 + $0x1c68] sm:$0xff] }
 0x718   : > { %3722 = vmatprep.subr.mxu0 %v2378_v35  ;;  %3789 = vmatprep.subr.mxu1 %v1900_v38  ;;  %v2188_v35 = vld [vmem:[#allocation3 + $0xd78] sm:$0xff]  ;;  %v2665_v38 = vld [vmem:[#allocation3 + $0x1c60] sm:$0xff] }
 0x719   : > { %3723 = vmatpush1.msra.mxu0 %v2377_v12  ;;  %3790 = vmatpush1.msra.mxu1 %v1899_v39  ;;  %v2187_v12 = vld [vmem:[#allocation3 + $0xd70] sm:$0xff]  ;;  %v2650_v39 = vld [vmem:[#allocation3 + $0x1be8] sm:$0xff] }
 0x71a   : > { %3724 = vmatprep.subr.mxu0 %v2362_v40  ;;  %3791 = vmatprep.subr.mxu1 %v1884_v41  ;;  %v2172_v40 = vld [vmem:[#allocation3 + $0xcf8] sm:$0xff]  ;;  %v2649_v41 = vld [vmem:[#allocation3 + $0x1be0] sm:$0xff] }
 0x71b   : > { %3725 = vmatpush1.msra.mxu0 %v2361_v42  ;;  %3792 = vmatpush1.msra.mxu1 %v1883_v25  ;;  %v2171_v42 = vld [vmem:[#allocation3 + $0xcf0] sm:$0xff]  ;;  %v2634_v25 = vld [vmem:[#allocation3 + $0x1b68] sm:$0xff] }
 0x71c   : > { %3726 = vmatprep.subr.mxu0 %v2346_v43  ;;  %3793 = vmatprep.subr.mxu1 %v1868_v46  ;;  %v2156_v43 = vld [vmem:[#allocation3 + $0xc78] sm:$0xff]  ;;  %v2633_v46 = vld [vmem:[#allocation3 + $0x1b60] sm:$0xff] }
 0x71d   : > { %3727 = vmatpush1.msra.mxu0 %v2345_v47  ;;  %3794 = vmatpush1.msra.mxu1 %v1867_v48  ;;  %v2155_v47 = vld [vmem:[#allocation3 + $0xc70] sm:$0xff]  ;;  %v2618_v48 = vld [vmem:[#allocation3 + $0x1ae8] sm:$0xff] }
 0x71e   : > { %3728 = vmatprep.subr.mxu0 %v2330_v49  ;;  %3795 = vmatprep.subr.mxu1 %v1852_v50  ;;  %v2140_v49 = vld [vmem:[#allocation3 + $0xbf8] sm:$0xff]  ;;  %v2617_v50 = vld [vmem:[#allocation3 + $0x1ae0] sm:$0xff] }
 0x71f   : > { %3729 = vmatpush1.msra.mxu0 %v2329_v51  ;;  %3796 = vmatpush1.msra.mxu1 %v1851_v52  ;;  %v2139_v51 = vld [vmem:[#allocation3 + $0xbf0] sm:$0xff]  ;;  %v2602_v52 = vld [vmem:[#allocation3 + $0x1a68] sm:$0xff] }
 0x720   : > { %3730 = vmatprep.subr.mxu0 %v2314_v53  ;;  %3797 = vmatprep.subr.mxu1 %v1836_v54  ;;  %v2124_v53 = vld [vmem:[#allocation3 + $0xb78] sm:$0xff]  ;;  %v2601_v54 = vld [vmem:[#allocation3 + $0x1a60] sm:$0xff] }
 0x721   : > { %3731 = vmatpush1.msra.mxu0 %v2313_v55  ;;  %3798 = vmatpush1.msra.mxu1 %v1835_v57  ;;  %v2123_v55 = vld [vmem:[#allocation3 + $0xb70] sm:$0xff]  ;;  %v2586_v57 = vld [vmem:[#allocation3 + $0x19e8] sm:$0xff] }
 0x722   : > { %3732 = vmatprep.subr.mxu0 %v2298_v58  ;;  %3799 = vmatprep.subr.mxu1 %v1820_v59  ;;  %v2108_v58 = vld [vmem:[#allocation3 + $0xaf8] sm:$0xff]  ;;  %v2585_v59 = vld [vmem:[#allocation3 + $0x19e0] sm:$0xff] }
 0x723   : > { %3733 = vmatpush1.msra.mxu0 %v2297_v60  ;;  %3800 = vmatpush1.msra.mxu1 %v1819_v61  ;;  %v2107_v60 = vld [vmem:[#allocation3 + $0xaf0] sm:$0xff]  ;;  %v2570_v61 = vld [vmem:[#allocation3 + $0x1968] sm:$0xff] }
 0x724   : > { %3734 = vmatprep.subr.mxu0 %v2282_v62  ;;  %3801 = vmatprep.subr.mxu1 %v1804_v63  ;;  %v2092_v62 = vld [vmem:[#allocation3 + $0xa78] sm:$0xff]  ;;  %v7221_v63 = vpop.f32.mrf.mxu1 }
 0x725   : > { %3735 = vmatpush1.msra.mxu0 %v2281_v1  ;;  %3802 = vmatpush1.msra.mxu1 %v1803_v2  ;;  %v7223_v1 = vpop.f32.mrf.mxu0  ;;  %v2569_v2 = vld [vmem:[#allocation3 + $0x1960] sm:$0xff] }
 0x726   : > { %3736 = vmatprep.subr.mxu0 %v2778_v0  ;;  %3803 = vmatprep.subr.mxu1 %v1788_v3  ;;  %v2091_v0 = vld [vmem:[#allocation3 + $0xa70] sm:$0xff]  ;;  %v2554_v3 = vld [vmem:[#allocation3 + $0x18e8] sm:$0xff] }
 0x727   : > { %3737 = vmatpush2.msra.mxu0 %v2777_v4  ;;  %3804 = vmatpush1.msra.mxu1 %v1787_v5  ;;  %v2076_v4 = vld [vmem:[#allocation3 + $0x9f8] sm:$0xff]  ;;  %v3273_v5 = vpop.f32.mrf.mxu1 }
 0x728   : > { %3738 = vmatprep.subr.mxu0 %v2762_v6  ;;  %3805 = vmatprep.subr.mxu1 %v1772_v10  ;;  %v2553_v6 = vld [vmem:[#allocation3 + $0x18e0] sm:$0xff]  ;;  %v2075_v10 = vld [vmem:[#allocation3 + $0x9f0] sm:$0xff] }
 0x729   : > { %3739 = vmatpush2.msra.mxu0 %v2761_v7  ;;  %3806 = vmatpush1.msra.mxu1 %v1771_v8  ;;  %v2538_v8 = vld [vmem:[#allocation3 + $0x1868] sm:$0xff] }
 0x72a   : > { %3740 = vmatprep.subr.mxu0 %v2746_v9  ;;  %3807 = vmatprep.subr.mxu1 %v2268_v29  ;;  %v2060_v9 = vld [vmem:[#allocation3 + $0x978] sm:$0xff] }
 0x72b   : > { %3741 = vmatpush2.msra.mxu0 %v2745_v11  ;;  %3808 = vmatpush2.msra.mxu1 %v2267_v14  ;;  %v2537_v11 = vld [vmem:[#allocation3 + $0x1860] sm:$0xff]  ;;  %v2059_v14 = vld [vmem:[#allocation3 + $0x970] sm:$0xff] }
 0x72c   : > { %3742 = vmatprep.subr.mxu0 %v2730_v15  ;;  %3809 = vmatprep.subr.mxu1 %v2252_v17  ;;  %v2044_v15 = vld [vmem:[#allocation3 + $0x8f8] sm:$0xff] }
 0x72d   : > { %3743 = vmatpush2.msra.mxu0 %v2729_v33  ;;  %3810 = vmatpush2.msra.mxu1 %v2251_v18  ;;  %v2524_v17 = vld [vmem:[#allocation3 + $0x17f8] sm:$0xff]  ;;  %v2043_v33 = vld [vmem:[#allocation3 + $0x8f0] sm:$0xff] }
 0x72e   : > { %3744 = vmatprep.subr.mxu0 %v2714_v19  ;;  %3811 = vmatprep.subr.mxu1 %v2236_v21  ;;  %v2523_v18 = vld [vmem:[#allocation3 + $0x17f0] sm:$0xff]  ;;  %v2028_v21 = vld [vmem:[#allocation3 + $0x878] sm:$0xff] }
 0x72f   : > { %3745 = vmatpush2.msra.mxu0 %v2713_v22  ;;  %3812 = vmatpush2.msra.mxu1 %v2235_v37  ;;  %v7227_v19 = vld [vmem:[#allocation2 + $0x10] sm:$0xff]  ;;  %v2508_v22 = vld [vmem:[#allocation3 + $0x1778] sm:$0xff]  ;;  %v7232_v37 = vadd.f32 %v7195_v24, %v7193_v23  ;;  %v3990_v24 = vld [vmem:[#allocation6 + $0x1c8] sm:$0xff] }
 0x730   : > { %3746 = vmatprep.subr.mxu0 %v2698_v26  ;;  %3813 = vmatprep.subr.mxu1 %v2220_v27  ;;  %v2027_v26 = vld [vmem:[#allocation3 + $0x870] sm:$0xff]  ;;  %v2476_v23 = vld [vmem:[#allocation3 + $0x1678] sm:$0xff] }
 0x731   : > { %3747 = vmatpush2.msra.mxu0 %v2697_v20  ;;  %3814 = vmatpush2.msra.mxu1 %v2219_v28  ;;  %v2507_v27 = vld [vmem:[#allocation3 + $0x1770] sm:$0xff]  ;;  %v6656_v20 = vld [vmem:[#allocation2 + $0x18] sm:$0xff] }
 0x732   : > { %3748 = vmatprep.subr.mxu0 %v2682_v30  ;;  %3815 = vmatprep.subr.mxu1 %v2204_v31  ;;  %v2492_v28 = vld [vmem:[#allocation3 + $0x16f8] sm:$0xff]  ;;  %v3994_v30 = vld [vmem:[#allocation6 + $0x1e8] sm:$0xff]  ;;  %v2491_v31 = vld [vmem:[#allocation3 + $0x16f0] sm:$0xff] }
 0x733   : > { %3749 = vmatpush2.msra.mxu0 %v2681_v32  ;;  %3816 = vmatpush2.msra.mxu1 %v2203_v34  ;;  %v3993_v32 = vld [vmem:[#allocation6 + $0x1e0] sm:$0xff]  ;;  %v3918_v34 = vmax.f32 %v7232_v37, 0.0  ;;  %v4866_v37 = vld [vmem:[#allocation6 + $0x1d28] sm:$0xff] }
 0x734   : > { %3750 = vmatprep.subr.mxu0 %v2666_v13  ;;  %3817 = vmatprep.subr.mxu1 %v2188_v35  ;;  %v6657_v13 = vld [vmem:[#allocation2] sm:$0xff]  ;;  %v2475_v35 = vld [vmem:[#allocation3 + $0x1670] sm:$0xff] }
 0x735   : > { %3751 = vmatpush2.msra.mxu0 %v2665_v38  ;;  %3818 = vmatpush2.msra.mxu1 %v2187_v12  ;;  %v3989_v38 = vld [vmem:[#allocation6 + $0x1c0] sm:$0xff]  ;;  %v2460_v12 = vld [vmem:[#allocation3 + $0x15f8] sm:$0xff] }
 0x736   : > { %3752 = vmatprep.subr.mxu0 %v2650_v39  ;;  %3819 = vmatprep.subr.mxu1 %v2172_v40  ;;  %v3986_v39 = vld [vmem:[#allocation6 + $0x1a8] sm:$0xff]  ;;  %v2459_v40 = vld [vmem:[#allocation3 + $0x15f0] sm:$0xff] }
 0x737   : > { %3753 = vmatpush2.msra.mxu0 %v2649_v41  ;;  %3820 = vmatpush2.msra.mxu1 %v2171_v42  ;;  %v3985_v41 = vld [vmem:[#allocation6 + $0x1a0] sm:$0xff]  ;;  %v2444_v42 = vld [vmem:[#allocation3 + $0x1578] sm:$0xff] }
 0x738   : > { %3754 = vmatprep.subr.mxu0 %v2634_v25  ;;  %3821 = vmatprep.subr.mxu1 %v2156_v43  ;;  %v3982_v25 = vld [vmem:[#allocation6 + $0x188] sm:$0xff]  ;;  %v2443_v43 = vld [vmem:[#allocation3 + $0x1570] sm:$0xff] }
 0x739   : > { %3755 = vmatpush2.msra.mxu0 %v2633_v46  ;;  %3822 = vmatpush2.msra.mxu1 %v2155_v47  ;;  %v3981_v46 = vld [vmem:[#allocation6 + $0x180] sm:$0xff]  ;;  %v2428_v47 = vld [vmem:[#allocation3 + $0x14f8] sm:$0xff] }
 0x73a   : > { %3756 = vmatprep.subr.mxu0 %v2618_v48  ;;  %3823 = vmatprep.subr.mxu1 %v2140_v49  ;;  %v3978_v48 = vld [vmem:[#allocation6 + $0x168] sm:$0xff]  ;;  %v2427_v49 = vld [vmem:[#allocation3 + $0x14f0] sm:$0xff] }
 0x73b   : > { %3757 = vmatpush2.msra.mxu0 %v2617_v50  ;;  %3824 = vmatpush2.msra.mxu1 %v2139_v51  ;;  %v3977_v50 = vld [vmem:[#allocation6 + $0x160] sm:$0xff]  ;;  %v2412_v51 = vld [vmem:[#allocation3 + $0x1478] sm:$0xff] }
 0x73c   : > { %3758 = vmatprep.subr.mxu0 %v2602_v52  ;;  %3825 = vmatprep.subr.mxu1 %v2124_v53  ;;  %v3974_v52 = vld [vmem:[#allocation6 + $0x148] sm:$0xff]  ;;  %v2411_v53 = vld [vmem:[#allocation3 + $0x1470] sm:$0xff] }
 0x73d   : > { %3759 = vmatpush2.msra.mxu0 %v2601_v54  ;;  %3826 = vmatpush2.msra.mxu1 %v2123_v55  ;;  %v3973_v54 = vld [vmem:[#allocation6 + $0x140] sm:$0xff]  ;;  %v2396_v55 = vld [vmem:[#allocation3 + $0x13f8] sm:$0xff] }
 0x73e   : > { %3760 = vmatprep.subr.mxu0 %v2586_v57  ;;  %3827 = vmatprep.subr.mxu1 %v2108_v58  ;;  %v3970_v57 = vld [vmem:[#allocation6 + $0x128] sm:$0xff]  ;;  %v2395_v58 = vld [vmem:[#allocation3 + $0x13f0] sm:$0xff] }
 0x73f   : > { %3761 = vmatpush2.msra.mxu0 %v2585_v59  ;;  %3828 = vmatpush2.msra.mxu1 %v2107_v60  ;;  %v3969_v59 = vld [vmem:[#allocation6 + $0x120] sm:$0xff]  ;;  %v2380_v60 = vld [vmem:[#allocation3 + $0x1378] sm:$0xff] }
 0x740   : > { %3762 = vmatprep.subr.mxu0 %v2570_v61  ;;  %3829 = vmatprep.subr.mxu1 %v2092_v62  ;;  %v3344_v7 = vpop.f32.mrf.mxu0  ;;  %v3966_v61 = vld [vmem:[#allocation6 + $0x108] sm:$0xff]  ;;  %v2379_v62 = vld [vmem:[#allocation3 + $0x1370] sm:$0xff] }
 0x741   : > { %3763 = vmatpush2.msra.mxu0 %v2569_v2  ;;  %3830 = vmatpush2.msra.mxu1 %v2091_v0  ;;  %v7225_v29 = vadd.f32 %v3344_v7, %v3273_v5  ;;  %v3965_v2 = vld [vmem:[#allocation6 + $0x100] sm:$0xff]  ;;  %v2364_v0 = vld [vmem:[#allocation3 + $0x12f8] sm:$0xff]  ;;  %v2347_v7 = vld [vmem:[#allocation3 + $0x1270] sm:$0xff] }
 0x742   : > { %3764 = vmatprep.subr.mxu0 %v2554_v3  ;;  %3831 = vmatprep.subr.mxu1 %v2076_v4  ;;  %v3962_v3 = vld [vmem:[#allocation6 + $0xe8] sm:$0xff]  ;;  %v2363_v4 = vld [vmem:[#allocation3 + $0x12f0] sm:$0xff]  ;;  %v3961_v5 = vld [vmem:[#allocation6 + $0xe0] sm:$0xff] }
 0x743   : > { %3765 = vmatpush2.msra.mxu0 %v2553_v6  ;;  %3832 = vmatpush2.msra.mxu1 %v2075_v10  ;;  %v2348_v6 = vld [vmem:[#allocation3 + $0x1278] sm:$0xff]  ;;  %v3958_v10 = vld [vmem:[#allocation6 + $0xc8] sm:$0xff] }
 0x744   : > { %3766 = vmatprep.subr.mxu0 %v2538_v8  ;;  %3833 = vmatprep.subr.mxu1 %v2060_v9  ;;  %v3957_v8 = vld [vmem:[#allocation6 + $0xc0] sm:$0xff]  ;;  %v2332_v9 = vld [vmem:[#allocation3 + $0x11f8] sm:$0xff] }
 0x745   : > { %3767 = vmatpush2.msra.mxu0 %v2537_v11  ;;  %3834 = vmatpush2.msra.mxu1 %v2059_v14  ;;  %v3954_v11 = vld [vmem:[#allocation6 + $0xa8] sm:$0xff]  ;;  %v2331_v14 = vld [vmem:[#allocation3 + $0x11f0] sm:$0xff] }
 0x746   : > { %3769 = vmatmul.mubr.f32.vlgmr.msra.gmra.mxu0 %v7227_v19  ;;  %3835 = vmatprep.subr.mxu1 %v2044_v15  ;;  %v3953_v15 = vld [vmem:[#allocation6 + $0xa0] sm:$0xff] }
 0x747   : > { %3846 = vmatprep.subr.mxu0 %v2524_v17  ;;  %3836 = vmatpush2.msra.mxu1 %v2043_v33  ;;  %v2316_v17 = vld [vmem:[#allocation3 + $0x1178] sm:$0xff]  ;;  %v3950_v33 = vld [vmem:[#allocation6 + $0x88] sm:$0xff] }
 0x748   : > { %3847 = vmatpush1.msra.mxu0 %v2523_v18  ;;  %3910 = vmatprep.mubr.f32.mxu0 %v6656_v20  ;;  %v2315_v18 = vld [vmem:[#allocation3 + $0x1170] sm:$0xff]  ;;  %v3945_v20 = vld [vmem:[#allocation6 + $0x60] sm:$0xff] }
 0x749   : > { %3837 = vmatprep.subr.mxu1 %v2028_v21  ;;  %3848 = vmatprep.subr.mxu0 %v2508_v22  ;;  %v3949_v21 = vld [vmem:[#allocation6 + $0x80] sm:$0xff]  ;;  %v2300_v22 = vld [vmem:[#allocation3 + $0x10f8] sm:$0xff] }
 0x74a   : > { %3838 = vmatpush2.msra.mxu1 %v2027_v26  ;;  %3849 = vmatpush1.msra.mxu0 %v2507_v27  ;;  %v3946_v26 = vld [vmem:[#allocation6 + $0x68] sm:$0xff]  ;;  %v2299_v27 = vld [vmem:[#allocation3 + $0x10f0] sm:$0xff] }
 0x74b   : > { %3840 = vmatmul.mubr.f32.vlgmr.msra.gmra.mxu1 %v6657_v13  ;;  %3850 = vmatprep.subr.mxu0 %v2492_v28  ;;  %v2284_v28 = vld [vmem:[#allocation3 + $0x1078] sm:$0xff] }
 0x74c   : > { %4957 = vmatprep.subr.mxu1 %v3994_v30  ;;  %3851 = vmatpush1.msra.mxu0 %v2491_v31  ;;  %v3942_v30 = vld [vmem:[#allocation6 + $0x48] sm:$0xff]  ;;  %v2283_v31 = vld [vmem:[#allocation3 + $0x1070] sm:$0xff]  ;;  %v2780_v13 = vld [vmem:[#allocation3 + $0x1ff8] sm:$0xff] }
 0x74d   : > { %4958 = vmatpush1.msra.mxu1 %v3993_v32  ;;  %5021 = vmatprep.mubr.f32.mxu1 %v3918_v34  ;;  %v3941_v32 = vld [vmem:[#allocation6 + $0x40] sm:$0xff] }
 0x74e   : > { %3852 = vmatprep.subr.mxu0 %v2476_v23  ;;  %4959 = vmatprep.subr.mxu1 %v3990_v24  ;;  %v3938_v23 = vld [vmem:[#allocation6 + $0x28] sm:$0xff]  ;;  %v2779_v24 = vld [vmem:[#allocation3 + $0x1ff0] sm:$0xff] }
 0x74f   : > { %3853 = vmatpush1.msra.mxu0 %v2475_v35  ;;  %4960 = vmatpush1.msra.mxu1 %v3989_v38  ;;  %v3937_v35 = vld [vmem:[#allocation6 + $0x20] sm:$0xff]  ;;  %v2764_v38 = vld [vmem:[#allocation3 + $0x1f78] sm:$0xff] }
 0x750   : > { %3854 = vmatprep.subr.mxu0 %v2460_v12  ;;  %4961 = vmatprep.subr.mxu1 %v3986_v39  ;;  %v3934_v12 = vld [vmem:[#allocation6 + $0x8] sm:$0xff]  ;;  %v2763_v39 = vld [vmem:[#allocation3 + $0x1f70] sm:$0xff] }
 0x751   : > { %3855 = vmatpush1.msra.mxu0 %v2459_v40  ;;  %4962 = vmatpush1.msra.mxu1 %v3985_v41  ;;  %v3933_v40 = vld [vmem:[#allocation6] sm:$0xff]  ;;  %v2748_v41 = vld [vmem:[#allocation3 + $0x1ef8] sm:$0xff] }
 0x752   : > { %3856 = vmatprep.subr.mxu0 %v2444_v42  ;;  %4963 = vmatprep.subr.mxu1 %v3982_v25  ;;  %v4058_v42 = vld [vmem:[#allocation6 + $0x3e8] sm:$0xff]  ;;  %v2747_v25 = vld [vmem:[#allocation3 + $0x1ef0] sm:$0xff] }
 0x753   : > { %3857 = vmatpush1.msra.mxu0 %v2443_v43  ;;  %4964 = vmatpush1.msra.mxu1 %v3981_v46  ;;  %v4057_v43 = vld [vmem:[#allocation6 + $0x3e0] sm:$0xff]  ;;  %v2732_v46 = vld [vmem:[#allocation3 + $0x1e78] sm:$0xff] }
 0x754   : > { %3858 = vmatprep.subr.mxu0 %v2428_v47  ;;  %4965 = vmatprep.subr.mxu1 %v3978_v48  ;;  %v4054_v47 = vld [vmem:[#allocation6 + $0x3c8] sm:$0xff]  ;;  %v2731_v48 = vld [vmem:[#allocation3 + $0x1e70] sm:$0xff] }
 0x755   : > { %3859 = vmatpush1.msra.mxu0 %v2427_v49  ;;  %4966 = vmatpush1.msra.mxu1 %v3977_v50  ;;  %v4053_v49 = vld [vmem:[#allocation6 + $0x3c0] sm:$0xff]  ;;  %v2716_v50 = vld [vmem:[#allocation3 + $0x1df8] sm:$0xff] }
 0x756   : > { %3860 = vmatprep.subr.mxu0 %v2412_v51  ;;  %4967 = vmatprep.subr.mxu1 %v3974_v52  ;;  %v4050_v51 = vld [vmem:[#allocation6 + $0x3a8] sm:$0xff]  ;;  %v2715_v52 = vld [vmem:[#allocation3 + $0x1df0] sm:$0xff] }
 0x757   : > { %3861 = vmatpush1.msra.mxu0 %v2411_v53  ;;  %4968 = vmatpush1.msra.mxu1 %v3973_v54  ;;  %v4049_v53 = vld [vmem:[#allocation6 + $0x3a0] sm:$0xff]  ;;  %v2700_v54 = vld [vmem:[#allocation3 + $0x1d78] sm:$0xff] }
 0x758   : > { %3862 = vmatprep.subr.mxu0 %v2396_v55  ;;  %4969 = vmatprep.subr.mxu1 %v3970_v57  ;;  %v4046_v55 = vld [vmem:[#allocation6 + $0x388] sm:$0xff]  ;;  %v2699_v57 = vld [vmem:[#allocation3 + $0x1d70] sm:$0xff] }
 0x759   : > { %3863 = vmatpush1.msra.mxu0 %v2395_v58  ;;  %4970 = vmatpush1.msra.mxu1 %v3969_v59  ;;  %v4045_v58 = vld [vmem:[#allocation6 + $0x380] sm:$0xff]  ;;  %v2684_v59 = vld [vmem:[#allocation3 + $0x1cf8] sm:$0xff] }
 0x75a   : > { %3864 = vmatprep.subr.mxu0 %v2380_v60  ;;  %4971 = vmatprep.subr.mxu1 %v3966_v61  ;;  %v4042_v60 = vld [vmem:[#allocation6 + $0x368] sm:$0xff]  ;;  %v2683_v61 = vld [vmem:[#allocation3 + $0x1cf0] sm:$0xff] }
 0x75b   : > { %3865 = vmatpush1.msra.mxu0 %v2379_v62  ;;  %4972 = vmatpush1.msra.mxu1 %v3965_v2  ;;  %v4041_v62 = vld [vmem:[#allocation6 + $0x360] sm:$0xff]  ;;  %v2668_v2 = vld [vmem:[#allocation3 + $0x1c78] sm:$0xff] }
 0x75c   : > { %3866 = vmatprep.subr.mxu0 %v2364_v0  ;;  %4973 = vmatprep.subr.mxu1 %v3962_v3  ;;  %v4038_v0 = vld [vmem:[#allocation6 + $0x348] sm:$0xff]  ;;  %v2667_v3 = vld [vmem:[#allocation3 + $0x1c70] sm:$0xff] }
 0x75d   : > { %3867 = vmatpush1.msra.mxu0 %v2363_v4  ;;  %4974 = vmatpush1.msra.mxu1 %v3961_v5  ;;  %v4037_v4 = vld [vmem:[#allocation6 + $0x340] sm:$0xff]  ;;  %v2652_v5 = vld [vmem:[#allocation3 + $0x1bf8] sm:$0xff] }
 0x75e   : > { %3868 = vmatprep.subr.mxu0 %v2348_v6  ;;  %4975 = vmatprep.subr.mxu1 %v3958_v10  ;;  %v4034_v6 = vld [vmem:[#allocation6 + $0x328] sm:$0xff]  ;;  %v2651_v10 = vld [vmem:[#allocation3 + $0x1bf0] sm:$0xff] }
 0x75f   : > { %3869 = vmatpush1.msra.mxu0 %v2347_v7  ;;  %4976 = vmatpush1.msra.mxu1 %v3957_v8  ;;  %v4033_v7 = vld [vmem:[#allocation6 + $0x320] sm:$0xff]  ;;  %v2636_v8 = vld [vmem:[#allocation3 + $0x1b78] sm:$0xff] }
 0x760   : > { %3870 = vmatprep.subr.mxu0 %v2332_v9  ;;  %4977 = vmatprep.subr.mxu1 %v3954_v11  ;;  %v4030_v9 = vld [vmem:[#allocation6 + $0x308] sm:$0xff]  ;;  %v2635_v11 = vld [vmem:[#allocation3 + $0x1b70] sm:$0xff] }
 0x761   : > { %3871 = vmatpush1.msra.mxu0 %v2331_v14  ;;  %4978 = vmatpush1.msra.mxu1 %v3953_v15  ;;  %v4029_v14 = vld [vmem:[#allocation6 + $0x300] sm:$0xff]  ;;  %v2620_v15 = vld [vmem:[#allocation3 + $0x1af8] sm:$0xff] }
 0x762   : > { %3872 = vmatprep.subr.mxu0 %v2316_v17  ;;  %4979 = vmatprep.subr.mxu1 %v3950_v33  ;;  %v4026_v17 = vld [vmem:[#allocation6 + $0x2e8] sm:$0xff]  ;;  %v2619_v33 = vld [vmem:[#allocation3 + $0x1af0] sm:$0xff] }
 0x763   : > { %3873 = vmatpush1.msra.mxu0 %v2315_v18  ;;  %4980 = vmatpush1.msra.mxu1 %v3949_v21  ;;  %v4025_v18 = vld [vmem:[#allocation6 + $0x2e0] sm:$0xff]  ;;  %v2604_v21 = vld [vmem:[#allocation3 + $0x1a78] sm:$0xff] }
 0x764   : > { %3874 = vmatprep.subr.mxu0 %v2300_v22  ;;  %4981 = vmatprep.subr.mxu1 %v3946_v26  ;;  %v4022_v22 = vld [vmem:[#allocation6 + $0x2c8] sm:$0xff]  ;;  %v2603_v26 = vld [vmem:[#allocation3 + $0x1a70] sm:$0xff] }
 0x765   : > { %3875 = vmatpush1.msra.mxu0 %v2299_v27  ;;  %4982 = vmatpush1.msra.mxu1 %v3945_v20  ;;  %v4021_v27 = vld [vmem:[#allocation6 + $0x2c0] sm:$0xff]  ;;  %v2588_v20 = vld [vmem:[#allocation3 + $0x19f8] sm:$0xff] }
 0x766   : > { %3876 = vmatprep.subr.mxu0 %v2284_v28  ;;  %4983 = vmatprep.subr.mxu1 %v3942_v30  ;;  %v4018_v28 = vld [vmem:[#allocation6 + $0x2a8] sm:$0xff]  ;;  %v2587_v30 = vld [vmem:[#allocation3 + $0x19f0] sm:$0xff] }
 0x767   : > { %3877 = vmatpush1.msra.mxu0 %v2283_v31  ;;  %4984 = vmatpush1.msra.mxu1 %v3941_v32  ;;  %v4017_v31 = vld [vmem:[#allocation6 + $0x2a0] sm:$0xff]  ;;  %v2572_v32 = vld [vmem:[#allocation3 + $0x1978] sm:$0xff] }
 0x768   : > { %3878 = vmatprep.subr.mxu0 %v2780_v13  ;;  %4985 = vmatprep.subr.mxu1 %v3938_v23  ;;  %v4014_v13 = vld [vmem:[#allocation6 + $0x288] sm:$0xff]  ;;  %v7237_v23 = vpop.f32.mrf.mxu1 }
 0x769   : > { %3879 = vmatpush2.msra.mxu0 %v2779_v24  ;;  %4986 = vmatpush1.msra.mxu1 %v3937_v35  ;;  %v7239_v24 = vpop.f32.mrf.mxu0  ;;  %v2571_v35 = vld [vmem:[#allocation3 + $0x1970] sm:$0xff] }
 0x76a   : > { %3880 = vmatprep.subr.mxu0 %v2764_v38  ;;  %4987 = vmatprep.subr.mxu1 %v3934_v12  ;;  %v4013_v38 = vld [vmem:[#allocation6 + $0x280] sm:$0xff]  ;;  %v2556_v12 = vld [vmem:[#allocation3 + $0x18f8] sm:$0xff] }
 0x76b   : > { %3881 = vmatpush2.msra.mxu0 %v2763_v39  ;;  %4988 = vmatpush1.msra.mxu1 %v3933_v40  ;;  %v4010_v39 = vld [vmem:[#allocation6 + $0x268] sm:$0xff]  ;;  %v3415_v40 = vpop.f32.mrf.mxu1 }
 0x76c   : > { %3882 = vmatprep.subr.mxu0 %v2748_v41  ;;  %4989 = vmatprep.subr.mxu1 %v4058_v42  ;;  %v2555_v41 = vld [vmem:[#allocation3 + $0x18f0] sm:$0xff]  ;;  %v4009_v42 = vld [vmem:[#allocation6 + $0x260] sm:$0xff] }
 0x76d   : > { %3883 = vmatpush2.msra.mxu0 %v2747_v25  ;;  %4990 = vmatpush2.msra.mxu1 %v4057_v43  ;;  %v2540_v43 = vld [vmem:[#allocation3 + $0x1878] sm:$0xff] }
 0x76e   : > { %3884 = vmatprep.subr.mxu0 %v2732_v46  ;;  %4991 = vmatprep.subr.mxu1 %v4054_v47  ;;  %v4006_v46 = vld [vmem:[#allocation6 + $0x248] sm:$0xff] }
 0x76f   : > { %3885 = vmatpush2.msra.mxu0 %v2731_v48  ;;  %4992 = vmatpush2.msra.mxu1 %v4053_v49  ;;  %v7245_v48 = vadd.f32 %v7213_v45, %v7211_v44  ;;  %v2539_v49 = vld [vmem:[#allocation3 + $0x1870] sm:$0xff]  ;;  %v3998_v44 = vld [vmem:[#allocation6 + $0x208] sm:$0xff] }
 0x770   : > { %3886 = vmatprep.subr.mxu0 %v2716_v50  ;;  %4993 = vmatprep.subr.mxu1 %v4050_v51  ;;  %v4005_v50 = vld [vmem:[#allocation6 + $0x240] sm:$0xff]  ;;  %v4002_v51 = vld [vmem:[#allocation6 + $0x228] sm:$0xff] }
 0x771   : > { %3887 = vmatpush2.msra.mxu0 %v2715_v52  ;;  %4994 = vmatpush2.msra.mxu1 %v4049_v53  ;;  %v4122_v52 = vld [vmem:[#allocation6 + $0x5e8] sm:$0xff]  ;;  %v4001_v53 = vld [vmem:[#allocation6 + $0x220] sm:$0xff] }
 0x772   : > { %3888 = vmatprep.subr.mxu0 %v2700_v54  ;;  %4995 = vmatprep.subr.mxu1 %v4046_v55  ;;  %v4121_v54 = vld [vmem:[#allocation6 + $0x5e0] sm:$0xff]  ;;  %v3920_v55 = vmax.f32 %v7245_v48, 0.0  ;;  %v4118_v45 = vld [vmem:[#allocation6 + $0x5c8] sm:$0xff]  ;;  %v4108_v48 = vld [vmem:[#allocation6 + $0x578] sm:$0xff] }
 0x773   : > { %3889 = vmatpush2.msra.mxu0 %v2699_v57  ;;  %4996 = vmatpush2.msra.mxu1 %v4045_v58  ;;  %v7251_v57 = vadd.f32 %v7223_v1, %v7221_v63  ;;  %v3997_v58 = vld [vmem:[#allocation6 + $0x200] sm:$0xff]  ;;  %v4110_v1 = vld [vmem:[#allocation6 + $0x588] sm:$0xff] }
 0x774   : > { %3890 = vmatprep.subr.mxu0 %v2684_v59  ;;  %4997 = vmatprep.subr.mxu1 %v4042_v60  ;;  %v4117_v59 = vld [vmem:[#allocation6 + $0x5c0] sm:$0xff]  ;;  %v4114_v60 = vld [vmem:[#allocation6 + $0x5a8] sm:$0xff] }
 0x775   : > { %3891 = vmatpush2.msra.mxu0 %v2683_v61  ;;  %4998 = vmatpush2.msra.mxu1 %v4041_v62  ;;  %v3917_v61 = vmax.f32 %v7187_v16, 0.0  ;;  %v4113_v62 = vld [vmem:[#allocation6 + $0x5a0] sm:$0xff]  ;;  %v3922_v63 = vmax.f32 %v7251_v57, 0.0  ;;  %v4104_v16 = vld [vmem:[#allocation6 + $0x558] sm:$0xff]  ;;  %v4099_v57 = vld [vmem:[#allocation6 + $0x530] sm:$0xff] }
 0x776   : > { %3892 = vmatprep.subr.mxu0 %v2668_v2  ;;  %4999 = vmatprep.subr.mxu1 %v4038_v0  ;;  %v4249_v2 = vld [vmem:[#allocation6 + $0x9e0] sm:$0xff]  ;;  %v4246_v0 = vld [vmem:[#allocation6 + $0x9c8] sm:$0xff] }
 0x777   : > { %3893 = vmatpush2.msra.mxu0 %v2667_v3  ;;  %5000 = vmatpush2.msra.mxu1 %v4037_v4  ;;  %v4109_v3 = vld [vmem:[#allocation6 + $0x580] sm:$0xff] }
 0x778   : > { %3894 = vmatprep.subr.mxu0 %v2652_v5  ;;  %5001 = vmatprep.subr.mxu1 %v4034_v6  ;;  %v4245_v4 = vld [vmem:[#allocation6 + $0x9c0] sm:$0xff]  ;;  %v4106_v5 = vld [vmem:[#allocation6 + $0x568] sm:$0xff] }
 0x779   : > { %3895 = vmatpush2.msra.mxu0 %v2651_v10  ;;  %5002 = vmatpush2.msra.mxu1 %v4033_v7  ;;  %v4242_v6 = vld [vmem:[#allocation6 + $0x9a8] sm:$0xff]  ;;  %v4105_v10 = vld [vmem:[#allocation6 + $0x560] sm:$0xff] }
 0x77a   : > { %3896 = vmatprep.subr.mxu0 %v2636_v8  ;;  %5003 = vmatprep.subr.mxu1 %v4030_v9  ;;  %v4241_v7 = vld [vmem:[#allocation6 + $0x9a0] sm:$0xff]  ;;  %v4102_v8 = vld [vmem:[#allocation6 + $0x548] sm:$0xff] }
 0x77b   : > { %3897 = vmatpush2.msra.mxu0 %v2635_v11  ;;  %5004 = vmatpush2.msra.mxu1 %v4029_v14  ;;  %v4238_v9 = vld [vmem:[#allocation6 + $0x988] sm:$0xff]  ;;  %v4101_v11 = vld [vmem:[#allocation6 + $0x540] sm:$0xff] }
 0x77c   : > { %3898 = vmatprep.subr.mxu0 %v2620_v15  ;;  %5005 = vmatprep.subr.mxu1 %v4026_v17  ;;  %v4237_v14 = vld [vmem:[#allocation6 + $0x980] sm:$0xff]  ;;  %v4098_v15 = vld [vmem:[#allocation6 + $0x528] sm:$0xff] }
 0x77d   : > { %3899 = vmatpush2.msra.mxu0 %v2619_v33  ;;  %5006 = vmatpush2.msra.mxu1 %v4025_v18  ;;  %v4234_v17 = vld [vmem:[#allocation6 + $0x968] sm:$0xff]  ;;  %v4097_v33 = vld [vmem:[#allocation6 + $0x520] sm:$0xff] }
 0x77e   : > { %3900 = vmatprep.subr.mxu0 %v2604_v21  ;;  %5007 = vmatprep.subr.mxu1 %v4022_v22  ;;  %v4233_v18 = vld [vmem:[#allocation6 + $0x960] sm:$0xff]  ;;  %v4094_v21 = vld [vmem:[#allocation6 + $0x508] sm:$0xff] }
 0x77f   : > { %3901 = vmatpush2.msra.mxu0 %v2603_v26  ;;  %5008 = vmatpush2.msra.mxu1 %v4021_v27  ;;  %v4230_v22 = vld [vmem:[#allocation6 + $0x948] sm:$0xff]  ;;  %v4093_v26 = vld [vmem:[#allocation6 + $0x500] sm:$0xff] }
 0x780   : > { %3902 = vmatprep.subr.mxu0 %v2588_v20  ;;  %5009 = vmatprep.subr.mxu1 %v4018_v28  ;;  %v4229_v27 = vld [vmem:[#allocation6 + $0x940] sm:$0xff]  ;;  %v4090_v20 = vld [vmem:[#allocation6 + $0x4e8] sm:$0xff] }
 0x781   : > { %3903 = vmatpush2.msra.mxu0 %v2587_v30  ;;  %5010 = vmatpush2.msra.mxu1 %v4017_v31  ;;  %v4226_v28 = vld [vmem:[#allocation6 + $0x928] sm:$0xff]  ;;  %v4089_v30 = vld [vmem:[#allocation6 + $0x4e0] sm:$0xff] }
 0x782   : > { %3904 = vmatprep.subr.mxu0 %v2572_v32  ;;  %5011 = vmatprep.subr.mxu1 %v4014_v13  ;;  %v3486_v25 = vpop.f32.mrf.mxu0  ;;  %v4225_v31 = vld [vmem:[#allocation6 + $0x920] sm:$0xff]  ;;  %v4086_v32 = vld [vmem:[#allocation6 + $0x4c8] sm:$0xff] }
 0x783   : > { %3905 = vmatpush2.msra.mxu0 %v2571_v35  ;;  %5012 = vmatpush2.msra.mxu1 %v4013_v38  ;;  %v7241_v47 = vadd.f32 %v3486_v25, %v3415_v40  ;;  %v4222_v13 = vld [vmem:[#allocation6 + $0x908] sm:$0xff]  ;;  %v4085_v35 = vld [vmem:[#allocation6 + $0x4c0] sm:$0xff] }
 0x784   : > { %3906 = vmatprep.subr.mxu0 %v2556_v12  ;;  %5013 = vmatprep.subr.mxu1 %v4010_v39  ;;  %v4221_v38 = vld [vmem:[#allocation6 + $0x900] sm:$0xff]  ;;  %v4082_v12 = vld [vmem:[#allocation6 + $0x4a8] sm:$0xff] }
 0x785   : > { %3907 = vmatpush2.msra.mxu0 %v2555_v41  ;;  %5014 = vmatpush2.msra.mxu1 %v4009_v42  ;;  %v4218_v39 = vld [vmem:[#allocation6 + $0x8e8] sm:$0xff]  ;;  %v4081_v40 = vld [vmem:[#allocation6 + $0x4a0] sm:$0xff] }
 0x786   : > { %3908 = vmatprep.subr.mxu0 %v2540_v43  ;;  %5015 = vmatprep.subr.mxu1 %v4006_v46  ;;  %v4217_v41 = vld [vmem:[#allocation6 + $0x8e0] sm:$0xff]  ;;  %v4078_v42 = vld [vmem:[#allocation6 + $0x488] sm:$0xff] }
 0x787   : > { %3909 = vmatpush2.msra.mxu0 %v2539_v49  ;;  %5016 = vmatpush2.msra.mxu1 %v4005_v50  ;;  %v4214_v25 = vld [vmem:[#allocation6 + $0x8c8] sm:$0xff]  ;;  %v4077_v43 = vld [vmem:[#allocation6 + $0x480] sm:$0xff] }
 0x788   : > { %3911 = vmatmul.mubr.f32.vlgmr.msra.gmra.mxu0 %v7227_v19  ;;  %5017 = vmatprep.subr.mxu1 %v4002_v51  ;;  %v4250_v19 = vld [vmem:[#allocation6 + $0x9e8] sm:$0xff]  ;;  %v4213_v46 = vld [vmem:[#allocation6 + $0x8c0] sm:$0xff] }
 0x789   : > { %5028 = vmatprep.subr.mxu0 %v4122_v52  ;;  %5018 = vmatpush2.msra.mxu1 %v4001_v53  ;;  %v4074_v49 = vld [vmem:[#allocation6 + $0x468] sm:$0xff]  ;;  %v4073_v51 = vld [vmem:[#allocation6 + $0x460] sm:$0xff] }
 0x78a   : > { %5029 = vmatpush1.msra.mxu0 %v4121_v54  ;;  %5092 = vmatprep.mubr.f32.mxu0 %v3920_v55  ;;  %v4210_v50 = vld [vmem:[#allocation6 + $0x8a8] sm:$0xff]  ;;  %v4209_v52 = vld [vmem:[#allocation6 + $0x8a0] sm:$0xff] }
 0x78b   : > { %5019 = vmatprep.subr.mxu1 %v3998_v44  ;;  %5030 = vmatprep.subr.mxu0 %v4118_v45  ;;  %v4070_v53 = vld [vmem:[#allocation6 + $0x448] sm:$0xff]  ;;  %v4069_v44 = vld [vmem:[#allocation6 + $0x440] sm:$0xff] }
 0x78c   : > { %5020 = vmatpush2.msra.mxu1 %v3997_v58  ;;  %5031 = vmatpush1.msra.mxu0 %v4117_v59  ;;  %v4206_v54 = vld [vmem:[#allocation6 + $0x888] sm:$0xff]  ;;  %v4205_v45 = vld [vmem:[#allocation6 + $0x880] sm:$0xff] }
 0x78d   : > { %5022 = vmatmul.mubr.f32.vlgmr.msra.gmra.mxu1 %v3917_v61  ;;  %5032 = vmatprep.subr.mxu0 %v4114_v60  ;;  %v4066_v58 = vld [vmem:[#allocation6 + $0x428] sm:$0xff]  ;;  %v4065_v60 = vld [vmem:[#allocation6 + $0x420] sm:$0xff] }
 0x78e   : > { %5099 = vmatprep.subr.mxu1 %v4250_v19  ;;  %5033 = vmatpush1.msra.mxu0 %v4113_v62  ;;  %v4202_v59 = vld [vmem:[#allocation6 + $0x868] sm:$0xff]  ;;  %v4201_v19 = vld [vmem:[#allocation6 + $0x860] sm:$0xff] }
 0x78f   : > { %5100 = vmatpush1.msra.mxu1 %v4249_v2  ;;  %5163 = vmatprep.mubr.f32.mxu1 %v3922_v63  ;;  %v4062_v62 = vld [vmem:[#allocation6 + $0x408] sm:$0xff] }
 0x790   : > { %5034 = vmatprep.subr.mxu0 %v4110_v1  ;;  %5101 = vmatprep.subr.mxu1 %v4246_v0  ;;  %v4198_v2 = vld [vmem:[#allocation6 + $0x848] sm:$0xff]  ;;  %v4061_v1 = vld [vmem:[#allocation6 + $0x400] sm:$0xff] }
 0x791   : > { %5035 = vmatpush1.msra.mxu0 %v4109_v3  ;;  %5102 = vmatpush1.msra.mxu1 %v4245_v4  ;;  %v4197_v0 = vld [vmem:[#allocation6 + $0x840] sm:$0xff]  ;;  %v4186_v3 = vld [vmem:[#allocation6 + $0x7e8] sm:$0xff] }
 0x792   : > { %5036 = vmatprep.subr.mxu0 %v4106_v5  ;;  %5103 = vmatprep.subr.mxu1 %v4242_v6  ;;  %v4194_v4 = vld [vmem:[#allocation6 + $0x828] sm:$0xff]  ;;  %v4185_v5 = vld [vmem:[#allocation6 + $0x7e0] sm:$0xff] }
 0x793   : > { %5037 = vmatpush1.msra.mxu0 %v4105_v10  ;;  %5104 = vmatpush1.msra.mxu1 %v4241_v7  ;;  %v4193_v6 = vld [vmem:[#allocation6 + $0x820] sm:$0xff]  ;;  %v4182_v10 = vld [vmem:[#allocation6 + $0x7c8] sm:$0xff] }
 0x794   : > { %5038 = vmatprep.subr.mxu0 %v4102_v8  ;;  %5105 = vmatprep.subr.mxu1 %v4238_v9  ;;  %v4190_v7 = vld [vmem:[#allocation6 + $0x808] sm:$0xff]  ;;  %v4181_v8 = vld [vmem:[#allocation6 + $0x7c0] sm:$0xff] }
 0x795   : > { %5039 = vmatpush1.msra.mxu0 %v4101_v11  ;;  %5106 = vmatpush1.msra.mxu1 %v4237_v14  ;;  %v4189_v9 = vld [vmem:[#allocation6 + $0x800] sm:$0xff]  ;;  %v4178_v11 = vld [vmem:[#allocation6 + $0x7a8] sm:$0xff] }
 0x796   : > { %5040 = vmatprep.subr.mxu0 %v4098_v15  ;;  %5107 = vmatprep.subr.mxu1 %v4234_v17  ;;  %v4314_v14 = vld [vmem:[#allocation6 + $0xbe8] sm:$0xff]  ;;  %v4177_v15 = vld [vmem:[#allocation6 + $0x7a0] sm:$0xff] }
 0x797   : > { %5041 = vmatpush1.msra.mxu0 %v4097_v33  ;;  %5108 = vmatpush1.msra.mxu1 %v4233_v18  ;;  %v4313_v17 = vld [vmem:[#allocation6 + $0xbe0] sm:$0xff]  ;;  %v4174_v33 = vld [vmem:[#allocation6 + $0x788] sm:$0xff] }
 0x798   : > { %5042 = vmatprep.subr.mxu0 %v4094_v21  ;;  %5109 = vmatprep.subr.mxu1 %v4230_v22  ;;  %v4310_v18 = vld [vmem:[#allocation6 + $0xbc8] sm:$0xff]  ;;  %v4173_v21 = vld [vmem:[#allocation6 + $0x780] sm:$0xff] }
 0x799   : > { %5043 = vmatpush1.msra.mxu0 %v4093_v26  ;;  %5110 = vmatpush1.msra.mxu1 %v4229_v27  ;;  %v4309_v22 = vld [vmem:[#allocation6 + $0xbc0] sm:$0xff]  ;;  %v4170_v26 = vld [vmem:[#allocation6 + $0x768] sm:$0xff] }
 0x79a   : > { %5044 = vmatprep.subr.mxu0 %v4090_v20  ;;  %5111 = vmatprep.subr.mxu1 %v4226_v28  ;;  %v4306_v27 = vld [vmem:[#allocation6 + $0xba8] sm:$0xff]  ;;  %v4169_v20 = vld [vmem:[#allocation6 + $0x760] sm:$0xff] }
 0x79b   : > { %5045 = vmatpush1.msra.mxu0 %v4089_v30  ;;  %5112 = vmatpush1.msra.mxu1 %v4225_v31  ;;  %v4305_v28 = vld [vmem:[#allocation6 + $0xba0] sm:$0xff]  ;;  %v4166_v30 = vld [vmem:[#allocation6 + $0x748] sm:$0xff] }
 0x79c   : > { %5046 = vmatprep.subr.mxu0 %v4086_v32  ;;  %5113 = vmatprep.subr.mxu1 %v4222_v13  ;;  %v4302_v31 = vld [vmem:[#allocation6 + $0xb88] sm:$0xff]  ;;  %v4165_v32 = vld [vmem:[#allocation6 + $0x740] sm:$0xff] }
 0x79d   : > { %5047 = vmatpush1.msra.mxu0 %v4085_v35  ;;  %5114 = vmatpush1.msra.mxu1 %v4221_v38  ;;  %v4301_v13 = vld [vmem:[#allocation6 + $0xb80] sm:$0xff]  ;;  %v4162_v35 = vld [vmem:[#allocation6 + $0x728] sm:$0xff] }
 0x79e   : > { %5048 = vmatprep.subr.mxu0 %v4082_v12  ;;  %5115 = vmatprep.subr.mxu1 %v4218_v39  ;;  %v4298_v38 = vld [vmem:[#allocation6 + $0xb68] sm:$0xff]  ;;  %v4161_v12 = vld [vmem:[#allocation6 + $0x720] sm:$0xff] }
 0x79f   : > { %5049 = vmatpush1.msra.mxu0 %v4081_v40  ;;  %5116 = vmatpush1.msra.mxu1 %v4217_v41  ;;  %v4297_v39 = vld [vmem:[#allocation6 + $0xb60] sm:$0xff]  ;;  %v4158_v40 = vld [vmem:[#allocation6 + $0x708] sm:$0xff] }
 0x7a0   : > { %5050 = vmatprep.subr.mxu0 %v4078_v42  ;;  %5117 = vmatprep.subr.mxu1 %v4214_v25  ;;  %v4294_v41 = vld [vmem:[#allocation6 + $0xb48] sm:$0xff]  ;;  %v4157_v42 = vld [vmem:[#allocation6 + $0x700] sm:$0xff] }
 0x7a1   : > { %5051 = vmatpush1.msra.mxu0 %v4077_v43  ;;  %5118 = vmatpush1.msra.mxu1 %v4213_v46  ;;  %v4293_v25 = vld [vmem:[#allocation6 + $0xb40] sm:$0xff]  ;;  %v4154_v43 = vld [vmem:[#allocation6 + $0x6e8] sm:$0xff] }
 0x7a2   : > { %5052 = vmatprep.subr.mxu0 %v4074_v49  ;;  %5119 = vmatprep.subr.mxu1 %v4210_v50  ;;  %v4290_v46 = vld [vmem:[#allocation6 + $0xb28] sm:$0xff]  ;;  %v4153_v49 = vld [vmem:[#allocation6 + $0x6e0] sm:$0xff] }
 0x7a3   : > { %5053 = vmatpush1.msra.mxu0 %v4073_v51  ;;  %5120 = vmatpush1.msra.mxu1 %v4209_v52  ;;  %v4289_v50 = vld [vmem:[#allocation6 + $0xb20] sm:$0xff]  ;;  %v4150_v51 = vld [vmem:[#allocation6 + $0x6c8] sm:$0xff] }
 0x7a4   : > { %5054 = vmatprep.subr.mxu0 %v4070_v53  ;;  %5121 = vmatprep.subr.mxu1 %v4206_v54  ;;  %v4286_v52 = vld [vmem:[#allocation6 + $0xb08] sm:$0xff]  ;;  %v4149_v53 = vld [vmem:[#allocation6 + $0x6c0] sm:$0xff] }
 0x7a5   : > { %5055 = vmatpush1.msra.mxu0 %v4069_v44  ;;  %5122 = vmatpush1.msra.mxu1 %v4205_v45  ;;  %v4285_v54 = vld [vmem:[#allocation6 + $0xb00] sm:$0xff]  ;;  %v4146_v44 = vld [vmem:[#allocation6 + $0x6a8] sm:$0xff] }
 0x7a6   : > { %5056 = vmatprep.subr.mxu0 %v4066_v58  ;;  %5123 = vmatprep.subr.mxu1 %v4202_v59  ;;  %v4282_v45 = vld [vmem:[#allocation6 + $0xae8] sm:$0xff]  ;;  %v4145_v58 = vld [vmem:[#allocation6 + $0x6a0] sm:$0xff] }
 0x7a7   : > { %5057 = vmatpush1.msra.mxu0 %v4065_v60  ;;  %5124 = vmatpush1.msra.mxu1 %v4201_v19  ;;  %v4281_v59 = vld [vmem:[#allocation6 + $0xae0] sm:$0xff]  ;;  %v4142_v60 = vld [vmem:[#allocation6 + $0x688] sm:$0xff] }
 0x7a8   : > { %5058 = vmatprep.subr.mxu0 %v4062_v62  ;;  %5125 = vmatprep.subr.mxu1 %v4198_v2  ;;  %v4278_v19 = vld [vmem:[#allocation6 + $0xac8] sm:$0xff]  ;;  %v4141_v62 = vld [vmem:[#allocation6 + $0x680] sm:$0xff] }
 0x7a9   : > { %5059 = vmatpush1.msra.mxu0 %v4061_v1  ;;  %5126 = vmatpush1.msra.mxu1 %v4197_v0  ;;  %v4277_v2 = vld [vmem:[#allocation6 + $0xac0] sm:$0xff]  ;;  %v4138_v1 = vld [vmem:[#allocation6 + $0x668] sm:$0xff] }
 0x7aa   : > { %5060 = vmatprep.subr.mxu0 %v4186_v3  ;;  %5127 = vmatprep.subr.mxu1 %v4194_v4  ;;  %v4274_v0 = vld [vmem:[#allocation6 + $0xaa8] sm:$0xff]  ;;  %v4137_v3 = vld [vmem:[#allocation6 + $0x660] sm:$0xff] }
 0x7ab   : > { %5061 = vmatpush2.msra.mxu0 %v4185_v5  ;;  %5128 = vmatpush1.msra.mxu1 %v4193_v6  ;;  %v4273_v4 = vld [vmem:[#allocation6 + $0xaa0] sm:$0xff]  ;;  %v4134_v5 = vld [vmem:[#allocation6 + $0x648] sm:$0xff] }
 0x7ac   : > { %5062 = vmatprep.subr.mxu0 %v4182_v10  ;;  %5129 = vmatprep.subr.mxu1 %v4190_v7  ;;  %v4270_v6 = vld [vmem:[#allocation6 + $0xa88] sm:$0xff]  ;;  %v3417_v10 = vpop.f32.mrf.mxu1  ;;  %v3488_v7 = vpop.f32.mrf.mxu0 }
 0x7ad   : > { %5063 = vmatpush2.msra.mxu0 %v4181_v8  ;;  %5130 = vmatpush1.msra.mxu1 %v4189_v9  ;;  %v4133_v8 = vld [vmem:[#allocation6 + $0x640] sm:$0xff] }
 0x7ae   : > { %5064 = vmatprep.subr.mxu0 %v4178_v11  ;;  %5131 = vmatprep.subr.mxu1 %v4314_v14  ;;  %v4269_v9 = vld [vmem:[#allocation6 + $0xa80] sm:$0xff]  ;;  %v4130_v11 = vld [vmem:[#allocation6 + $0x628] sm:$0xff] }
 0x7af   : > { %5065 = vmatpush2.msra.mxu0 %v4177_v15  ;;  %5132 = vmatpush2.msra.mxu1 %v4313_v17  ;;  %v4266_v14 = vld [vmem:[#allocation6 + $0xa68] sm:$0xff]  ;;  %v3557_v15 = vpop.f32.mrf.mxu1  ;;  %v4129_v17 = vld [vmem:[#allocation6 + $0x620] sm:$0xff] }
 0x7b0   : > { %5066 = vmatprep.subr.mxu0 %v4174_v33  ;;  %5133 = vmatprep.subr.mxu1 %v4310_v18  ;;  %v4265_v33 = vld [vmem:[#allocation6 + $0xa60] sm:$0xff] }
 0x7b1   : > { %5067 = vmatpush2.msra.mxu0 %v4173_v21  ;;  %5134 = vmatpush2.msra.mxu1 %v4309_v22  ;;  %v4126_v21 = vld [vmem:[#allocation6 + $0x608] sm:$0xff] }
 0x7b2   : > { %5068 = vmatprep.subr.mxu0 %v4170_v26  ;;  %5135 = vmatprep.subr.mxu1 %v4306_v27  ;;  %v4262_v22 = vld [vmem:[#allocation6 + $0xa48] sm:$0xff]  ;;  %v7265_v27 = vadd.f32 %v7239_v24, %v7237_v23 }
 0x7b3   : > { %5069 = vmatpush2.msra.mxu0 %v4169_v20  ;;  %5136 = vmatpush2.msra.mxu1 %v4305_v28  ;;  %v4125_v20 = vld [vmem:[#allocation6 + $0x600] sm:$0xff]  ;;  %v4254_v23 = vld [vmem:[#allocation6 + $0xa08] sm:$0xff] }
 0x7b4   : > { %5070 = vmatprep.subr.mxu0 %v4166_v30  ;;  %5137 = vmatprep.subr.mxu1 %v4302_v31  ;;  %v4261_v28 = vld [vmem:[#allocation6 + $0xa40] sm:$0xff]  ;;  %v4258_v30 = vld [vmem:[#allocation6 + $0xa28] sm:$0xff]  ;;  %v3919_v31 = vmax.f32 %v7197_v36, 0.0  ;;  %v4507_v36 = vld [vmem:[#allocation6 + $0x11f0] sm:$0xff] }
 0x7b5   : > { %5071 = vmatpush2.msra.mxu0 %v4165_v32  ;;  %5138 = vmatpush2.msra.mxu1 %v4301_v13  ;;  %v4378_v32 = vld [vmem:[#allocation6 + $0xde8] sm:$0xff]  ;;  %v4257_v13 = vld [vmem:[#allocation6 + $0xa20] sm:$0xff] }
 0x7b6   : > { %5072 = vmatprep.subr.mxu0 %v4162_v35  ;;  %5139 = vmatprep.subr.mxu1 %v4298_v38  ;;  %v4377_v35 = vld [vmem:[#allocation6 + $0xde0] sm:$0xff]  ;;  %v3924_v38 = vmax.f32 %v7265_v27, 0.0  ;;  %v4374_v24 = vld [vmem:[#allocation6 + $0xdc8] sm:$0xff]  ;;  %v4364_v27 = vld [vmem:[#allocation6 + $0xd78] sm:$0xff] }
 0x7b7   : > { %5073 = vmatpush2.msra.mxu0 %v4161_v12  ;;  %5140 = vmatpush2.msra.mxu1 %v4297_v39  ;;  %v7271_v12 = vadd.f32 %v3488_v7, %v3417_v10  ;;  %v4253_v39 = vld [vmem:[#allocation6 + $0xa00] sm:$0xff]  ;;  %v4346_v7 = vld [vmem:[#allocation6 + $0xce8] sm:$0xff] }
 0x7b8   : > { %5074 = vmatprep.subr.mxu0 %v4158_v40  ;;  %5141 = vmatprep.subr.mxu1 %v4294_v41  ;;  %v4373_v40 = vld [vmem:[#allocation6 + $0xdc0] sm:$0xff]  ;;  %v4370_v41 = vld [vmem:[#allocation6 + $0xda8] sm:$0xff] }
 0x7b9   : > { %5075 = vmatpush2.msra.mxu0 %v4157_v42  ;;  %5142 = vmatpush2.msra.mxu1 %v4293_v25  ;;  %v3921_v42 = vmax.f32 %v7215_v56, 0.0  ;;  %v4506_v25 = vld [vmem:[#allocation6 + $0x11e8] sm:$0xff]  ;;  %v4485_v10 = vld [vmem:[#allocation6 + $0x1140] sm:$0xff]  ;;  %v4360_v56 = vld [vmem:[#allocation6 + $0xd58] sm:$0xff] }
 0x7ba   : > { %5076 = vmatprep.subr.mxu0 %v4154_v43  ;;  %5143 = vmatprep.subr.mxu1 %v4290_v46  ;;  %v4369_v43 = vld [vmem:[#allocation6 + $0xda0] sm:$0xff] }
 0x7bb   : > { %5077 = vmatpush2.msra.mxu0 %v4153_v49  ;;  %5144 = vmatpush2.msra.mxu1 %v4289_v50  ;;  %v4505_v46 = vld [vmem:[#allocation6 + $0x11e0] sm:$0xff]  ;;  %v3926_v49 = vmax.f32 %v7271_v12, 0.0  ;;  %v4366_v50 = vld [vmem:[#allocation6 + $0xd88] sm:$0xff]  ;;  %v4355_v12 = vld [vmem:[#allocation6 + $0xd30] sm:$0xff] }
 0x7bc   : > { %5078 = vmatprep.subr.mxu0 %v4150_v51  ;;  %5145 = vmatprep.subr.mxu1 %v4286_v52  ;;  %v4502_v51 = vld [vmem:[#allocation6 + $0x11c8] sm:$0xff]  ;;  %v4365_v52 = vld [vmem:[#allocation6 + $0xd80] sm:$0xff] }
 0x7bd   : > { %5079 = vmatpush2.msra.mxu0 %v4149_v53  ;;  %5146 = vmatpush2.msra.mxu1 %v4285_v54  ;;  %v4501_v53 = vld [vmem:[#allocation6 + $0x11c0] sm:$0xff]  ;;  %v4362_v54 = vld [vmem:[#allocation6 + $0xd68] sm:$0xff] }
 0x7be   : > { %5080 = vmatprep.subr.mxu0 %v4146_v44  ;;  %5147 = vmatprep.subr.mxu1 %v4282_v45  ;;  %v4498_v44 = vld [vmem:[#allocation6 + $0x11a8] sm:$0xff]  ;;  %v4361_v45 = vld [vmem:[#allocation6 + $0xd60] sm:$0xff] }
 0x7bf   : > { %5081 = vmatpush2.msra.mxu0 %v4145_v58  ;;  %5148 = vmatpush2.msra.mxu1 %v4281_v59  ;;  %v4497_v58 = vld [vmem:[#allocation6 + $0x11a0] sm:$0xff]  ;;  %v4358_v59 = vld [vmem:[#allocation6 + $0xd48] sm:$0xff] }
 0x7c0   : > { %5082 = vmatprep.subr.mxu0 %v4142_v60  ;;  %5149 = vmatprep.subr.mxu1 %v4278_v19  ;;  %v4494_v60 = vld [vmem:[#allocation6 + $0x1188] sm:$0xff]  ;;  %v4357_v19 = vld [vmem:[#allocation6 + $0xd40] sm:$0xff] }
 0x7c1   : > { %5083 = vmatpush2.msra.mxu0 %v4141_v62  ;;  %5150 = vmatpush2.msra.mxu1 %v4277_v2  ;;  %v4493_v62 = vld [vmem:[#allocation6 + $0x1180] sm:$0xff]  ;;  %v4354_v2 = vld [vmem:[#allocation6 + $0xd28] sm:$0xff] }
 0x7c2   : > { %5084 = vmatprep.subr.mxu0 %v4138_v1  ;;  %5151 = vmatprep.subr.mxu1 %v4274_v0  ;;  %v4490_v1 = vld [vmem:[#allocation6 + $0x1168] sm:$0xff]  ;;  %v4353_v0 = vld [vmem:[#allocation6 + $0xd20] sm:$0xff] }
 0x7c3   : > { %5085 = vmatpush2.msra.mxu0 %v4137_v3  ;;  %5152 = vmatpush2.msra.mxu1 %v4273_v4  ;;  %v4489_v3 = vld [vmem:[#allocation6 + $0x1160] sm:$0xff]  ;;  %v4350_v4 = vld [vmem:[#allocation6 + $0xd08] sm:$0xff] }
 0x7c4   : > { %5086 = vmatprep.subr.mxu0 %v4134_v5  ;;  %5153 = vmatprep.subr.mxu1 %v4270_v6  ;;  %v3628_v18 = vpop.f32.mrf.mxu0  ;;  %v4486_v5 = vld [vmem:[#allocation6 + $0x1148] sm:$0xff]  ;;  %v4349_v6 = vld [vmem:[#allocation6 + $0xd00] sm:$0xff] }
 0x7c5   : > { %5087 = vmatpush2.msra.mxu0 %v4133_v8  ;;  %5154 = vmatpush2.msra.mxu1 %v4269_v9  ;;  %v7261_v26 = vadd.f32 %v3628_v18, %v3557_v15  ;;  %v4482_v8 = vld [vmem:[#allocation6 + $0x1128] sm:$0xff]  ;;  %v4345_v9 = vld [vmem:[#allocation6 + $0xce0] sm:$0xff] }
 0x7c6   : > { %5088 = vmatprep.subr.mxu0 %v4130_v11  ;;  %5155 = vmatprep.subr.mxu1 %v4266_v14  ;;  %v4481_v11 = vld [vmem:[#allocation6 + $0x1120] sm:$0xff]  ;;  %v4342_v14 = vld [vmem:[#allocation6 + $0xcc8] sm:$0xff] }
 0x7c7   : > { %5089 = vmatpush2.msra.mxu0 %v4129_v17  ;;  %5156 = vmatpush2.msra.mxu1 %v4265_v33  ;;  %v4478_v15 = vld [vmem:[#allocation6 + $0x1108] sm:$0xff]  ;;  %v4341_v17 = vld [vmem:[#allocation6 + $0xcc0] sm:$0xff] }
 0x7c8   : > { %5090 = vmatprep.subr.mxu0 %v4126_v21  ;;  %5157 = vmatprep.subr.mxu1 %v4262_v22  ;;  %v4477_v33 = vld [vmem:[#allocation6 + $0x1100] sm:$0xff]  ;;  %v4338_v18 = vld [vmem:[#allocation6 + $0xca8] sm:$0xff] }
 0x7c9   : > { %5091 = vmatpush2.msra.mxu0 %v4125_v20  ;;  %5158 = vmatpush2.msra.mxu1 %v4261_v28  ;;  %v4474_v21 = vld [vmem:[#allocation6 + $0x10e8] sm:$0xff]  ;;  %v4337_v22 = vld [vmem:[#allocation6 + $0xca0] sm:$0xff] }
 0x7ca   : > { %5093 = vmatmul.mubr.f32.vlgmr.msra.gmra.mxu0 %v3919_v31  ;;  %5159 = vmatprep.subr.mxu1 %v4258_v30  ;;  %v4473_v20 = vld [vmem:[#allocation6 + $0x10e0] sm:$0xff]  ;;  %v4334_v28 = vld [vmem:[#allocation6 + $0xc88] sm:$0xff] }
 0x7cb   : > { %5170 = vmatprep.subr.mxu0 %v4378_v32  ;;  %5160 = vmatpush2.msra.mxu1 %v4257_v13  ;;  %v4470_v30 = vld [vmem:[#allocation6 + $0x10c8] sm:$0xff]  ;;  %v4333_v32 = vld [vmem:[#allocation6 + $0xc80] sm:$0xff] }
 0x7cc   : > { %5171 = vmatpush1.msra.mxu0 %v4377_v35  ;;  %5234 = vmatprep.mubr.f32.mxu0 %v3924_v38  ;;  %v4469_v13 = vld [vmem:[#allocation6 + $0x10c0] sm:$0xff]  ;;  %v4330_v35 = vld [vmem:[#allocation6 + $0xc68] sm:$0xff] }
 0x7cd   : > { %5161 = vmatprep.subr.mxu1 %v4254_v23  ;;  %5172 = vmatprep.subr.mxu0 %v4374_v24  ;;  %v4466_v23 = vld [vmem:[#allocation6 + $0x10a8] sm:$0xff]  ;;  %v4329_v24 = vld [vmem:[#allocation6 + $0xc60] sm:$0xff] }
 0x7ce   : > { %5162 = vmatpush2.msra.mxu1 %v4253_v39  ;;  %5173 = vmatpush1.msra.mxu0 %v4373_v40  ;;  %v4465_v39 = vld [vmem:[#allocation6 + $0x10a0] sm:$0xff]  ;;  %v4326_v40 = vld [vmem:[#allocation6 + $0xc48] sm:$0xff] }
 0x7cf   : > { %5164 = vmatmul.mubr.f32.vlgmr.msra.gmra.mxu1 %v3921_v42  ;;  %5174 = vmatprep.subr.mxu0 %v4370_v41  ;;  %v4462_v41 = vld [vmem:[#allocation6 + $0x1088] sm:$0xff] }
 0x7d0   : > { %5241 = vmatprep.subr.mxu1 %v4506_v25  ;;  %5175 = vmatpush1.msra.mxu0 %v4369_v43  ;;  %v4325_v25 = vld [vmem:[#allocation6 + $0xc40] sm:$0xff] }
 0x7d1   : > { %5242 = vmatpush1.msra.mxu1 %v4505_v46  ;;  %5305 = vmatprep.mubr.f32.mxu1 %v3926_v49  ;;  %v4461_v43 = vld [vmem:[#allocation6 + $0x1080] sm:$0xff]  ;;  %v4322_v46 = vld [vmem:[#allocation6 + $0xc28] sm:$0xff] }
 0x7d2   : > { %5176 = vmatprep.subr.mxu0 %v4366_v50  ;;  %5243 = vmatprep.subr.mxu1 %v4502_v51  ;;  %v4458_v50 = vld [vmem:[#allocation6 + $0x1068] sm:$0xff]  ;;  %v4321_v51 = vld [vmem:[#allocation6 + $0xc20] sm:$0xff] }
 0x7d3   : > { %5177 = vmatpush1.msra.mxu0 %v4365_v52  ;;  %5244 = vmatpush1.msra.mxu1 %v4501_v53  ;;  %v4457_v52 = vld [vmem:[#allocation6 + $0x1060] sm:$0xff]  ;;  %v4318_v53 = vld [vmem:[#allocation6 + $0xc08] sm:$0xff] }
 0x7d4   : > { %5178 = vmatprep.subr.mxu0 %v4362_v54  ;;  %5245 = vmatprep.subr.mxu1 %v4498_v44  ;;  %v4454_v54 = vld [vmem:[#allocation6 + $0x1048] sm:$0xff]  ;;  %v4317_v44 = vld [vmem:[#allocation6 + $0xc00] sm:$0xff] }
 0x7d5   : > { %5179 = vmatpush1.msra.mxu0 %v4361_v45  ;;  %5246 = vmatpush1.msra.mxu1 %v4497_v58  ;;  %v4453_v45 = vld [vmem:[#allocation6 + $0x1040] sm:$0xff]  ;;  %v4442_v58 = vld [vmem:[#allocation6 + $0xfe8] sm:$0xff] }
 0x7d6   : > { %5180 = vmatprep.subr.mxu0 %v4358_v59  ;;  %5247 = vmatprep.subr.mxu1 %v4494_v60  ;;  %v4450_v59 = vld [vmem:[#allocation6 + $0x1028] sm:$0xff]  ;;  %v4441_v60 = vld [vmem:[#allocation6 + $0xfe0] sm:$0xff] }
 0x7d7   : > { %5181 = vmatpush1.msra.mxu0 %v4357_v19  ;;  %5248 = vmatpush1.msra.mxu1 %v4493_v62  ;;  %v4449_v19 = vld [vmem:[#allocation6 + $0x1020] sm:$0xff]  ;;  %v4438_v62 = vld [vmem:[#allocation6 + $0xfc8] sm:$0xff] }
 0x7d8   : > { %5182 = vmatprep.subr.mxu0 %v4354_v2  ;;  %5249 = vmatprep.subr.mxu1 %v4490_v1  ;;  %v4446_v2 = vld [vmem:[#allocation6 + $0x1008] sm:$0xff]  ;;  %v4437_v1 = vld [vmem:[#allocation6 + $0xfc0] sm:$0xff] }
 0x7d9   : > { %5183 = vmatpush1.msra.mxu0 %v4353_v0  ;;  %5250 = vmatpush1.msra.mxu1 %v4489_v3  ;;  %v4445_v0 = vld [vmem:[#allocation6 + $0x1000] sm:$0xff]  ;;  %v4434_v3 = vld [vmem:[#allocation6 + $0xfa8] sm:$0xff] }
 0x7da   : > { %5184 = vmatprep.subr.mxu0 %v4350_v4  ;;  %5251 = vmatprep.subr.mxu1 %v4486_v5  ;;  %v4570_v4 = vld [vmem:[#allocation6 + $0x13e8] sm:$0xff]  ;;  %v4433_v5 = vld [vmem:[#allocation6 + $0xfa0] sm:$0xff] }
 0x7db   : > { %5185 = vmatpush1.msra.mxu0 %v4349_v6  ;;  %5252 = vmatpush1.msra.mxu1 %v4485_v10  ;;  %v4569_v6 = vld [vmem:[#allocation6 + $0x13e0] sm:$0xff]  ;;  %v4430_v10 = vld [vmem:[#allocation6 + $0xf88] sm:$0xff] }
 0x7dc   : > { %5186 = vmatprep.subr.mxu0 %v4346_v7  ;;  %5253 = vmatprep.subr.mxu1 %v4482_v8  ;;  %v4566_v7 = vld [vmem:[#allocation6 + $0x13c8] sm:$0xff]  ;;  %v4429_v8 = vld [vmem:[#allocation6 + $0xf80] sm:$0xff] }
 0x7dd   : > { %5187 = vmatpush1.msra.mxu0 %v4345_v9  ;;  %5254 = vmatpush1.msra.mxu1 %v4481_v11  ;;  %v4565_v9 = vld [vmem:[#allocation6 + $0x13c0] sm:$0xff]  ;;  %v4426_v11 = vld [vmem:[#allocation6 + $0xf68] sm:$0xff] }
 0x7de   : > { %5188 = vmatprep.subr.mxu0 %v4342_v14  ;;  %5255 = vmatprep.subr.mxu1 %v4478_v15  ;;  %v4562_v14 = vld [vmem:[#allocation6 + $0x13a8] sm:$0xff]  ;;  %v4425_v15 = vld [vmem:[#allocation6 + $0xf60] sm:$0xff] }
 0x7df   : > { %5189 = vmatpush1.msra.mxu0 %v4341_v17  ;;  %5256 = vmatpush1.msra.mxu1 %v4477_v33  ;;  %v4561_v17 = vld [vmem:[#allocation6 + $0x13a0] sm:$0xff]  ;;  %v4422_v33 = vld [vmem:[#allocation6 + $0xf48] sm:$0xff] }
 0x7e0   : > { %5190 = vmatprep.subr.mxu0 %v4338_v18  ;;  %5257 = vmatprep.subr.mxu1 %v4474_v21  ;;  %v4558_v18 = vld [vmem:[#allocation6 + $0x1388] sm:$0xff]  ;;  %v4421_v21 = vld [vmem:[#allocation6 + $0xf40] sm:$0xff] }
 0x7e1   : > { %5191 = vmatpush1.msra.mxu0 %v4337_v22  ;;  %5258 = vmatpush1.msra.mxu1 %v4473_v20  ;;  %v4557_v22 = vld [vmem:[#allocation6 + $0x1380] sm:$0xff]  ;;  %v4418_v20 = vld [vmem:[#allocation6 + $0xf28] sm:$0xff] }
 0x7e2   : > { %5192 = vmatprep.subr.mxu0 %v4334_v28  ;;  %5259 = vmatprep.subr.mxu1 %v4470_v30  ;;  %v4554_v28 = vld [vmem:[#allocation6 + $0x1368] sm:$0xff]  ;;  %v4417_v30 = vld [vmem:[#allocation6 + $0xf20] sm:$0xff] }
 0x7e3   : > { %5193 = vmatpush1.msra.mxu0 %v4333_v32  ;;  %5260 = vmatpush1.msra.mxu1 %v4469_v13  ;;  %v4553_v32 = vld [vmem:[#allocation6 + $0x1360] sm:$0xff]  ;;  %v4414_v13 = vld [vmem:[#allocation6 + $0xf08] sm:$0xff] }
 0x7e4   : > { %5194 = vmatprep.subr.mxu0 %v4330_v35  ;;  %5261 = vmatprep.subr.mxu1 %v4466_v23  ;;  %v4550_v35 = vld [vmem:[#allocation6 + $0x1348] sm:$0xff]  ;;  %v4413_v23 = vld [vmem:[#allocation6 + $0xf00] sm:$0xff] }
 0x7e5   : > { %5195 = vmatpush1.msra.mxu0 %v4329_v24  ;;  %5262 = vmatpush1.msra.mxu1 %v4465_v39  ;;  %v4549_v24 = vld [vmem:[#allocation6 + $0x1340] sm:$0xff]  ;;  %v4410_v39 = vld [vmem:[#allocation6 + $0xee8] sm:$0xff] }
 0x7e6   : > { %5196 = vmatprep.subr.mxu0 %v4326_v40  ;;  %5263 = vmatprep.subr.mxu1 %v4462_v41  ;;  %v4546_v40 = vld [vmem:[#allocation6 + $0x1328] sm:$0xff]  ;;  %v4409_v41 = vld [vmem:[#allocation6 + $0xee0] sm:$0xff] }
 0x7e7   : > { %5197 = vmatpush1.msra.mxu0 %v4325_v25  ;;  %5264 = vmatpush1.msra.mxu1 %v4461_v43  ;;  %v4545_v25 = vld [vmem:[#allocation6 + $0x1320] sm:$0xff]  ;;  %v4406_v43 = vld [vmem:[#allocation6 + $0xec8] sm:$0xff] }
 0x7e8   : > { %5198 = vmatprep.subr.mxu0 %v4322_v46  ;;  %5265 = vmatprep.subr.mxu1 %v4458_v50  ;;  %v4542_v46 = vld [vmem:[#allocation6 + $0x1308] sm:$0xff]  ;;  %v4405_v50 = vld [vmem:[#allocation6 + $0xec0] sm:$0xff] }
 0x7e9   : > { %5199 = vmatpush1.msra.mxu0 %v4321_v51  ;;  %5266 = vmatpush1.msra.mxu1 %v4457_v52  ;;  %v4541_v51 = vld [vmem:[#allocation6 + $0x1300] sm:$0xff]  ;;  %v4402_v52 = vld [vmem:[#allocation6 + $0xea8] sm:$0xff] }
 0x7ea   : > { %5200 = vmatprep.subr.mxu0 %v4318_v53  ;;  %5267 = vmatprep.subr.mxu1 %v4454_v54  ;;  %v4538_v53 = vld [vmem:[#allocation6 + $0x12e8] sm:$0xff]  ;;  %v4401_v54 = vld [vmem:[#allocation6 + $0xea0] sm:$0xff] }
 0x7eb   : > { %5201 = vmatpush1.msra.mxu0 %v4317_v44  ;;  %5268 = vmatpush1.msra.mxu1 %v4453_v45  ;;  %v4537_v44 = vld [vmem:[#allocation6 + $0x12e0] sm:$0xff]  ;;  %v4398_v45 = vld [vmem:[#allocation6 + $0xe88] sm:$0xff] }
 0x7ec   : > { %5202 = vmatprep.subr.mxu0 %v4442_v58  ;;  %5269 = vmatprep.subr.mxu1 %v4450_v59  ;;  %v4534_v58 = vld [vmem:[#allocation6 + $0x12c8] sm:$0xff]  ;;  %v4397_v59 = vld [vmem:[#allocation6 + $0xe80] sm:$0xff] }
 0x7ed   : > { %5203 = vmatpush2.msra.mxu0 %v4441_v60  ;;  %5270 = vmatpush1.msra.mxu1 %v4449_v19  ;;  %v4533_v60 = vld [vmem:[#allocation6 + $0x12c0] sm:$0xff]  ;;  %v4394_v19 = vld [vmem:[#allocation6 + $0xe68] sm:$0xff] }
 0x7ee   : > { %5204 = vmatprep.subr.mxu0 %v4438_v62  ;;  %5271 = vmatprep.subr.mxu1 %v4446_v2  ;;  %v4530_v62 = vld [vmem:[#allocation6 + $0x12a8] sm:$0xff]  ;;  %v4393_v2 = vld [vmem:[#allocation6 + $0xe60] sm:$0xff] }
 0x7ef   : > { %5205 = vmatpush2.msra.mxu0 %v4437_v1  ;;  %5272 = vmatpush1.msra.mxu1 %v4445_v0  ;;  %v4529_v1 = vld [vmem:[#allocation6 + $0x12a0] sm:$0xff]  ;;  %v4390_v0 = vld [vmem:[#allocation6 + $0xe48] sm:$0xff] }
 0x7f0   : > { %5206 = vmatprep.subr.mxu0 %v4434_v3  ;;  %5273 = vmatprep.subr.mxu1 %v4570_v4  ;;  %v4526_v3 = vld [vmem:[#allocation6 + $0x1288] sm:$0xff]  ;;  %v3630_v4 = vpop.f32.mrf.mxu0 }
 0x7f1   : > { %5207 = vmatpush2.msra.mxu0 %v4433_v5  ;;  %5274 = vmatpush2.msra.mxu1 %v4569_v6  ;;  %v4389_v5 = vld [vmem:[#allocation6 + $0xe40] sm:$0xff] }
 0x7f2   : > { %5208 = vmatprep.subr.mxu0 %v4430_v10  ;;  %5275 = vmatprep.subr.mxu1 %v4566_v7  ;;  %v4525_v6 = vld [vmem:[#allocation6 + $0x1280] sm:$0xff]  ;;  %v4386_v10 = vld [vmem:[#allocation6 + $0xe28] sm:$0xff] }
 0x7f3   : > { %5209 = vmatpush2.msra.mxu0 %v4429_v8  ;;  %5276 = vmatpush2.msra.mxu1 %v4565_v9  ;;  %v4522_v7 = vld [vmem:[#allocation6 + $0x1268] sm:$0xff]  ;;  %v3559_v8 = vpop.f32.mrf.mxu1  ;;  %v4385_v9 = vld [vmem:[#allocation6 + $0xe20] sm:$0xff] }
 0x7f4   : > { %5210 = vmatprep.subr.mxu0 %v4426_v11  ;;  %5277 = vmatprep.subr.mxu1 %v4562_v14  ;;  %v4521_v11 = vld [vmem:[#allocation6 + $0x1260] sm:$0xff] }
 0x7f5   : > { %5211 = vmatpush2.msra.mxu0 %v4425_v15  ;;  %5278 = vmatpush2.msra.mxu1 %v4561_v17  ;;  %v4382_v15 = vld [vmem:[#allocation6 + $0xe08] sm:$0xff] }
 0x7f6   : > { %5212 = vmatprep.subr.mxu0 %v4422_v33  ;;  %5279 = vmatprep.subr.mxu1 %v4558_v18  ;;  %v4518_v17 = vld [vmem:[#allocation6 + $0x1248] sm:$0xff]  ;;  %v7283_v33 = vadd.f32 %v3630_v4, %v3559_v8  ;;  %v7285_v18 = vpop.f32.mrf.mxu1  ;;  %v4749_v4 = vld [vmem:[#allocation6 + $0x1980] sm:$0xff] }
 0x7f7   : > { %5213 = vmatpush2.msra.mxu0 %v4421_v21  ;;  %5280 = vmatpush2.msra.mxu1 %v4557_v22  ;;  %v4381_v21 = vld [vmem:[#allocation6 + $0xe00] sm:$0xff]  ;;  %v4606_v8 = vld [vmem:[#allocation6 + $0x1508] sm:$0xff] }
 0x7f8   : > { %5214 = vmatprep.subr.mxu0 %v4418_v20  ;;  %5281 = vmatprep.subr.mxu1 %v4554_v28  ;;  %v4517_v22 = vld [vmem:[#allocation6 + $0x1240] sm:$0xff]  ;;  %v4514_v20 = vld [vmem:[#allocation6 + $0x1228] sm:$0xff]  ;;  %v3923_v28 = vmax.f32 %v7225_v29, 0.0  ;;  %v4763_v29 = vld [vmem:[#allocation6 + $0x19f0] sm:$0xff] }
 0x7f9   : > { %5215 = vmatpush2.msra.mxu0 %v4417_v30  ;;  %5282 = vmatpush2.msra.mxu1 %v4553_v32  ;;  %v4634_v30 = vld [vmem:[#allocation6 + $0x15e8] sm:$0xff]  ;;  %v4513_v32 = vld [vmem:[#allocation6 + $0x1220] sm:$0xff] }
 0x7fa   : > { %5216 = vmatprep.subr.mxu0 %v4414_v13  ;;  %5283 = vmatprep.subr.mxu1 %v4550_v35  ;;  %v4633_v35 = vld [vmem:[#allocation6 + $0x15e0] sm:$0xff] }
 0x7fb   : > { %5217 = vmatpush2.msra.mxu0 %v4413_v23  ;;  %5284 = vmatpush2.msra.mxu1 %v4549_v24  ;;  %v3928_v23 = vmax.f32 %v7283_v33, 0.0  ;;  %v3701_v24 = vpop.f32.mrf.mxu1  ;;  %v4620_v33 = vld [vmem:[#allocation6 + $0x1578] sm:$0xff] }
 0x7fc   : > { %5218 = vmatprep.subr.mxu0 %v4410_v39  ;;  %5285 = vmatprep.subr.mxu1 %v4546_v40  ;;  %v4510_v39 = vld [vmem:[#allocation6 + $0x1208] sm:$0xff] }
 0x7fd   : > { %5219 = vmatpush2.msra.mxu0 %v4409_v41  ;;  %5286 = vmatpush2.msra.mxu1 %v4545_v25  ;;  %v4630_v40 = vld [vmem:[#allocation6 + $0x15c8] sm:$0xff]  ;;  %v4509_v25 = vld [vmem:[#allocation6 + $0x1200] sm:$0xff] }
 0x7fe   : > { %5220 = vmatprep.subr.mxu0 %v4406_v43  ;;  %5287 = vmatprep.subr.mxu1 %v4542_v46  ;;  %v4629_v43 = vld [vmem:[#allocation6 + $0x15c0] sm:$0xff]  ;;  %v4626_v46 = vld [vmem:[#allocation6 + $0x15a8] sm:$0xff] }
 0x7ff   : > { %5221 = vmatpush2.msra.mxu0 %v4405_v50  ;;  %5288 = vmatpush2.msra.mxu1 %v4541_v51  ;;  %v3925_v50 = vmax.f32 %v7241_v47, 0.0  ;;  %v4762_v51 = vld [vmem:[#allocation6 + $0x19e8] sm:$0xff]  ;;  %v4616_v47 = vld [vmem:[#allocation6 + $0x1558] sm:$0xff] }
 0x800   : > { %5222 = vmatprep.subr.mxu0 %v4402_v52  ;;  %5289 = vmatprep.subr.mxu1 %v4538_v53  ;;  %v4625_v52 = vld [vmem:[#allocation6 + $0x15a0] sm:$0xff] }
 0x801   : > { %5223 = vmatpush2.msra.mxu0 %v4401_v54  ;;  %5290 = vmatpush2.msra.mxu1 %v4537_v44  ;;  %v4761_v53 = vld [vmem:[#allocation6 + $0x19e0] sm:$0xff]  ;;  %v4622_v54 = vld [vmem:[#allocation6 + $0x1588] sm:$0xff] }
 0x802   : > { %5224 = vmatprep.subr.mxu0 %v4398_v45  ;;  %5291 = vmatprep.subr.mxu1 %v4534_v58  ;;  %v4758_v45 = vld [vmem:[#allocation6 + $0x19c8] sm:$0xff]  ;;  %v4621_v58 = vld [vmem:[#allocation6 + $0x1580] sm:$0xff] }
 0x803   : > { %5225 = vmatpush2.msra.mxu0 %v4397_v59  ;;  %5292 = vmatpush2.msra.mxu1 %v4533_v60  ;;  %v4757_v59 = vld [vmem:[#allocation6 + $0x19c0] sm:$0xff]  ;;  %v4618_v60 = vld [vmem:[#allocation6 + $0x1568] sm:$0xff] }
 0x804   : > { %5226 = vmatprep.subr.mxu0 %v4394_v19  ;;  %5293 = vmatprep.subr.mxu1 %v4530_v62  ;;  %v4754_v19 = vld [vmem:[#allocation6 + $0x19a8] sm:$0xff]  ;;  %v4617_v62 = vld [vmem:[#allocation6 + $0x1560] sm:$0xff] }
 0x805   : > { %5227 = vmatpush2.msra.mxu0 %v4393_v2  ;;  %5294 = vmatpush2.msra.mxu1 %v4529_v1  ;;  %v4753_v2 = vld [vmem:[#allocation6 + $0x19a0] sm:$0xff]  ;;  %v4614_v1 = vld [vmem:[#allocation6 + $0x1548] sm:$0xff] }
 0x806   : > { %5228 = vmatprep.subr.mxu0 %v4390_v0  ;;  %5295 = vmatprep.subr.mxu1 %v4526_v3  ;;  %v7281_v14 = vpop.f32.mrf.mxu0  ;;  %v4750_v0 = vld [vmem:[#allocation6 + $0x1988] sm:$0xff]  ;;  %v4613_v3 = vld [vmem:[#allocation6 + $0x1540] sm:$0xff] }
 0x807   : > { %5229 = vmatpush2.msra.mxu0 %v4389_v5  ;;  %5296 = vmatpush2.msra.mxu1 %v4525_v6  ;;  %v4610_v5 = vld [vmem:[#allocation6 + $0x1528] sm:$0xff] }
 0x808   : > { %5230 = vmatprep.subr.mxu0 %v4386_v10  ;;  %5297 = vmatprep.subr.mxu1 %v4522_v7  ;;  %v3772_v13 = vpop.f32.mrf.mxu0  ;;  %v4746_v6 = vld [vmem:[#allocation6 + $0x1968] sm:$0xff]  ;;  %v4609_v10 = vld [vmem:[#allocation6 + $0x1520] sm:$0xff] }
 0x809   : > { %5231 = vmatpush2.msra.mxu0 %v4385_v9  ;;  %5298 = vmatpush2.msra.mxu1 %v4521_v11  ;;  %v7291_v41 = vadd.f32 %v3772_v13, %v3701_v24  ;;  %v4745_v7 = vld [vmem:[#allocation6 + $0x1960] sm:$0xff]  ;;  %v4742_v9 = vld [vmem:[#allocation6 + $0x1948] sm:$0xff] }
 0x80a   : > { %5232 = vmatprep.subr.mxu0 %v4382_v15  ;;  %5299 = vmatprep.subr.mxu1 %v4518_v17  ;;  %v4605_v11 = vld [vmem:[#allocation6 + $0x1500] sm:$0xff]  ;;  %v4602_v17 = vld [vmem:[#allocation6 + $0x14e8] sm:$0xff] }
 0x80b   : > { %5233 = vmatpush2.msra.mxu0 %v4381_v21  ;;  %5300 = vmatpush2.msra.mxu1 %v4517_v22  ;;  %v3930_v44 = vmax.f32 %v7291_v41, 0.0  ;;  %v4741_v15 = vld [vmem:[#allocation6 + $0x1940] sm:$0xff]  ;;  %v4738_v21 = vld [vmem:[#allocation6 + $0x1928] sm:$0xff]  ;;  %v4611_v41 = vld [vmem:[#allocation6 + $0x1530] sm:$0xff] }
 0x80c   : > { %5235 = vmatmul.mubr.f32.vlgmr.msra.gmra.mxu0 %v3923_v28  ;;  %5301 = vmatprep.subr.mxu1 %v4514_v20  ;;  %v4601_v22 = vld [vmem:[#allocation6 + $0x14e0] sm:$0xff]  ;;  %v4594_v24 = vld [vmem:[#allocation6 + $0x14a8] sm:$0xff] }
 0x80d   : > { %5312 = vmatprep.subr.mxu0 %v4634_v30  ;;  %5302 = vmatpush2.msra.mxu1 %v4513_v32  ;;  %v4737_v20 = vld [vmem:[#allocation6 + $0x1920] sm:$0xff]  ;;  %v4598_v30 = vld [vmem:[#allocation6 + $0x14c8] sm:$0xff] }
 0x80e   : > { %5313 = vmatpush1.msra.mxu0 %v4633_v35  ;;  %5376 = vmatprep.mubr.f32.mxu0 %v3928_v23  ;;  %v4734_v32 = vld [vmem:[#allocation6 + $0x1908] sm:$0xff]  ;;  %v4597_v13 = vld [vmem:[#allocation6 + $0x14c0] sm:$0xff] }
 0x80f   : > { %5303 = vmatprep.subr.mxu1 %v4510_v39  ;;  %5314 = vmatprep.subr.mxu0 %v4630_v40  ;;  %v4733_v35 = vld [vmem:[#allocation6 + $0x1900] sm:$0xff]  ;;  %v4730_v39 = vld [vmem:[#allocation6 + $0x18e8] sm:$0xff] }
 0x810   : > { %5304 = vmatpush2.msra.mxu1 %v4509_v25  ;;  %5315 = vmatpush1.msra.mxu0 %v4629_v43  ;;  %v4593_v40 = vld [vmem:[#allocation6 + $0x14a0] sm:$0xff]  ;;  %v4590_v43 = vld [vmem:[#allocation6 + $0x1488] sm:$0xff] }
 0x811   : > { %5306 = vmatmul.mubr.f32.vlgmr.msra.gmra.mxu1 %v3925_v50  ;;  %5316 = vmatprep.subr.mxu0 %v4626_v46  ;;  %v4729_v25 = vld [vmem:[#allocation6 + $0x18e0] sm:$0xff]  ;;  %v4726_v46 = vld [vmem:[#allocation6 + $0x18c8] sm:$0xff] }
 0x812   : > { %5383 = vmatprep.subr.mxu1 %v4762_v51  ;;  %5317 = vmatpush1.msra.mxu0 %v4625_v52  ;;  %v4589_v51 = vld [vmem:[#allocation6 + $0x1480] sm:$0xff] }
 0x813   : > { %5384 = vmatpush1.msra.mxu1 %v4761_v53  ;;  %5318 = vmatprep.subr.mxu0 %v4622_v54  ;;  %v4725_v52 = vld [vmem:[#allocation6 + $0x18c0] sm:$0xff]  ;;  %v4586_v53 = vld [vmem:[#allocation6 + $0x1468] sm:$0xff] }
 0x814   : > { %5385 = vmatprep.subr.mxu1 %v4758_v45  ;;  %5319 = vmatpush1.msra.mxu0 %v4621_v58  ;;  %v4722_v54 = vld [vmem:[#allocation6 + $0x18a8] sm:$0xff]  ;;  %v4585_v45 = vld [vmem:[#allocation6 + $0x1460] sm:$0xff] }
 0x815   : > { %5386 = vmatpush1.msra.mxu1 %v4757_v59  ;;  %5447 = vmatprep.mubr.f32.mxu1 %v3930_v44  ;;  %v4721_v58 = vld [vmem:[#allocation6 + $0x18a0] sm:$0xff]  ;;  %v4582_v59 = vld [vmem:[#allocation6 + $0x1448] sm:$0xff] }
 0x816   : > { %5320 = vmatprep.subr.mxu0 %v4618_v60  ;;  %5387 = vmatprep.subr.mxu1 %v4754_v19  ;;  %v4718_v60 = vld [vmem:[#allocation6 + $0x1888] sm:$0xff]  ;;  %v4581_v19 = vld [vmem:[#allocation6 + $0x1440] sm:$0xff] }
 0x817   : > { %5321 = vmatpush1.msra.mxu0 %v4617_v62  ;;  %5388 = vmatpush1.msra.mxu1 %v4753_v2  ;;  %v4717_v62 = vld [vmem:[#allocation6 + $0x1880] sm:$0xff]  ;;  %v4578_v2 = vld [vmem:[#allocation6 + $0x1428] sm:$0xff] }
 0x818   : > { %5322 = vmatprep.subr.mxu0 %v4614_v1  ;;  %5389 = vmatprep.subr.mxu1 %v4750_v0  ;;  %v4714_v1 = vld [vmem:[#allocation6 + $0x1868] sm:$0xff]  ;;  %v4577_v0 = vld [vmem:[#allocation6 + $0x1420] sm:$0xff] }
 0x819   : > { %5323 = vmatpush1.msra.mxu0 %v4613_v3  ;;  %5390 = vmatpush1.msra.mxu1 %v4749_v4  ;;  %v4713_v3 = vld [vmem:[#allocation6 + $0x1860] sm:$0xff]  ;;  %v4574_v4 = vld [vmem:[#allocation6 + $0x1408] sm:$0xff] }
 0x81a   : > { %5324 = vmatprep.subr.mxu0 %v4610_v5  ;;  %5391 = vmatprep.subr.mxu1 %v4746_v6  ;;  %v4710_v5 = vld [vmem:[#allocation6 + $0x1848] sm:$0xff]  ;;  %v4573_v6 = vld [vmem:[#allocation6 + $0x1400] sm:$0xff] }
 0x81b   : > { %5325 = vmatpush1.msra.mxu0 %v4609_v10  ;;  %5392 = vmatpush1.msra.mxu1 %v4745_v7  ;;  %v4709_v10 = vld [vmem:[#allocation6 + $0x1840] sm:$0xff]  ;;  %v4698_v7 = vld [vmem:[#allocation6 + $0x17e8] sm:$0xff] }
 0x81c   : > { %5326 = vmatprep.subr.mxu0 %v4606_v8  ;;  %5393 = vmatprep.subr.mxu1 %v4742_v9  ;;  %v4706_v8 = vld [vmem:[#allocation6 + $0x1828] sm:$0xff]  ;;  %v4697_v9 = vld [vmem:[#allocation6 + $0x17e0] sm:$0xff] }
 0x81d   : > { %5327 = vmatpush1.msra.mxu0 %v4605_v11  ;;  %5394 = vmatpush1.msra.mxu1 %v4741_v15  ;;  %v4705_v11 = vld [vmem:[#allocation6 + $0x1820] sm:$0xff]  ;;  %v4694_v15 = vld [vmem:[#allocation6 + $0x17c8] sm:$0xff] }
 0x81e   : > { %5328 = vmatprep.subr.mxu0 %v4602_v17  ;;  %5395 = vmatprep.subr.mxu1 %v4738_v21  ;;  %v4702_v17 = vld [vmem:[#allocation6 + $0x1808] sm:$0xff]  ;;  %v4693_v21 = vld [vmem:[#allocation6 + $0x17c0] sm:$0xff] }
 0x81f   : > { %5329 = vmatpush1.msra.mxu0 %v4601_v22  ;;  %5396 = vmatpush1.msra.mxu1 %v4737_v20  ;;  %v4701_v22 = vld [vmem:[#allocation6 + $0x1800] sm:$0xff]  ;;  %v4690_v20 = vld [vmem:[#allocation6 + $0x17a8] sm:$0xff] }
 0x820   : > { %5330 = vmatprep.subr.mxu0 %v4598_v30  ;;  %5397 = vmatprep.subr.mxu1 %v4734_v32  ;;  %v4826_v30 = vld [vmem:[#allocation6 + $0x1be8] sm:$0xff]  ;;  %v4689_v32 = vld [vmem:[#allocation6 + $0x17a0] sm:$0xff] }
 0x821   : > { %5331 = vmatpush1.msra.mxu0 %v4597_v13  ;;  %5398 = vmatpush1.msra.mxu1 %v4733_v35  ;;  %v4825_v13 = vld [vmem:[#allocation6 + $0x1be0] sm:$0xff]  ;;  %v4686_v35 = vld [vmem:[#allocation6 + $0x1788] sm:$0xff] }
 0x822   : > { %5332 = vmatprep.subr.mxu0 %v4594_v24  ;;  %5399 = vmatprep.subr.mxu1 %v4730_v39  ;;  %v4822_v24 = vld [vmem:[#allocation6 + $0x1bc8] sm:$0xff]  ;;  %v4685_v39 = vld [vmem:[#allocation6 + $0x1780] sm:$0xff] }
 0x823   : > { %5333 = vmatpush1.msra.mxu0 %v4593_v40  ;;  %5400 = vmatpush1.msra.mxu1 %v4729_v25  ;;  %v4821_v40 = vld [vmem:[#allocation6 + $0x1bc0] sm:$0xff]  ;;  %v4682_v25 = vld [vmem:[#allocation6 + $0x1768] sm:$0xff] }
 0x824   : > { %5334 = vmatprep.subr.mxu0 %v4590_v43  ;;  %5401 = vmatprep.subr.mxu1 %v4726_v46  ;;  %v4818_v43 = vld [vmem:[#allocation6 + $0x1ba8] sm:$0xff]  ;;  %v4681_v46 = vld [vmem:[#allocation6 + $0x1760] sm:$0xff] }
 0x825   : > { %5335 = vmatpush1.msra.mxu0 %v4589_v51  ;;  %5402 = vmatpush1.msra.mxu1 %v4725_v52  ;;  %v4817_v51 = vld [vmem:[#allocation6 + $0x1ba0] sm:$0xff]  ;;  %v4678_v52 = vld [vmem:[#allocation6 + $0x1748] sm:$0xff] }
 0x826   : > { %5336 = vmatprep.subr.mxu0 %v4586_v53  ;;  %5403 = vmatprep.subr.mxu1 %v4722_v54  ;;  %v4814_v53 = vld [vmem:[#allocation6 + $0x1b88] sm:$0xff]  ;;  %v4677_v54 = vld [vmem:[#allocation6 + $0x1740] sm:$0xff] }
 0x827   : > { %5337 = vmatpush1.msra.mxu0 %v4585_v45  ;;  %5404 = vmatpush1.msra.mxu1 %v4721_v58  ;;  %v4813_v45 = vld [vmem:[#allocation6 + $0x1b80] sm:$0xff]  ;;  %v4674_v58 = vld [vmem:[#allocation6 + $0x1728] sm:$0xff] }
 0x828   : > { %5338 = vmatprep.subr.mxu0 %v4582_v59  ;;  %5405 = vmatprep.subr.mxu1 %v4718_v60  ;;  %v4810_v59 = vld [vmem:[#allocation6 + $0x1b68] sm:$0xff]  ;;  %v4673_v60 = vld [vmem:[#allocation6 + $0x1720] sm:$0xff] }
 0x829   : > { %5339 = vmatpush1.msra.mxu0 %v4581_v19  ;;  %5406 = vmatpush1.msra.mxu1 %v4717_v62  ;;  %v4809_v19 = vld [vmem:[#allocation6 + $0x1b60] sm:$0xff]  ;;  %v4670_v62 = vld [vmem:[#allocation6 + $0x1708] sm:$0xff] }
 0x82a   : > { %5340 = vmatprep.subr.mxu0 %v4578_v2  ;;  %5407 = vmatprep.subr.mxu1 %v4714_v1  ;;  %v4806_v2 = vld [vmem:[#allocation6 + $0x1b48] sm:$0xff]  ;;  %v4669_v1 = vld [vmem:[#allocation6 + $0x1700] sm:$0xff] }
 0x82b   : > { %5341 = vmatpush1.msra.mxu0 %v4577_v0  ;;  %5408 = vmatpush1.msra.mxu1 %v4713_v3  ;;  %v4805_v0 = vld [vmem:[#allocation6 + $0x1b40] sm:$0xff]  ;;  %v4666_v3 = vld [vmem:[#allocation6 + $0x16e8] sm:$0xff] }
 0x82c   : > { %5342 = vmatprep.subr.mxu0 %v4574_v4  ;;  %5409 = vmatprep.subr.mxu1 %v4710_v5  ;;  %v4802_v4 = vld [vmem:[#allocation6 + $0x1b28] sm:$0xff]  ;;  %v4665_v5 = vld [vmem:[#allocation6 + $0x16e0] sm:$0xff] }
 0x82d   : > { %5343 = vmatpush1.msra.mxu0 %v4573_v6  ;;  %5410 = vmatpush1.msra.mxu1 %v4709_v10  ;;  %v4801_v6 = vld [vmem:[#allocation6 + $0x1b20] sm:$0xff]  ;;  %v4662_v10 = vld [vmem:[#allocation6 + $0x16c8] sm:$0xff] }
 0x82e   : > { %5344 = vmatprep.subr.mxu0 %v4698_v7  ;;  %5411 = vmatprep.subr.mxu1 %v4706_v8  ;;  %v4798_v7 = vld [vmem:[#allocation6 + $0x1b08] sm:$0xff]  ;;  %v4661_v8 = vld [vmem:[#allocation6 + $0x16c0] sm:$0xff] }
 0x82f   : > { %5345 = vmatpush2.msra.mxu0 %v4697_v9  ;;  %5412 = vmatpush1.msra.mxu1 %v4705_v11  ;;  %v4797_v9 = vld [vmem:[#allocation6 + $0x1b00] sm:$0xff]  ;;  %v4658_v11 = vld [vmem:[#allocation6 + $0x16a8] sm:$0xff] }
 0x830   : > { %5346 = vmatprep.subr.mxu0 %v4694_v15  ;;  %5413 = vmatprep.subr.mxu1 %v4702_v17  ;;  %v4794_v15 = vld [vmem:[#allocation6 + $0x1ae8] sm:$0xff]  ;;  %v4657_v17 = vld [vmem:[#allocation6 + $0x16a0] sm:$0xff] }
 0x831   : > { %5347 = vmatpush2.msra.mxu0 %v4693_v21  ;;  %5414 = vmatpush1.msra.mxu1 %v4701_v22  ;;  %v4793_v21 = vld [vmem:[#allocation6 + $0x1ae0] sm:$0xff]  ;;  %v4654_v22 = vld [vmem:[#allocation6 + $0x1688] sm:$0xff] }
 0x832   : > { %5348 = vmatprep.subr.mxu0 %v4690_v20  ;;  %5415 = vmatprep.subr.mxu1 %v4826_v30  ;;  %v4790_v20 = vld [vmem:[#allocation6 + $0x1ac8] sm:$0xff]  ;;  %v4653_v30 = vld [vmem:[#allocation6 + $0x1680] sm:$0xff] }
 0x833   : > { %5349 = vmatpush2.msra.mxu0 %v4689_v32  ;;  %5416 = vmatpush2.msra.mxu1 %v4825_v13  ;;  %v4789_v32 = vld [vmem:[#allocation6 + $0x1ac0] sm:$0xff]  ;;  %v4650_v13 = vld [vmem:[#allocation6 + $0x1668] sm:$0xff] }
 0x834   : > { %5350 = vmatprep.subr.mxu0 %v4686_v35  ;;  %5417 = vmatprep.subr.mxu1 %v4822_v24  ;;  %v4786_v35 = vld [vmem:[#allocation6 + $0x1aa8] sm:$0xff]  ;;  %v4649_v24 = vld [vmem:[#allocation6 + $0x1660] sm:$0xff] }
 0x835   : > { %5351 = vmatpush2.msra.mxu0 %v4685_v39  ;;  %5418 = vmatpush2.msra.mxu1 %v4821_v40  ;;  %v4785_v39 = vld [vmem:[#allocation6 + $0x1aa0] sm:$0xff]  ;;  %v4646_v40 = vld [vmem:[#allocation6 + $0x1648] sm:$0xff] }
 0x836   : > { %5352 = vmatprep.subr.mxu0 %v4682_v25  ;;  %5419 = vmatprep.subr.mxu1 %v4818_v43  ;;  %v4782_v25 = vld [vmem:[#allocation6 + $0x1a88] sm:$0xff]  ;;  %v4645_v43 = vld [vmem:[#allocation6 + $0x1640] sm:$0xff] }
 0x837   : > { %5353 = vmatpush2.msra.mxu0 %v4681_v46  ;;  %5420 = vmatpush2.msra.mxu1 %v4817_v51  ;;  %v4781_v46 = vld [vmem:[#allocation6 + $0x1a80] sm:$0xff]  ;;  %v4642_v51 = vld [vmem:[#allocation6 + $0x1628] sm:$0xff] }
 0x838   : > { %5354 = vmatprep.subr.mxu0 %v4678_v52  ;;  %5421 = vmatprep.subr.mxu1 %v4814_v53  ;;  %v4778_v52 = vld [vmem:[#allocation6 + $0x1a68] sm:$0xff]  ;;  %v4641_v53 = vld [vmem:[#allocation6 + $0x1620] sm:$0xff] }
 0x839   : > { %5355 = vmatpush2.msra.mxu0 %v4677_v54  ;;  %5422 = vmatpush2.msra.mxu1 %v4813_v45  ;;  %v4777_v54 = vld [vmem:[#allocation6 + $0x1a60] sm:$0xff] }
 0x83a   : > { %5356 = vmatprep.subr.mxu0 %v4674_v58  ;;  %5423 = vmatprep.subr.mxu1 %v4810_v59  ;;  %v4638_v58 = vld [vmem:[#allocation6 + $0x1608] sm:$0xff] }
 0x83b   : > { %5357 = vmatpush2.msra.mxu0 %v4673_v60  ;;  %5424 = vmatpush2.msra.mxu1 %v4809_v19  ;;  %v4774_v59 = vld [vmem:[#allocation6 + $0x1a48] sm:$0xff]  ;;  %v7303_v60 = vpop.f32.mrf.mxu1  ;;  %v4637_v19 = vld [vmem:[#allocation6 + $0x1600] sm:$0xff] }
 0x83c   : > { %5358 = vmatprep.subr.mxu0 %v4670_v62  ;;  %5425 = vmatprep.subr.mxu1 %v4806_v2  ;;  %v4773_v62 = vld [vmem:[#allocation6 + $0x1a40] sm:$0xff]  ;;  %v4770_v2 = vld [vmem:[#allocation6 + $0x1a28] sm:$0xff] }
 0x83d   : > { %5359 = vmatpush2.msra.mxu0 %v4669_v1  ;;  %5426 = vmatpush2.msra.mxu1 %v4805_v0  ;;  %v3927_v1 = vmax.f32 %v7261_v26, 0.0  ;;  %v7308_v0 = vadd.f32 %v7281_v14, %v7285_v18  ;;  %v4885_v18 = vld [vmem:[#allocation6 + $0x1dc0] sm:$0xff]  ;;  %v4879_v26 = vld [vmem:[#allocation6 + $0x1d90] sm:$0xff] }
 0x83e   : > { %5360 = vmatprep.subr.mxu0 %v4666_v3  ;;  %5427 = vmatprep.subr.mxu1 %v4802_v4  ;;  %v4890_v3 = vld [vmem:[#allocation6 + $0x1de8] sm:$0xff]  ;;  %v4769_v4 = vld [vmem:[#allocation6 + $0x1a20] sm:$0xff] }
 0x83f   : > { %5361 = vmatpush2.msra.mxu0 %v4665_v5  ;;  %5428 = vmatpush2.msra.mxu1 %v4801_v6  ;;  %v4889_v6 = vld [vmem:[#allocation6 + $0x1de0] sm:$0xff] }
 0x840   : > { %5362 = vmatprep.subr.mxu0 %v4662_v10  ;;  %5429 = vmatprep.subr.mxu1 %v4798_v7  ;;  %v4766_v10 = vld [vmem:[#allocation6 + $0x1a08] sm:$0xff]  ;;  %v3843_v7 = vpop.f32.mrf.mxu1 }
 0x841   : > { %5363 = vmatpush2.msra.mxu0 %v4661_v8  ;;  %5430 = vmatpush2.msra.mxu1 %v4797_v9  ;;  %v4886_v8 = vld [vmem:[#allocation6 + $0x1dc8] sm:$0xff]  ;;  %v4765_v9 = vld [vmem:[#allocation6 + $0x1a00] sm:$0xff] }
 0x842   : > { %5364 = vmatprep.subr.mxu0 %v4658_v11  ;;  %5431 = vmatprep.subr.mxu1 %v4794_v15  ;;  %v3929_v11 = vmax.f32 %v7308_v0, 0.0  ;;  %v4882_v15 = vld [vmem:[#allocation6 + $0x1da8] sm:$0xff]  ;;  %v4860_v0 = vld [vmem:[#allocation6 + $0x1cf8] sm:$0xff] }
 0x843   : > { %5365 = vmatpush2.msra.mxu0 %v4657_v17  ;;  %5432 = vmatpush2.msra.mxu1 %v4793_v21  ;;  %v3996_v17 = vld [vmem:[#allocation6 + $0x1f8] sm:$0xff]  ;;  %v4881_v21 = vld [vmem:[#allocation6 + $0x1da0] sm:$0xff] }
 0x844   : > { %5366 = vmatprep.subr.mxu0 %v4654_v22  ;;  %5433 = vmatprep.subr.mxu1 %v4790_v20  ;;  %v3995_v22 = vld [vmem:[#allocation6 + $0x1f0] sm:$0xff]  ;;  %v4878_v20 = vld [vmem:[#allocation6 + $0x1d88] sm:$0xff] }
 0x845   : > { %5367 = vmatpush2.msra.mxu0 %v4653_v30  ;;  %5434 = vmatpush2.msra.mxu1 %v4789_v32  ;;  %v3992_v32 = vld [vmem:[#allocation6 + $0x1d8] sm:$0xff] }
 0x846   : > { %5368 = vmatprep.subr.mxu0 %v4650_v13  ;;  %5435 = vmatprep.subr.mxu1 %v4786_v35  ;;  %v4877_v13 = vld [vmem:[#allocation6 + $0x1d80] sm:$0xff]  ;;  %v3991_v35 = vld [vmem:[#allocation6 + $0x1d0] sm:$0xff] }
 0x847   : > { %5369 = vmatpush2.msra.mxu0 %v4649_v24  ;;  %5436 = vmatpush2.msra.mxu1 %v4785_v39  ;;  %v4874_v24 = vld [vmem:[#allocation6 + $0x1d68] sm:$0xff]  ;;  %v3988_v39 = vld [vmem:[#allocation6 + $0x1b8] sm:$0xff] }
 0x848   : > { %5370 = vmatprep.subr.mxu0 %v4646_v40  ;;  %5437 = vmatprep.subr.mxu1 %v4782_v25  ;;  %v7301_v45 = vpop.f32.mrf.mxu0  ;;  %v4873_v40 = vld [vmem:[#allocation6 + $0x1d60] sm:$0xff]  ;;  %v3987_v25 = vld [vmem:[#allocation6 + $0x1b0] sm:$0xff] }
 0x849   : > { %5371 = vmatpush2.msra.mxu0 %v4645_v43  ;;  %5438 = vmatpush2.msra.mxu1 %v4781_v46  ;;  %v4870_v43 = vld [vmem:[#allocation6 + $0x1d48] sm:$0xff]  ;;  %v3984_v46 = vld [vmem:[#allocation6 + $0x198] sm:$0xff] }
 0x84a   : > { %5372 = vmatprep.subr.mxu0 %v4642_v51  ;;  %5439 = vmatprep.subr.mxu1 %v4778_v52  ;;  %v3914_v5 = vpop.f32.mrf.mxu0  ;;  %v4869_v51 = vld [vmem:[#allocation6 + $0x1d40] sm:$0xff]  ;;  %v3983_v52 = vld [vmem:[#allocation6 + $0x190] sm:$0xff] }
 0x84b   : > { %5373 = vmatpush2.msra.mxu0 %v4641_v53  ;;  %5440 = vmatpush2.msra.mxu1 %v4777_v54  ;;  %v7312_v14 = vadd.f32 %v3914_v5, %v3843_v7  ;;  %v4865_v53 = vld [vmem:[#allocation6 + $0x1d20] sm:$0xff]  ;;  %v3979_v54 = vld [vmem:[#allocation6 + $0x170] sm:$0xff] }
 0x84c   : > { %5374 = vmatprep.subr.mxu0 %v4638_v58  ;;  %5441 = vmatprep.subr.mxu1 %v4774_v59  ;;  %v4862_v58 = vld [vmem:[#allocation6 + $0x1d08] sm:$0xff]  ;;  %v3976_v59 = vld [vmem:[#allocation6 + $0x158] sm:$0xff]  ;;  %v3971_v5 = vld [vmem:[#allocation6 + $0x130] sm:$0xff] }
 0x84d   : > { %5375 = vmatpush2.msra.mxu0 %v4637_v19  ;;  %5442 = vmatpush2.msra.mxu1 %v4773_v62  ;;  %v3932_v30 = vmax.f32 %v7312_v14, 0.0  ;;  %v4861_v19 = vld [vmem:[#allocation6 + $0x1d00] sm:$0xff]  ;;  %v3975_v62 = vld [vmem:[#allocation6 + $0x150] sm:$0xff] }
 0x84e   : > { %5377 = vmatmul.mubr.f32.vlgmr.msra.gmra.mxu0 %v3927_v1  ;;  %5443 = vmatprep.subr.mxu1 %v4770_v2  ;;  %v4858_v2 = vld [vmem:[#allocation6 + $0x1ce8] sm:$0xff]  ;;  %v4853_v7 = vld [vmem:[#allocation6 + $0x1cc0] sm:$0xff]  ;;  %v4871_v14 = vld [vmem:[#allocation6 + $0x1d50] sm:$0xff] }
 0x84f   : > { %5454 = vmatprep.subr.mxu0 %v4890_v3  ;;  %5444 = vmatpush2.msra.mxu1 %v4769_v4  ;;  %v3972_v3 = vld [vmem:[#allocation6 + $0x138] sm:$0xff]  ;;  %v4857_v4 = vld [vmem:[#allocation6 + $0x1ce0] sm:$0xff] }
 0x850   : > { %5455 = vmatpush1.msra.mxu0 %v4889_v6  ;;  %5445 = vmatprep.subr.mxu1 %v4766_v10  ;;  %v4854_v6 = vld [vmem:[#allocation6 + $0x1cc8] sm:$0xff]  ;;  %v3968_v10 = vld [vmem:[#allocation6 + $0x118] sm:$0xff] }
 0x851   : > { %5456 = vmatprep.subr.mxu0 %v4886_v8  ;;  %5446 = vmatpush2.msra.mxu1 %v4765_v9  ;;  %v3967_v8 = vld [vmem:[#allocation6 + $0x110] sm:$0xff]  ;;  %v4850_v9 = vld [vmem:[#allocation6 + $0x1ca8] sm:$0xff] }
 0x852   : > { %5457 = vmatpush1.msra.mxu0 %v4885_v18  ;;  %5448 = vmatmul.mubr.f32.vlgmr.msra.gmra.mxu1 %v3929_v11  ;;  %v3964_v18 = vld [vmem:[#allocation6 + $0xf8] sm:$0xff] }
 0x853   : > { %5458 = vmatprep.subr.mxu0 %v4882_v15  ;;  %5525 = vmatprep.subr.mxu1 %v3996_v17  ;;  %v4849_v15 = vld [vmem:[#allocation6 + $0x1ca0] sm:$0xff]  ;;  %v3963_v17 = vld [vmem:[#allocation6 + $0xf0] sm:$0xff] }
 0x854   : > { %5459 = vmatpush1.msra.mxu0 %v4881_v21  ;;  %5526 = vmatpush1.msra.mxu1 %v3995_v22  ;;  %v4846_v21 = vld [vmem:[#allocation6 + $0x1c88] sm:$0xff]  ;;  %v3960_v22 = vld [vmem:[#allocation6 + $0xd8] sm:$0xff] }
 0x855   : > { %5589 = vmatprep.mubr.f32.mxu1 %v3918_v34  ;;  %5460 = vmatprep.subr.mxu0 %v4878_v20  ;;  %v3980_v34 = vld [vmem:[#allocation6 + $0x178] sm:$0xff]  ;;  %v4845_v20 = vld [vmem:[#allocation6 + $0x1c80] sm:$0xff] }
 0x856   : > { %5527 = vmatprep.subr.mxu1 %v3992_v32  ;;  %5461 = vmatpush1.msra.mxu0 %v4877_v13  ;;  %v3959_v32 = vld [vmem:[#allocation6 + $0xd0] sm:$0xff]  ;;  %v4842_v13 = vld [vmem:[#allocation6 + $0x1c68] sm:$0xff] }
 0x857   : > { %5518 = vmatprep.mubr.f32.mxu0 %v3932_v30  ;;  %5528 = vmatpush1.msra.mxu1 %v3991_v35  ;;  %v3956_v35 = vld [vmem:[#allocation6 + $0xb8] sm:$0xff] }
 0x858   : > { %5462 = vmatprep.subr.mxu0 %v4874_v24  ;;  %5529 = vmatprep.subr.mxu1 %v3988_v39  ;;  %v4841_v24 = vld [vmem:[#allocation6 + $0x1c60] sm:$0xff]  ;;  %v3955_v39 = vld [vmem:[#allocation6 + $0xb0] sm:$0xff] }
 0x859   : > { %5463 = vmatpush1.msra.mxu0 %v4873_v40  ;;  %5530 = vmatpush1.msra.mxu1 %v3987_v25  ;;  %v4838_v40 = vld [vmem:[#allocation6 + $0x1c48] sm:$0xff]  ;;  %v3952_v25 = vld [vmem:[#allocation6 + $0x98] sm:$0xff] }
 0x85a   : > { %5464 = vmatprep.subr.mxu0 %v4870_v43  ;;  %5531 = vmatprep.subr.mxu1 %v3984_v46  ;;  %v4837_v43 = vld [vmem:[#allocation6 + $0x1c40] sm:$0xff]  ;;  %v3951_v46 = vld [vmem:[#allocation6 + $0x90] sm:$0xff] }
 0x85b   : > { %5465 = vmatpush1.msra.mxu0 %v4869_v51  ;;  %5532 = vmatpush1.msra.mxu1 %v3983_v52  ;;  %v4834_v51 = vld [vmem:[#allocation6 + $0x1c28] sm:$0xff]  ;;  %v3948_v52 = vld [vmem:[#allocation6 + $0x78] sm:$0xff] }
 0x85c   : > { %5466 = vmatprep.subr.mxu0 %v4866_v37  ;;  %5533 = vmatprep.subr.mxu1 %v3980_v34  ;;  %v4833_v37 = vld [vmem:[#allocation6 + $0x1c20] sm:$0xff]  ;;  %v3947_v34 = vld [vmem:[#allocation6 + $0x70] sm:$0xff] }
 0x85d   : > { %5467 = vmatpush1.msra.mxu0 %v4865_v53  ;;  %5534 = vmatpush1.msra.mxu1 %v3979_v54  ;;  %v4830_v53 = vld [vmem:[#allocation6 + $0x1c08] sm:$0xff]  ;;  %v3944_v54 = vld [vmem:[#allocation6 + $0x58] sm:$0xff] }
 0x85e   : > { %5468 = vmatprep.subr.mxu0 %v4862_v58  ;;  %5535 = vmatprep.subr.mxu1 %v3976_v59  ;;  %v4829_v58 = vld [vmem:[#allocation6 + $0x1c00] sm:$0xff]  ;;  %v3943_v59 = vld [vmem:[#allocation6 + $0x50] sm:$0xff] }
 0x85f   : > { %5469 = vmatpush1.msra.mxu0 %v4861_v19  ;;  %5536 = vmatpush1.msra.mxu1 %v3975_v62  ;;  %v4954_v19 = vld [vmem:[#allocation6 + $0x1fe8] sm:$0xff]  ;;  %v3940_v62 = vld [vmem:[#allocation6 + $0x38] sm:$0xff] }
 0x860   : > { %5470 = vmatprep.subr.mxu0 %v4858_v2  ;;  %5537 = vmatprep.subr.mxu1 %v3972_v3  ;;  %v4953_v2 = vld [vmem:[#allocation6 + $0x1fe0] sm:$0xff]  ;;  %v3939_v3 = vld [vmem:[#allocation6 + $0x30] sm:$0xff] }
 0x861   : > { %5471 = vmatpush1.msra.mxu0 %v4857_v4  ;;  %5538 = vmatpush1.msra.mxu1 %v3971_v5  ;;  %v4950_v4 = vld [vmem:[#allocation6 + $0x1fc8] sm:$0xff]  ;;  %v3936_v5 = vld [vmem:[#allocation6 + $0x18] sm:$0xff] }
 0x862   : > { %5472 = vmatprep.subr.mxu0 %v4854_v6  ;;  %5539 = vmatprep.subr.mxu1 %v3968_v10  ;;  %v4949_v6 = vld [vmem:[#allocation6 + $0x1fc0] sm:$0xff]  ;;  %v3935_v10 = vld [vmem:[#allocation6 + $0x10] sm:$0xff] }
 0x863   : > { %5473 = vmatpush1.msra.mxu0 %v4853_v7  ;;  %5540 = vmatpush1.msra.mxu1 %v3967_v8  ;;  %v4946_v7 = vld [vmem:[#allocation6 + $0x1fa8] sm:$0xff]  ;;  %v4060_v8 = vld [vmem:[#allocation6 + $0x3f8] sm:$0xff] }
 0x864   : > { %5474 = vmatprep.subr.mxu0 %v4850_v9  ;;  %5541 = vmatprep.subr.mxu1 %v3964_v18  ;;  %v4945_v9 = vld [vmem:[#allocation6 + $0x1fa0] sm:$0xff]  ;;  %v4059_v18 = vld [vmem:[#allocation6 + $0x3f0] sm:$0xff] }
 0x865   : > { %5475 = vmatpush1.msra.mxu0 %v4849_v15  ;;  %5542 = vmatpush1.msra.mxu1 %v3963_v17  ;;  %v4942_v15 = vld [vmem:[#allocation6 + $0x1f88] sm:$0xff]  ;;  %v4056_v17 = vld [vmem:[#allocation6 + $0x3d8] sm:$0xff] }
 0x866   : > { %5476 = vmatprep.subr.mxu0 %v4846_v21  ;;  %5543 = vmatprep.subr.mxu1 %v3960_v22  ;;  %v4941_v21 = vld [vmem:[#allocation6 + $0x1f80] sm:$0xff]  ;;  %v4055_v22 = vld [vmem:[#allocation6 + $0x3d0] sm:$0xff] }
 0x867   : > { %5477 = vmatpush1.msra.mxu0 %v4845_v20  ;;  %5544 = vmatpush1.msra.mxu1 %v3959_v32  ;;  %v4938_v20 = vld [vmem:[#allocation6 + $0x1f68] sm:$0xff]  ;;  %v4052_v32 = vld [vmem:[#allocation6 + $0x3b8] sm:$0xff] }
 0x868   : > { %5478 = vmatprep.subr.mxu0 %v4842_v13  ;;  %5545 = vmatprep.subr.mxu1 %v3956_v35  ;;  %v4937_v13 = vld [vmem:[#allocation6 + $0x1f60] sm:$0xff]  ;;  %v4051_v35 = vld [vmem:[#allocation6 + $0x3b0] sm:$0xff] }
 0x869   : > { %5479 = vmatpush1.msra.mxu0 %v4841_v24  ;;  %5546 = vmatpush1.msra.mxu1 %v3955_v39  ;;  %v4934_v24 = vld [vmem:[#allocation6 + $0x1f48] sm:$0xff]  ;;  %v4048_v39 = vld [vmem:[#allocation6 + $0x398] sm:$0xff] }
 0x86a   : > { %5480 = vmatprep.subr.mxu0 %v4838_v40  ;;  %5547 = vmatprep.subr.mxu1 %v3952_v25  ;;  %v4933_v40 = vld [vmem:[#allocation6 + $0x1f40] sm:$0xff]  ;;  %v4047_v25 = vld [vmem:[#allocation6 + $0x390] sm:$0xff] }
 0x86b   : > { %5481 = vmatpush1.msra.mxu0 %v4837_v43  ;;  %5548 = vmatpush1.msra.mxu1 %v3951_v46  ;;  %v4930_v43 = vld [vmem:[#allocation6 + $0x1f28] sm:$0xff]  ;;  %v4044_v46 = vld [vmem:[#allocation6 + $0x378] sm:$0xff] }
 0x86c   : > { %5482 = vmatprep.subr.mxu0 %v4834_v51  ;;  %5549 = vmatprep.subr.mxu1 %v3948_v52  ;;  %v4929_v51 = vld [vmem:[#allocation6 + $0x1f20] sm:$0xff]  ;;  %v4043_v52 = vld [vmem:[#allocation6 + $0x370] sm:$0xff] }
 0x86d   : > { %5483 = vmatpush1.msra.mxu0 %v4833_v37  ;;  %5550 = vmatpush1.msra.mxu1 %v3947_v34  ;;  %v4926_v37 = vld [vmem:[#allocation6 + $0x1f08] sm:$0xff]  ;;  %v4040_v34 = vld [vmem:[#allocation6 + $0x358] sm:$0xff] }
 0x86e   : > { %5484 = vmatprep.subr.mxu0 %v4830_v53  ;;  %5551 = vmatprep.subr.mxu1 %v3944_v54  ;;  %v4925_v53 = vld [vmem:[#allocation6 + $0x1f00] sm:$0xff]  ;;  %v4039_v54 = vld [vmem:[#allocation6 + $0x350] sm:$0xff] }
 0x86f   : > { %5485 = vmatpush1.msra.mxu0 %v4829_v58  ;;  %5552 = vmatpush1.msra.mxu1 %v3943_v59  ;;  %v4922_v58 = vld [vmem:[#allocation6 + $0x1ee8] sm:$0xff]  ;;  %v4036_v59 = vld [vmem:[#allocation6 + $0x338] sm:$0xff] }
 0x870   : > { %5486 = vmatprep.subr.mxu0 %v4954_v19  ;;  %5553 = vmatprep.subr.mxu1 %v3940_v62  ;;  %v4921_v19 = vld [vmem:[#allocation6 + $0x1ee0] sm:$0xff]  ;;  %v4035_v62 = vld [vmem:[#allocation6 + $0x330] sm:$0xff] }
 0x871   : > { %5487 = vmatpush2.msra.mxu0 %v4953_v2  ;;  %5554 = vmatpush1.msra.mxu1 %v3939_v3  ;;  %v4918_v2 = vld [vmem:[#allocation6 + $0x1ec8] sm:$0xff]  ;;  %v4032_v3 = vld [vmem:[#allocation6 + $0x318] sm:$0xff] }
 0x872   : > { %5488 = vmatprep.subr.mxu0 %v4950_v4  ;;  %5555 = vmatprep.subr.mxu1 %v3936_v5  ;;  %v4917_v4 = vld [vmem:[#allocation6 + $0x1ec0] sm:$0xff]  ;;  %v4031_v5 = vld [vmem:[#allocation6 + $0x310] sm:$0xff] }
 0x873   : > { %5489 = vmatpush2.msra.mxu0 %v4949_v6  ;;  %5556 = vmatpush1.msra.mxu1 %v3935_v10  ;;  %v4914_v6 = vld [vmem:[#allocation6 + $0x1ea8] sm:$0xff]  ;;  %v4028_v10 = vld [vmem:[#allocation6 + $0x2f8] sm:$0xff] }
 0x874   : > { %5490 = vmatprep.subr.mxu0 %v4946_v7  ;;  %5557 = vmatprep.subr.mxu1 %v4060_v8  ;;  %v4913_v7 = vld [vmem:[#allocation6 + $0x1ea0] sm:$0xff]  ;;  %v4027_v8 = vld [vmem:[#allocation6 + $0x2f0] sm:$0xff] }
 0x875   : > { %5491 = vmatpush2.msra.mxu0 %v4945_v9  ;;  %5558 = vmatpush2.msra.mxu1 %v4059_v18  ;;  %v4910_v9 = vld [vmem:[#allocation6 + $0x1e88] sm:$0xff]  ;;  %v4024_v18 = vld [vmem:[#allocation6 + $0x2d8] sm:$0xff] }
 0x876   : > { %5492 = vmatprep.subr.mxu0 %v4942_v15  ;;  %5559 = vmatprep.subr.mxu1 %v4056_v17  ;;  %v4909_v15 = vld [vmem:[#allocation6 + $0x1e80] sm:$0xff]  ;;  %v4023_v17 = vld [vmem:[#allocation6 + $0x2d0] sm:$0xff] }
 0x877   : > { %5493 = vmatpush2.msra.mxu0 %v4941_v21  ;;  %5560 = vmatpush2.msra.mxu1 %v4055_v22  ;;  %v4906_v21 = vld [vmem:[#allocation6 + $0x1e68] sm:$0xff]  ;;  %v4020_v22 = vld [vmem:[#allocation6 + $0x2b8] sm:$0xff] }
 0x878   : > { %5494 = vmatprep.subr.mxu0 %v4938_v20  ;;  %5561 = vmatprep.subr.mxu1 %v4052_v32  ;;  %v4905_v20 = vld [vmem:[#allocation6 + $0x1e60] sm:$0xff]  ;;  %v4019_v32 = vld [vmem:[#allocation6 + $0x2b0] sm:$0xff] }
 0x879   : > { %5495 = vmatpush2.msra.mxu0 %v4937_v13  ;;  %5562 = vmatpush2.msra.mxu1 %v4051_v35  ;;  %v4902_v13 = vld [vmem:[#allocation6 + $0x1e48] sm:$0xff]  ;;  %v4016_v35 = vld [vmem:[#allocation6 + $0x298] sm:$0xff] }
 0x87a   : > { %5496 = vmatprep.subr.mxu0 %v4934_v24  ;;  %5563 = vmatprep.subr.mxu1 %v4048_v39  ;;  %v4901_v24 = vld [vmem:[#allocation6 + $0x1e40] sm:$0xff]  ;;  %v4015_v39 = vld [vmem:[#allocation6 + $0x290] sm:$0xff] }
 0x87b   : > { %5497 = vmatpush2.msra.mxu0 %v4933_v40  ;;  %5564 = vmatpush2.msra.mxu1 %v4047_v25  ;;  %v4898_v40 = vld [vmem:[#allocation6 + $0x1e28] sm:$0xff]  ;;  %v4012_v25 = vld [vmem:[#allocation6 + $0x278] sm:$0xff] }
 0x87c   : > { %5498 = vmatprep.subr.mxu0 %v4930_v43  ;;  %5565 = vmatprep.subr.mxu1 %v4044_v46  ;;  %v7324_v43 = vadd.f32 %v7301_v45, %v7303_v60  ;;  %v4897_v46 = vld [vmem:[#allocation6 + $0x1e20] sm:$0xff]  ;;  %v4124_v45 = vld [vmem:[#allocation6 + $0x5f8] sm:$0xff]  ;;  %v4003_v60 = vld [vmem:[#allocation6 + $0x230] sm:$0xff] }
 0x87d   : > { %5499 = vmatpush2.msra.mxu0 %v4929_v51  ;;  %5566 = vmatpush2.msra.mxu1 %v4043_v52  ;;  %v4011_v51 = vld [vmem:[#allocation6 + $0x270] sm:$0xff]  ;;  %v4894_v52 = vld [vmem:[#allocation6 + $0x1e08] sm:$0xff] }
 0x87e   : > { %5500 = vmatprep.subr.mxu0 %v4926_v37  ;;  %5567 = vmatprep.subr.mxu1 %v4040_v34  ;;  %v4008_v37 = vld [vmem:[#allocation6 + $0x258] sm:$0xff]  ;;  %v4893_v34 = vld [vmem:[#allocation6 + $0x1e00] sm:$0xff] }
 0x87f   : > { %5501 = vmatpush2.msra.mxu0 %v4925_v53  ;;  %5568 = vmatpush2.msra.mxu1 %v4039_v54  ;;  %v4007_v53 = vld [vmem:[#allocation6 + $0x250] sm:$0xff]  ;;  %v4004_v54 = vld [vmem:[#allocation6 + $0x238] sm:$0xff] }
 0x880   : > { %5502 = vmatprep.subr.mxu0 %v4922_v58  ;;  %5569 = vmatprep.subr.mxu1 %v4036_v59  ;;  %v3931_v58 = vmax.f32 %v7324_v43, 0.0  ;;  %v4123_v59 = vld [vmem:[#allocation6 + $0x5f0] sm:$0xff] }
 0x881   : > { %5503 = vmatpush2.msra.mxu0 %v4921_v19  ;;  %5570 = vmatpush2.msra.mxu1 %v4035_v62  ;;  %v4000_v19 = vld [vmem:[#allocation6 + $0x218] sm:$0xff] }
 0x882   : > { %5504 = vmatprep.subr.mxu0 %v4918_v2  ;;  %5571 = vmatprep.subr.mxu1 %v4032_v3  ;;  %v4120_v62 = vld [vmem:[#allocation6 + $0x5d8] sm:$0xff]  ;;  %v3999_v2 = vld [vmem:[#allocation6 + $0x210] sm:$0xff] }
 0x883   : > { %5505 = vmatpush2.msra.mxu0 %v4917_v4  ;;  %5572 = vmatpush2.msra.mxu1 %v4031_v5  ;;  %v4119_v3 = vld [vmem:[#allocation6 + $0x5d0] sm:$0xff]  ;;  %v4116_v4 = vld [vmem:[#allocation6 + $0x5b8] sm:$0xff] }
 0x884   : > { %5506 = vmatprep.subr.mxu0 %v4914_v6  ;;  %5573 = vmatprep.subr.mxu1 %v4028_v10  ;;  %v4252_v5 = vld [vmem:[#allocation6 + $0x9f8] sm:$0xff]  ;;  %v4115_v6 = vld [vmem:[#allocation6 + $0x5b0] sm:$0xff] }
 0x885   : > { %5507 = vmatpush2.msra.mxu0 %v4913_v7  ;;  %5574 = vmatpush2.msra.mxu1 %v4027_v8  ;;  %v4251_v10 = vld [vmem:[#allocation6 + $0x9f0] sm:$0xff]  ;;  %v4112_v7 = vld [vmem:[#allocation6 + $0x598] sm:$0xff] }
 0x886   : > { %5508 = vmatprep.subr.mxu0 %v4910_v9  ;;  %5575 = vmatprep.subr.mxu1 %v4024_v18  ;;  %v4248_v8 = vld [vmem:[#allocation6 + $0x9d8] sm:$0xff]  ;;  %v4111_v9 = vld [vmem:[#allocation6 + $0x590] sm:$0xff] }
 0x887   : > { %5509 = vmatpush2.msra.mxu0 %v4909_v15  ;;  %5576 = vmatpush2.msra.mxu1 %v4023_v17  ;;  %v4247_v18 = vld [vmem:[#allocation6 + $0x9d0] sm:$0xff] }
 0x888   : > { %5510 = vmatprep.subr.mxu0 %v4906_v21  ;;  %5577 = vmatprep.subr.mxu1 %v4020_v22  ;;  %v4107_v15 = vld [vmem:[#allocation6 + $0x570] sm:$0xff] }
 0x889   : > { %5511 = vmatpush2.msra.mxu0 %v4905_v20  ;;  %5578 = vmatpush2.msra.mxu1 %v4019_v32  ;;  %v4243_v17 = vld [vmem:[#allocation6 + $0x9b0] sm:$0xff]  ;;  %v4100_v20 = vld [vmem:[#allocation6 + $0x538] sm:$0xff] }
 0x88a   : > { %5512 = vmatprep.subr.mxu0 %v4902_v13  ;;  %5579 = vmatprep.subr.mxu1 %v4016_v35  ;;  %v4103_v21 = vld [vmem:[#allocation6 + $0x550] sm:$0xff]  ;;  %v4236_v32 = vld [vmem:[#allocation6 + $0x978] sm:$0xff] }
 0x88b   : > { %5513 = vmatpush2.msra.mxu0 %v4901_v24  ;;  %5580 = vmatpush2.msra.mxu1 %v4015_v39  ;;  %v4239_v22 = vld [vmem:[#allocation6 + $0x990] sm:$0xff]  ;;  %v4096_v13 = vld [vmem:[#allocation6 + $0x518] sm:$0xff] }
 0x88c   : > { %5514 = vmatprep.subr.mxu0 %v4898_v40  ;;  %5581 = vmatprep.subr.mxu1 %v4012_v25  ;;  %v4232_v35 = vld [vmem:[#allocation6 + $0x958] sm:$0xff]  ;;  %v4095_v24 = vld [vmem:[#allocation6 + $0x510] sm:$0xff] }
 0x88d   : > { %5515 = vmatpush2.msra.mxu0 %v4897_v46  ;;  %5582 = vmatpush2.msra.mxu1 %v4011_v51  ;;  %v4231_v39 = vld [vmem:[#allocation6 + $0x950] sm:$0xff]  ;;  %v4092_v40 = vld [vmem:[#allocation6 + $0x4f8] sm:$0xff] }
 0x88e   : > { %5516 = vmatprep.subr.mxu0 %v4894_v52  ;;  %5583 = vmatprep.subr.mxu1 %v4008_v37  ;;  %v4228_v25 = vld [vmem:[#allocation6 + $0x938] sm:$0xff]  ;;  %v4091_v46 = vld [vmem:[#allocation6 + $0x4f0] sm:$0xff] }
 0x88f   : > { %5517 = vmatpush2.msra.mxu0 %v4893_v34  ;;  %5584 = vmatpush2.msra.mxu1 %v4007_v53  ;;  %v4227_v51 = vld [vmem:[#allocation6 + $0x930] sm:$0xff]  ;;  %v4088_v52 = vld [vmem:[#allocation6 + $0x4d8] sm:$0xff] }
 0x890   : > { %5519 = vmatmul.mubr.f32.vlgmr.msra.gmra.mxu0 %v3931_v58  ;;  %5585 = vmatprep.subr.mxu1 %v4004_v54  ;;  %v4224_v37 = vld [vmem:[#allocation6 + $0x918] sm:$0xff]  ;;  %v4087_v34 = vld [vmem:[#allocation6 + $0x4d0] sm:$0xff] }
 0x891   : > { %5596 = vmatprep.subr.mxu0 %v4124_v45  ;;  %5586 = vmatpush2.msra.mxu1 %v4003_v60  ;;  %v4223_v53 = vld [vmem:[#allocation6 + $0x910] sm:$0xff]  ;;  %v4084_v54 = vld [vmem:[#allocation6 + $0x4b8] sm:$0xff] }
 0x892   : > { %5597 = vmatpush1.msra.mxu0 %v4123_v59  ;;  %5660 = vmatprep.mubr.f32.mxu0 %v3920_v55  ;;  %v4244_v55 = vld [vmem:[#allocation6 + $0x9b8] sm:$0xff]  ;;  %v4083_v60 = vld [vmem:[#allocation6 + $0x4b0] sm:$0xff] }
 0x893   : > { %5587 = vmatprep.subr.mxu1 %v4000_v19  ;;  %5598 = vmatprep.subr.mxu0 %v4120_v62  ;;  %v4220_v45 = vld [vmem:[#allocation6 + $0x8f8] sm:$0xff]  ;;  %v4219_v59 = vld [vmem:[#allocation6 + $0x8f0] sm:$0xff] }
 0x894   : > { %5588 = vmatpush2.msra.mxu1 %v3999_v2  ;;  %5599 = vmatpush1.msra.mxu0 %v4119_v3  ;;  %v4080_v19 = vld [vmem:[#allocation6 + $0x498] sm:$0xff]  ;;  %v4079_v2 = vld [vmem:[#allocation6 + $0x490] sm:$0xff] }
 0x895   : > { %5590 = vmatmul.mubr.f32.vlgmr.msra.gmra.mxu1 %v3917_v61  ;;  %5600 = vmatprep.subr.mxu0 %v4116_v4  ;;  %v4240_v61 = vld [vmem:[#allocation6 + $0x998] sm:$0xff]  ;;  %v4215_v3 = vld [vmem:[#allocation6 + $0x8d0] sm:$0xff] }
 0x896   : > { %5667 = vmatprep.subr.mxu1 %v4252_v5  ;;  %5601 = vmatpush1.msra.mxu0 %v4115_v6  ;;  %v4216_v62 = vld [vmem:[#allocation6 + $0x8d8] sm:$0xff]  ;;  %v4075_v6 = vld [vmem:[#allocation6 + $0x470] sm:$0xff] }
 0x897   : > { %5668 = vmatpush1.msra.mxu1 %v4251_v10  ;;  %5731 = vmatprep.mubr.f32.mxu1 %v3922_v63  ;;  %v4235_v63 = vld [vmem:[#allocation6 + $0x970] sm:$0xff]  ;;  %v4076_v4 = vld [vmem:[#allocation6 + $0x478] sm:$0xff] }
 0x898   : > { %5602 = vmatprep.subr.mxu0 %v4112_v7  ;;  %5669 = vmatprep.subr.mxu1 %v4248_v8  ;;  %v4212_v5 = vld [vmem:[#allocation6 + $0x8b8] sm:$0xff]  ;;  %v4211_v10 = vld [vmem:[#allocation6 + $0x8b0] sm:$0xff] }
 0x899   : > { %5603 = vmatpush1.msra.mxu0 %v4111_v9  ;;  %5670 = vmatpush1.msra.mxu1 %v4247_v18  ;;  %v4072_v7 = vld [vmem:[#allocation6 + $0x458] sm:$0xff]  ;;  %v4071_v9 = vld [vmem:[#allocation6 + $0x450] sm:$0xff] }
 0x89a   : > { %5604 = vmatprep.subr.mxu0 %v4108_v48  ;;  %5671 = vmatprep.subr.mxu1 %v4244_v55  ;;  %v4208_v8 = vld [vmem:[#allocation6 + $0x898] sm:$0xff]  ;;  %v4207_v18 = vld [vmem:[#allocation6 + $0x890] sm:$0xff] }
 0x89b   : > { %5605 = vmatpush1.msra.mxu0 %v4107_v15  ;;  %5672 = vmatpush1.msra.mxu1 %v4243_v17  ;;  %v4068_v48 = vld [vmem:[#allocation6 + $0x438] sm:$0xff]  ;;  %v4067_v15 = vld [vmem:[#allocation6 + $0x430] sm:$0xff] }
 0x89c   : > { %5606 = vmatprep.subr.mxu0 %v4104_v16  ;;  %5673 = vmatprep.subr.mxu1 %v4240_v61  ;;  %v4204_v55 = vld [vmem:[#allocation6 + $0x878] sm:$0xff]  ;;  %v4203_v17 = vld [vmem:[#allocation6 + $0x870] sm:$0xff] }
 0x89d   : > { %5607 = vmatpush1.msra.mxu0 %v4103_v21  ;;  %5674 = vmatpush1.msra.mxu1 %v4239_v22  ;;  %v4064_v16 = vld [vmem:[#allocation6 + $0x418] sm:$0xff]  ;;  %v4063_v21 = vld [vmem:[#allocation6 + $0x410] sm:$0xff] }
 0x89e   : > { %5608 = vmatprep.subr.mxu0 %v4100_v20  ;;  %5675 = vmatprep.subr.mxu1 %v4236_v32  ;;  %v4200_v61 = vld [vmem:[#allocation6 + $0x858] sm:$0xff]  ;;  %v4199_v22 = vld [vmem:[#allocation6 + $0x850] sm:$0xff] }
 0x89f   : > { %5609 = vmatpush1.msra.mxu0 %v4099_v57  ;;  %5676 = vmatpush1.msra.mxu1 %v4235_v63  ;;  %v4188_v20 = vld [vmem:[#allocation6 + $0x7f8] sm:$0xff]  ;;  %v4187_v57 = vld [vmem:[#allocation6 + $0x7f0] sm:$0xff] }
 0x8a0   : > { %5610 = vmatprep.subr.mxu0 %v4096_v13  ;;  %5677 = vmatprep.subr.mxu1 %v4232_v35  ;;  %v4196_v32 = vld [vmem:[#allocation6 + $0x838] sm:$0xff]  ;;  %v4195_v63 = vld [vmem:[#allocation6 + $0x830] sm:$0xff] }
 0x8a1   : > { %5611 = vmatpush1.msra.mxu0 %v4095_v24  ;;  %5678 = vmatpush1.msra.mxu1 %v4231_v39  ;;  %v4184_v13 = vld [vmem:[#allocation6 + $0x7d8] sm:$0xff]  ;;  %v4183_v24 = vld [vmem:[#allocation6 + $0x7d0] sm:$0xff] }
 0x8a2   : > { %5612 = vmatprep.subr.mxu0 %v4092_v40  ;;  %5679 = vmatprep.subr.mxu1 %v4228_v25  ;;  %v4192_v35 = vld [vmem:[#allocation6 + $0x818] sm:$0xff]  ;;  %v4191_v39 = vld [vmem:[#allocation6 + $0x810] sm:$0xff] }
 0x8a3   : > { %5613 = vmatpush1.msra.mxu0 %v4091_v46  ;;  %5680 = vmatpush1.msra.mxu1 %v4227_v51  ;;  %v4180_v40 = vld [vmem:[#allocation6 + $0x7b8] sm:$0xff]  ;;  %v4179_v46 = vld [vmem:[#allocation6 + $0x7b0] sm:$0xff] }
 0x8a4   : > { %5614 = vmatprep.subr.mxu0 %v4088_v52  ;;  %5681 = vmatprep.subr.mxu1 %v4224_v37  ;;  %v4316_v25 = vld [vmem:[#allocation6 + $0xbf8] sm:$0xff]  ;;  %v4315_v51 = vld [vmem:[#allocation6 + $0xbf0] sm:$0xff] }
 0x8a5   : > { %5615 = vmatpush1.msra.mxu0 %v4087_v34  ;;  %5682 = vmatpush1.msra.mxu1 %v4223_v53  ;;  %v4176_v52 = vld [vmem:[#allocation6 + $0x798] sm:$0xff]  ;;  %v4175_v34 = vld [vmem:[#allocation6 + $0x790] sm:$0xff] }
 0x8a6   : > { %5616 = vmatprep.subr.mxu0 %v4084_v54  ;;  %5683 = vmatprep.subr.mxu1 %v4220_v45  ;;  %v4312_v37 = vld [vmem:[#allocation6 + $0xbd8] sm:$0xff]  ;;  %v4311_v53 = vld [vmem:[#allocation6 + $0xbd0] sm:$0xff] }
 0x8a7   : > { %5617 = vmatpush1.msra.mxu0 %v4083_v60  ;;  %5684 = vmatpush1.msra.mxu1 %v4219_v59  ;;  %v4172_v54 = vld [vmem:[#allocation6 + $0x778] sm:$0xff]  ;;  %v4171_v60 = vld [vmem:[#allocation6 + $0x770] sm:$0xff] }
 0x8a8   : > { %5618 = vmatprep.subr.mxu0 %v4080_v19  ;;  %5685 = vmatprep.subr.mxu1 %v4216_v62  ;;  %v4308_v45 = vld [vmem:[#allocation6 + $0xbb8] sm:$0xff]  ;;  %v4307_v59 = vld [vmem:[#allocation6 + $0xbb0] sm:$0xff] }
 0x8a9   : > { %5619 = vmatpush1.msra.mxu0 %v4079_v2  ;;  %5686 = vmatpush1.msra.mxu1 %v4215_v3  ;;  %v4168_v19 = vld [vmem:[#allocation6 + $0x758] sm:$0xff]  ;;  %v4167_v2 = vld [vmem:[#allocation6 + $0x750] sm:$0xff] }
 0x8aa   : > { %5620 = vmatprep.subr.mxu0 %v4076_v4  ;;  %5687 = vmatprep.subr.mxu1 %v4212_v5  ;;  %v4304_v62 = vld [vmem:[#allocation6 + $0xb98] sm:$0xff]  ;;  %v4303_v3 = vld [vmem:[#allocation6 + $0xb90] sm:$0xff] }
 0x8ab   : > { %5621 = vmatpush1.msra.mxu0 %v4075_v6  ;;  %5688 = vmatpush1.msra.mxu1 %v4211_v10  ;;  %v4164_v4 = vld [vmem:[#allocation6 + $0x738] sm:$0xff]  ;;  %v4163_v6 = vld [vmem:[#allocation6 + $0x730] sm:$0xff] }
 0x8ac   : > { %5622 = vmatprep.subr.mxu0 %v4072_v7  ;;  %5689 = vmatprep.subr.mxu1 %v4208_v8  ;;  %v4300_v5 = vld [vmem:[#allocation6 + $0xb78] sm:$0xff]  ;;  %v4299_v10 = vld [vmem:[#allocation6 + $0xb70] sm:$0xff] }
 0x8ad   : > { %5623 = vmatpush1.msra.mxu0 %v4071_v9  ;;  %5690 = vmatpush1.msra.mxu1 %v4207_v18  ;;  %v4160_v7 = vld [vmem:[#allocation6 + $0x718] sm:$0xff]  ;;  %v4159_v9 = vld [vmem:[#allocation6 + $0x710] sm:$0xff] }
 0x8ae   : > { %5624 = vmatprep.subr.mxu0 %v4068_v48  ;;  %5691 = vmatprep.subr.mxu1 %v4204_v55  ;;  %v4296_v8 = vld [vmem:[#allocation6 + $0xb58] sm:$0xff]  ;;  %v4295_v18 = vld [vmem:[#allocation6 + $0xb50] sm:$0xff] }
 0x8af   : > { %5625 = vmatpush1.msra.mxu0 %v4067_v15  ;;  %5692 = vmatpush1.msra.mxu1 %v4203_v17  ;;  %v4156_v48 = vld [vmem:[#allocation6 + $0x6f8] sm:$0xff]  ;;  %v4155_v15 = vld [vmem:[#allocation6 + $0x6f0] sm:$0xff] }
 0x8b0   : > { %5626 = vmatprep.subr.mxu0 %v4064_v16  ;;  %5693 = vmatprep.subr.mxu1 %v4200_v61  ;;  %v4292_v55 = vld [vmem:[#allocation6 + $0xb38] sm:$0xff]  ;;  %v4291_v17 = vld [vmem:[#allocation6 + $0xb30] sm:$0xff] }
 0x8b1   : > { %5627 = vmatpush1.msra.mxu0 %v4063_v21  ;;  %5694 = vmatpush1.msra.mxu1 %v4199_v22  ;;  %v4152_v16 = vld [vmem:[#allocation6 + $0x6d8] sm:$0xff]  ;;  %v4151_v21 = vld [vmem:[#allocation6 + $0x6d0] sm:$0xff] }
 0x8b2   : > { %5628 = vmatprep.subr.mxu0 %v4188_v20  ;;  %5695 = vmatprep.subr.mxu1 %v4196_v32  ;;  %v4288_v61 = vld [vmem:[#allocation6 + $0xb18] sm:$0xff]  ;;  %v4287_v22 = vld [vmem:[#allocation6 + $0xb10] sm:$0xff] }
 0x8b3   : > { %5629 = vmatpush2.msra.mxu0 %v4187_v57  ;;  %5696 = vmatpush1.msra.mxu1 %v4195_v63  ;;  %v4148_v20 = vld [vmem:[#allocation6 + $0x6b8] sm:$0xff]  ;;  %v4147_v57 = vld [vmem:[#allocation6 + $0x6b0] sm:$0xff] }
 0x8b4   : > { %5630 = vmatprep.subr.mxu0 %v4184_v13  ;;  %5697 = vmatprep.subr.mxu1 %v4192_v35  ;;  %v4284_v32 = vld [vmem:[#allocation6 + $0xaf8] sm:$0xff]  ;;  %v4283_v63 = vld [vmem:[#allocation6 + $0xaf0] sm:$0xff] }
 0x8b5   : > { %5631 = vmatpush2.msra.mxu0 %v4183_v24  ;;  %5698 = vmatpush1.msra.mxu1 %v4191_v39  ;;  %v4144_v13 = vld [vmem:[#allocation6 + $0x698] sm:$0xff]  ;;  %v4143_v24 = vld [vmem:[#allocation6 + $0x690] sm:$0xff] }
 0x8b6   : > { %5632 = vmatprep.subr.mxu0 %v4180_v40  ;;  %5699 = vmatprep.subr.mxu1 %v4316_v25  ;;  %v4280_v35 = vld [vmem:[#allocation6 + $0xad8] sm:$0xff]  ;;  %v4279_v39 = vld [vmem:[#allocation6 + $0xad0] sm:$0xff] }
 0x8b7   : > { %5633 = vmatpush2.msra.mxu0 %v4179_v46  ;;  %5700 = vmatpush2.msra.mxu1 %v4315_v51  ;;  %v4140_v40 = vld [vmem:[#allocation6 + $0x678] sm:$0xff]  ;;  %v4139_v46 = vld [vmem:[#allocation6 + $0x670] sm:$0xff] }
 0x8b8   : > { %5634 = vmatprep.subr.mxu0 %v4176_v52  ;;  %5701 = vmatprep.subr.mxu1 %v4312_v37  ;;  %v4276_v25 = vld [vmem:[#allocation6 + $0xab8] sm:$0xff]  ;;  %v4275_v51 = vld [vmem:[#allocation6 + $0xab0] sm:$0xff] }
 0x8b9   : > { %5635 = vmatpush2.msra.mxu0 %v4175_v34  ;;  %5702 = vmatpush2.msra.mxu1 %v4311_v53  ;;  %v4136_v52 = vld [vmem:[#allocation6 + $0x658] sm:$0xff]  ;;  %v4135_v34 = vld [vmem:[#allocation6 + $0x650] sm:$0xff] }
 0x8ba   : > { %5636 = vmatprep.subr.mxu0 %v4172_v54  ;;  %5703 = vmatprep.subr.mxu1 %v4308_v45  ;;  %v4272_v37 = vld [vmem:[#allocation6 + $0xa98] sm:$0xff]  ;;  %v4271_v53 = vld [vmem:[#allocation6 + $0xa90] sm:$0xff] }
 0x8bb   : > { %5637 = vmatpush2.msra.mxu0 %v4171_v60  ;;  %5704 = vmatpush2.msra.mxu1 %v4307_v59  ;;  %v4132_v54 = vld [vmem:[#allocation6 + $0x638] sm:$0xff]  ;;  %v4131_v60 = vld [vmem:[#allocation6 + $0x630] sm:$0xff] }
 0x8bc   : > { %5638 = vmatprep.subr.mxu0 %v4168_v19  ;;  %5705 = vmatprep.subr.mxu1 %v4304_v62  ;;  %v4268_v45 = vld [vmem:[#allocation6 + $0xa78] sm:$0xff]  ;;  %v4267_v59 = vld [vmem:[#allocation6 + $0xa70] sm:$0xff] }
 0x8bd   : > { %5639 = vmatpush2.msra.mxu0 %v4167_v2  ;;  %5706 = vmatpush2.msra.mxu1 %v4303_v3  ;;  %v4128_v19 = vld [vmem:[#allocation6 + $0x618] sm:$0xff]  ;;  %v4127_v2 = vld [vmem:[#allocation6 + $0x610] sm:$0xff] }
 0x8be   : > { %5640 = vmatprep.subr.mxu0 %v4164_v4  ;;  %5707 = vmatprep.subr.mxu1 %v4300_v5  ;;  %v4264_v62 = vld [vmem:[#allocation6 + $0xa58] sm:$0xff]  ;;  %v4263_v3 = vld [vmem:[#allocation6 + $0xa50] sm:$0xff] }
 0x8bf   : > { %5641 = vmatpush2.msra.mxu0 %v4163_v6  ;;  %5708 = vmatpush2.msra.mxu1 %v4299_v10  ;;  %v4260_v4 = vld [vmem:[#allocation6 + $0xa38] sm:$0xff]  ;;  %v4259_v6 = vld [vmem:[#allocation6 + $0xa30] sm:$0xff] }
 0x8c0   : > { %5642 = vmatprep.subr.mxu0 %v4160_v7  ;;  %5709 = vmatprep.subr.mxu1 %v4296_v8  ;;  %v4380_v5 = vld [vmem:[#allocation6 + $0xdf8] sm:$0xff]  ;;  %v4379_v10 = vld [vmem:[#allocation6 + $0xdf0] sm:$0xff] }
 0x8c1   : > { %5643 = vmatpush2.msra.mxu0 %v4159_v9  ;;  %5710 = vmatpush2.msra.mxu1 %v4295_v18  ;;  %v4256_v7 = vld [vmem:[#allocation6 + $0xa18] sm:$0xff]  ;;  %v4255_v9 = vld [vmem:[#allocation6 + $0xa10] sm:$0xff] }
 0x8c2   : > { %5644 = vmatprep.subr.mxu0 %v4156_v48  ;;  %5711 = vmatprep.subr.mxu1 %v4292_v55  ;;  %v4376_v8 = vld [vmem:[#allocation6 + $0xdd8] sm:$0xff]  ;;  %v4375_v18 = vld [vmem:[#allocation6 + $0xdd0] sm:$0xff] }
 0x8c3   : > { %5645 = vmatpush2.msra.mxu0 %v4155_v15  ;;  %5712 = vmatpush2.msra.mxu1 %v4291_v17  ;;  %v4372_v48 = vld [vmem:[#allocation6 + $0xdb8] sm:$0xff]  ;;  %v4371_v15 = vld [vmem:[#allocation6 + $0xdb0] sm:$0xff] }
 0x8c4   : > { %5646 = vmatprep.subr.mxu0 %v4152_v16  ;;  %5713 = vmatprep.subr.mxu1 %v4288_v61  ;;  %v4508_v55 = vld [vmem:[#allocation6 + $0x11f8] sm:$0xff]  ;;  %v4367_v16 = vld [vmem:[#allocation6 + $0xd90] sm:$0xff] }
 0x8c5   : > { %5647 = vmatpush2.msra.mxu0 %v4151_v21  ;;  %5714 = vmatpush2.msra.mxu1 %v4287_v22  ;;  %v4504_v17 = vld [vmem:[#allocation6 + $0x11d8] sm:$0xff]  ;;  %v4503_v61 = vld [vmem:[#allocation6 + $0x11d0] sm:$0xff] }
 0x8c6   : > { %5648 = vmatprep.subr.mxu0 %v4148_v20  ;;  %5715 = vmatprep.subr.mxu1 %v4284_v32  ;;  %v4363_v21 = vld [vmem:[#allocation6 + $0xd70] sm:$0xff] }
 0x8c7   : > { %5649 = vmatpush2.msra.mxu0 %v4147_v57  ;;  %5716 = vmatpush2.msra.mxu1 %v4283_v63  ;;  %v4499_v22 = vld [vmem:[#allocation6 + $0x11b0] sm:$0xff]  ;;  %v4356_v57 = vld [vmem:[#allocation6 + $0xd38] sm:$0xff] }
 0x8c8   : > { %5650 = vmatprep.subr.mxu0 %v4144_v13  ;;  %5717 = vmatprep.subr.mxu1 %v4280_v35  ;;  %v4359_v20 = vld [vmem:[#allocation6 + $0xd50] sm:$0xff]  ;;  %v4492_v63 = vld [vmem:[#allocation6 + $0x1178] sm:$0xff] }
 0x8c9   : > { %5651 = vmatpush2.msra.mxu0 %v4143_v24  ;;  %5718 = vmatpush2.msra.mxu1 %v4279_v39  ;;  %v4495_v32 = vld [vmem:[#allocation6 + $0x1190] sm:$0xff]  ;;  %v4352_v13 = vld [vmem:[#allocation6 + $0xd18] sm:$0xff] }
 0x8ca   : > { %5652 = vmatprep.subr.mxu0 %v4140_v40  ;;  %5719 = vmatprep.subr.mxu1 %v4276_v25  ;;  %v4488_v35 = vld [vmem:[#allocation6 + $0x1158] sm:$0xff]  ;;  %v4351_v24 = vld [vmem:[#allocation6 + $0xd10] sm:$0xff] }
 0x8cb   : > { %5653 = vmatpush2.msra.mxu0 %v4139_v46  ;;  %5720 = vmatpush2.msra.mxu1 %v4275_v51  ;;  %v4487_v39 = vld [vmem:[#allocation6 + $0x1150] sm:$0xff]  ;;  %v4348_v40 = vld [vmem:[#allocation6 + $0xcf8] sm:$0xff] }
 0x8cc   : > { %5654 = vmatprep.subr.mxu0 %v4136_v52  ;;  %5721 = vmatprep.subr.mxu1 %v4272_v37  ;;  %v4484_v25 = vld [vmem:[#allocation6 + $0x1138] sm:$0xff]  ;;  %v4347_v46 = vld [vmem:[#allocation6 + $0xcf0] sm:$0xff] }
 0x8cd   : > { %5655 = vmatpush2.msra.mxu0 %v4135_v34  ;;  %5722 = vmatpush2.msra.mxu1 %v4271_v53  ;;  %v4483_v51 = vld [vmem:[#allocation6 + $0x1130] sm:$0xff]  ;;  %v4344_v52 = vld [vmem:[#allocation6 + $0xcd8] sm:$0xff] }
 0x8ce   : > { %5656 = vmatprep.subr.mxu0 %v4132_v54  ;;  %5723 = vmatprep.subr.mxu1 %v4268_v45  ;;  %v4480_v37 = vld [vmem:[#allocation6 + $0x1118] sm:$0xff]  ;;  %v4343_v34 = vld [vmem:[#allocation6 + $0xcd0] sm:$0xff] }
 0x8cf   : > { %5657 = vmatpush2.msra.mxu0 %v4131_v60  ;;  %5724 = vmatpush2.msra.mxu1 %v4267_v59  ;;  %v4479_v53 = vld [vmem:[#allocation6 + $0x1110] sm:$0xff]  ;;  %v4340_v54 = vld [vmem:[#allocation6 + $0xcb8] sm:$0xff] }
 0x8d0   : > { %5658 = vmatprep.subr.mxu0 %v4128_v19  ;;  %5725 = vmatprep.subr.mxu1 %v4264_v62  ;;  %v4476_v45 = vld [vmem:[#allocation6 + $0x10f8] sm:$0xff]  ;;  %v4339_v60 = vld [vmem:[#allocation6 + $0xcb0] sm:$0xff] }
 0x8d1   : > { %5659 = vmatpush2.msra.mxu0 %v4127_v2  ;;  %5726 = vmatpush2.msra.mxu1 %v4263_v3  ;;  %v4475_v59 = vld [vmem:[#allocation6 + $0x10f0] sm:$0xff]  ;;  %v4336_v19 = vld [vmem:[#allocation6 + $0xc98] sm:$0xff] }
 0x8d2   : > { %5661 = vmatmul.mubr.f32.vlgmr.msra.gmra.mxu0 %v3919_v31  ;;  %5727 = vmatprep.subr.mxu1 %v4260_v4  ;;  %v4368_v31 = vld [vmem:[#allocation6 + $0xd98] sm:$0xff]  ;;  %v4335_v2 = vld [vmem:[#allocation6 + $0xc90] sm:$0xff] }
 0x8d3   : > { %5738 = vmatprep.subr.mxu0 %v4380_v5  ;;  %5728 = vmatpush2.msra.mxu1 %v4259_v6  ;;  %v4472_v62 = vld [vmem:[#allocation6 + $0x10d8] sm:$0xff]  ;;  %v4471_v3 = vld [vmem:[#allocation6 + $0x10d0] sm:$0xff] }
 0x8d4   : > { %5739 = vmatpush1.msra.mxu0 %v4379_v10  ;;  %5802 = vmatprep.mubr.f32.mxu0 %v3924_v38  ;;  %v4500_v38 = vld [vmem:[#allocation6 + $0x11b8] sm:$0xff]  ;;  %v4331_v6 = vld [vmem:[#allocation6 + $0xc70] sm:$0xff] }
 0x8d5   : > { %5729 = vmatprep.subr.mxu1 %v4256_v7  ;;  %5740 = vmatprep.subr.mxu0 %v4376_v8  ;;  %v4332_v4 = vld [vmem:[#allocation6 + $0xc78] sm:$0xff]  ;;  %v4467_v10 = vld [vmem:[#allocation6 + $0x10b0] sm:$0xff] }
 0x8d6   : > { %5730 = vmatpush2.msra.mxu1 %v4255_v9  ;;  %5741 = vmatpush1.msra.mxu0 %v4375_v18  ;;  %v4468_v5 = vld [vmem:[#allocation6 + $0x10b8] sm:$0xff]  ;;  %v4327_v9 = vld [vmem:[#allocation6 + $0xc50] sm:$0xff] }
 0x8d7   : > { %5732 = vmatmul.mubr.f32.vlgmr.msra.gmra.mxu1 %v3921_v42  ;;  %5742 = vmatprep.subr.mxu0 %v4372_v48  ;;  %v4496_v42 = vld [vmem:[#allocation6 + $0x1198] sm:$0xff]  ;;  %v4463_v18 = vld [vmem:[#allocation6 + $0x1090] sm:$0xff] }
 0x8d8   : > { %5809 = vmatprep.subr.mxu1 %v4508_v55  ;;  %5743 = vmatpush1.msra.mxu0 %v4371_v15  ;;  %v4328_v7 = vld [vmem:[#allocation6 + $0xc58] sm:$0xff]  ;;  %v4323_v15 = vld [vmem:[#allocation6 + $0xc30] sm:$0xff] }
 0x8d9   : > { %5810 = vmatpush1.msra.mxu1 %v4507_v36  ;;  %5873 = vmatprep.mubr.f32.mxu1 %v3926_v49  ;;  %v4491_v49 = vld [vmem:[#allocation6 + $0x1170] sm:$0xff]  ;;  %v4464_v8 = vld [vmem:[#allocation6 + $0x1098] sm:$0xff] }
 0x8da   : > { %5744 = vmatprep.subr.mxu0 %v4368_v31  ;;  %5811 = vmatprep.subr.mxu1 %v4504_v17  ;;  %v4324_v48 = vld [vmem:[#allocation6 + $0xc38] sm:$0xff]  ;;  %v4459_v36 = vld [vmem:[#allocation6 + $0x1070] sm:$0xff] }
 0x8db   : > { %5745 = vmatpush1.msra.mxu0 %v4367_v16  ;;  %5812 = vmatpush1.msra.mxu1 %v4503_v61  ;;  %v4460_v55 = vld [vmem:[#allocation6 + $0x1078] sm:$0xff]  ;;  %v4319_v16 = vld [vmem:[#allocation6 + $0xc10] sm:$0xff] }
 0x8dc   : > { %5746 = vmatprep.subr.mxu0 %v4364_v27  ;;  %5813 = vmatprep.subr.mxu1 %v4500_v38  ;;  %v4320_v31 = vld [vmem:[#allocation6 + $0xc18] sm:$0xff]  ;;  %v4455_v61 = vld [vmem:[#allocation6 + $0x1050] sm:$0xff] }
 0x8dd   : > { %5747 = vmatpush1.msra.mxu0 %v4363_v21  ;;  %5814 = vmatpush1.msra.mxu1 %v4499_v22  ;;  %v4456_v17 = vld [vmem:[#allocation6 + $0x1058] sm:$0xff]  ;;  %v4443_v21 = vld [vmem:[#allocation6 + $0xff0] sm:$0xff] }
 0x8de   : > { %5748 = vmatprep.subr.mxu0 %v4360_v56  ;;  %5815 = vmatprep.subr.mxu1 %v4496_v42  ;;  %v4444_v27 = vld [vmem:[#allocation6 + $0xff8] sm:$0xff]  ;;  %v4451_v22 = vld [vmem:[#allocation6 + $0x1030] sm:$0xff] }
 0x8df   : > { %5749 = vmatpush1.msra.mxu0 %v4359_v20  ;;  %5816 = vmatpush1.msra.mxu1 %v4495_v32  ;;  %v4452_v38 = vld [vmem:[#allocation6 + $0x1038] sm:$0xff]  ;;  %v4439_v20 = vld [vmem:[#allocation6 + $0xfd0] sm:$0xff] }
 0x8e0   : > { %5750 = vmatprep.subr.mxu0 %v4356_v57  ;;  %5817 = vmatprep.subr.mxu1 %v4492_v63  ;;  %v4440_v56 = vld [vmem:[#allocation6 + $0xfd8] sm:$0xff]  ;;  %v4447_v32 = vld [vmem:[#allocation6 + $0x1010] sm:$0xff] }
 0x8e1   : > { %5751 = vmatpush1.msra.mxu0 %v4355_v12  ;;  %5818 = vmatpush1.msra.mxu1 %v4491_v49  ;;  %v4448_v42 = vld [vmem:[#allocation6 + $0x1018] sm:$0xff]  ;;  %v4435_v12 = vld [vmem:[#allocation6 + $0xfb0] sm:$0xff] }
 0x8e2   : > { %5752 = vmatprep.subr.mxu0 %v4352_v13  ;;  %5819 = vmatprep.subr.mxu1 %v4488_v35  ;;  %v4436_v57 = vld [vmem:[#allocation6 + $0xfb8] sm:$0xff]  ;;  %v4571_v49 = vld [vmem:[#allocation6 + $0x13f0] sm:$0xff] }
 0x8e3   : > { %5753 = vmatpush1.msra.mxu0 %v4351_v24  ;;  %5820 = vmatpush1.msra.mxu1 %v4487_v39  ;;  %v4572_v63 = vld [vmem:[#allocation6 + $0x13f8] sm:$0xff]  ;;  %v4431_v24 = vld [vmem:[#allocation6 + $0xf90] sm:$0xff] }
 0x8e4   : > { %5754 = vmatprep.subr.mxu0 %v4348_v40  ;;  %5821 = vmatprep.subr.mxu1 %v4484_v25  ;;  %v4432_v13 = vld [vmem:[#allocation6 + $0xf98] sm:$0xff]  ;;  %v4567_v39 = vld [vmem:[#allocation6 + $0x13d0] sm:$0xff] }
 0x8e5   : > { %5755 = vmatpush1.msra.mxu0 %v4347_v46  ;;  %5822 = vmatpush1.msra.mxu1 %v4483_v51  ;;  %v4568_v35 = vld [vmem:[#allocation6 + $0x13d8] sm:$0xff]  ;;  %v4427_v46 = vld [vmem:[#allocation6 + $0xf70] sm:$0xff] }
 0x8e6   : > { %5756 = vmatprep.subr.mxu0 %v4344_v52  ;;  %5823 = vmatprep.subr.mxu1 %v4480_v37  ;;  %v4428_v40 = vld [vmem:[#allocation6 + $0xf78] sm:$0xff]  ;;  %v4563_v51 = vld [vmem:[#allocation6 + $0x13b0] sm:$0xff] }
 0x8e7   : > { %5757 = vmatpush1.msra.mxu0 %v4343_v34  ;;  %5824 = vmatpush1.msra.mxu1 %v4479_v53  ;;  %v4564_v25 = vld [vmem:[#allocation6 + $0x13b8] sm:$0xff]  ;;  %v4423_v34 = vld [vmem:[#allocation6 + $0xf50] sm:$0xff] }
 0x8e8   : > { %5758 = vmatprep.subr.mxu0 %v4340_v54  ;;  %5825 = vmatprep.subr.mxu1 %v4476_v45  ;;  %v4424_v52 = vld [vmem:[#allocation6 + $0xf58] sm:$0xff]  ;;  %v4559_v53 = vld [vmem:[#allocation6 + $0x1390] sm:$0xff] }
 0x8e9   : > { %5759 = vmatpush1.msra.mxu0 %v4339_v60  ;;  %5826 = vmatpush1.msra.mxu1 %v4475_v59  ;;  %v4560_v37 = vld [vmem:[#allocation6 + $0x1398] sm:$0xff]  ;;  %v4419_v60 = vld [vmem:[#allocation6 + $0xf30] sm:$0xff] }
 0x8ea   : > { %5760 = vmatprep.subr.mxu0 %v4336_v19  ;;  %5827 = vmatprep.subr.mxu1 %v4472_v62  ;;  %v4420_v54 = vld [vmem:[#allocation6 + $0xf38] sm:$0xff]  ;;  %v4555_v59 = vld [vmem:[#allocation6 + $0x1370] sm:$0xff] }
 0x8eb   : > { %5761 = vmatpush1.msra.mxu0 %v4335_v2  ;;  %5828 = vmatpush1.msra.mxu1 %v4471_v3  ;;  %v4556_v45 = vld [vmem:[#allocation6 + $0x1378] sm:$0xff]  ;;  %v4415_v2 = vld [vmem:[#allocation6 + $0xf10] sm:$0xff] }
 0x8ec   : > { %5762 = vmatprep.subr.mxu0 %v4332_v4  ;;  %5829 = vmatprep.subr.mxu1 %v4468_v5  ;;  %v4416_v19 = vld [vmem:[#allocation6 + $0xf18] sm:$0xff]  ;;  %v4551_v3 = vld [vmem:[#allocation6 + $0x1350] sm:$0xff] }
 0x8ed   : > { %5763 = vmatpush1.msra.mxu0 %v4331_v6  ;;  %5830 = vmatpush1.msra.mxu1 %v4467_v10  ;;  %v4552_v62 = vld [vmem:[#allocation6 + $0x1358] sm:$0xff]  ;;  %v4411_v6 = vld [vmem:[#allocation6 + $0xef0] sm:$0xff] }
 0x8ee   : > { %5764 = vmatprep.subr.mxu0 %v4328_v7  ;;  %5831 = vmatprep.subr.mxu1 %v4464_v8  ;;  %v4412_v4 = vld [vmem:[#allocation6 + $0xef8] sm:$0xff]  ;;  %v4547_v10 = vld [vmem:[#allocation6 + $0x1330] sm:$0xff] }
 0x8ef   : > { %5765 = vmatpush1.msra.mxu0 %v4327_v9  ;;  %5832 = vmatpush1.msra.mxu1 %v4463_v18  ;;  %v4548_v5 = vld [vmem:[#allocation6 + $0x1338] sm:$0xff]  ;;  %v4407_v9 = vld [vmem:[#allocation6 + $0xed0] sm:$0xff] }
 0x8f0   : > { %5766 = vmatprep.subr.mxu0 %v4324_v48  ;;  %5833 = vmatprep.subr.mxu1 %v4460_v55  ;;  %v4408_v7 = vld [vmem:[#allocation6 + $0xed8] sm:$0xff]  ;;  %v4543_v18 = vld [vmem:[#allocation6 + $0x1310] sm:$0xff] }
 0x8f1   : > { %5767 = vmatpush1.msra.mxu0 %v4323_v15  ;;  %5834 = vmatpush1.msra.mxu1 %v4459_v36  ;;  %v4544_v8 = vld [vmem:[#allocation6 + $0x1318] sm:$0xff]  ;;  %v4403_v15 = vld [vmem:[#allocation6 + $0xeb0] sm:$0xff] }
 0x8f2   : > { %5768 = vmatprep.subr.mxu0 %v4320_v31  ;;  %5835 = vmatprep.subr.mxu1 %v4456_v17  ;;  %v4404_v48 = vld [vmem:[#allocation6 + $0xeb8] sm:$0xff]  ;;  %v4539_v36 = vld [vmem:[#allocation6 + $0x12f0] sm:$0xff] }
 0x8f3   : > { %5769 = vmatpush1.msra.mxu0 %v4319_v16  ;;  %5836 = vmatpush1.msra.mxu1 %v4455_v61  ;;  %v4540_v55 = vld [vmem:[#allocation6 + $0x12f8] sm:$0xff]  ;;  %v4399_v16 = vld [vmem:[#allocation6 + $0xe90] sm:$0xff] }
 0x8f4   : > { %5770 = vmatprep.subr.mxu0 %v4444_v27  ;;  %5837 = vmatprep.subr.mxu1 %v4452_v38  ;;  %v4400_v31 = vld [vmem:[#allocation6 + $0xe98] sm:$0xff]  ;;  %v4535_v61 = vld [vmem:[#allocation6 + $0x12d0] sm:$0xff] }
 0x8f5   : > { %5771 = vmatpush2.msra.mxu0 %v4443_v21  ;;  %5838 = vmatpush1.msra.mxu1 %v4451_v22  ;;  %v4536_v17 = vld [vmem:[#allocation6 + $0x12d8] sm:$0xff]  ;;  %v4395_v21 = vld [vmem:[#allocation6 + $0xe70] sm:$0xff] }
 0x8f6   : > { %5772 = vmatprep.subr.mxu0 %v4440_v56  ;;  %5839 = vmatprep.subr.mxu1 %v4448_v42  ;;  %v4396_v27 = vld [vmem:[#allocation6 + $0xe78] sm:$0xff]  ;;  %v4531_v22 = vld [vmem:[#allocation6 + $0x12b0] sm:$0xff] }
 0x8f7   : > { %5773 = vmatpush2.msra.mxu0 %v4439_v20  ;;  %5840 = vmatpush1.msra.mxu1 %v4447_v32  ;;  %v4532_v38 = vld [vmem:[#allocation6 + $0x12b8] sm:$0xff]  ;;  %v4391_v20 = vld [vmem:[#allocation6 + $0xe50] sm:$0xff] }
 0x8f8   : > { %5774 = vmatprep.subr.mxu0 %v4436_v57  ;;  %5841 = vmatprep.subr.mxu1 %v4572_v63  ;;  %v4392_v56 = vld [vmem:[#allocation6 + $0xe58] sm:$0xff]  ;;  %v4527_v32 = vld [vmem:[#allocation6 + $0x1290] sm:$0xff] }
 0x8f9   : > { %5775 = vmatpush2.msra.mxu0 %v4435_v12  ;;  %5842 = vmatpush2.msra.mxu1 %v4571_v49  ;;  %v4528_v42 = vld [vmem:[#allocation6 + $0x1298] sm:$0xff]  ;;  %v4387_v12 = vld [vmem:[#allocation6 + $0xe30] sm:$0xff] }
 0x8fa   : > { %5776 = vmatprep.subr.mxu0 %v4432_v13  ;;  %5843 = vmatprep.subr.mxu1 %v4568_v35  ;;  %v4388_v57 = vld [vmem:[#allocation6 + $0xe38] sm:$0xff]  ;;  %v4523_v49 = vld [vmem:[#allocation6 + $0x1270] sm:$0xff] }
 0x8fb   : > { %5777 = vmatpush2.msra.mxu0 %v4431_v24  ;;  %5844 = vmatpush2.msra.mxu1 %v4567_v39  ;;  %v4524_v63 = vld [vmem:[#allocation6 + $0x1278] sm:$0xff]  ;;  %v4383_v24 = vld [vmem:[#allocation6 + $0xe10] sm:$0xff] }
 0x8fc   : > { %5778 = vmatprep.subr.mxu0 %v4428_v40  ;;  %5845 = vmatprep.subr.mxu1 %v4564_v25  ;;  %v4384_v13 = vld [vmem:[#allocation6 + $0xe18] sm:$0xff]  ;;  %v4519_v39 = vld [vmem:[#allocation6 + $0x1250] sm:$0xff] }
 0x8fd   : > { %5779 = vmatpush2.msra.mxu0 %v4427_v46  ;;  %5846 = vmatpush2.msra.mxu1 %v4563_v51  ;;  %v4520_v35 = vld [vmem:[#allocation6 + $0x1258] sm:$0xff]  ;;  %v4515_v46 = vld [vmem:[#allocation6 + $0x1230] sm:$0xff] }
 0x8fe   : > { %5780 = vmatprep.subr.mxu0 %v4424_v52  ;;  %5847 = vmatprep.subr.mxu1 %v4560_v37  ;;  %v4516_v40 = vld [vmem:[#allocation6 + $0x1238] sm:$0xff]  ;;  %v4635_v51 = vld [vmem:[#allocation6 + $0x15f0] sm:$0xff] }
 0x8ff   : > { %5781 = vmatpush2.msra.mxu0 %v4423_v34  ;;  %5848 = vmatpush2.msra.mxu1 %v4559_v53  ;;  %v4636_v25 = vld [vmem:[#allocation6 + $0x15f8] sm:$0xff]  ;;  %v4511_v34 = vld [vmem:[#allocation6 + $0x1210] sm:$0xff] }
 0x900   : > { %5782 = vmatprep.subr.mxu0 %v4420_v54  ;;  %5849 = vmatprep.subr.mxu1 %v4556_v45  ;;  %v4512_v52 = vld [vmem:[#allocation6 + $0x1218] sm:$0xff]  ;;  %v4631_v53 = vld [vmem:[#allocation6 + $0x15d0] sm:$0xff] }
 0x901   : > { %5783 = vmatpush2.msra.mxu0 %v4419_v60  ;;  %5850 = vmatpush2.msra.mxu1 %v4555_v59  ;;  %v4632_v37 = vld [vmem:[#allocation6 + $0x15d8] sm:$0xff]  ;;  %v4627_v60 = vld [vmem:[#allocation6 + $0x15b0] sm:$0xff] }
 0x902   : > { %5784 = vmatprep.subr.mxu0 %v4416_v19  ;;  %5851 = vmatprep.subr.mxu1 %v4552_v62  ;;  %v4628_v54 = vld [vmem:[#allocation6 + $0x15b8] sm:$0xff]  ;;  %v4623_v19 = vld [vmem:[#allocation6 + $0x1590] sm:$0xff] }
 0x903   : > { %5785 = vmatpush2.msra.mxu0 %v4415_v2  ;;  %5852 = vmatpush2.msra.mxu1 %v4551_v3  ;;  %v4764_v45 = vld [vmem:[#allocation6 + $0x19f8] sm:$0xff]  ;;  %v4759_v62 = vld [vmem:[#allocation6 + $0x19d0] sm:$0xff] }
 0x904   : > { %5786 = vmatprep.subr.mxu0 %v4412_v4  ;;  %5853 = vmatprep.subr.mxu1 %v4548_v5  ;;  %v4760_v59 = vld [vmem:[#allocation6 + $0x19d8] sm:$0xff]  ;;  %v4619_v2 = vld [vmem:[#allocation6 + $0x1570] sm:$0xff] }
 0x905   : > { %5787 = vmatpush2.msra.mxu0 %v4411_v6  ;;  %5854 = vmatpush2.msra.mxu1 %v4547_v10  ;;  %v4755_v3 = vld [vmem:[#allocation6 + $0x19b0] sm:$0xff]  ;;  %v4612_v6 = vld [vmem:[#allocation6 + $0x1538] sm:$0xff] }
 0x906   : > { %5788 = vmatprep.subr.mxu0 %v4408_v7  ;;  %5855 = vmatprep.subr.mxu1 %v4544_v8  ;;  %v4615_v4 = vld [vmem:[#allocation6 + $0x1550] sm:$0xff]  ;;  %v4748_v10 = vld [vmem:[#allocation6 + $0x1978] sm:$0xff] }
 0x907   : > { %5789 = vmatpush2.msra.mxu0 %v4407_v9  ;;  %5856 = vmatpush2.msra.mxu1 %v4543_v18  ;;  %v4751_v5 = vld [vmem:[#allocation6 + $0x1990] sm:$0xff]  ;;  %v4608_v7 = vld [vmem:[#allocation6 + $0x1518] sm:$0xff] }
 0x908   : > { %5790 = vmatprep.subr.mxu0 %v4404_v48  ;;  %5857 = vmatprep.subr.mxu1 %v4540_v55  ;;  %v4744_v8 = vld [vmem:[#allocation6 + $0x1958] sm:$0xff]  ;;  %v4607_v9 = vld [vmem:[#allocation6 + $0x1510] sm:$0xff] }
 0x909   : > { %5791 = vmatpush2.msra.mxu0 %v4403_v15  ;;  %5858 = vmatpush2.msra.mxu1 %v4539_v36  ;;  %v4743_v18 = vld [vmem:[#allocation6 + $0x1950] sm:$0xff]  ;;  %v4604_v48 = vld [vmem:[#allocation6 + $0x14f8] sm:$0xff] }
 0x90a   : > { %5792 = vmatprep.subr.mxu0 %v4400_v31  ;;  %5859 = vmatprep.subr.mxu1 %v4536_v17  ;;  %v4740_v55 = vld [vmem:[#allocation6 + $0x1938] sm:$0xff]  ;;  %v4603_v15 = vld [vmem:[#allocation6 + $0x14f0] sm:$0xff] }
 0x90b   : > { %5793 = vmatpush2.msra.mxu0 %v4399_v16  ;;  %5860 = vmatpush2.msra.mxu1 %v4535_v61  ;;  %v4739_v36 = vld [vmem:[#allocation6 + $0x1930] sm:$0xff]  ;;  %v4600_v31 = vld [vmem:[#allocation6 + $0x14d8] sm:$0xff] }
 0x90c   : > { %5794 = vmatprep.subr.mxu0 %v4396_v27  ;;  %5861 = vmatprep.subr.mxu1 %v4532_v38  ;;  %v4736_v17 = vld [vmem:[#allocation6 + $0x1918] sm:$0xff]  ;;  %v4599_v16 = vld [vmem:[#allocation6 + $0x14d0] sm:$0xff] }
 0x90d   : > { %5795 = vmatpush2.msra.mxu0 %v4395_v21  ;;  %5862 = vmatpush2.msra.mxu1 %v4531_v22  ;;  %v4735_v61 = vld [vmem:[#allocation6 + $0x1910] sm:$0xff]  ;;  %v4596_v27 = vld [vmem:[#allocation6 + $0x14b8] sm:$0xff] }
 0x90e   : > { %5796 = vmatprep.subr.mxu0 %v4392_v56  ;;  %5863 = vmatprep.subr.mxu1 %v4528_v42  ;;  %v4732_v38 = vld [vmem:[#allocation6 + $0x18f8] sm:$0xff]  ;;  %v4595_v21 = vld [vmem:[#allocation6 + $0x14b0] sm:$0xff] }
 0x90f   : > { %5797 = vmatpush2.msra.mxu0 %v4391_v20  ;;  %5864 = vmatpush2.msra.mxu1 %v4527_v32  ;;  %v4731_v22 = vld [vmem:[#allocation6 + $0x18f0] sm:$0xff]  ;;  %v4592_v56 = vld [vmem:[#allocation6 + $0x1498] sm:$0xff] }
 0x910   : > { %5798 = vmatprep.subr.mxu0 %v4388_v57  ;;  %5865 = vmatprep.subr.mxu1 %v4524_v63  ;;  %v4728_v42 = vld [vmem:[#allocation6 + $0x18d8] sm:$0xff]  ;;  %v4591_v20 = vld [vmem:[#allocation6 + $0x1490] sm:$0xff] }
 0x911   : > { %5799 = vmatpush2.msra.mxu0 %v4387_v12  ;;  %5866 = vmatpush2.msra.mxu1 %v4523_v49  ;;  %v4727_v32 = vld [vmem:[#allocation6 + $0x18d0] sm:$0xff]  ;;  %v4588_v57 = vld [vmem:[#allocation6 + $0x1478] sm:$0xff] }
 0x912   : > { %5800 = vmatprep.subr.mxu0 %v4384_v13  ;;  %5867 = vmatprep.subr.mxu1 %v4520_v35  ;;  %v4724_v63 = vld [vmem:[#allocation6 + $0x18b8] sm:$0xff]  ;;  %v4587_v12 = vld [vmem:[#allocation6 + $0x1470] sm:$0xff] }
 0x913   : > { %5801 = vmatpush2.msra.mxu0 %v4383_v24  ;;  %5868 = vmatpush2.msra.mxu1 %v4519_v39  ;;  %v4723_v49 = vld [vmem:[#allocation6 + $0x18b0] sm:$0xff]  ;;  %v4584_v13 = vld [vmem:[#allocation6 + $0x1458] sm:$0xff] }
 0x914   : > { %5803 = vmatmul.mubr.f32.vlgmr.msra.gmra.mxu0 %v3923_v28  ;;  %5869 = vmatprep.subr.mxu1 %v4516_v40  ;;  %v4624_v28 = vld [vmem:[#allocation6 + $0x1598] sm:$0xff]  ;;  %v4583_v24 = vld [vmem:[#allocation6 + $0x1450] sm:$0xff] }
 0x915   : > { %5880 = vmatprep.subr.mxu0 %v4636_v25  ;;  %5870 = vmatpush2.msra.mxu1 %v4515_v46  ;;  %v4720_v35 = vld [vmem:[#allocation6 + $0x1898] sm:$0xff]  ;;  %v4719_v39 = vld [vmem:[#allocation6 + $0x1890] sm:$0xff] }
 0x916   : > { %5881 = vmatpush1.msra.mxu0 %v4635_v51  ;;  %5944 = vmatprep.mubr.f32.mxu0 %v3928_v23  ;;  %v4756_v23 = vld [vmem:[#allocation6 + $0x19b8] sm:$0xff]  ;;  %v4579_v46 = vld [vmem:[#allocation6 + $0x1430] sm:$0xff] }
 0x917   : > { %5871 = vmatprep.subr.mxu1 %v4512_v52  ;;  %5882 = vmatprep.subr.mxu0 %v4632_v37  ;;  %v4580_v40 = vld [vmem:[#allocation6 + $0x1438] sm:$0xff]  ;;  %v4715_v51 = vld [vmem:[#allocation6 + $0x1870] sm:$0xff] }
 0x918   : > { %5872 = vmatpush2.msra.mxu1 %v4511_v34  ;;  %5883 = vmatpush1.msra.mxu0 %v4631_v53  ;;  %v4716_v25 = vld [vmem:[#allocation6 + $0x1878] sm:$0xff]  ;;  %v4575_v34 = vld [vmem:[#allocation6 + $0x1410] sm:$0xff] }
 0x919   : > { %5874 = vmatmul.mubr.f32.vlgmr.msra.gmra.mxu1 %v3925_v50  ;;  %5884 = vmatprep.subr.mxu0 %v4628_v54  ;;  %v4752_v50 = vld [vmem:[#allocation6 + $0x1998] sm:$0xff]  ;;  %v4711_v53 = vld [vmem:[#allocation6 + $0x1850] sm:$0xff] }
 0x91a   : > { %5951 = vmatprep.subr.mxu1 %v4764_v45  ;;  %5885 = vmatpush1.msra.mxu0 %v4627_v60  ;;  %v4576_v52 = vld [vmem:[#allocation6 + $0x1418] sm:$0xff]  ;;  %v4699_v60 = vld [vmem:[#allocation6 + $0x17f0] sm:$0xff] }
 0x91b   : > { %5952 = vmatpush1.msra.mxu1 %v4763_v29  ;;  %6015 = vmatprep.mubr.f32.mxu1 %v3930_v44  ;;  %v4747_v44 = vld [vmem:[#allocation6 + $0x1970] sm:$0xff]  ;;  %v4712_v37 = vld [vmem:[#allocation6 + $0x1858] sm:$0xff] }
 0x91c   : > { %5886 = vmatprep.subr.mxu0 %v4624_v28  ;;  %5953 = vmatprep.subr.mxu1 %v4760_v59  ;;  %v4700_v54 = vld [vmem:[#allocation6 + $0x17f8] sm:$0xff]  ;;  %v4707_v29 = vld [vmem:[#allocation6 + $0x1830] sm:$0xff] }
 0x91d   : > { %5887 = vmatpush1.msra.mxu0 %v4623_v19  ;;  %5954 = vmatpush1.msra.mxu1 %v4759_v62  ;;  %v4708_v45 = vld [vmem:[#allocation6 + $0x1838] sm:$0xff]  ;;  %v4695_v19 = vld [vmem:[#allocation6 + $0x17d0] sm:$0xff] }
 0x91e   : > { %5888 = vmatprep.subr.mxu0 %v4620_v33  ;;  %5955 = vmatprep.subr.mxu1 %v4756_v23  ;;  %v4696_v28 = vld [vmem:[#allocation6 + $0x17d8] sm:$0xff]  ;;  %v4703_v62 = vld [vmem:[#allocation6 + $0x1810] sm:$0xff] }
 0x91f   : > { %5889 = vmatpush1.msra.mxu0 %v4619_v2  ;;  %5956 = vmatpush1.msra.mxu1 %v4755_v3  ;;  %v4704_v59 = vld [vmem:[#allocation6 + $0x1818] sm:$0xff]  ;;  %v4691_v2 = vld [vmem:[#allocation6 + $0x17b0] sm:$0xff] }
 0x920   : > { %5890 = vmatprep.subr.mxu0 %v4616_v47  ;;  %5957 = vmatprep.subr.mxu1 %v4752_v50  ;;  %v4692_v33 = vld [vmem:[#allocation6 + $0x17b8] sm:$0xff]  ;;  %v4827_v3 = vld [vmem:[#allocation6 + $0x1bf0] sm:$0xff] }
 0x921   : > { %5891 = vmatpush1.msra.mxu0 %v4615_v4  ;;  %5958 = vmatpush1.msra.mxu1 %v4751_v5  ;;  %v4828_v23 = vld [vmem:[#allocation6 + $0x1bf8] sm:$0xff]  ;;  %v4687_v4 = vld [vmem:[#allocation6 + $0x1790] sm:$0xff] }
 0x922   : > { %5892 = vmatprep.subr.mxu0 %v4612_v6  ;;  %5959 = vmatprep.subr.mxu1 %v4748_v10  ;;  %v4688_v47 = vld [vmem:[#allocation6 + $0x1798] sm:$0xff]  ;;  %v4823_v5 = vld [vmem:[#allocation6 + $0x1bd0] sm:$0xff] }
 0x923   : > { %5893 = vmatpush1.msra.mxu0 %v4611_v41  ;;  %5960 = vmatpush1.msra.mxu1 %v4747_v44  ;;  %v4824_v50 = vld [vmem:[#allocation6 + $0x1bd8] sm:$0xff]  ;;  %v4683_v41 = vld [vmem:[#allocation6 + $0x1770] sm:$0xff] }
 0x924   : > { %5894 = vmatprep.subr.mxu0 %v4608_v7  ;;  %5961 = vmatprep.subr.mxu1 %v4744_v8  ;;  %v4684_v6 = vld [vmem:[#allocation6 + $0x1778] sm:$0xff]  ;;  %v4819_v44 = vld [vmem:[#allocation6 + $0x1bb0] sm:$0xff] }
 0x925   : > { %5895 = vmatpush1.msra.mxu0 %v4607_v9  ;;  %5962 = vmatpush1.msra.mxu1 %v4743_v18  ;;  %v4820_v10 = vld [vmem:[#allocation6 + $0x1bb8] sm:$0xff]  ;;  %v4679_v9 = vld [vmem:[#allocation6 + $0x1750] sm:$0xff] }
 0x926   : > { %5896 = vmatprep.subr.mxu0 %v4604_v48  ;;  %5963 = vmatprep.subr.mxu1 %v4740_v55  ;;  %v4680_v7 = vld [vmem:[#allocation6 + $0x1758] sm:$0xff]  ;;  %v4815_v18 = vld [vmem:[#allocation6 + $0x1b90] sm:$0xff] }
 0x927   : > { %5897 = vmatpush1.msra.mxu0 %v4603_v15  ;;  %5964 = vmatpush1.msra.mxu1 %v4739_v36  ;;  %v4816_v8 = vld [vmem:[#allocation6 + $0x1b98] sm:$0xff]  ;;  %v4675_v15 = vld [vmem:[#allocation6 + $0x1730] sm:$0xff] }
 0x928   : > { %5898 = vmatprep.subr.mxu0 %v4600_v31  ;;  %5965 = vmatprep.subr.mxu1 %v4736_v17  ;;  %v4676_v48 = vld [vmem:[#allocation6 + $0x1738] sm:$0xff]  ;;  %v4811_v36 = vld [vmem:[#allocation6 + $0x1b70] sm:$0xff] }
 0x929   : > { %5899 = vmatpush1.msra.mxu0 %v4599_v16  ;;  %5966 = vmatpush1.msra.mxu1 %v4735_v61  ;;  %v4812_v55 = vld [vmem:[#allocation6 + $0x1b78] sm:$0xff]  ;;  %v4671_v16 = vld [vmem:[#allocation6 + $0x1710] sm:$0xff] }
 0x92a   : > { %5900 = vmatprep.subr.mxu0 %v4596_v27  ;;  %5967 = vmatprep.subr.mxu1 %v4732_v38  ;;  %v4672_v31 = vld [vmem:[#allocation6 + $0x1718] sm:$0xff]  ;;  %v4807_v61 = vld [vmem:[#allocation6 + $0x1b50] sm:$0xff] }
 0x92b   : > { %5901 = vmatpush1.msra.mxu0 %v4595_v21  ;;  %5968 = vmatpush1.msra.mxu1 %v4731_v22  ;;  %v4808_v17 = vld [vmem:[#allocation6 + $0x1b58] sm:$0xff]  ;;  %v4667_v21 = vld [vmem:[#allocation6 + $0x16f0] sm:$0xff] }
 0x92c   : > { %5902 = vmatprep.subr.mxu0 %v4592_v56  ;;  %5969 = vmatprep.subr.mxu1 %v4728_v42  ;;  %v4668_v27 = vld [vmem:[#allocation6 + $0x16f8] sm:$0xff]  ;;  %v4803_v22 = vld [vmem:[#allocation6 + $0x1b30] sm:$0xff] }
 0x92d   : > { %5903 = vmatpush1.msra.mxu0 %v4591_v20  ;;  %5970 = vmatpush1.msra.mxu1 %v4727_v32  ;;  %v4804_v38 = vld [vmem:[#allocation6 + $0x1b38] sm:$0xff]  ;;  %v4663_v20 = vld [vmem:[#allocation6 + $0x16d0] sm:$0xff] }
 0x92e   : > { %5904 = vmatprep.subr.mxu0 %v4588_v57  ;;  %5971 = vmatprep.subr.mxu1 %v4724_v63  ;;  %v4664_v56 = vld [vmem:[#allocation6 + $0x16d8] sm:$0xff]  ;;  %v4799_v32 = vld [vmem:[#allocation6 + $0x1b10] sm:$0xff] }
 0x92f   : > { %5905 = vmatpush1.msra.mxu0 %v4587_v12  ;;  %5972 = vmatpush1.msra.mxu1 %v4723_v49  ;;  %v4800_v42 = vld [vmem:[#allocation6 + $0x1b18] sm:$0xff]  ;;  %v4659_v12 = vld [vmem:[#allocation6 + $0x16b0] sm:$0xff] }
 0x930   : > { %5906 = vmatprep.subr.mxu0 %v4584_v13  ;;  %5973 = vmatprep.subr.mxu1 %v4720_v35  ;;  %v4660_v57 = vld [vmem:[#allocation6 + $0x16b8] sm:$0xff]  ;;  %v4795_v49 = vld [vmem:[#allocation6 + $0x1af0] sm:$0xff] }
 0x931   : > { %5907 = vmatpush1.msra.mxu0 %v4583_v24  ;;  %5974 = vmatpush1.msra.mxu1 %v4719_v39  ;;  %v4796_v63 = vld [vmem:[#allocation6 + $0x1af8] sm:$0xff]  ;;  %v4655_v24 = vld [vmem:[#allocation6 + $0x1690] sm:$0xff] }
 0x932   : > { %5908 = vmatprep.subr.mxu0 %v4580_v40  ;;  %5975 = vmatprep.subr.mxu1 %v4716_v25  ;;  %v4656_v13 = vld [vmem:[#allocation6 + $0x1698] sm:$0xff]  ;;  %v4791_v39 = vld [vmem:[#allocation6 + $0x1ad0] sm:$0xff] }
 0x933   : > { %5909 = vmatpush1.msra.mxu0 %v4579_v46  ;;  %5976 = vmatpush1.msra.mxu1 %v4715_v51  ;;  %v4792_v35 = vld [vmem:[#allocation6 + $0x1ad8] sm:$0xff]  ;;  %v4651_v46 = vld [vmem:[#allocation6 + $0x1670] sm:$0xff] }
 0x934   : > { %5910 = vmatprep.subr.mxu0 %v4576_v52  ;;  %5977 = vmatprep.subr.mxu1 %v4712_v37  ;;  %v4652_v40 = vld [vmem:[#allocation6 + $0x1678] sm:$0xff]  ;;  %v4787_v51 = vld [vmem:[#allocation6 + $0x1ab0] sm:$0xff] }
 0x935   : > { %5911 = vmatpush1.msra.mxu0 %v4575_v34  ;;  %5978 = vmatpush1.msra.mxu1 %v4711_v53  ;;  %v4788_v25 = vld [vmem:[#allocation6 + $0x1ab8] sm:$0xff]  ;;  %v4647_v34 = vld [vmem:[#allocation6 + $0x1650] sm:$0xff] }
 0x936   : > { %5912 = vmatprep.subr.mxu0 %v4700_v54  ;;  %5979 = vmatprep.subr.mxu1 %v4708_v45  ;;  %v4648_v52 = vld [vmem:[#allocation6 + $0x1658] sm:$0xff]  ;;  %v4783_v53 = vld [vmem:[#allocation6 + $0x1a90] sm:$0xff] }
 0x937   : > { %5913 = vmatpush2.msra.mxu0 %v4699_v60  ;;  %5980 = vmatpush1.msra.mxu1 %v4707_v29  ;;  %v4784_v37 = vld [vmem:[#allocation6 + $0x1a98] sm:$0xff]  ;;  %v4643_v60 = vld [vmem:[#allocation6 + $0x1630] sm:$0xff] }
 0x938   : > { %5914 = vmatprep.subr.mxu0 %v4696_v28  ;;  %5981 = vmatprep.subr.mxu1 %v4704_v59  ;;  %v4644_v54 = vld [vmem:[#allocation6 + $0x1638] sm:$0xff]  ;;  %v4779_v29 = vld [vmem:[#allocation6 + $0x1a70] sm:$0xff] }
 0x939   : > { %5915 = vmatpush2.msra.mxu0 %v4695_v19  ;;  %5982 = vmatpush1.msra.mxu1 %v4703_v62  ;;  %v4780_v45 = vld [vmem:[#allocation6 + $0x1a78] sm:$0xff]  ;;  %v4639_v19 = vld [vmem:[#allocation6 + $0x1610] sm:$0xff] }
 0x93a   : > { %5916 = vmatprep.subr.mxu0 %v4692_v33  ;;  %5983 = vmatprep.subr.mxu1 %v4828_v23  ;;  %v4640_v28 = vld [vmem:[#allocation6 + $0x1618] sm:$0xff]  ;;  %v4775_v62 = vld [vmem:[#allocation6 + $0x1a50] sm:$0xff] }
 0x93b   : > { %5917 = vmatpush2.msra.mxu0 %v4691_v2  ;;  %5984 = vmatpush2.msra.mxu1 %v4827_v3  ;;  %v4776_v59 = vld [vmem:[#allocation6 + $0x1a58] sm:$0xff]  ;;  %v4771_v2 = vld [vmem:[#allocation6 + $0x1a30] sm:$0xff] }
 0x93c   : > { %5918 = vmatprep.subr.mxu0 %v4688_v47  ;;  %5985 = vmatprep.subr.mxu1 %v4824_v50  ;;  %v4772_v33 = vld [vmem:[#allocation6 + $0x1a38] sm:$0xff]  ;;  %v4891_v3 = vld [vmem:[#allocation6 + $0x1df0] sm:$0xff] }
 0x93d   : > { %5919 = vmatpush2.msra.mxu0 %v4687_v4  ;;  %5986 = vmatpush2.msra.mxu1 %v4823_v5  ;;  %v4892_v23 = vld [vmem:[#allocation6 + $0x1df8] sm:$0xff]  ;;  %v4767_v4 = vld [vmem:[#allocation6 + $0x1a10] sm:$0xff] }
 0x93e   : > { %5920 = vmatprep.subr.mxu0 %v4684_v6  ;;  %5987 = vmatprep.subr.mxu1 %v4820_v10  ;;  %v4768_v47 = vld [vmem:[#allocation6 + $0x1a18] sm:$0xff]  ;;  %v4887_v5 = vld [vmem:[#allocation6 + $0x1dd0] sm:$0xff] }
 0x93f   : > { %5921 = vmatpush2.msra.mxu0 %v4683_v41  ;;  %5988 = vmatpush2.msra.mxu1 %v4819_v44  ;;  %v4888_v50 = vld [vmem:[#allocation6 + $0x1dd8] sm:$0xff]  ;;  %v4883_v10 = vld [vmem:[#allocation6 + $0x1db0] sm:$0xff] }
 0x940   : > { %5922 = vmatprep.subr.mxu0 %v4680_v7  ;;  %5989 = vmatprep.subr.mxu1 %v4816_v8  ;;  %v4884_v6 = vld [vmem:[#allocation6 + $0x1db8] sm:$0xff]  ;;  %v4875_v44 = vld [vmem:[#allocation6 + $0x1d70] sm:$0xff] }
 0x941   : > { %5923 = vmatpush2.msra.mxu0 %v4679_v9  ;;  %5990 = vmatpush2.msra.mxu1 %v4815_v18  ;;  %v4880_v41 = vld [vmem:[#allocation6 + $0x1d98] sm:$0xff]  ;;  %v4867_v8 = vld [vmem:[#allocation6 + $0x1d30] sm:$0xff] }
 0x942   : > { %5924 = vmatprep.subr.mxu0 %v4676_v48  ;;  %5991 = vmatprep.subr.mxu1 %v4812_v55  ;;  %v4872_v7 = vld [vmem:[#allocation6 + $0x1d58] sm:$0xff]  ;;  %v4863_v18 = vld [vmem:[#allocation6 + $0x1d10] sm:$0xff] }
 0x943   : > { %5925 = vmatpush2.msra.mxu0 %v4675_v15  ;;  %5992 = vmatpush2.msra.mxu1 %v4811_v36  ;;  %v4864_v9 = vld [vmem:[#allocation6 + $0x1d18] sm:$0xff]  ;;  %v4855_v55 = vld [vmem:[#allocation6 + $0x1cd0] sm:$0xff] }
 0x944   : > { %5926 = vmatprep.subr.mxu0 %v4672_v31  ;;  %5993 = vmatprep.subr.mxu1 %v4808_v17  ;;  %v4856_v48 = vld [vmem:[#allocation6 + $0x1cd8] sm:$0xff]  ;;  %v4851_v36 = vld [vmem:[#allocation6 + $0x1cb0] sm:$0xff] }
 0x945   : > { %5927 = vmatpush2.msra.mxu0 %v4671_v16  ;;  %5994 = vmatpush2.msra.mxu1 %v4807_v61  ;;  %v4852_v15 = vld [vmem:[#allocation6 + $0x1cb8] sm:$0xff]  ;;  %v4847_v17 = vld [vmem:[#allocation6 + $0x1c90] sm:$0xff] }
 0x946   : > { %5928 = vmatprep.subr.mxu0 %v4668_v27  ;;  %5995 = vmatprep.subr.mxu1 %v4804_v38  ;;  %v4848_v31 = vld [vmem:[#allocation6 + $0x1c98] sm:$0xff]  ;;  %v4843_v61 = vld [vmem:[#allocation6 + $0x1c70] sm:$0xff] }
 0x947   : > { %5929 = vmatpush2.msra.mxu0 %v4667_v21  ;;  %5996 = vmatpush2.msra.mxu1 %v4803_v22  ;;  %v4844_v16 = vld [vmem:[#allocation6 + $0x1c78] sm:$0xff]  ;;  %v4839_v38 = vld [vmem:[#allocation6 + $0x1c50] sm:$0xff] }
 0x948   : > { %5930 = vmatprep.subr.mxu0 %v4664_v56  ;;  %5997 = vmatprep.subr.mxu1 %v4800_v42  ;;  %v4840_v27 = vld [vmem:[#allocation6 + $0x1c58] sm:$0xff]  ;;  %v4835_v22 = vld [vmem:[#allocation6 + $0x1c30] sm:$0xff] }
 0x949   : > { %5931 = vmatpush2.msra.mxu0 %v4663_v20  ;;  %5998 = vmatpush2.msra.mxu1 %v4799_v32  ;;  %v4836_v21 = vld [vmem:[#allocation6 + $0x1c38] sm:$0xff]  ;;  %v4831_v42 = vld [vmem:[#allocation6 + $0x1c10] sm:$0xff] }
 0x94a   : > { %5932 = vmatprep.subr.mxu0 %v4660_v57  ;;  %5999 = vmatprep.subr.mxu1 %v4796_v63  ;;  %v4832_v56 = vld [vmem:[#allocation6 + $0x1c18] sm:$0xff]  ;;  %v4955_v32 = vld [vmem:[#allocation6 + $0x1ff0] sm:$0xff] }
 0x94b   : > { %5933 = vmatpush2.msra.mxu0 %v4659_v12  ;;  %6000 = vmatpush2.msra.mxu1 %v4795_v49  ;;  %v4956_v20 = vld [vmem:[#allocation6 + $0x1ff8] sm:$0xff]  ;;  %v4951_v63 = vld [vmem:[#allocation6 + $0x1fd0] sm:$0xff] }
 0x94c   : > { %5934 = vmatprep.subr.mxu0 %v4656_v13  ;;  %6001 = vmatprep.subr.mxu1 %v4792_v35  ;;  %v4952_v57 = vld [vmem:[#allocation6 + $0x1fd8] sm:$0xff]  ;;  %v4947_v49 = vld [vmem:[#allocation6 + $0x1fb0] sm:$0xff] }
 0x94d   : > { %5935 = vmatpush2.msra.mxu0 %v4655_v24  ;;  %6002 = vmatpush2.msra.mxu1 %v4791_v39  ;;  %v4948_v12 = vld [vmem:[#allocation6 + $0x1fb8] sm:$0xff]  ;;  %v4943_v35 = vld [vmem:[#allocation6 + $0x1f90] sm:$0xff] }
 0x94e   : > { %5936 = vmatprep.subr.mxu0 %v4652_v40  ;;  %6003 = vmatprep.subr.mxu1 %v4788_v25  ;;  %v4944_v13 = vld [vmem:[#allocation6 + $0x1f98] sm:$0xff]  ;;  %v4939_v39 = vld [vmem:[#allocation6 + $0x1f70] sm:$0xff] }
 0x94f   : > { %5937 = vmatpush2.msra.mxu0 %v4651_v46  ;;  %6004 = vmatpush2.msra.mxu1 %v4787_v51  ;;  %v4940_v24 = vld [vmem:[#allocation6 + $0x1f78] sm:$0xff]  ;;  %v4935_v25 = vld [vmem:[#allocation6 + $0x1f50] sm:$0xff] }
 0x950   : > { %5938 = vmatprep.subr.mxu0 %v4648_v52  ;;  %6005 = vmatprep.subr.mxu1 %v4784_v37  ;;  %v4936_v40 = vld [vmem:[#allocation6 + $0x1f58] sm:$0xff]  ;;  %v4931_v51 = vld [vmem:[#allocation6 + $0x1f30] sm:$0xff] }
 0x951   : > { %5939 = vmatpush2.msra.mxu0 %v4647_v34  ;;  %6006 = vmatpush2.msra.mxu1 %v4783_v53  ;;  %v4932_v46 = vld [vmem:[#allocation6 + $0x1f38] sm:$0xff]  ;;  %v4927_v37 = vld [vmem:[#allocation6 + $0x1f10] sm:$0xff] }
 0x952   : > { %5940 = vmatprep.subr.mxu0 %v4644_v54  ;;  %6007 = vmatprep.subr.mxu1 %v4780_v45  ;;  %v4928_v52 = vld [vmem:[#allocation6 + $0x1f18] sm:$0xff]  ;;  %v4923_v53 = vld [vmem:[#allocation6 + $0x1ef0] sm:$0xff] }
 0x953   : > { %5941 = vmatpush2.msra.mxu0 %v4643_v60  ;;  %6008 = vmatpush2.msra.mxu1 %v4779_v29  ;;  %v4924_v34 = vld [vmem:[#allocation6 + $0x1ef8] sm:$0xff]  ;;  %v4919_v45 = vld [vmem:[#allocation6 + $0x1ed0] sm:$0xff] }
 0x954   : > { %5942 = vmatprep.subr.mxu0 %v4640_v28  ;;  %6009 = vmatprep.subr.mxu1 %v4776_v59  ;;  %v4920_v54 = vld [vmem:[#allocation6 + $0x1ed8] sm:$0xff]  ;;  %v4915_v29 = vld [vmem:[#allocation6 + $0x1eb0] sm:$0xff] }
 0x955   : > { %5943 = vmatpush2.msra.mxu0 %v4639_v19  ;;  %6010 = vmatpush2.msra.mxu1 %v4775_v62  ;;  %v4916_v60 = vld [vmem:[#allocation6 + $0x1eb8] sm:$0xff]  ;;  %v4911_v59 = vld [vmem:[#allocation6 + $0x1e90] sm:$0xff] }
 0x956   : > { %5945 = vmatmul.mubr.f32.vlgmr.msra.gmra.mxu0 %v3927_v1  ;;  %6011 = vmatprep.subr.mxu1 %v4772_v33  ;;  %v4876_v1 = vld [vmem:[#allocation6 + $0x1d78] sm:$0xff]  ;;  %v4907_v62 = vld [vmem:[#allocation6 + $0x1e70] sm:$0xff] }
 0x957   : > { %6022 = vmatprep.subr.mxu0 %v4892_v23  ;;  %6012 = vmatpush2.msra.mxu1 %v4771_v2  ;;  %v4912_v28 = vld [vmem:[#allocation6 + $0x1e98] sm:$0xff]  ;;  %v4903_v23 = vld [vmem:[#allocation6 + $0x1e50] sm:$0xff] }
 0x958   : > { %6023 = vmatpush1.msra.mxu0 %v4891_v3  ;;  %6086 = vmatprep.mubr.f32.mxu0 %v3932_v30  ;;  %v4868_v30 = vld [vmem:[#allocation6 + $0x1d38] sm:$0xff]  ;;  %v4899_v3 = vld [vmem:[#allocation6 + $0x1e30] sm:$0xff] }
 0x959   : > { %6013 = vmatprep.subr.mxu1 %v4768_v47  ;;  %6024 = vmatprep.subr.mxu0 %v4888_v50  ;;  %v4908_v19 = vld [vmem:[#allocation6 + $0x1e78] sm:$0xff]  ;;  %v4895_v50 = vld [vmem:[#allocation6 + $0x1e10] sm:$0xff] }
 0x95a   : > { %6014 = vmatpush2.msra.mxu1 %v4767_v4  ;;  %6025 = vmatpush1.msra.mxu0 %v4887_v5  ;;  %v4904_v33 = vld [vmem:[#allocation6 + $0x1e58] sm:$0xff]  ;;  %v5023_v4 = vpop.f32.mrf.mxu1 }
 0x95b   : > { %6016 = vmatmul.mubr.f32.vlgmr.msra.gmra.mxu1 %v3929_v11  ;;  %6026 = vmatprep.subr.mxu0 %v4884_v6  ;;  %v4859_v11 = vld [vmem:[#allocation6 + $0x1cf0] sm:$0xff]  ;;  %v4900_v2 = vld [vmem:[#allocation6 + $0x1e38] sm:$0xff]  ;;  %v5094_v6 = vpop.f32.mrf.mxu0 }
 0x95c   : > { %6027 = vmatpush1.msra.mxu0 %v4883_v10  ;;  %v4896_v47 = vld [vmem:[#allocation6 + $0x1e18] sm:$0xff]  ;;  %v5025_v5 = vpop.f32.mrf.mxu1 }
 0x95d   : > { %6028 = vmatprep.subr.mxu0 %v4880_v41  ;;  %v5096_v41 = vpop.f32.mrf.mxu0 }
 0x95e   : > { %6029 = vmatpush1.msra.mxu0 %v4879_v26  ;;  %v5165_v10 = vpop.f32.mrf.mxu1 }
 0x95f   : > { %6030 = vmatprep.subr.mxu0 %v4876_v1  ;;  %v5236_v1 = vpop.f32.mrf.mxu0 }
 0x960   : > { %6031 = vmatpush1.msra.mxu0 %v4875_v44  ;;  %v5167_v26 = vpop.f32.mrf.mxu1 }
 0x961   : > { %6032 = vmatprep.subr.mxu0 %v4872_v7  ;;  %v5238_v7 = vpop.f32.mrf.mxu0 }
 0x962   : > { %6033 = vmatpush1.msra.mxu0 %v4871_v14  ;;  %v5307_v44 = vpop.f32.mrf.mxu1 }
 0x963   : > { %6034 = vmatprep.subr.mxu0 %v4868_v30  ;;  %v5378_v30 = vpop.f32.mrf.mxu0 }
 0x964   : > { %6035 = vmatpush1.msra.mxu0 %v4867_v8  ;;  %v5309_v14 = vpop.f32.mrf.mxu1 }
 0x965   : > { %6036 = vmatprep.subr.mxu0 %v4864_v9  ;;  %v5380_v9 = vpop.f32.mrf.mxu0 }
 0x966   : > { %6037 = vmatpush1.msra.mxu0 %v4863_v18  ;;  %v5449_v8 = vpop.f32.mrf.mxu1 }
 0x967   : > { %6038 = vmatprep.subr.mxu0 %v4860_v0  ;;  %v5520_v0 = vpop.f32.mrf.mxu0 }
 0x968   : > { %6039 = vmatpush1.msra.mxu0 %v4859_v11  ;;  %v5451_v18 = vpop.f32.mrf.mxu1 }
 0x969   : > { %6040 = vmatprep.subr.mxu0 %v4856_v48  ;;  %v5522_v48 = vpop.f32.mrf.mxu0 }
 0x96a   : > { %6041 = vmatpush1.msra.mxu0 %v4855_v55  ;;  %v5591_v11 = vpop.f32.mrf.mxu1 }
 0x96b   : > { %6042 = vmatprep.subr.mxu0 %v4852_v15  ;;  %v6658_v15 = vld [vmem:[#allocation2 + $0x8] sm:$0xff] }
 0x96c   : > { %6043 = vmatpush1.msra.mxu0 %v4851_v36  ;;  %v5593_v55 = vpop.f32.mrf.mxu1  ;;  %v5026_v36 = vadd.f32 %v6658_v15, %v5025_v5 }
 0x96d   : > { %6044 = vmatprep.subr.mxu0 %v4848_v31 }
 0x96e   : > { %6045 = vmatpush1.msra.mxu0 %v4847_v17  ;;  %v6659_v17 = vld [vmem:[#allocation2] sm:$0xff] }
 0x96f   : > { %6046 = vmatprep.subr.mxu0 %v4844_v16  ;;  %v5024_v16 = vadd.f32 %v6659_v17, %v5023_v4 }
 0x970   : > { %6047 = vmatpush1.msra.mxu0 %v4843_v61  ;;  %v5097_v61 = vadd.f32 %v5096_v41, %v5026_v36 }
 0x971   : > { %6048 = vmatprep.subr.mxu0 %v4840_v27 }
 0x972   : > { %6049 = vmatpush1.msra.mxu0 %v4839_v38 }
 0x973   : > { %6050 = vmatprep.subr.mxu0 %v4836_v21  ;;  %v5095_v21 = vadd.f32 %v5094_v6, %v5024_v16 }
 0x974   : > { %6051 = vmatpush1.msra.mxu0 %v4835_v22  ;;  %v5168_v22 = vadd.f32 %v5167_v26, %v5097_v61 }
 0x975   : > { %6052 = vmatprep.subr.mxu0 %v4832_v56  ;;  %v6660_v56 = vld [vmem:[#allocation2 + $0x10] sm:$0xff] }
 0x976   : > { %6053 = vmatpush1.msra.mxu0 %v4831_v42  ;;  %v5592_v42 = vadd.f32 %v6660_v56, %v5591_v11 }
 0x977   : > { %6054 = vmatprep.subr.mxu0 %v4956_v20 }
 0x978   : > { %6055 = vmatpush2.msra.mxu0 %v4955_v32  ;;  %v5166_v32 = vadd.f32 %v5165_v10, %v5095_v21 }
 0x979   : > { %6056 = vmatprep.subr.mxu0 %v4952_v57  ;;  %v5239_v57 = vadd.f32 %v5238_v7, %v5168_v22 }
 0x97a   : > { %6057 = vmatpush2.msra.mxu0 %v4951_v63  ;;  %v6661_v63 = vld [vmem:[#allocation2 + $0x18] sm:$0xff] }
 0x97b   : > { %6058 = vmatprep.subr.mxu0 %v4948_v12  ;;  %v5594_v12 = vadd.f32 %v6661_v63, %v5593_v55 }
 0x97c   : > { %6059 = vmatpush2.msra.mxu0 %v4947_v49 }
 0x97d   : > { %6060 = vmatprep.subr.mxu0 %v4944_v13 }
 0x97e   : > { %6061 = vmatpush2.msra.mxu0 %v4943_v35  ;;  %v5237_v35 = vadd.f32 %v5236_v1, %v5166_v32 }
 0x97f   : > { %6062 = vmatprep.subr.mxu0 %v4940_v24  ;;  %v5310_v24 = vadd.f32 %v5309_v14, %v5239_v57 }
 0x980   : > { %6063 = vmatpush2.msra.mxu0 %v4939_v39 }
 0x981   : > { %6064 = vmatprep.subr.mxu0 %v4936_v40 }
 0x982   : > { %6065 = vmatpush2.msra.mxu0 %v4935_v25 }
 0x983   : > { %6066 = vmatprep.subr.mxu0 %v4932_v46 }
 0x984   : > { %6067 = vmatpush2.msra.mxu0 %v4931_v51  ;;  %v5308_v51 = vadd.f32 %v5307_v44, %v5237_v35 }
 0x985   : > { %6068 = vmatprep.subr.mxu0 %v4928_v52  ;;  %v5381_v52 = vadd.f32 %v5380_v9, %v5310_v24 }
 0x986   : > { %6069 = vmatpush2.msra.mxu0 %v4927_v37 }
 0x987   : > { %6070 = vmatprep.subr.mxu0 %v4924_v34 }
 0x988   : > { %6071 = vmatpush2.msra.mxu0 %v4923_v53 }
 0x989   : > { %6072 = vmatprep.subr.mxu0 %v4920_v54  ;;  %v5379_v54 = vadd.f32 %v5378_v30, %v5308_v51 }
 0x98a   : > { %6073 = vmatpush2.msra.mxu0 %v4919_v45  ;;  %v5452_v45 = vadd.f32 %v5451_v18, %v5381_v52 }
 0x98b   : > { %6074 = vmatprep.subr.mxu0 %v4916_v60 }
 0x98c   : > { %6075 = vmatpush2.msra.mxu0 %v4915_v29 }
 0x98d   : > { %6076 = vmatprep.subr.mxu0 %v4912_v28 }
 0x98e   : > { %6077 = vmatpush2.msra.mxu0 %v4911_v59  ;;  %v5450_v59 = vadd.f32 %v5449_v8, %v5379_v54 }
 0x98f   : > { %6078 = vmatprep.subr.mxu0 %v4908_v19  ;;  %v5523_v19 = vadd.f32 %v5522_v48, %v5452_v45 }
 0x990   : > { %6079 = vmatpush2.msra.mxu0 %v4907_v62 }
 0x991   : > { %6080 = vmatprep.subr.mxu0 %v4904_v33 }
 0x992   : > { %6081 = vmatpush2.msra.mxu0 %v4903_v23  ;;  %v5662_v43 = vpop.f32.mrf.mxu0 }
 0x993   : > { %6082 = vmatprep.subr.mxu0 %v4900_v2  ;;  %v5663_v49 = vadd.f32 %v5662_v43, %v5592_v42  ;;  %v5521_v2 = vadd.f32 %v5520_v0, %v5450_v59 }
 0x994   : > { %6083 = vmatpush2.msra.mxu0 %v4899_v3  ;;  %v5664_v31 = vpop.f32.mrf.mxu0 }
 0x995   : > { %6084 = vmatprep.subr.mxu0 %v4896_v47  ;;  %v5665_v39 = vadd.f32 %v5664_v31, %v5594_v12  ;;  %v6093_v4 = vadd.f32 %v5523_v19, %v5521_v2 }
 0x996   : > { %6085 = vmatpush2.msra.mxu0 %v4895_v50 }
 0x997   : > { %6087 = vmatmul.mubr.f32.vlgmr.msra.gmra.mxu0 %v3931_v58  ;;  %v5733_v58 = vpop.f32.mrf.mxu1 }
 0x998   : > { %v5734_v40 = vadd.f32 %v5733_v58, %v5663_v49 }
 0x999   : > { %v5735_v27 = vpop.f32.mrf.mxu1 }
 0x99a   : > { %v5736_v37 = vadd.f32 %v5735_v27, %v5665_v39 }
 0x9d4   : > { %v5804_v38 = vpop.f32.mrf.mxu0 }
 0x9d5   : > { %v5805_v34 = vadd.f32 %v5804_v38, %v5734_v40 }
 0x9d6   : > { %v5806_v13 = vpop.f32.mrf.mxu0 }
 0x9d7   : > { %v5807_v60 = vadd.f32 %v5806_v13, %v5736_v37 }
 0x9d9   : > { %v5875_v20 = vpop.f32.mrf.mxu1 }
 0x9da   : > { %v5876_v29 = vadd.f32 %v5875_v20, %v5805_v34 }
 0x9db   : > { %v5877_v25 = vpop.f32.mrf.mxu1 }
 0x9dc   : > { %v5878_v62 = vadd.f32 %v5877_v25, %v5807_v60 }
 0xa16   : > { %v5946_v46 = vpop.f32.mrf.mxu0 }
 0xa17   : > { %v5947_v33 = vadd.f32 %v5946_v46, %v5876_v29 }
 0xa18   : > { %v5948_v28 = vpop.f32.mrf.mxu0 }
 0xa19   : > { %v5949_v3 = vadd.f32 %v5948_v28, %v5878_v62 }
 0xa1b   : > { %v6017_v53 = vpop.f32.mrf.mxu1 }
 0xa1c   : > { %v6018_v47 = vadd.f32 %v6017_v53, %v5947_v33 }
 0xa1d   : > { %v6019_v23 = vpop.f32.mrf.mxu1 }
 0xa1e   : > { %v6020_v5 = vadd.f32 %v6019_v23, %v5949_v3 }
 0xa57   : > { %v6088_v50 = vpop.f32.mrf.mxu0 }
 0xa58   : > { %v6089_v6 = vadd.f32 %v6088_v50, %v6018_v47 }
 0xa59   : > { %v6090_v10 = vpop.f32.mrf.mxu0 }
 0xa5a   : > { %v6094_v41 = vadd.f32 %v6093_v4, %v6089_v6  ;;  %v6091_v26 = vadd.f32 %v6090_v10, %v6020_v5 }
 0xa5c   : > { %v6095_v1 = vadd.f32 %v6094_v41, %v6091_v26 }
 0xa5e   : > { %6096 = vadd.xlane.f32.xlu1 %v6095_v1 }
 0xae7   : > { %v6097_v44 = vpop.xlane.xlu1 %6096 }
 0xae8   : > { %v6099_v7 = vmul.f32 0.001953125, %v6097_v44 }
 0xaea   : > { %v6100_v14 = vsub.f32 %v5521_v2, %v6099_v7  ;;  %v6101_v30 = vsub.f32 %v5523_v19, %v6099_v7  ;;  %v6102_v8 = vsub.f32 %v6089_v6, %v6099_v7  ;;  %v6103_v9 = vsub.f32 %v6091_v26, %v6099_v7 }
 0xaec   : > { %v6104_v18 = vmul.f32 %v6100_v14, %v6100_v14  ;;  %v6105_v0 = vmul.f32 %v6101_v30, %v6101_v30  ;;  %v6106_v11 = vmul.f32 %v6102_v8, %v6102_v8  ;;  %v6107_v55 = vmul.f32 %v6103_v9, %v6103_v9 }
 0xaee   : > { %v6108_v48 = vadd.f32 %v6105_v0, %v6104_v18 }
 0xaf0   : > { %v6109_v43 = vadd.f32 %v6108_v48, %v6106_v11 }
 0xaf2   : > { %v6110_v58 = vadd.f32 %v6109_v43, %v6107_v55 }
 0xaf4   : > { %6111 = vadd.xlane.f32.xlu0 %v6110_v58 }
 0xaf5   : > { %6727 = shalt.err (!%p6724_p9)
}
 0xaf6   : > { %s6728_s13 = scalar_lea.hbm %s7363_s17, 1024  ;;  %s6732_s14 = scalar_lea.hbm %s7449_s6, 2048 }
 0xaf7   : > { %p6729_p12 = scmp.ne.s32.totalorder %s7363_s17, %s6728_s13  ;;  %p6733_p5 = scmp.lt.s32.totalorder %s7363_s17, %s7449_s6 }
 0xaf8   : > { %p6734_p3 = scmp.lt.s32.totalorder %s6732_s14, %s6728_s13 }
 0xaf9   : > { %p6730_p1 = pnand %p6729_p12, %p7456_p10 }
 0xafa   : > { %p6735_p4 = por %p6734_p3, %p6733_p5 }
 0xafb   : > { %p6731_p2 = pneg %p6730_p1 }
 0xafd   : > { %p6736_p8 = pnand %p6735_p4, %p6731_p2 }
 0xaff   : > { %6739 = shalt.err (!%p6736_p8)
}
 0xb00   : > { %s6840_s27 = smov 128   ;;  %s6841_s28 = smov 8  }
 0xb01   : > { %6532 = dma.vmem_to_hbm [thread:$0]  (%p7456_p10), %s7366_s19, 1024, %s7363_s17, %s6130_s20, %s6840_s27, %s6840_s27, %s6841_s28  }
 0xb02   : > { %s6343_s30 = sshll.u32 %s7028_s16, 5  ;;  %s6409_s8 = sshll.u32 %s6820_s24, 9 }
 0xb03   : > { %s338_s13 = scalar_lea.vmem [#allocation8], %s6343_s30  ;;  %s7396_s12 = scalar_lea.hbm %s7448_s5, %s6409_s8 }
 0xb04   : > { %s6146_s18 = sshll.u32 %s338_s13, 4  ;;  %s6125_s24 = scalar_lea.sflag [#allocation5], %s7028_s16  ;;  %s7398_s18 = int_to_ptr.vmem [resolvable:$true] %s6146_s18 }
 0xb05   : > { %s6740_s17 = scalar_lea.vmem %s7398_s18, 512  ;;  %s6842_s19 = smov [#allocation8]  }
 0xb06   : > { %p6741_p11 = scmp.ne.s32.totalorder %s7398_s18, %s6740_s17  ;;  %s6744_s20 = sshll.u32 %s6842_s19, 4  ;;  %s6745_s20 = int_to_ptr.vmem [resolvable:$false] %s6744_s20 }
 0xb07   : > { %s6746_s15 = scalar_lea.vmem %s6745_s20, 1024  ;;  %p6747_p6 = scmp.lt.s32.totalorder %s7398_s18, %s6745_s20 }
 0xb08   : > { %p6742_p13 = pnand %p6741_p11, %p7456_p10  ;;  %p6748_p7 = scmp.lt.s32.totalorder %s6746_s15, %s6740_s17 }
 0xb0a   : > { %p6743_p0 = pneg %p6742_p13  ;;  %p6749_p9 = por %p6748_p7, %p6747_p6 }
 0xb0c   : > { %p6750_p12 = pnand %p6749_p9, %p6743_p0 }
 0xb7d   : > { %v6112_v15 = vpop.xlane.xlu0 %6111 }
 0xb7e   : > { %v6113_v36 = vmul.f32 0.001953125, %v6112_v15 }
 0xb80   : > { %v6114_v31 = vadd.f32 1e-05, %v6113_v36 }
 0xb82   : > { %6645 = vrsqrt.f32 %v6114_v31 }
 0xb8f   : > { %v6646_v17 = vpop.eup %6645 }
 0xb90   : > { %v6116_v16 = vmul.f32 %v6646_v17, %v6100_v14  ;;  %v6117_v61 = vmul.f32 %v6646_v17, %v6101_v30  ;;  %v6118_v27 = vmul.f32 %v6646_v17, %v6102_v8  ;;  %v6119_v38 = vmul.f32 %v6646_v17, %v6103_v9 }
 0xb92   : > { %6120 = vst [vmem:[%s338_s13] sm:$0xff] %v6116_v16  ;;  %6121 = vst [vmem:[%s338_s13 + $0x8] sm:$0xff] %v6117_v61 }
 0xb93   : > { %6122 = vst [vmem:[%s338_s13 + $0x10] sm:$0xff] %v6118_v27  ;;  %6123 = vst [vmem:[%s338_s13 + $0x18] sm:$0xff] %v6119_v38 }
 0xb94   : > { %6753 = shalt.err (!%p6750_p12)
}
 0xb95   : > { %s6754_s27 = scalar_lea.hbm %s7396_s12, 512  ;;  %s6758_s30 = scalar_lea.hbm %s7448_s5, 1024 }
 0xb96   : > { %p6755_p1 = scmp.ne.s32.totalorder %s7396_s12, %s6754_s27  ;;  %p6759_p3 = scmp.lt.s32.totalorder %s7396_s12, %s7448_s5 }
 0xb97   : > { %p6760_p4 = scmp.lt.s32.totalorder %s6758_s30, %s6754_s27 }
 0xb98   : > { %p6756_p2 = pnand %p6755_p1, %p7456_p10 }
 0xb99   : > { %p6761_p8 = por %p6760_p4, %p6759_p3 }
 0xb9a   : > { %p6757_p5 = pneg %p6756_p2 }
 0xb9c   : > { %p6762_p11 = pnand %p6761_p8, %p6757_p5 }
 0xb9e   : > { %6765 = shalt.err (!%p6762_p11)
}
 0xb9f   : > { %6531 = dma.vmem_to_hbm [thread:$0]  (%p7456_p10), %s7398_s18, 512, %s7396_s12, %s6125_s24  }
 0xba0 PF: > { %p6553_p13 = scmp.ge.s32.totalorder %s6828_s26, 2  ;;  %s6175_s11 = sand.u32 1, %s6808_s21  }
 0xba1   : > { %p7457_p0 = scmp.ne.s32.totalorder %s7452_s9, 0  ;;  %s6176_s14 = scalar_lea.sflag [#allocation5], %s6175_s11 }
 0xba3   : > { %p6543_p6 = pnand %p6553_p13, %p7457_p0 }
 0xba5   : > { %p6544_p7 = pneg %p6543_p6 }
 0xba7   : > { %6799 = dma.done.wait (%p6544_p7), %s6176_s14, 512  }
 0xba8   : > { %6801 = vsyncadd (%p6544_p7), %s6176_s14, 4294966784  ;;  %s6185_s17 = scalar_lea.sflag [#allocation10], %s6175_s11 }
 0xba9   : > { %6803 = dma.done.wait (%p6544_p7), %s6185_s17, 1024  }
 0xbaa   : > { %6805 = vsyncadd (%p6544_p7), %s6185_s17, 4294966272  ;;  %s25_s26 = sadd.s32 1, %s6828_s26   ;;  %s7458_s21 = smov %s6812_s22 }
 0xbab   : > { %p22_p9 = scmp.ge.s32.totalorder %s25_s26, 4   ;;  %s7459_s22 = smov %s6816_s23 }
 0xbac   : > { %s7460_s23 = smov %s6931_s10  ;;  %s7461_s24 = smov %s6824_s25 }
 0xbad   : > { %s7462_s25 = smov %s7464_s29  ;;  %24 = sbr.rel (!%p22_p9) target bundleno = 8 (0x8), region = 114 }
 0xbb2   :  { %6190 = vsyncpa [#allocation4], 1 }
 0xbb3   :  { %6192 = vsyncpa [#allocation4 + $0x1], 1 }
 0xbb4   :  { %6193 = vsyncpa [#allocation7], 1 }
 0xbb5   :  { %6194 = vsyncpa [#allocation5], 1 }
 0xbb6   :  { %6196 = vsyncpa [#allocation5 + $0x1], 1 }
 0xbb7   :  { %6197 = vsyncpa [#allocation10], 1 }
 0xbb8   :  { %6199 = vsyncpa [#allocation10 + $0x1], 1 }

</bundles_post_ra>
